<compile_context>
chip_gen: v5e
topology: v5e:2x2
jax: 0.10.0
libtpu: 0.0.40
codegen_flags: <defaults>
</compile_context>

<pallas_src>
import jax
import jax.numpy as jnp
import numpy as np
from jax.experimental import pallas as pl
from jax.experimental.pallas import tpu as pltpu

K = 5                # conv kernel size
C_OUT = 32           # conv output channels
POOL_HW = 6          # adaptive-avg-pool target size
FC_OUT = 136
FC_PAD = 256         # FC output padded to a lane-dense multiple of 128

# bf16 operands -> native MXU rate + half the weight DMA; accumulation stays f32.
MATMUL_DTYPE = jnp.bfloat16


def _fused_kernel(img_ref, wconv_ref, bc_ref, wbig_ref, bf_ref, out_ref):
    # img_ref  : [TB, H*W]          lane-dense image tile (streamed)
    # wconv_ref: [H*W, OH*OW*32]    dense folded conv weight (VMEM-resident)
    # bc_ref   : [1, OH*OW*32]      conv bias tiled per output pixel (f32)
    # wbig_ref : [OH*OW*32, 256]    pool + flatten + fc folded, cols zero-padded
    # bf_ref   : [1, 256]           fc bias, zero-padded (f32)
    # out_ref  : [TB, 256]          lane-dense output block
    act = jnp.dot(img_ref[...], wconv_ref[...],
                  preferred_element_type=jnp.float32)            # [TB, OH*OW*32]
    act = jnp.maximum(act + bc_ref[...], 0.0)                    # f32 bias + ReLU
    out_ref[...] = (jnp.dot(act.astype(wbig_ref.dtype), wbig_ref[...],
                            preferred_element_type=jnp.float32)
                    + bf_ref[...])


def prepare_params(params, H, W):
    """Host-side, one-time weight folding (conv stencil, pool, flatten, padding)."""
    conv_w, conv_b = params["conv_w"], params["conv_b"]
    fc_w, fc_b = params["fc_w"], params["fc_b"]
    OH, OW = H - K + 1, W - K + 1
    # TODO(synk): general AdaptiveAvgPool2d (OH/OW not multiples of 6, uneven
    # windows) is not implemented; this covers the clean uniform-pool case.
    assert OH % POOL_HW == 0 and OW % POOL_HW == 0
    sh, sw = OH // POOL_HW, OW // POOL_HW

    # Dense folded conv weight:
    #   Wconv[(oh+kh)*W + (ow+kw), (oh*OW+ow)*32 + c] = conv_w[c, 0, kh, kw]
    oh, ow = np.arange(OH), np.arange(OW)
    kh, kw, cc = np.arange(K), np.arange(K), np.arange(C_OUT)
    rows = ((oh[:, None, None, None, None] + kh[None, None, :, None, None]) * W
            + (ow[None, :, None, None, None] + kw[None, None, None, :, None]))
    rows = np.broadcast_to(rows, (OH, OW, K, K, C_OUT)).reshape(-1).astype(np.int32)
    cols = ((oh[:, None, None, None, None] * OW
             + ow[None, :, None, None, None]) * C_OUT
            + cc[None, None, None, None, :])
    cols = np.broadcast_to(cols, (OH, OW, K, K, C_OUT)).reshape(-1).astype(np.int32)
    vals = jnp.broadcast_to(
        conv_w[:, 0].astype(jnp.float32).transpose(1, 2, 0)[None, None],
        (OH, OW, K, K, C_OUT)).reshape(-1)
    wconv = jnp.zeros((H * W, OH * OW * C_OUT), jnp.float32).at[rows, cols].set(vals)

    # Conv bias tiled to the (oh, ow, c) activation layout.
    bc = jnp.tile(conv_b.astype(jnp.float32), OH * OW).reshape(1, OH * OW * C_OUT)

    # Fold AdaptiveAvgPool (uniform sh x sw mean) + PyTorch (c,h,w) flatten + fc1
    # into one weight in (oh, ow, c) row order; zero-pad output cols 136 -> 256.
    wf4 = fc_w.reshape(FC_OUT, C_OUT, POOL_HW, POOL_HW).astype(jnp.float32)
    wexp = jnp.repeat(jnp.repeat(wf4, sh, axis=2), sw, axis=3) / float(sh * sw)
    wbig = wexp.transpose(2, 3, 1, 0).reshape(OH * OW * C_OUT, FC_OUT)
    wbig = jnp.pad(wbig, ((0, 0), (0, FC_PAD - FC_OUT)))
    bf = jnp.pad(fc_b.astype(jnp.float32), (0, FC_PAD - FC_OUT)).reshape(1, FC_PAD)

    return {"wconv": wconv.astype(MATMUL_DTYPE), "bc": bc,
            "wbig": wbig.astype(MATMUL_DTYPE), "bf": bf}


@jax.jit
def simplenet1_forward(x, prepared):
    """x: [B, 1, H, W] float32 (NCHW, like PyTorch)."""
    wconv, bc = prepared["wconv"], prepared["bc"]
    wbig, bf = prepared["wbig"], prepared["bf"]
    B, C, H, W = x.shape
    assert C == 1
    HW = H * W
    CONV_COLS = wconv.shape[1]                      # OH*OW*C_OUT

    imgs = x.reshape(B, HW).astype(MATMUL_DTYPE)    # lane-dense [B, H*W]

    # Batch tiling: TB up to 256 (fills the MXU M tile, amortizes grid-step
    # overhead); >= 2 grid steps once B >= 16 so both v7x TensorCores get work.
    TB = min(256, max(8, ((pl.cdiv(B, 2) + 7) // 8) * 8))
    Bp = pl.cdiv(B, TB) * TB
    if Bp != B:
        imgs = jnp.pad(imgs, ((0, Bp - B), (0, 0)))

    out = pl.pallas_call(
        _fused_kernel,
        out_shape=jax.ShapeDtypeStruct((Bp, FC_PAD), jnp.float32),
        grid_spec=pltpu.PrefetchScalarGridSpec(
            num_scalar_prefetch=0,
            grid=(Bp // TB,),
            in_specs=[
                pl.BlockSpec((TB, HW), lambda i: (i, 0)),            # streamed
                pl.BlockSpec((HW, CONV_COLS), lambda i: (0, 0)),     # resident
                pl.BlockSpec((1, CONV_COLS), lambda i: (0, 0)),      # resident
                pl.BlockSpec((CONV_COLS, FC_PAD), lambda i: (0, 0)), # resident
                pl.BlockSpec((1, FC_PAD), lambda i: (0, 0)),         # resident
            ],
            out_specs=pl.BlockSpec((TB, FC_PAD), lambda i: (i, 0)),
        ),
        compiler_params=pltpu.CompilerParams(
            dimension_semantics=("parallel",),
            # Large-TB f32 intermediates + double-buffered bf16 weights exceed
            # v5e's 16 MiB default scoped VMEM; 48 MiB leaves headroom under
            # v7x's 64 MiB physical VMEM.
            vmem_limit_bytes=48 * 1024 * 1024,
        ),
    )(imgs, wconv, bc, wbig, bf)
    return out[:B, :FC_OUT]


def reference_forward(x, params):
    """Pure-JAX reference with exact PyTorch semantics (for self-check)."""
    conv_w, conv_b = params["conv_w"], params["conv_b"]
    fc_w, fc_b = params["fc_w"], params["fc_b"]
    y = jax.lax.conv_general_dilated(
        x, conv_w, window_strides=(1, 1), padding="VALID",
        dimension_numbers=("NCHW", "OIHW", "NCHW"))
    y = jnp.maximum(y + conv_b[None, :, None, None], 0.0)     # [B,32,OH,OW]
    B, Co, OH, OW = y.shape
    sh, sw = OH // POOL_HW, OW // POOL_HW
    y = y.reshape(B, Co, POOL_HW, sh, POOL_HW, sw).mean(axis=(3, 5))
    y = y.reshape(B, -1)                                      # (c,h,w) flatten
    return y @ fc_w.T + fc_b


if __name__ == "__main__":
    key = jax.random.PRNGKey(0)
    kx, kw1, kb1, kw2, kb2 = jax.random.split(key, 5)

    # deterministic synthetic parameters (shapes from SimpleNet1.__init__)
    params = {
        "conv_w": 0.1 * jax.random.normal(kw1, (C_OUT, 1, K, K), jnp.float32),
        "conv_b": 0.1 * jax.random.normal(kb1, (C_OUT,), jnp.float32),
        "fc_w": 0.02 * jax.random.normal(
            kw2, (FC_OUT, C_OUT * POOL_HW * POOL_HW), jnp.float32),
        "fc_b": 0.02 * jax.random.normal(kb2, (FC_OUT,), jnp.float32),
    }

    # NCHW input; 16x16 -> conv 12x12 -> pool 6x6 (uniform 2x2 adaptive pooling)
    x = jax.random.normal(kx, (2, 1, 16, 16), jnp.float32)

    prepared = prepare_params(params, H=16, W=16)
    out = jax.block_until_ready(simplenet1_forward(x, prepared))
    assert out.shape == (2, FC_OUT)

    ref = reference_forward(x, params)
    # bf16 MXU operands (f32 accumulation): ~1e-3 abs error on ~0.2-scale outputs.
    # Set MATMUL_DTYPE = jnp.float32 to recover 1e-4 agreement.
    np.testing.assert_allclose(np.asarray(out), np.asarray(ref),
                               rtol=2e-2, atol=2e-2)
    print("KERNEL_OK")
</pallas_src>

<mosaic_0001>
module attributes {stable_mosaic.version = 11 : i64} {
  func.func @_fused_kernel(%arg0: i32, %arg1: memref<8x256xbf16, #tpu.memory_space<vmem>>, %arg2: memref<256x4608xbf16, #tpu.memory_space<vmem>>, %arg3: memref<1x4608xf32, #tpu.memory_space<vmem>>, %arg4: memref<4608x256xbf16, #tpu.memory_space<vmem>>, %arg5: memref<1x256xf32, #tpu.memory_space<vmem>>, %arg6: memref<8x256xf32, #tpu.memory_space<vmem>>) attributes {dimension_semantics = [#tpu.dimension_semantics<parallel>], iteration_bounds = array<i64: 1>, scalar_prefetch = 0 : i64, scratch_operands = 0 : i64, tpu.core_type = #tpu.core_type<tc>, window_params = [{transform_indices = @transform_0, window_bounds = array<i64: 8, 256>}, {pipeline_mode = #tpu.pipeline_mode<synchronous>, transform_indices = @transform_1, window_bounds = array<i64: 256, 4608>}, {pipeline_mode = #tpu.pipeline_mode<synchronous>, transform_indices = @transform_2, window_bounds = array<i64: 1, 4608>}, {pipeline_mode = #tpu.pipeline_mode<synchronous>, transform_indices = @transform_3, window_bounds = array<i64: 4608, 256>}, {pipeline_mode = #tpu.pipeline_mode<synchronous>, transform_indices = @transform_4, window_bounds = array<i64: 1, 256>}, {transform_indices = @transform_5, window_bounds = array<i64: 8, 256>}]} {
    %c0 = arith.constant 0 : index
    %c0_0 = arith.constant 0 : index
    %0 = vector.load %arg1[%c0, %c0_0] : memref<8x256xbf16, #tpu.memory_space<vmem>>, vector<8x256xbf16>
    %c0_1 = arith.constant 0 : index
    %c0_2 = arith.constant 0 : index
    %1 = vector.load %arg2[%c0_1, %c0_2] : memref<256x4608xbf16, #tpu.memory_space<vmem>>, vector<256x4608xbf16>
    %cst = arith.constant dense<0.000000e+00> : vector<8x4608xf32>
    %2 = tpu.matmul %0, %1, %cst {dimension_numbers = #tpu.dot_dimension_numbers<[1], [0], [0], [1], [0, 0, 1, 1], [], []>} : vector<8x256xbf16>, vector<256x4608xbf16>, vector<8x4608xf32> -> vector<8x4608xf32>
    %c0_3 = arith.constant 0 : index
    %c0_4 = arith.constant 0 : index
    %3 = vector.load %arg3[%c0_3, %c0_4] : memref<1x4608xf32, #tpu.memory_space<vmem>>, vector<1x4608xf32>
    %4 = vector.broadcast %3 : vector<1x4608xf32> to vector<8x4608xf32>
    %5 = arith.addf %2, %4 : vector<8x4608xf32>
    %cst_5 = arith.constant 0.000000e+00 : f32
    %6 = vector.broadcast %cst_5 : f32 to vector<8x4608xf32>
    %7 = arith.maximumf %5, %6 : vector<8x4608xf32>
    %8 = arith.truncf %7 : vector<8x4608xf32> to vector<8x4608xbf16>
    %c0_6 = arith.constant 0 : index
    %c0_7 = arith.constant 0 : index
    %9 = vector.load %arg4[%c0_6, %c0_7] : memref<4608x256xbf16, #tpu.memory_space<vmem>>, vector<4608x256xbf16>
    %cst_8 = arith.constant dense<0.000000e+00> : vector<8x256xf32>
    %10 = tpu.matmul %8, %9, %cst_8 {dimension_numbers = #tpu.dot_dimension_numbers<[1], [0], [0], [1], [0, 0, 1, 1], [], []>} : vector<8x4608xbf16>, vector<4608x256xbf16>, vector<8x256xf32> -> vector<8x256xf32>
    %c0_9 = arith.constant 0 : index
    %c0_10 = arith.constant 0 : index
    %11 = vector.load %arg5[%c0_9, %c0_10] : memref<1x256xf32, #tpu.memory_space<vmem>>, vector<1x256xf32>
    %12 = vector.broadcast %11 : vector<1x256xf32> to vector<8x256xf32>
    %13 = arith.addf %10, %12 : vector<8x256xf32>
    %c0_11 = arith.constant 0 : index
    %c0_12 = arith.constant 0 : index
    %14 = vector.load %arg6[%c0_11, %c0_12] : memref<8x256xf32, #tpu.memory_space<vmem>>, vector<8x256xf32>
    tpu.vector_store %arg6[%c0_11, %c0_12], %13 {strides = array<i32>} : memref<8x256xf32, #tpu.memory_space<vmem>>, vector<8x256xf32>,
    return
  }
  func.func @transform_0(%arg0: i32) -> (i32, i32) {
    %c0_i32 = arith.constant 0 : i32
    %c0_i32_0 = arith.constant 0 : i32
    return %arg0, %c0_i32 : i32, i32
  }
  func.func @transform_1(%arg0: i32) -> (i32, i32) {
    %c0_i32 = arith.constant 0 : i32
    %c0_i32_0 = arith.constant 0 : i32
    %c0_i32_1 = arith.constant 0 : i32
    return %c0_i32, %c0_i32_0 : i32, i32
  }
  func.func @transform_2(%arg0: i32) -> (i32, i32) {
    %c0_i32 = arith.constant 0 : i32
    %c0_i32_0 = arith.constant 0 : i32
    %c0_i32_1 = arith.constant 0 : i32
    return %c0_i32, %c0_i32_0 : i32, i32
  }
  func.func @transform_3(%arg0: i32) -> (i32, i32) {
    %c0_i32 = arith.constant 0 : i32
    %c0_i32_0 = arith.constant 0 : i32
    %c0_i32_1 = arith.constant 0 : i32
    return %c0_i32, %c0_i32_0 : i32, i32
  }
  func.func @transform_4(%arg0: i32) -> (i32, i32) {
    %c0_i32 = arith.constant 0 : i32
    %c0_i32_0 = arith.constant 0 : i32
    %c0_i32_1 = arith.constant 0 : i32
    return %c0_i32, %c0_i32_0 : i32, i32
  }
  func.func @transform_5(%arg0: i32) -> (i32, i32) {
    %c0_i32 = arith.constant 0 : i32
    %c0_i32_0 = arith.constant 0 : i32
    return %arg0, %c0_i32 : i32, i32
  }
}

</mosaic_0001>

<bundles_post_ra>
// kernel: simplenet1_forward.1
= control target key start
LH: loop header
LB: loop body
LE: loop exit
PB: predicated region body
PF: predicated region fallthrough
CT: control target
= control target key end

     0   :  { %10 = vsyncpa [#allocation3], 0  ;;  %s15395_s0 = inlined_call_operand.vmem [shape: bf16[8,256], index: 0, kind: input, shape index: {}]   ;;  %s15396_s1 = inlined_call_operand.hbm [shape: bf16[256,4608], index: 1, kind: input, shape index: {}]   ;;  %s15397_s2 = inlined_call_operand.hbm [shape: f32[1,4608], index: 2, kind: input, shape index: {}]   ;;  %s15398_s3 = inlined_call_operand.hbm [shape: bf16[4608,256], index: 3, kind: input, shape index: {}]   ;;  %s15399_s4 = inlined_call_operand.hbm [shape: f32[1,256], index: 4, kind: input, shape index: {}]   ;;  %s15400_s5 = inlined_call_operand.vmem [shape: f32[8,256], index: 5, kind: output, shape index: {}]  }
   0x1   :  { %11 = vsyncpa [#allocation5], 0  ;;  %s33_s20 = sshll.u32 %s15397_s2, 4  ;;  %s34_s20 = int_to_ptr.hbm [resolvable:$true] %s33_s20 }
   0x2   :  { %12 = vsyncpa [#allocation8], 0  ;;  %s14911_s21 = smov [#allocation4]   ;;  %s19_s25 = sshll.u32 %s15396_s1, 4  ;;  %s20_s25 = int_to_ptr.hbm [resolvable:$true] %s19_s25 }
   0x3   :  { %s35_s22 = sshll.u32 %s14911_s21, 4  ;;  %s14912_s26 = smov [#allocation2]   ;;  %s36_s22 = int_to_ptr.vmem [resolvable:$true] %s35_s22 }
   0x4   :  { %38 = dma.hbm_to_vmem [thread:$0]  %s34_s20, 576, %s36_s22, [#allocation5]  }
   0x5   :  { %s21_s27 = sshll.u32 %s14912_s26, 4  ;;  %s14913_s28 = smov 2304   ;;  %s22_s27 = int_to_ptr.vmem [resolvable:$true] %s21_s27 }
   0x6   :  { %s14914_s29 = smov 144   ;;  %s43_s2 = sshll.u32 %s15398_s3, 4  ;;  %s44_s2 = int_to_ptr.hbm [resolvable:$true] %s43_s2 }
   0x7   :  { %27 = dma.hbm_to_vmem [thread:$0]  %s20_s25, 73728, %s22_s27, [#allocation3], %s14913_s28, %s14913_s28, %s14914_s29  }
   0x8   :  { %s14915_s7 = smov [#allocation6]   ;;  %s57_s1 = sshll.u32 %s15399_s4, 4  ;;  %s58_s1 = int_to_ptr.hbm [resolvable:$true] %s57_s1 }
   0x9   :  { %s45_s8 = sshll.u32 %s14915_s7, 4  ;;  %s14916_s11 = smov 128   ;;  %s46_s8 = int_to_ptr.vmem [resolvable:$true] %s45_s8 }
   0xa   :  { %s14917_s12 = smov 8   ;;  %s14918_s13 = smov [#allocation7]  }
   0xb   :  { %51 = dma.hbm_to_vmem [thread:$0]  %s44_s2, 73728, %s46_s8, [#allocation5], %s14916_s11, %s14916_s11, %s14917_s12  }
   0xc   :  { %s59_s14 = sshll.u32 %s14918_s13, 4  ;;  %s60_s14 = int_to_ptr.vmem [resolvable:$true] %s59_s14 }
   0xd   :  { %62 = dma.hbm_to_vmem [thread:$0]  %s58_s1, 32, %s60_s14, [#allocation8]  }
   0xe   :  { %14905 = dma.done.wait [#allocation3], 73728  }
   0xf   :  { %14906 = vsyncadd [#allocation3], 4294893568 }
  0x10   :  { %14907 = dma.done.wait [#allocation5], 74304  }
  0x11   :  { %14908 = vsyncadd [#allocation5], 4294892992 }
  0x12   :  { %14909 = dma.done.wait [#allocation8], 32  }
  0x13   :  { %14910 = vsyncadd [#allocation8], 4294967264  ;;  %v10050_v0 = vld [vmem:[#allocation2 + $0x7e0] sm:$0xf]  ;;  %v13918_v1 = vld [vmem:[#allocation2 + $0x86c] sm:$0xf0] }
  0x14   :  { %v11202_v2 = vld [vmem:[#allocation2 + $0x10e0] sm:$0xf]  ;;  %v10051_v3 = vor.u32 %v13918_v1, %v10050_v0  ;;  %v14206_v4 = vld [vmem:[#allocation2 + $0x116c] sm:$0xf0]  ;;  %v13900_v5 = vld [vmem:[#allocation2 + $0x7e4] sm:$0xf] }
  0x15   :  { %v10052_v6 = vld [vmem:[#allocation2 + $0x870] sm:$0xf0]  ;;  %v11203_v7 = vor.u32 %v14206_v4, %v11202_v2  ;;  %v14188_v9 = vld [vmem:[#allocation2 + $0x10e4] sm:$0xf]  ;;  %v9906_v11 = vld [vmem:[#allocation2 + $0x6c0] sm:$0xf] }
  0x16   :  { %v10055_v8 = vor.u32 %v13900_v5, %v10052_v6  ;;  %v11204_v10 = vld [vmem:[#allocation2 + $0x1170] sm:$0xf0]  ;;  %3625 = vmatpush.bf16.msra.mxu0 %v10051_v3  ;;  %v13882_v13 = vld [vmem:[#allocation2 + $0x74c] sm:$0xf0]  ;;  %v11058_v14 = vld [vmem:[#allocation2 + $0xfc0] sm:$0xf] }
  0x17   :  { %v11207_v12 = vor.u32 %v14188_v9, %v11204_v10  ;;  %v14170_v15 = vld [vmem:[#allocation2 + $0x104c] sm:$0xf0]  ;;  %3638 = vmatpush.bf16.msra.mxu1 %v11203_v7  ;;  %v9907_v16 = vor.u32 %v13882_v13, %v9906_v11  ;;  %v13864_v18 = vld [vmem:[#allocation2 + $0x6c4] sm:$0xf]  ;;  %v9908_v19 = vld [vmem:[#allocation2 + $0x750] sm:$0xf0] }
  0x18   :  { %3651 = vmatpush.bf16.msra.mxu2 %v10055_v8  ;;  %v11059_v17 = vor.u32 %v14170_v15, %v11058_v14  ;;  %v14152_v20 = vld [vmem:[#allocation2 + $0xfc4] sm:$0xf]  ;;  %v9911_v21 = vor.u32 %v13864_v18, %v9908_v19  ;;  %v11060_v22 = vld [vmem:[#allocation2 + $0x1050] sm:$0xf0]  ;;  %v9762_v23 = vld [vmem:[#allocation2 + $0x5a0] sm:$0xf] }
  0x19   :  { %3664 = vmatpush.bf16.msra.mxu3 %v11207_v12  ;;  %v13846_v24 = vld [vmem:[#allocation2 + $0x62c] sm:$0xf0]  ;;  %v11063_v25 = vor.u32 %v14152_v20, %v11060_v22  ;;  %v10914_v26 = vld [vmem:[#allocation2 + $0xea0] sm:$0xf]  ;;  %v13828_v28 = vld [vmem:[#allocation2 + $0x5a4] sm:$0xf] }
  0x1a   :  { %v14134_v27 = vld [vmem:[#allocation2 + $0xf2c] sm:$0xf0]  ;;  %3626 = vmatpush.bf16.msra.mxu0 %v9907_v16  ;;  %v9763_v29 = vor.u32 %v13846_v24, %v9762_v23  ;;  %v9764_v30 = vld [vmem:[#allocation2 + $0x630] sm:$0xf0]  ;;  %v14116_v31 = vld [vmem:[#allocation2 + $0xea4] sm:$0xf] }
  0x1b   :  { %v10916_v32 = vld [vmem:[#allocation2 + $0xf30] sm:$0xf0]  ;;  %3639 = vmatpush.bf16.msra.mxu1 %v11059_v17  ;;  %v10915_v33 = vor.u32 %v14134_v27, %v10914_v26  ;;  %v9767_v34 = vor.u32 %v13828_v28, %v9764_v30  ;;  %v9618_v35 = vld [vmem:[#allocation2 + $0x480] sm:$0xf]  ;;  %v13810_v36 = vld [vmem:[#allocation2 + $0x50c] sm:$0xf0] }
  0x1c   :  { %3652 = vmatpush.bf16.msra.mxu2 %v9911_v21  ;;  %v10770_v37 = vld [vmem:[#allocation2 + $0xd80] sm:$0xf]  ;;  %v10919_v38 = vor.u32 %v14116_v31, %v10916_v32  ;;  %v14098_v39 = vld [vmem:[#allocation2 + $0xe0c] sm:$0xf0]  ;;  %v13792_v40 = vld [vmem:[#allocation2 + $0x484] sm:$0xf]  ;;  %v9619_v44 = vor.u32 %v13810_v36, %v9618_v35 }
  0x1d   :  { %3665 = vmatpush.bf16.msra.mxu3 %v11063_v25  ;;  %v9620_v41 = vld [vmem:[#allocation2 + $0x510] sm:$0xf0]  ;;  %v14080_v42 = vld [vmem:[#allocation2 + $0xd84] sm:$0xf]  ;;  %v10771_v45 = vor.u32 %v14098_v39, %v10770_v37  ;;  %v9474_v47 = vld [vmem:[#allocation2 + $0x360] sm:$0xf] }
  0x1e   :  { %v10772_v43 = vld [vmem:[#allocation2 + $0xe10] sm:$0xf0]  ;;  %3627 = vmatpush.bf16.msra.mxu0 %v9763_v29  ;;  %v9623_v46 = vor.u32 %v13792_v40, %v9620_v41  ;;  %v13774_v48 = vld [vmem:[#allocation2 + $0x3ec] sm:$0xf0]  ;;  %v10626_v49 = vld [vmem:[#allocation2 + $0xc60] sm:$0xf] }
  0x1f   :  { %3640 = vmatpush.bf16.msra.mxu1 %v10915_v33  ;;  %v10775_v50 = vor.u32 %v14080_v42, %v10772_v43  ;;  %v14062_v51 = vld [vmem:[#allocation2 + $0xcec] sm:$0xf0]  ;;  %v13756_v52 = vld [vmem:[#allocation2 + $0x364] sm:$0xf]  ;;  %v9476_v53 = vld [vmem:[#allocation2 + $0x3f0] sm:$0xf0]  ;;  %v9475_v56 = vor.u32 %v13774_v48, %v9474_v47 }
  0x20   :  { %3653 = vmatpush.bf16.msra.mxu2 %v9767_v34  ;;  %v14044_v54 = vld [vmem:[#allocation2 + $0xc64] sm:$0xf]  ;;  %v10628_v55 = vld [vmem:[#allocation2 + $0xcf0] sm:$0xf0]  ;;  %v10627_v57 = vor.u32 %v14062_v51, %v10626_v49  ;;  %v9479_v58 = vor.u32 %v13756_v52, %v9476_v53  ;;  %v9330_v59 = vld [vmem:[#allocation2 + $0x240] sm:$0xf] }
  0x21   :  { %3666 = vmatpush.bf16.msra.mxu3 %v10919_v38  ;;  %v13738_v60 = vld [vmem:[#allocation2 + $0x2cc] sm:$0xf0]  ;;  %v10482_v61 = vld [vmem:[#allocation2 + $0xb40] sm:$0xf]  ;;  %v10631_v62 = vor.u32 %v14044_v54, %v10628_v55  ;;  %v13720_v0 = vld [vmem:[#allocation2 + $0x244] sm:$0xf] }
  0x22   :  { %3628 = vmatpush.bf16.msra.mxu0 %v9619_v44  ;;  %v14026_v63 = vld [vmem:[#allocation2 + $0xbcc] sm:$0xf0]  ;;  %v9332_v1 = vld [vmem:[#allocation2 + $0x2d0] sm:$0xf0]  ;;  %v14008_v2 = vld [vmem:[#allocation2 + $0xb44] sm:$0xf]  ;;  %v9331_v4 = vor.u32 %v13738_v60, %v9330_v59 }
  0x23   :  { %3641 = vmatpush.bf16.msra.mxu1 %v10771_v45  ;;  %v10484_v3 = vld [vmem:[#allocation2 + $0xbd0] sm:$0xf0]  ;;  %v10483_v5 = vor.u32 %v14026_v63, %v10482_v61  ;;  %v9335_v6 = vor.u32 %v13720_v0, %v9332_v1  ;;  %v9186_v7 = vld [vmem:[#allocation2 + $0x120] sm:$0xf]  ;;  %v13702_v8 = vld [vmem:[#allocation2 + $0x1ac] sm:$0xf0] }
  0x24   :  { %3654 = vmatpush.bf16.msra.mxu2 %v9623_v46  ;;  %v10338_v9 = vld [vmem:[#allocation2 + $0xa20] sm:$0xf]  ;;  %v10487_v10 = vor.u32 %v14008_v2, %v10484_v3  ;;  %v13990_v11 = vld [vmem:[#allocation2 + $0xaac] sm:$0xf0]  ;;  %v13684_v12 = vld [vmem:[#allocation2 + $0x124] sm:$0xf]  ;;  %v9187_v16 = vor.u32 %v13702_v8, %v9186_v7 }
  0x25   :  { %3667 = vmatpush.bf16.msra.mxu3 %v10775_v50  ;;  %v9188_v13 = vld [vmem:[#allocation2 + $0x1b0] sm:$0xf0]  ;;  %v13972_v14 = vld [vmem:[#allocation2 + $0xa24] sm:$0xf]  ;;  %v9042_v17 = vld [vmem:[#allocation2] sm:$0xf]  ;;  %v10339_v19 = vor.u32 %v13990_v11, %v10338_v9 }
  0x26   :  { %3629 = vmatpush.bf16.msra.mxu0 %v9475_v56  ;;  %v10340_v15 = vld [vmem:[#allocation2 + $0xab0] sm:$0xf0]  ;;  %v13666_v18 = vld [vmem:[#allocation2 + $0x8c] sm:$0xf0]  ;;  %v9191_v20 = vor.u32 %v13684_v12, %v9188_v13  ;;  %v10194_v21 = vld [vmem:[#allocation2 + $0x900] sm:$0xf] }
  0x27   :  { %3642 = vmatpush.bf16.msra.mxu1 %v10627_v57  ;;  %v13954_v22 = vld [vmem:[#allocation2 + $0x98c] sm:$0xf0]  ;;  %v13648_v23 = vld [vmem:[#allocation2 + $0x4] sm:$0xf]  ;;  %v10343_v24 = vor.u32 %v13972_v14, %v10340_v15  ;;  %v9044_v25 = vld [vmem:[#allocation2 + $0x90] sm:$0xf0]  ;;  %v9043_v31 = vor.u32 %v13666_v18, %v9042_v17 }
  0x28   :  { %3655 = vmatpush.bf16.msra.mxu2 %v9479_v58  ;;  %v13936_v26 = vld [vmem:[#allocation2 + $0x904] sm:$0xf]  ;;  %v10196_v27 = vld [vmem:[#allocation2 + $0x990] sm:$0xf0]  ;;  %v10058_v28 = vld [vmem:[#allocation2 + $0x7e8] sm:$0xf]  ;;  %v10195_v35 = vor.u32 %v13954_v22, %v10194_v21  ;;  %v9047_v36 = vor.u32 %v13648_v23, %v9044_v25 }
  0x29   :  { %3668 = vmatpush.bf16.msra.mxu3 %v10631_v62  ;;  %v13919_v29 = vld [vmem:[#allocation2 + $0x874] sm:$0xf0]  ;;  %v11210_v30 = vld [vmem:[#allocation2 + $0x10e8] sm:$0xf]  ;;  %v13901_v33 = vld [vmem:[#allocation2 + $0x7ec] sm:$0xf]  ;;  %v10199_v39 = vor.u32 %v13936_v26, %v10196_v27 }
  0x2a   :  { %3630 = vmatpush.bf16.msra.mxu0 %v9331_v4  ;;  %v14207_v32 = vld [vmem:[#allocation2 + $0x1174] sm:$0xf0]  ;;  %v10060_v34 = vld [vmem:[#allocation2 + $0x878] sm:$0xf0]  ;;  %v14189_v37 = vld [vmem:[#allocation2 + $0x10ec] sm:$0xf]  ;;  %v10059_v40 = vor.u32 %v13919_v29, %v10058_v28 }
  0x2b   :  { %3643 = vmatpush.bf16.msra.mxu1 %v10483_v5  ;;  %v11212_v38 = vld [vmem:[#allocation2 + $0x1178] sm:$0xf0]  ;;  %v11211_v41 = vor.u32 %v14207_v32, %v11210_v30  ;;  %v10063_v42 = vor.u32 %v13901_v33, %v10060_v34  ;;  %v9914_v43 = vld [vmem:[#allocation2 + $0x6c8] sm:$0xf]  ;;  %v13883_v44 = vld [vmem:[#allocation2 + $0x754] sm:$0xf0] }
  0x2c   :  { %3656 = vmatpush.bf16.msra.mxu2 %v9335_v6  ;;  %v11066_v45 = vld [vmem:[#allocation2 + $0xfc8] sm:$0xf]  ;;  %v11215_v46 = vor.u32 %v14189_v37, %v11212_v38  ;;  %v14171_v47 = vld [vmem:[#allocation2 + $0x1054] sm:$0xf0]  ;;  %v13865_v48 = vld [vmem:[#allocation2 + $0x6cc] sm:$0xf]  ;;  %v9915_v52 = vor.u32 %v13883_v44, %v9914_v43 }
  0x2d   :  { %3669 = vmatpush.bf16.msra.mxu3 %v10487_v10  ;;  %v9916_v49 = vld [vmem:[#allocation2 + $0x758] sm:$0xf0]  ;;  %v14153_v50 = vld [vmem:[#allocation2 + $0xfcc] sm:$0xf]  ;;  %v11067_v53 = vor.u32 %v14171_v47, %v11066_v45  ;;  %v9770_v55 = vld [vmem:[#allocation2 + $0x5a8] sm:$0xf] }
  0x2e   :  { %3631 = vmatpush.bf16.msra.mxu0 %v9187_v16  ;;  %v11068_v51 = vld [vmem:[#allocation2 + $0x1058] sm:$0xf0]  ;;  %v9919_v54 = vor.u32 %v13865_v48, %v9916_v49  ;;  %v13847_v56 = vld [vmem:[#allocation2 + $0x634] sm:$0xf0]  ;;  %v10922_v57 = vld [vmem:[#allocation2 + $0xea8] sm:$0xf] }
  0x2f   :  { %3644 = vmatpush.bf16.msra.mxu1 %v10339_v19  ;;  %v11071_v58 = vor.u32 %v14153_v50, %v11068_v51  ;;  %v14135_v59 = vld [vmem:[#allocation2 + $0xf34] sm:$0xf0]  ;;  %v13829_v60 = vld [vmem:[#allocation2 + $0x5ac] sm:$0xf]  ;;  %v9772_v61 = vld [vmem:[#allocation2 + $0x638] sm:$0xf0]  ;;  %v9771_v0 = vor.u32 %v13847_v56, %v9770_v55 }
  0x30   :  { %3657 = vmatpush.bf16.msra.mxu2 %v9191_v20  ;;  %v14117_v62 = vld [vmem:[#allocation2 + $0xeac] sm:$0xf]  ;;  %v10924_v63 = vld [vmem:[#allocation2 + $0xf38] sm:$0xf0]  ;;  %v79_v1 = vld [vmem:[%s15395_s0] sm:$0xff]  ;;  %v10923_v2 = vor.u32 %v14135_v59, %v10922_v57  ;;  %v9775_v3 = vor.u32 %v13829_v60, %v9772_v61 }
  0x31   :  { %3670 = vmatpush.bf16.msra.mxu3 %v10343_v24  ;;  %v9626_v4 = vld [vmem:[#allocation2 + $0x488] sm:$0xf]  ;;  %v13811_v5 = vld [vmem:[#allocation2 + $0x514] sm:$0xf0]  ;;  %v739_v7 = vunpack.c.l.b16 %v79_v1  ;;  %v740_v8 = vunpack.c.h.b16 %v79_v1  ;;  %v10927_v9 = vor.u32 %v14117_v62, %v10924_v63  ;;  %v13793_v11 = vld [vmem:[#allocation2 + $0x48c] sm:$0xf] }
  0x32   :  { %3632 = vmatpush.bf16.msra.mxu0 %v9043_v31  ;;  %v10778_v6 = vld [vmem:[#allocation2 + $0xd88] sm:$0xf]  ;;  %v14099_v10 = vld [vmem:[#allocation2 + $0xe14] sm:$0xf0]  ;;  %v9628_v12 = vld [vmem:[#allocation2 + $0x518] sm:$0xf0]  ;;  %v9627_v17 = vor.u32 %v13811_v5, %v9626_v4 }
  0x33   :  { %3645 = vmatpush.bf16.msra.mxu1 %v10195_v35  ;;  %v14081_v13 = vld [vmem:[#allocation2 + $0xd8c] sm:$0xf]  ;;  %v10780_v14 = vld [vmem:[#allocation2 + $0xe18] sm:$0xf0]  ;;  %v14964_v15 = vpack.c.b16 %v739_v7, %v739_v7  ;;  %v14966_v16 = vpack.c.b16 %v740_v8, %v740_v8  ;;  %v10779_v18 = vor.u32 %v14099_v10, %v10778_v6  ;;  %v9631_v19 = vor.u32 %v13793_v11, %v9628_v12  ;;  %v9482_v20 = vld [vmem:[#allocation2 + $0x368] sm:$0xf] }
  0x34   :  { %3658 = vmatpush.bf16.msra.mxu2 %v9047_v36  ;;  %v13775_v21 = vld [vmem:[#allocation2 + $0x3f4] sm:$0xf0]  ;;  %v10634_v22 = vld [vmem:[#allocation2 + $0xc68] sm:$0xf]  ;;  %v10783_v23 = vor.u32 %v14081_v13, %v10780_v14  ;;  %v13757_v25 = vld [vmem:[#allocation2 + $0x36c] sm:$0xf] }
  0x35   :  { %3671 = vmatpush.bf16.msra.mxu3 %v10199_v39  ;;  %v14063_v24 = vld [vmem:[#allocation2 + $0xcf4] sm:$0xf0]  ;;  %v9484_v26 = vld [vmem:[#allocation2 + $0x3f8] sm:$0xf0]  ;;  %v14045_v27 = vld [vmem:[#allocation2 + $0xc6c] sm:$0xf]  ;;  %3633 = vmatmul.bf16.vlgmr.msra.gmra.mxu0 %v14964_v15  ;;  %v9483_v29 = vor.u32 %v13775_v21, %v9482_v20 }
  0x36   :  { %3677 = vmatpush.bf16.msrb.mxu0 %v10059_v40  ;;  %v10636_v28 = vld [vmem:[#allocation2 + $0xcf8] sm:$0xf0]  ;;  %3646 = vmatmul.bf16.vlgmr.msra.gmra.mxu1 %v14966_v16  ;;  %v10635_v30 = vor.u32 %v14063_v24, %v10634_v22  ;;  %v9487_v31 = vor.u32 %v13757_v25, %v9484_v26  ;;  %v9338_v32 = vld [vmem:[#allocation2 + $0x248] sm:$0xf]  ;;  %v13739_v33 = vld [vmem:[#allocation2 + $0x2d4] sm:$0xf0] }
  0x37   :  { %3690 = vmatpush.bf16.msrb.mxu1 %v11211_v41  ;;  %3659 = vmatmul.bf16.vlgmr.msra.gmra.mxu2 %v14964_v15  ;;  %v10490_v34 = vld [vmem:[#allocation2 + $0xb48] sm:$0xf]  ;;  %v10639_v35 = vor.u32 %v14045_v27, %v10636_v28  ;;  %v14027_v36 = vld [vmem:[#allocation2 + $0xbd4] sm:$0xf0]  ;;  %v13721_v37 = vld [vmem:[#allocation2 + $0x24c] sm:$0xf]  ;;  %v9339_v41 = vor.u32 %v13739_v33, %v9338_v32 }
  0x38   :  { %3703 = vmatpush.bf16.msrb.mxu2 %v10063_v42  ;;  %3672 = vmatmul.bf16.vlgmr.msra.gmra.mxu3 %v14966_v16  ;;  %v9340_v38 = vld [vmem:[#allocation2 + $0x2d8] sm:$0xf0]  ;;  %v14009_v39 = vld [vmem:[#allocation2 + $0xb4c] sm:$0xf]  ;;  %v10491_v42 = vor.u32 %v14027_v36, %v10490_v34  ;;  %v9194_v44 = vld [vmem:[#allocation2 + $0x128] sm:$0xf] }
  0x39   :  { %3716 = vmatpush.bf16.msrb.mxu3 %v11215_v46  ;;  %v10492_v40 = vld [vmem:[#allocation2 + $0xbd8] sm:$0xf0]  ;;  %v9343_v43 = vor.u32 %v13721_v37, %v9340_v38  ;;  %v13703_v45 = vld [vmem:[#allocation2 + $0x1b4] sm:$0xf0]  ;;  %v10346_v46 = vld [vmem:[#allocation2 + $0xa28] sm:$0xf] }
  0x3a   :  { %3678 = vmatpush.bf16.msrb.mxu0 %v9915_v52  ;;  %v10495_v47 = vor.u32 %v14009_v39, %v10492_v40  ;;  %v13991_v48 = vld [vmem:[#allocation2 + $0xab4] sm:$0xf0]  ;;  %v13685_v49 = vld [vmem:[#allocation2 + $0x12c] sm:$0xf]  ;;  %v9196_v50 = vld [vmem:[#allocation2 + $0x1b8] sm:$0xf0] }
  0x3b   :  { %3691 = vmatpush.bf16.msrb.mxu1 %v11067_v53  ;;  %v13973_v51 = vld [vmem:[#allocation2 + $0xa2c] sm:$0xf]  ;;  %v10348_v52 = vld [vmem:[#allocation2 + $0xab8] sm:$0xf0]  ;;  %v9195_v53 = vor.u32 %v13703_v45, %v9194_v44  ;;  %v13667_v55 = vld [vmem:[#allocation2 + $0x94] sm:$0xf0]  ;;  %v10347_v56 = vor.u32 %v13991_v48, %v10346_v46  ;;  %v9199_v57 = vor.u32 %v13685_v49, %v9196_v50 }
  0x3c   :  { %3704 = vmatpush.bf16.msrb.mxu2 %v9919_v54  ;;  %v9050_v54 = vld [vmem:[#allocation2 + $0x8] sm:$0xf]  ;;  %v13955_v59 = vld [vmem:[#allocation2 + $0x994] sm:$0xf0]  ;;  %v13649_v60 = vld [vmem:[#allocation2 + $0xc] sm:$0xf]  ;;  %v10351_v61 = vor.u32 %v13973_v51, %v10348_v52 }
  0x3d   :  { %3717 = vmatpush.bf16.msrb.mxu3 %v11071_v58  ;;  %v10202_v58 = vld [vmem:[#allocation2 + $0x908] sm:$0xf]  ;;  %v9052_v62 = vld [vmem:[#allocation2 + $0x98] sm:$0xf0]  ;;  %v13937_v63 = vld [vmem:[#allocation2 + $0x90c] sm:$0xf]  ;;  %v9051_v4 = vor.u32 %v13667_v55, %v9050_v54 }
  0x3e   :  { %3679 = vmatpush.bf16.msrb.mxu0 %v9771_v0  ;;  %v10204_v0 = vld [vmem:[#allocation2 + $0x998] sm:$0xf0]  ;;  %v10066_v1 = vld [vmem:[#allocation2 + $0x7f0] sm:$0xf]  ;;  %v14208_v5 = vld [vmem:[#allocation2 + $0x117c] sm:$0xf0]  ;;  %v10203_v8 = vor.u32 %v13955_v59, %v10202_v58 }
  0x3f   :  { %3692 = vmatpush.bf16.msrb.mxu1 %v10923_v2  ;;  %v13920_v2 = vld [vmem:[#allocation2 + $0x87c] sm:$0xf0]  ;;  %v13902_v6 = vld [vmem:[#allocation2 + $0x7f4] sm:$0xf]  ;;  %v10068_v7 = vld [vmem:[#allocation2 + $0x880] sm:$0xf0]  ;;  %v10207_v12 = vor.u32 %v13937_v63, %v10204_v0 }
  0x40   :  { %3705 = vmatpush.bf16.msrb.mxu2 %v9775_v3  ;;  %v11218_v3 = vld [vmem:[#allocation2 + $0x10f0] sm:$0xf]  ;;  %v14190_v10 = vld [vmem:[#allocation2 + $0x10f4] sm:$0xf]  ;;  %v11220_v11 = vld [vmem:[#allocation2 + $0x1180] sm:$0xf0]  ;;  %v10067_v13 = vor.u32 %v13920_v2, %v10066_v1 }
  0x41   :  { %3718 = vmatpush.bf16.msrb.mxu3 %v10927_v9  ;;  %v9055_v9 = vor.u32 %v13649_v60, %v9052_v62  ;;  %v11219_v14 = vor.u32 %v14208_v5, %v11218_v3  ;;  %v11074_v20 = vld [vmem:[#allocation2 + $0xfd0] sm:$0xf]  ;;  %v11223_v21 = vor.u32 %v14190_v10, %v11220_v11  ;;  %v14172_v22 = vld [vmem:[#allocation2 + $0x105c] sm:$0xf0]  ;;  %v9924_v24 = vld [vmem:[#allocation2 + $0x760] sm:$0xf0] }
  0x42   :  { %3680 = vmatpush.bf16.msrb.mxu0 %v9627_v17  ;;  %v10071_v17 = vor.u32 %v13902_v6, %v10068_v7  ;;  %v14154_v25 = vld [vmem:[#allocation2 + $0xfd4] sm:$0xf]  ;;  %v11076_v26 = vld [vmem:[#allocation2 + $0x1060] sm:$0xf0]  ;;  %v11075_v28 = vor.u32 %v14172_v22, %v11074_v20  ;;  %v10930_v32 = vld [vmem:[#allocation2 + $0xeb0] sm:$0xf] }
  0x43   :  { %3693 = vmatpush.bf16.msrb.mxu1 %v10779_v18  ;;  %v9922_v18 = vld [vmem:[#allocation2 + $0x6d0] sm:$0xf]  ;;  %v11079_v33 = vor.u32 %v14154_v25, %v11076_v26  ;;  %v14136_v34 = vld [vmem:[#allocation2 + $0xf3c] sm:$0xf0]  ;;  %v9780_v36 = vld [vmem:[#allocation2 + $0x640] sm:$0xf0] }
  0x44   :  { %3706 = vmatpush.bf16.msrb.mxu2 %v9631_v19  ;;  %v13884_v19 = vld [vmem:[#allocation2 + $0x75c] sm:$0xf0]  ;;  %v14118_v37 = vld [vmem:[#allocation2 + $0xeb4] sm:$0xf]  ;;  %v10932_v38 = vld [vmem:[#allocation2 + $0xf40] sm:$0xf0]  ;;  %v10931_v40 = vor.u32 %v14136_v34, %v10930_v32 }
  0x45   :  { %3719 = vmatpush.bf16.msrb.mxu3 %v10783_v23  ;;  %v13866_v23 = vld [vmem:[#allocation2 + $0x6d4] sm:$0xf]  ;;  %v9923_v27 = vor.u32 %v13884_v19, %v9922_v18  ;;  %v10786_v44 = vld [vmem:[#allocation2 + $0xd90] sm:$0xf]  ;;  %v10935_v45 = vor.u32 %v14118_v37, %v10932_v38  ;;  %v14100_v46 = vld [vmem:[#allocation2 + $0xe1c] sm:$0xf0] }
  0x46   :  { %3681 = vmatpush.bf16.msrb.mxu0 %v9483_v29  ;;  %v9927_v29 = vor.u32 %v13866_v23, %v9924_v24  ;;  %v9636_v48 = vld [vmem:[#allocation2 + $0x520] sm:$0xf0]  ;;  %v14082_v49 = vld [vmem:[#allocation2 + $0xd94] sm:$0xf]  ;;  %v10787_v52 = vor.u32 %v14100_v46, %v10786_v44  ;;  %v9490_v54 = vld [vmem:[#allocation2 + $0x370] sm:$0xf] }
  0x47   :  { %3694 = vmatpush.bf16.msrb.mxu1 %v10635_v30  ;;  %v9778_v30 = vld [vmem:[#allocation2 + $0x5b0] sm:$0xf]  ;;  %v10788_v50 = vld [vmem:[#allocation2 + $0xe20] sm:$0xf0]  ;;  %v13776_v55 = vld [vmem:[#allocation2 + $0x3fc] sm:$0xf0] }
  0x48   :  { %3707 = vmatpush.bf16.msrb.mxu2 %v9487_v31  ;;  %v13848_v31 = vld [vmem:[#allocation2 + $0x63c] sm:$0xf0]  ;;  %v13758_v59 = vld [vmem:[#allocation2 + $0x374] sm:$0xf]  ;;  %v9492_v60 = vld [vmem:[#allocation2 + $0x400] sm:$0xf0]  ;;  %v9491_v63 = vor.u32 %v13776_v55, %v9490_v54 }
  0x49   :  { %3720 = vmatpush.bf16.msrb.mxu3 %v10639_v35  ;;  %v13830_v35 = vld [vmem:[#allocation2 + $0x5b4] sm:$0xf]  ;;  %v9779_v39 = vor.u32 %v13848_v31, %v9778_v30  ;;  %v14064_v58 = vld [vmem:[#allocation2 + $0xcfc] sm:$0xf0]  ;;  %v10644_v62 = vld [vmem:[#allocation2 + $0xd00] sm:$0xf0]  ;;  %v9495_v1 = vor.u32 %v13758_v59, %v9492_v60 }
  0x4a   :  { %3682 = vmatpush.bf16.msrb.mxu0 %v9339_v41  ;;  %v9783_v41 = vor.u32 %v13830_v35, %v9780_v36  ;;  %v9346_v2 = vld [vmem:[#allocation2 + $0x250] sm:$0xf]  ;;  %v13740_v3 = vld [vmem:[#allocation2 + $0x2dc] sm:$0xf0]  ;;  %v13722_v7 = vld [vmem:[#allocation2 + $0x254] sm:$0xf] }
  0x4b   :  { %3695 = vmatpush.bf16.msrb.mxu1 %v10491_v42  ;;  %v9634_v42 = vld [vmem:[#allocation2 + $0x490] sm:$0xf]  ;;  %v14028_v6 = vld [vmem:[#allocation2 + $0xbdc] sm:$0xf0]  ;;  %v10500_v10 = vld [vmem:[#allocation2 + $0xbe0] sm:$0xf0]  ;;  %v9347_v11 = vor.u32 %v13740_v3, %v9346_v2 }
  0x4c   :  { %3708 = vmatpush.bf16.msrb.mxu2 %v9343_v43  ;;  %v13812_v43 = vld [vmem:[#allocation2 + $0x51c] sm:$0xf0]  ;;  %v10354_v18 = vld [vmem:[#allocation2 + $0xa30] sm:$0xf]  ;;  %v9204_v22 = vld [vmem:[#allocation2 + $0x1c0] sm:$0xf0] }
  0x4d   :  { %3721 = vmatpush.bf16.msrb.mxu3 %v10495_v47  ;;  %v13794_v47 = vld [vmem:[#allocation2 + $0x494] sm:$0xf]  ;;  %v9635_v51 = vor.u32 %v13812_v43, %v9634_v42  ;;  %v13992_v20 = vld [vmem:[#allocation2 + $0xabc] sm:$0xf0]  ;;  %v10356_v24 = vld [vmem:[#allocation2 + $0xac0] sm:$0xf0] }
  0x4e   :  { %3683 = vmatpush.bf16.msrb.mxu0 %v9195_v53  ;;  %v9639_v53 = vor.u32 %v13794_v47, %v9636_v48  ;;  %v13974_v23 = vld [vmem:[#allocation2 + $0xa34] sm:$0xf]  ;;  %v9058_v26 = vld [vmem:[#allocation2 + $0x10] sm:$0xf]  ;;  %v13956_v31 = vld [vmem:[#allocation2 + $0x99c] sm:$0xf0] }
  0x4f   :  { %3696 = vmatpush.bf16.msrb.mxu1 %v10347_v56  ;;  %v10642_v56 = vld [vmem:[#allocation2 + $0xc70] sm:$0xf]  ;;  %v13650_v32 = vld [vmem:[#allocation2 + $0x14] sm:$0xf]  ;;  %v9060_v34 = vld [vmem:[#allocation2 + $0xa0] sm:$0xf0] }
  0x50   :  { %3709 = vmatpush.bf16.msrb.mxu2 %v9199_v57  ;;  %v10791_v57 = vor.u32 %v14082_v49, %v10788_v50  ;;  %v10643_v0 = vor.u32 %v14064_v58, %v10642_v56  ;;  %v10210_v30 = vld [vmem:[#allocation2 + $0x910] sm:$0xf]  ;;  %v13938_v35 = vld [vmem:[#allocation2 + $0x914] sm:$0xf]  ;;  %v10212_v36 = vld [vmem:[#allocation2 + $0x9a0] sm:$0xf0] }
  0x51   :  { %3722 = vmatpush.bf16.msrb.mxu3 %v10351_v61  ;;  %v14046_v61 = vld [vmem:[#allocation2 + $0xc74] sm:$0xf]  ;;  %v10074_v37 = vld [vmem:[#allocation2 + $0x7f8] sm:$0xf]  ;;  %v13921_v38 = vld [vmem:[#allocation2 + $0x884] sm:$0xf0]  ;;  %v10211_v44 = vor.u32 %v13956_v31, %v10210_v30  ;;  %v10215_v48 = vor.u32 %v13938_v35, %v10212_v36 }
  0x52   :  { %3684 = vmatpush.bf16.msrb.mxu0 %v9051_v4  ;;  %v10498_v4 = vld [vmem:[#allocation2 + $0xb50] sm:$0xf]  ;;  %v10647_v5 = vor.u32 %v14046_v61, %v10644_v62  ;;  %v13903_v42 = vld [vmem:[#allocation2 + $0x7fc] sm:$0xf]  ;;  %v10076_v43 = vld [vmem:[#allocation2 + $0x888] sm:$0xf0]  ;;  %v10075_v49 = vor.u32 %v13921_v38, %v10074_v37 }
  0x53   :  { %3697 = vmatpush.bf16.msrb.mxu1 %v10203_v8  ;;  %v9348_v8 = vld [vmem:[#allocation2 + $0x2e0] sm:$0xf0]  ;;  %v14191_v46 = vld [vmem:[#allocation2 + $0x10fc] sm:$0xf]  ;;  %v11228_v47 = vld [vmem:[#allocation2 + $0x1188] sm:$0xf0] }
  0x54   :  { %3710 = vmatpush.bf16.msrb.mxu2 %v9055_v9  ;;  %v14010_v9 = vld [vmem:[#allocation2 + $0xb54] sm:$0xf]  ;;  %v11082_v54 = vld [vmem:[#allocation2 + $0xfd8] sm:$0xf]  ;;  %v11231_v55 = vor.u32 %v14191_v46, %v11228_v47  ;;  %v14173_v56 = vld [vmem:[#allocation2 + $0x1064] sm:$0xf0] }
  0x55   :  { %3723 = vmatpush.bf16.msrb.mxu3 %v10207_v12  ;;  %3685 = vmatmul.bf16.vlgmr.msrb.gmra.mxu0 %v14964_v15  ;;  %v10499_v12 = vor.u32 %v14028_v6, %v10498_v4  ;;  %v10503_v19 = vor.u32 %v14010_v9, %v10500_v10  ;;  %v9932_v58 = vld [vmem:[#allocation2 + $0x768] sm:$0xf0]  ;;  %v14155_v59 = vld [vmem:[#allocation2 + $0xfdc] sm:$0xf]  ;;  %v11083_v62 = vor.u32 %v14173_v56, %v11082_v54  ;;  %v10938_v2 = vld [vmem:[#allocation2 + $0xeb8] sm:$0xf] }
  0x56   :  { %3729 = vmatpush.bf16.msra.mxu0 %v10067_v13  ;;  %3698 = vmatmul.bf16.vlgmr.msrb.gmra.mxu1 %v14966_v16  ;;  %v9351_v13 = vor.u32 %v13722_v7, %v9348_v8  ;;  %v11084_v60 = vld [vmem:[#allocation2 + $0x1068] sm:$0xf0]  ;;  %v14137_v4 = vld [vmem:[#allocation2 + $0xf44] sm:$0xf0]  ;;  %v14119_v7 = vld [vmem:[#allocation2 + $0xebc] sm:$0xf] }
  0x57   :  { %3742 = vmatpush.bf16.msra.mxu1 %v11219_v14  ;;  %3711 = vmatmul.bf16.vlgmr.msrb.gmra.mxu2 %v14964_v15  ;;  %v9202_v14 = vld [vmem:[#allocation2 + $0x130] sm:$0xf]  ;;  %v11087_v3 = vor.u32 %v14155_v59, %v11084_v60  ;;  %v9788_v6 = vld [vmem:[#allocation2 + $0x648] sm:$0xf0]  ;;  %v10939_v10 = vor.u32 %v14137_v4, %v10938_v2  ;;  %v14065_v30 = vld [vmem:[#allocation2 + $0xd04] sm:$0xf0] }
  0x58   :  { %3755 = vmatpush.bf16.msra.mxu2 %v10071_v17  ;;  %3724 = vmatmul.bf16.vlgmr.msrb.gmra.mxu3 %v14966_v16  ;;  %v13704_v17 = vld [vmem:[#allocation2 + $0x1bc] sm:$0xf0]  ;;  %v10940_v8 = vld [vmem:[#allocation2 + $0xf48] sm:$0xf0]  ;;  %v13759_v31 = vld [vmem:[#allocation2 + $0x37c] sm:$0xf] }
  0x59   :  { %3768 = vmatpush.bf16.msra.mxu3 %v11223_v21  ;;  %v13686_v21 = vld [vmem:[#allocation2 + $0x134] sm:$0xf]  ;;  %v9203_v25 = vor.u32 %v13704_v17, %v9202_v14  ;;  %v10794_v14 = vld [vmem:[#allocation2 + $0xd98] sm:$0xf]  ;;  %v10943_v17 = vor.u32 %v14119_v7, %v10940_v8  ;;  %v10508_v46 = vld [vmem:[#allocation2 + $0xbe8] sm:$0xf0] }
  0x5a   :  { %3730 = vmatpush.bf16.msra.mxu0 %v9923_v27  ;;  %v13668_v27 = vld [vmem:[#allocation2 + $0x9c] sm:$0xf0]  ;;  %v9354_v38 = vld [vmem:[#allocation2 + $0x258] sm:$0xf]  ;;  %v13993_v54 = vld [vmem:[#allocation2 + $0xac4] sm:$0xf0] }
  0x5b   :  { %3743 = vmatpush.bf16.msra.mxu1 %v11075_v28  ;;  %v10355_v28 = vor.u32 %v13992_v20, %v10354_v18  ;;  %v14101_v18 = vld [vmem:[#allocation2 + $0xe24] sm:$0xf0]  ;;  %v9644_v20 = vld [vmem:[#allocation2 + $0x528] sm:$0xf0]  ;;  %v9066_v60 = vld [vmem:[#allocation2 + $0x18] sm:$0xf] }
  0x5c   :  { %3756 = vmatpush.bf16.msra.mxu2 %v9927_v29  ;;  %v9207_v29 = vor.u32 %v13686_v21, %v9204_v22  ;;  %v14083_v21 = vld [vmem:[#allocation2 + $0xd9c] sm:$0xf]  ;;  %v10796_v22 = vld [vmem:[#allocation2 + $0xe28] sm:$0xf0]  ;;  %v10082_v7 = vld [vmem:[#allocation2 + $0x800] sm:$0xf] }
  0x5d   :  { %3769 = vmatpush.bf16.msra.mxu3 %v11079_v33  ;;  %v10359_v33 = vor.u32 %v13974_v23, %v10356_v24  ;;  %v10795_v24 = vor.u32 %v14101_v18, %v10794_v14  ;;  %v9212_v56 = vld [vmem:[#allocation2 + $0x1c8] sm:$0xf0]  ;;  %v13651_v2 = vld [vmem:[#allocation2 + $0x1c] sm:$0xf]  ;;  %v13922_v8 = vld [vmem:[#allocation2 + $0x88c] sm:$0xf0] }
  0x5e   :  { %3731 = vmatpush.bf16.msra.mxu0 %v9779_v39  ;;  %v11226_v39 = vld [vmem:[#allocation2 + $0x10f8] sm:$0xf]  ;;  %v9068_v4 = vld [vmem:[#allocation2 + $0xa8] sm:$0xf0]  ;;  %v14192_v18 = vld [vmem:[#allocation2 + $0x1104] sm:$0xf] }
  0x5f   :  { %3744 = vmatpush.bf16.msra.mxu1 %v10931_v40  ;;  %v9059_v40 = vor.u32 %v13668_v27, %v9058_v26  ;;  %v9498_v26 = vld [vmem:[#allocation2 + $0x378] sm:$0xf]  ;;  %v13777_v27 = vld [vmem:[#allocation2 + $0x404] sm:$0xf0] }
  0x60   :  { %3757 = vmatpush.bf16.msra.mxu2 %v9783_v41  ;;  %v14209_v41 = vld [vmem:[#allocation2 + $0x1184] sm:$0xf0]  ;;  %v9499_v35 = vor.u32 %v13777_v27, %v9498_v26  ;;  %v11090_v26 = vld [vmem:[#allocation2 + $0xfe0] sm:$0xf] }
  0x61   :  { %3770 = vmatpush.bf16.msra.mxu3 %v10935_v45  ;;  %v9063_v45 = vor.u32 %v13650_v32, %v9060_v34  ;;  %v11227_v50 = vor.u32 %v14209_v41, %v11226_v39  ;;  %v9500_v32 = vld [vmem:[#allocation2 + $0x408] sm:$0xf0]  ;;  %v13741_v39 = vld [vmem:[#allocation2 + $0x2e4] sm:$0xf0] }
  0x62   :  { %3732 = vmatpush.bf16.msra.mxu0 %v9635_v51  ;;  %v10079_v51 = vor.u32 %v13903_v42, %v10076_v43  ;;  %v10652_v34 = vld [vmem:[#allocation2 + $0xd08] sm:$0xf0]  ;;  %v9503_v37 = vor.u32 %v13759_v31, %v9500_v32  ;;  %v14029_v42 = vld [vmem:[#allocation2 + $0xbe4] sm:$0xf0]  ;;  %v13723_v43 = vld [vmem:[#allocation2 + $0x25c] sm:$0xf]  ;;  %v9355_v47 = vor.u32 %v13741_v39, %v9354_v38 }
  0x63   :  { %3745 = vmatpush.bf16.msra.mxu1 %v10787_v52  ;;  %v9930_v52 = vld [vmem:[#allocation2 + $0x6d8] sm:$0xf]  ;;  %v14156_v31 = vld [vmem:[#allocation2 + $0xfe4] sm:$0xf]  ;;  %v11092_v32 = vld [vmem:[#allocation2 + $0x1070] sm:$0xf0] }
  0x64   :  { %3758 = vmatpush.bf16.msra.mxu2 %v9639_v53  ;;  %v13885_v53 = vld [vmem:[#allocation2 + $0x764] sm:$0xf0]  ;;  %v10946_v38 = vld [vmem:[#allocation2 + $0xec0] sm:$0xf]  ;;  %v11095_v39 = vor.u32 %v14156_v31, %v11092_v32 }
  0x65   :  { %3771 = vmatpush.bf16.msra.mxu3 %v10791_v57  ;;  %v13867_v57 = vld [vmem:[#allocation2 + $0x6dc] sm:$0xf]  ;;  %v9931_v61 = vor.u32 %v13885_v53, %v9930_v52  ;;  %v10362_v52 = vld [vmem:[#allocation2 + $0xa38] sm:$0xf]  ;;  %v9074_v32 = vld [vmem:[#allocation2 + $0x20] sm:$0xf] }
  0x66   :  { %3733 = vmatpush.bf16.msra.mxu0 %v9491_v63  ;;  %v9935_v63 = vor.u32 %v13867_v57, %v9932_v58  ;;  %v13975_v57 = vld [vmem:[#allocation2 + $0xa3c] sm:$0xf]  ;;  %v10364_v58 = vld [vmem:[#allocation2 + $0xac8] sm:$0xf0] }
  0x67   :  { %3746 = vmatpush.bf16.msra.mxu1 %v10643_v0  ;;  %v9786_v0 = vld [vmem:[#allocation2 + $0x5b8] sm:$0xf] }
  0x68   :  { %3759 = vmatpush.bf16.msra.mxu2 %v9495_v1  ;;  %v13849_v1 = vld [vmem:[#allocation2 + $0x644] sm:$0xf0] }
  0x69   :  { %3772 = vmatpush.bf16.msra.mxu3 %v10647_v5  ;;  %v13831_v5 = vld [vmem:[#allocation2 + $0x5bc] sm:$0xf]  ;;  %v9787_v9 = vor.u32 %v13849_v1, %v9786_v0  ;;  %v10218_v0 = vld [vmem:[#allocation2 + $0x918] sm:$0xf]  ;;  %v13957_v1 = vld [vmem:[#allocation2 + $0x9a4] sm:$0xf0] }
  0x6a   :  { %3734 = vmatpush.bf16.msra.mxu0 %v9347_v11  ;;  %v9791_v11 = vor.u32 %v13831_v5, %v9788_v6  ;;  %v13939_v5 = vld [vmem:[#allocation2 + $0x91c] sm:$0xf]  ;;  %v10220_v6 = vld [vmem:[#allocation2 + $0x9a8] sm:$0xf0]  ;;  %v10219_v14 = vor.u32 %v13957_v1, %v10218_v0  ;;  %v14066_v0 = vld [vmem:[#allocation2 + $0xd0c] sm:$0xf0] }
  0x6b   :  { %3747 = vmatpush.bf16.msra.mxu1 %v10499_v12  ;;  %v9642_v12 = vld [vmem:[#allocation2 + $0x498] sm:$0xf]  ;;  %v13760_v1 = vld [vmem:[#allocation2 + $0x384] sm:$0xf] }
  0x6c   :  { %3760 = vmatpush.bf16.msra.mxu2 %v9351_v13  ;;  %v13813_v13 = vld [vmem:[#allocation2 + $0x524] sm:$0xf0] }
  0x6d   :  { %3773 = vmatpush.bf16.msra.mxu3 %v10503_v19  ;;  %v13795_v19 = vld [vmem:[#allocation2 + $0x49c] sm:$0xf]  ;;  %v9643_v23 = vor.u32 %v13813_v13, %v9642_v12  ;;  %v13904_v12 = vld [vmem:[#allocation2 + $0x804] sm:$0xf]  ;;  %v10084_v13 = vld [vmem:[#allocation2 + $0x890] sm:$0xf0] }
  0x6e   :  { %3735 = vmatpush.bf16.msra.mxu0 %v9203_v25  ;;  %v9647_v25 = vor.u32 %v13795_v19, %v9644_v20  ;;  %v11236_v19 = vld [vmem:[#allocation2 + $0x1190] sm:$0xf0]  ;;  %v10223_v20 = vor.u32 %v13939_v5, %v10220_v6 }
  0x6f   :  { %3748 = vmatpush.bf16.msra.mxu1 %v10355_v28  ;;  %v10650_v28 = vld [vmem:[#allocation2 + $0xc78] sm:$0xf]  ;;  %v11239_v27 = vor.u32 %v14192_v18, %v11236_v19  ;;  %v10516_v18 = vld [vmem:[#allocation2 + $0xbf0] sm:$0xf0] }
  0x70   :  { %3761 = vmatpush.bf16.msra.mxu2 %v9207_v29  ;;  %v10799_v29 = vor.u32 %v14083_v21, %v10796_v22  ;;  %v10651_v36 = vor.u32 %v14065_v30, %v10650_v28  ;;  %v10083_v21 = vor.u32 %v13922_v8, %v10082_v7  ;;  %v14174_v28 = vld [vmem:[#allocation2 + $0x106c] sm:$0xf0]  ;;  %v9940_v30 = vld [vmem:[#allocation2 + $0x770] sm:$0xf0]  ;;  %v9362_v8 = vld [vmem:[#allocation2 + $0x260] sm:$0xf] }
  0x71   :  { %3774 = vmatpush.bf16.msra.mxu3 %v10359_v33  ;;  %v14047_v33 = vld [vmem:[#allocation2 + $0xc7c] sm:$0xf] }
  0x72   :  { %3736 = vmatpush.bf16.msra.mxu0 %v9059_v40  ;;  %v10506_v40 = vld [vmem:[#allocation2 + $0xb58] sm:$0xf]  ;;  %v10655_v41 = vor.u32 %v14047_v33, %v10652_v34  ;;  %v11091_v34 = vor.u32 %v14174_v28, %v11090_v26  ;;  %v13994_v26 = vld [vmem:[#allocation2 + $0xacc] sm:$0xf0]  ;;  %v9220_v28 = vld [vmem:[#allocation2 + $0x1d0] sm:$0xf0] }
  0x73   :  { %3749 = vmatpush.bf16.msra.mxu1 %v10211_v44  ;;  %v9356_v44 = vld [vmem:[#allocation2 + $0x2e8] sm:$0xf0] }
  0x74   :  { %3762 = vmatpush.bf16.msra.mxu2 %v9063_v45  ;;  %v14011_v45 = vld [vmem:[#allocation2 + $0xb5c] sm:$0xf] }
  0x75   :  { %3775 = vmatpush.bf16.msra.mxu3 %v10215_v48  ;;  %3737 = vmatmul.bf16.vlgmr.msra.gmra.mxu0 %v14964_v15  ;;  %v10507_v48 = vor.u32 %v14029_v42, %v10506_v40  ;;  %v10511_v53 = vor.u32 %v14011_v45, %v10508_v46  ;;  %v14138_v40 = vld [vmem:[#allocation2 + $0xf4c] sm:$0xf0]  ;;  %v9796_v42 = vld [vmem:[#allocation2 + $0x650] sm:$0xf0] }
  0x76   :  { %3781 = vmatpush.bf16.msrb.mxu0 %v10075_v49  ;;  %3750 = vmatmul.bf16.vlgmr.msra.gmra.mxu1 %v14966_v16  ;;  %v9359_v49 = vor.u32 %v13723_v43, %v9356_v44  ;;  %v14120_v43 = vld [vmem:[#allocation2 + $0xec4] sm:$0xf]  ;;  %v10948_v44 = vld [vmem:[#allocation2 + $0xf50] sm:$0xf0]  ;;  %v10947_v46 = vor.u32 %v14138_v40, %v10946_v38 }
  0x77   :  { %3794 = vmatpush.bf16.msrb.mxu1 %v11227_v50  ;;  %3763 = vmatmul.bf16.vlgmr.msra.gmra.mxu2 %v14964_v15  ;;  %v9210_v50 = vld [vmem:[#allocation2 + $0x138] sm:$0xf]  ;;  %v13652_v38 = vld [vmem:[#allocation2 + $0x24] sm:$0xf]  ;;  %v9076_v40 = vld [vmem:[#allocation2 + $0xb0] sm:$0xf0] }
  0x78   :  { %3807 = vmatpush.bf16.msrb.mxu2 %v10079_v51  ;;  %3776 = vmatmul.bf16.vlgmr.msra.gmra.mxu3 %v14966_v16  ;;  %v13705_v51 = vld [vmem:[#allocation2 + $0x1c4] sm:$0xf0] }
  0x79   :  { %3820 = vmatpush.bf16.msrb.mxu3 %v11231_v55  ;;  %v13687_v55 = vld [vmem:[#allocation2 + $0x13c] sm:$0xf]  ;;  %v9211_v59 = vor.u32 %v13705_v51, %v9210_v50  ;;  %v10802_v50 = vld [vmem:[#allocation2 + $0xda0] sm:$0xf]  ;;  %v10951_v51 = vor.u32 %v14120_v43, %v10948_v44  ;;  %v10090_v43 = vld [vmem:[#allocation2 + $0x808] sm:$0xf] }
  0x7a   :  { %3782 = vmatpush.bf16.msrb.mxu0 %v9931_v61  ;;  %v13669_v61 = vld [vmem:[#allocation2 + $0xa4] sm:$0xf0]  ;;  %v13923_v44 = vld [vmem:[#allocation2 + $0x894] sm:$0xf0] }
  0x7b   :  { %3795 = vmatpush.bf16.msrb.mxu1 %v11083_v62  ;;  %v10363_v62 = vor.u32 %v13993_v54, %v10362_v52  ;;  %v14102_v52 = vld [vmem:[#allocation2 + $0xe2c] sm:$0xf0]  ;;  %v9652_v54 = vld [vmem:[#allocation2 + $0x530] sm:$0xf0] }
  0x7c   :  { %3808 = vmatpush.bf16.msrb.mxu2 %v9935_v63  ;;  %v9215_v63 = vor.u32 %v13687_v55, %v9212_v56  ;;  %v14084_v55 = vld [vmem:[#allocation2 + $0xda4] sm:$0xf]  ;;  %v10804_v56 = vld [vmem:[#allocation2 + $0xe30] sm:$0xf0] }
  0x7d   :  { %3821 = vmatpush.bf16.msrb.mxu3 %v11087_v3  ;;  %v10367_v3 = vor.u32 %v13975_v57, %v10364_v58  ;;  %v10803_v58 = vor.u32 %v14102_v52, %v10802_v50  ;;  %v14193_v52 = vld [vmem:[#allocation2 + $0x110c] sm:$0xf] }
  0x7e   :  { %3783 = vmatpush.bf16.msrb.mxu0 %v9787_v9  ;;  %v11234_v9 = vld [vmem:[#allocation2 + $0x1100] sm:$0xf] }
  0x7f   :  { %3796 = vmatpush.bf16.msrb.mxu1 %v10939_v10  ;;  %v9067_v10 = vor.u32 %v13669_v61, %v9066_v60  ;;  %v9506_v60 = vld [vmem:[#allocation2 + $0x380] sm:$0xf]  ;;  %v13778_v61 = vld [vmem:[#allocation2 + $0x40c] sm:$0xf0] }
  0x80   :  { %3809 = vmatpush.bf16.msrb.mxu2 %v9791_v11  ;;  %v14210_v11 = vld [vmem:[#allocation2 + $0x118c] sm:$0xf0]  ;;  %v9507_v5 = vor.u32 %v13778_v61, %v9506_v60  ;;  %v11098_v60 = vld [vmem:[#allocation2 + $0xfe8] sm:$0xf] }
  0x81   :  { %3822 = vmatpush.bf16.msrb.mxu3 %v10943_v17  ;;  %v9071_v17 = vor.u32 %v13651_v2, %v9068_v4  ;;  %v11235_v22 = vor.u32 %v14210_v11, %v11234_v9  ;;  %v9508_v2 = vld [vmem:[#allocation2 + $0x410] sm:$0xf0]  ;;  %v13742_v9 = vld [vmem:[#allocation2 + $0x2ec] sm:$0xf0] }
  0x82   :  { %3784 = vmatpush.bf16.msrb.mxu0 %v9643_v23  ;;  %v10087_v23 = vor.u32 %v13904_v12, %v10084_v13  ;;  %v10660_v4 = vld [vmem:[#allocation2 + $0xd10] sm:$0xf0]  ;;  %v9511_v7 = vor.u32 %v13760_v1, %v9508_v2  ;;  %v14030_v12 = vld [vmem:[#allocation2 + $0xbec] sm:$0xf0]  ;;  %v13724_v13 = vld [vmem:[#allocation2 + $0x264] sm:$0xf]  ;;  %v9363_v19 = vor.u32 %v13742_v9, %v9362_v8 }
  0x83   :  { %3797 = vmatpush.bf16.msrb.mxu1 %v10795_v24  ;;  %v9938_v24 = vld [vmem:[#allocation2 + $0x6e0] sm:$0xf]  ;;  %v14157_v1 = vld [vmem:[#allocation2 + $0xfec] sm:$0xf]  ;;  %v11100_v2 = vld [vmem:[#allocation2 + $0x1078] sm:$0xf0] }
  0x84   :  { %3810 = vmatpush.bf16.msrb.mxu2 %v9647_v25  ;;  %v13886_v25 = vld [vmem:[#allocation2 + $0x76c] sm:$0xf0]  ;;  %v10954_v8 = vld [vmem:[#allocation2 + $0xec8] sm:$0xf]  ;;  %v11103_v9 = vor.u32 %v14157_v1, %v11100_v2  ;;  %v13689_v2 = vld [vmem:[#allocation2 + $0x14c] sm:$0xf] }
  0x85   :  { %3823 = vmatpush.bf16.msrb.mxu3 %v10799_v29  ;;  %v13868_v29 = vld [vmem:[#allocation2 + $0x6e4] sm:$0xf]  ;;  %v9939_v33 = vor.u32 %v13886_v25, %v9938_v24  ;;  %v10370_v24 = vld [vmem:[#allocation2 + $0xa40] sm:$0xf] }
  0x86   :  { %3785 = vmatpush.bf16.msrb.mxu0 %v9499_v35  ;;  %v9943_v35 = vor.u32 %v13868_v29, %v9940_v30  ;;  %v13976_v29 = vld [vmem:[#allocation2 + $0xa44] sm:$0xf]  ;;  %v10372_v30 = vld [vmem:[#allocation2 + $0xad0] sm:$0xf0] }
  0x87   :  { %3798 = vmatpush.bf16.msrb.mxu1 %v10651_v36  ;;  %v9794_v36 = vld [vmem:[#allocation2 + $0x5c0] sm:$0xf] }
  0x88   :  { %3811 = vmatpush.bf16.msrb.mxu2 %v9503_v37  ;;  %v13850_v37 = vld [vmem:[#allocation2 + $0x64c] sm:$0xf0] }
  0x89   :  { %3824 = vmatpush.bf16.msrb.mxu3 %v10655_v41  ;;  %v13832_v41 = vld [vmem:[#allocation2 + $0x5c4] sm:$0xf]  ;;  %v9795_v45 = vor.u32 %v13850_v37, %v9794_v36  ;;  %v10226_v36 = vld [vmem:[#allocation2 + $0x920] sm:$0xf]  ;;  %v13958_v37 = vld [vmem:[#allocation2 + $0x9ac] sm:$0xf0] }
  0x8a   :  { %3786 = vmatpush.bf16.msrb.mxu0 %v9355_v47  ;;  %v9799_v47 = vor.u32 %v13832_v41, %v9796_v42  ;;  %v13940_v41 = vld [vmem:[#allocation2 + $0x924] sm:$0xf]  ;;  %v10228_v42 = vld [vmem:[#allocation2 + $0x9b0] sm:$0xf0]  ;;  %v10227_v50 = vor.u32 %v13958_v37, %v10226_v36  ;;  %v13761_v37 = vld [vmem:[#allocation2 + $0x38c] sm:$0xf] }
  0x8b   :  { %3799 = vmatpush.bf16.msrb.mxu1 %v10507_v48  ;;  %v9650_v48 = vld [vmem:[#allocation2 + $0x4a0] sm:$0xf] }
  0x8c   :  { %3812 = vmatpush.bf16.msrb.mxu2 %v9359_v49  ;;  %v13814_v49 = vld [vmem:[#allocation2 + $0x52c] sm:$0xf0] }
  0x8d   :  { %3825 = vmatpush.bf16.msrb.mxu3 %v10511_v53  ;;  %v13796_v53 = vld [vmem:[#allocation2 + $0x4a4] sm:$0xf]  ;;  %v9651_v57 = vor.u32 %v13814_v49, %v9650_v48  ;;  %v13905_v48 = vld [vmem:[#allocation2 + $0x80c] sm:$0xf]  ;;  %v10092_v49 = vld [vmem:[#allocation2 + $0x898] sm:$0xf0] }
  0x8e   :  { %3787 = vmatpush.bf16.msrb.mxu0 %v9211_v59  ;;  %v9655_v59 = vor.u32 %v13796_v53, %v9652_v54  ;;  %v11244_v53 = vld [vmem:[#allocation2 + $0x1198] sm:$0xf0]  ;;  %v10231_v54 = vor.u32 %v13940_v41, %v10228_v42 }
  0x8f   :  { %3800 = vmatpush.bf16.msrb.mxu1 %v10363_v62  ;;  %v10658_v62 = vld [vmem:[#allocation2 + $0xc80] sm:$0xf]  ;;  %v11247_v61 = vor.u32 %v14193_v52, %v11244_v53  ;;  %v10668_v41 = vld [vmem:[#allocation2 + $0xd18] sm:$0xf0]  ;;  %v14013_v53 = vld [vmem:[#allocation2 + $0xb6c] sm:$0xf] }
  0x90   :  { %3813 = vmatpush.bf16.msrb.mxu2 %v9215_v63  ;;  %v10807_v63 = vor.u32 %v14084_v55, %v10804_v56  ;;  %v10659_v6 = vor.u32 %v14066_v0, %v10658_v62  ;;  %v10091_v55 = vor.u32 %v13923_v44, %v10090_v43  ;;  %v14175_v62 = vld [vmem:[#allocation2 + $0x1074] sm:$0xf0]  ;;  %v9948_v0 = vld [vmem:[#allocation2 + $0x778] sm:$0xf0]  ;;  %v9370_v43 = vld [vmem:[#allocation2 + $0x268] sm:$0xf] }
  0x91   :  { %3826 = vmatpush.bf16.msrb.mxu3 %v10367_v3  ;;  %v14048_v3 = vld [vmem:[#allocation2 + $0xc84] sm:$0xf]  ;;  %v9372_v52 = vld [vmem:[#allocation2 + $0x2f8] sm:$0xf0] }
  0x92   :  { %3788 = vmatpush.bf16.msrb.mxu0 %v9067_v10  ;;  %v10514_v10 = vld [vmem:[#allocation2 + $0xb60] sm:$0xf]  ;;  %v10663_v11 = vor.u32 %v14048_v3, %v10660_v4  ;;  %v11099_v4 = vor.u32 %v14175_v62, %v11098_v60  ;;  %v13707_v60 = vld [vmem:[#allocation2 + $0x1d4] sm:$0xf0] }
  0x93   :  { %3801 = vmatpush.bf16.msrb.mxu1 %v10219_v14  ;;  %v9364_v14 = vld [vmem:[#allocation2 + $0x2f0] sm:$0xf0]  ;;  %v13995_v62 = vld [vmem:[#allocation2 + $0xad4] sm:$0xf0] }
  0x94   :  { %3814 = vmatpush.bf16.msrb.mxu2 %v9071_v17  ;;  %v14012_v17 = vld [vmem:[#allocation2 + $0xb64] sm:$0xf] }
  0x95   :  { %3827 = vmatpush.bf16.msrb.mxu3 %v10223_v20  ;;  %3789 = vmatmul.bf16.vlgmr.msrb.gmra.mxu0 %v14964_v15  ;;  %v10515_v20 = vor.u32 %v14030_v12, %v10514_v10  ;;  %v10519_v25 = vor.u32 %v14012_v17, %v10516_v18  ;;  %v14139_v10 = vld [vmem:[#allocation2 + $0xf54] sm:$0xf0]  ;;  %v9804_v12 = vld [vmem:[#allocation2 + $0x658] sm:$0xf0] }
  0x96   :  { %3833 = vmatpush.bf16.msra.mxu0 %v10083_v21  ;;  %3802 = vmatmul.bf16.vlgmr.msrb.gmra.mxu1 %v14966_v16  ;;  %v9367_v21 = vor.u32 %v13724_v13, %v9364_v14  ;;  %v14121_v13 = vld [vmem:[#allocation2 + $0xecc] sm:$0xf]  ;;  %v10956_v14 = vld [vmem:[#allocation2 + $0xf58] sm:$0xf0]  ;;  %v10955_v18 = vor.u32 %v14139_v10, %v10954_v8  ;;  %v13671_v10 = vld [vmem:[#allocation2 + $0xb4] sm:$0xf0] }
  0x97   :  { %3846 = vmatpush.bf16.msra.mxu1 %v11235_v22  ;;  %3815 = vmatmul.bf16.vlgmr.msrb.gmra.mxu2 %v14964_v15  ;;  %v9218_v22 = vld [vmem:[#allocation2 + $0x140] sm:$0xf] }
  0x98   :  { %3859 = vmatpush.bf16.msra.mxu2 %v10087_v23  ;;  %3828 = vmatmul.bf16.vlgmr.msrb.gmra.mxu3 %v14966_v16  ;;  %v13706_v23 = vld [vmem:[#allocation2 + $0x1cc] sm:$0xf0] }
  0x99   :  { %3872 = vmatpush.bf16.msra.mxu3 %v11239_v27  ;;  %v13688_v27 = vld [vmem:[#allocation2 + $0x144] sm:$0xf]  ;;  %v9219_v31 = vor.u32 %v13706_v23, %v9218_v22  ;;  %v10810_v22 = vld [vmem:[#allocation2 + $0xda8] sm:$0xf]  ;;  %v10959_v23 = vor.u32 %v14121_v13, %v10956_v14  ;;  %v13959_v14 = vld [vmem:[#allocation2 + $0x9b4] sm:$0xf0] }
  0x9a   :  { %3834 = vmatpush.bf16.msra.mxu0 %v9939_v33  ;;  %v13670_v33 = vld [vmem:[#allocation2 + $0xac] sm:$0xf0]  ;;  %v10234_v13 = vld [vmem:[#allocation2 + $0x928] sm:$0xf] }
  0x9b   :  { %3847 = vmatpush.bf16.msra.mxu1 %v11091_v34  ;;  %v10371_v34 = vor.u32 %v13994_v26, %v10370_v24  ;;  %v14103_v24 = vld [vmem:[#allocation2 + $0xe34] sm:$0xf0]  ;;  %v9660_v26 = vld [vmem:[#allocation2 + $0x538] sm:$0xf0] }
  0x9c   :  { %3860 = vmatpush.bf16.msra.mxu2 %v9943_v35  ;;  %v9223_v35 = vor.u32 %v13688_v27, %v9220_v28  ;;  %v14085_v27 = vld [vmem:[#allocation2 + $0xdac] sm:$0xf]  ;;  %v10812_v28 = vld [vmem:[#allocation2 + $0xe38] sm:$0xf0] }
  0x9d   :  { %3873 = vmatpush.bf16.msra.mxu3 %v11095_v39  ;;  %v10375_v39 = vor.u32 %v13976_v29, %v10372_v30  ;;  %v9514_v30 = vld [vmem:[#allocation2 + $0x388] sm:$0xf]  ;;  %v10815_v36 = vor.u32 %v14085_v27, %v10812_v28  ;;  %v11250_v27 = vld [vmem:[#allocation2 + $0x1110] sm:$0xf] }
  0x9e   :  { %3835 = vmatpush.bf16.msra.mxu0 %v9795_v45  ;;  %v11242_v45 = vld [vmem:[#allocation2 + $0x1108] sm:$0xf] }
  0x9f   :  { %3848 = vmatpush.bf16.msra.mxu1 %v10947_v46  ;;  %v9075_v46 = vor.u32 %v13670_v33, %v9074_v32  ;;  %v13779_v33 = vld [vmem:[#allocation2 + $0x414] sm:$0xf0] }
  0xa0   :  { %3861 = vmatpush.bf16.msra.mxu2 %v9799_v47  ;;  %v14211_v47 = vld [vmem:[#allocation2 + $0x1194] sm:$0xf0]  ;;  %v9515_v42 = vor.u32 %v13779_v33, %v9514_v30  ;;  %v13906_v30 = vld [vmem:[#allocation2 + $0x814] sm:$0xf] }
  0xa1   :  { %3874 = vmatpush.bf16.msra.mxu3 %v10951_v51  ;;  %v9079_v51 = vor.u32 %v13652_v38, %v9076_v40  ;;  %v11243_v56 = vor.u32 %v14211_v47, %v11242_v45  ;;  %v9516_v38 = vld [vmem:[#allocation2 + $0x418] sm:$0xf0]  ;;  %v14049_v40 = vld [vmem:[#allocation2 + $0xc8c] sm:$0xf]  ;;  %v10522_v47 = vld [vmem:[#allocation2 + $0xb68] sm:$0xf] }
  0xa2   :  { %3836 = vmatpush.bf16.msra.mxu0 %v9651_v57  ;;  %v10095_v57 = vor.u32 %v13905_v48, %v10092_v49  ;;  %v9519_v45 = vor.u32 %v13761_v37, %v9516_v38  ;;  %v10671_v49 = vor.u32 %v14049_v40, %v10668_v41  ;;  %v11252_v37 = vld [vmem:[#allocation2 + $0x11a0] sm:$0xf0] }
  0xa3   :  { %3849 = vmatpush.bf16.msra.mxu1 %v10803_v58  ;;  %v9946_v58 = vld [vmem:[#allocation2 + $0x6e8] sm:$0xf] }
  0xa4   :  { %3862 = vmatpush.bf16.msra.mxu2 %v9655_v59  ;;  %v13887_v59 = vld [vmem:[#allocation2 + $0x774] sm:$0xf0] }
  0xa5   :  { %3875 = vmatpush.bf16.msra.mxu3 %v10807_v63  ;;  %v13869_v63 = vld [vmem:[#allocation2 + $0x6ec] sm:$0xf]  ;;  %v9947_v3 = vor.u32 %v13887_v59, %v9946_v58 }
  0xa6   :  { %3837 = vmatpush.bf16.msra.mxu0 %v9507_v5  ;;  %v9951_v5 = vor.u32 %v13869_v63, %v9948_v0 }
  0xa7   :  { %3850 = vmatpush.bf16.msra.mxu1 %v10659_v6  ;;  %v9802_v6 = vld [vmem:[#allocation2 + $0x5c8] sm:$0xf] }
  0xa8   :  { %3863 = vmatpush.bf16.msra.mxu2 %v9511_v7  ;;  %v13851_v7 = vld [vmem:[#allocation2 + $0x654] sm:$0xf0] }
  0xa9   :  { %3876 = vmatpush.bf16.msra.mxu3 %v10663_v11  ;;  %v13833_v11 = vld [vmem:[#allocation2 + $0x5cc] sm:$0xf]  ;;  %v9803_v17 = vor.u32 %v13851_v7, %v9802_v6  ;;  %v10380_v6 = vld [vmem:[#allocation2 + $0xad8] sm:$0xf0] }
  0xaa   :  { %3838 = vmatpush.bf16.msra.mxu0 %v9363_v19  ;;  %v9807_v19 = vor.u32 %v13833_v11, %v9804_v12 }
  0xab   :  { %3851 = vmatpush.bf16.msra.mxu1 %v10515_v20  ;;  %v9658_v20 = vld [vmem:[#allocation2 + $0x4a8] sm:$0xf] }
  0xac   :  { %3864 = vmatpush.bf16.msra.mxu2 %v9367_v21  ;;  %v13815_v21 = vld [vmem:[#allocation2 + $0x534] sm:$0xf0] }
  0xad   :  { %3877 = vmatpush.bf16.msra.mxu3 %v10519_v25  ;;  %v13797_v25 = vld [vmem:[#allocation2 + $0x4ac] sm:$0xf]  ;;  %v9659_v29 = vor.u32 %v13815_v21, %v9658_v20  ;;  %v9084_v20 = vld [vmem:[#allocation2 + $0xb8] sm:$0xf0] }
  0xae   :  { %3839 = vmatpush.bf16.msra.mxu0 %v9219_v31  ;;  %v10811_v31 = vor.u32 %v14103_v24, %v10810_v22  ;;  %v9663_v32 = vor.u32 %v13797_v25, %v9660_v26  ;;  %v13941_v21 = vld [vmem:[#allocation2 + $0x92c] sm:$0xf]  ;;  %v10236_v22 = vld [vmem:[#allocation2 + $0x9b8] sm:$0xf0]  ;;  %v10098_v25 = vld [vmem:[#allocation2 + $0x810] sm:$0xf] }
  0xaf   :  { %3852 = vmatpush.bf16.msra.mxu1 %v10371_v34  ;;  %v10666_v34 = vld [vmem:[#allocation2 + $0xc88] sm:$0xf]  ;;  %v13924_v26 = vld [vmem:[#allocation2 + $0x89c] sm:$0xf0]  ;;  %v10239_v40 = vor.u32 %v13941_v21, %v10236_v22 }
  0xb0   :  { %3865 = vmatpush.bf16.msra.mxu2 %v9223_v35  ;;  %v14067_v35 = vld [vmem:[#allocation2 + $0xd14] sm:$0xf0]  ;;  %v10099_v41 = vor.u32 %v13924_v26, %v10098_v25  ;;  %v10674_v25 = vld [vmem:[#allocation2 + $0xc90] sm:$0xf]  ;;  %v14068_v26 = vld [vmem:[#allocation2 + $0xd1c] sm:$0xf0] }
  0xb1   :  { %3878 = vmatpush.bf16.msra.mxu3 %v10375_v39  ;;  %v14988_v39 = vld [vmem:[#allocation4] sm:$0xff]  ;;  %v10667_v44 = vor.u32 %v14067_v35, %v10666_v34  ;;  %v10235_v34 = vor.u32 %v13959_v14, %v10234_v13  ;;  %v13798_v13 = vld [vmem:[#allocation2 + $0x4b4] sm:$0xf] }
  0xb2   :  { %3840 = vmatpush.bf16.msra.mxu0 %v9075_v46  ;;  %v13743_v46 = vld [vmem:[#allocation2 + $0x2f4] sm:$0xf0]  ;;  %v666_v48 = vperm.slane %v14988_v39, 0  ;;  %v9668_v14 = vld [vmem:[#allocation2 + $0x540] sm:$0xf0] }
  0xb3   :  { %3853 = vmatpush.bf16.msra.mxu1 %v10227_v50  ;;  %v14031_v50 = vld [vmem:[#allocation2 + $0xbf4] sm:$0xf0]  ;;  %v3647_v0 = vpop.f32.mrf.mxu1 }
  0xb4   :  { %3866 = vmatpush.bf16.msra.mxu2 %v9079_v51  ;;  %v13725_v51 = vld [vmem:[#allocation2 + $0x26c] sm:$0xf]  ;;  %v10523_v58 = vor.u32 %v14031_v50, %v10522_v47  ;;  %v9956_v50 = vld [vmem:[#allocation2 + $0x780] sm:$0xf0] }
  0xb5   :  { %3879 = vmatpush.bf16.msra.mxu3 %v10231_v54  ;;  %3841 = vmatmul.bf16.vlgmr.msra.gmra.mxu0 %v14964_v15  ;;  %v10524_v54 = vld [vmem:[#allocation2 + $0xbf8] sm:$0xf0]  ;;  %v9375_v59 = vor.u32 %v13725_v51, %v9372_v52  ;;  %v14158_v51 = vld [vmem:[#allocation2 + $0xff4] sm:$0xf]  ;;  %v11108_v52 = vld [vmem:[#allocation2 + $0x1080] sm:$0xf0] }
  0xb6   :  { %3885 = vmatpush.bf16.msrb.mxu0 %v10091_v55  ;;  %3854 = vmatmul.bf16.vlgmr.msra.gmra.mxu1 %v14966_v16  ;;  %v9371_v55 = vor.u32 %v13743_v46, %v9370_v43  ;;  %v10527_v1 = vor.u32 %v14013_v53, %v10524_v54  ;;  %v11106_v46 = vld [vmem:[#allocation2 + $0xff0] sm:$0xf] }
  0xb7   :  { %3898 = vmatpush.bf16.msrb.mxu1 %v11243_v56  ;;  %3867 = vmatmul.bf16.vlgmr.msra.gmra.mxu2 %v14964_v15  ;;  %v9226_v56 = vld [vmem:[#allocation2 + $0x148] sm:$0xf] }
  0xb8   :  { %3911 = vmatpush.bf16.msrb.mxu2 %v10095_v57  ;;  %3880 = vmatmul.bf16.vlgmr.msra.gmra.mxu3 %v14966_v16  ;;  %v3634_v57 = vpop.f32.mrf.mxu0  ;;  %v9227_v8 = vor.u32 %v13707_v60, %v9226_v56  ;;  %v10962_v60 = vld [vmem:[#allocation2 + $0xed0] sm:$0xf] }
  0xb9   :  { %3924 = vmatpush.bf16.msrb.mxu3 %v11247_v61  ;;  %v10378_v61 = vld [vmem:[#allocation2 + $0xa48] sm:$0xf]  ;;  %v3635_v63 = vadd.f32 %v3634_v57, %v666_v48  ;;  %v14176_v48 = vld [vmem:[#allocation2 + $0x107c] sm:$0xf0] }
  0xba   :  { %3886 = vmatpush.bf16.msrb.mxu0 %v9947_v3  ;;  %v9228_v3 = vld [vmem:[#allocation2 + $0x1d8] sm:$0xf0]  ;;  %v10379_v11 = vor.u32 %v13995_v62, %v10378_v61  ;;  %v11107_v56 = vor.u32 %v14176_v48, %v11106_v46  ;;  %v11111_v61 = vor.u32 %v14158_v51, %v11108_v52  ;;  %v14140_v62 = vld [vmem:[#allocation2 + $0xf5c] sm:$0xf0]  ;;  %v9380_v48 = vld [vmem:[#allocation2 + $0x300] sm:$0xf0] }
  0xbb   :  { %3899 = vmatpush.bf16.msrb.mxu1 %v11099_v4  ;;  %v667_v4 = vperm.slane %v14988_v39, 1  ;;  %v14992_v7 = vadd.f32 %v3647_v0, %v3635_v63  ;;  %v9231_v12 = vor.u32 %v13689_v2, %v9228_v3  ;;  %v3673_v24 = vpop.f32.mrf.mxu3  ;;  %v3649_v38 = vpop.f32.mrf.mxu1  ;;  %v13834_v63 = vld [vmem:[#allocation2 + $0x5d4] sm:$0xf]  ;;  %v9812_v0 = vld [vmem:[#allocation2 + $0x660] sm:$0xf0] }
  0xbc   :  { %3912 = vmatpush.bf16.msrb.mxu2 %v9951_v5  ;;  %v13977_v5 = vld [vmem:[#allocation2 + $0xa4c] sm:$0xf]  ;;  %v10964_v2 = vld [vmem:[#allocation2 + $0xf60] sm:$0xf0]  ;;  %v10675_v38 = vor.u32 %v14068_v26, %v10674_v25  ;;  %v14032_v46 = vld [vmem:[#allocation2 + $0xbfc] sm:$0xf0] }
  0xbd   :  { %3925 = vmatpush.bf16.msrb.mxu3 %v11103_v9  ;;  %v9082_v9 = vld [vmem:[#allocation2 + $0x28] sm:$0xf]  ;;  %v14014_v51 = vld [vmem:[#allocation2 + $0xb74] sm:$0xf]  ;;  %v10532_v52 = vld [vmem:[#allocation2 + $0xc00] sm:$0xf0] }
  0xbe   :  { %3887 = vmatpush.bf16.msrb.mxu0 %v9803_v17  ;;  %v13653_v17 = vld [vmem:[#allocation2 + $0x2c] sm:$0xf]  ;;  %v9083_v28 = vor.u32 %v13671_v10, %v9082_v9  ;;  %v10818_v9 = vld [vmem:[#allocation2 + $0xdb0] sm:$0xf]  ;;  %v668_v10 = vperm.slane %v14988_v39, 2 }
  0xbf   :  { %3900 = vmatpush.bf16.msrb.mxu1 %v10955_v18  ;;  %v3660_v18 = vpop.f32.mrf.mxu2  ;;  %v9087_v35 = vor.u32 %v13653_v17, %v9084_v20  ;;  %v14086_v17 = vld [vmem:[#allocation2 + $0xdb4] sm:$0xf]  ;;  %v9522_v20 = vld [vmem:[#allocation2 + $0x390] sm:$0xf]  ;;  %v14213_v25 = vld [vmem:[#allocation2 + $0x11a4] sm:$0xf0] }
  0xc0   :  { %3913 = vmatpush.bf16.msrb.mxu2 %v9807_v19  ;;  %v10383_v19 = vor.u32 %v13977_v5, %v10380_v6  ;;  %v3636_v33 = vpop.f32.mrf.mxu0  ;;  %v10963_v5 = vor.u32 %v14140_v62, %v10962_v60  ;;  %v9815_v6 = vor.u32 %v13834_v63, %v9812_v0  ;;  %v10386_v60 = vld [vmem:[#allocation2 + $0xa50] sm:$0xf]  ;;  %v10535_v62 = vor.u32 %v14014_v51, %v10532_v52  ;;  %v13996_v63 = vld [vmem:[#allocation2 + $0xadc] sm:$0xf0]  ;;  %v13690_v0 = vld [vmem:[#allocation2 + $0x154] sm:$0xf] }
  0xc1   :  { %3926 = vmatpush.bf16.msrb.mxu3 %v10959_v23  ;;  %v3661_v23 = vadd.f32 %v3660_v18, %v667_v4  ;;  %v9666_v4 = vld [vmem:[#allocation2 + $0x4b0] sm:$0xf]  ;;  %v10820_v18 = vld [vmem:[#allocation2 + $0xe40] sm:$0xf0]  ;;  %v669_v33 = vperm.slane %v14988_v39, 3 }
  0xc2   :  { %3888 = vmatpush.bf16.msrb.mxu0 %v9659_v29  ;;  %v14212_v29 = vld [vmem:[#allocation2 + $0x119c] sm:$0xf0]  ;;  %v13907_v26 = vld [vmem:[#allocation2 + $0x81c] sm:$0xf]  ;;  %v9818_v51 = vld [vmem:[#allocation2 + $0x5d8] sm:$0xf] }
  0xc3   :  { %3901 = vmatpush.bf16.msrb.mxu1 %v10811_v31  ;;  %v10100_v31 = vld [vmem:[#allocation2 + $0x8a0] sm:$0xf0]  ;;  %v13853_v52 = vld [vmem:[#allocation2 + $0x664] sm:$0xf0] }
  0xc4   :  { %3914 = vmatpush.bf16.msrb.mxu2 %v9663_v32  ;;  %v14994_v32 = vadd.f32 %v3673_v24, %v3661_v23  ;;  %v10103_v43 = vor.u32 %v13906_v30, %v10100_v31  ;;  %v9671_v23 = vor.u32 %v13798_v13, %v9668_v14  ;;  %v13780_v24 = vld [vmem:[#allocation2 + $0x41c] sm:$0xf0]  ;;  %v13762_v30 = vld [vmem:[#allocation2 + $0x394] sm:$0xf]  ;;  %v9524_v31 = vld [vmem:[#allocation2 + $0x420] sm:$0xf0] }
  0xc5   :  { %3927 = vmatpush.bf16.msrb.mxu3 %v10815_v36  ;;  %v14194_v36 = vld [vmem:[#allocation2 + $0x1114] sm:$0xf] }
  0xc6   :  { %3889 = vmatpush.bf16.msrb.mxu0 %v9515_v42  ;;  %v11251_v42 = vor.u32 %v14212_v29, %v11250_v27  ;;  %v11255_v47 = vor.u32 %v14194_v36, %v11252_v37  ;;  %v10823_v29 = vor.u32 %v14086_v17, %v10820_v18  ;;  %v9523_v37 = vor.u32 %v13780_v24, %v9522_v20  ;;  %v9092_v17 = vld [vmem:[#allocation2 + $0xc0] sm:$0xf0]  ;;  %v13942_v18 = vld [vmem:[#allocation2 + $0x934] sm:$0xf] }
  0xc7   :  { %3902 = vmatpush.bf16.msrb.mxu1 %v10667_v44  ;;  %v9954_v44 = vld [vmem:[#allocation2 + $0x6f0] sm:$0xf]  ;;  %v3662_v53 = vpop.f32.mrf.mxu2 }
  0xc8   :  { %3915 = vmatpush.bf16.msrb.mxu2 %v9519_v45  ;;  %v13888_v45 = vld [vmem:[#allocation2 + $0x77c] sm:$0xf0] }
  0xc9   :  { %3928 = vmatpush.bf16.msrb.mxu3 %v10671_v49  ;;  %v13870_v49 = vld [vmem:[#allocation2 + $0x6f4] sm:$0xf]  ;;  %v9955_v54 = vor.u32 %v13888_v45, %v9954_v44 }
  0xca   :  { %3890 = vmatpush.bf16.msrb.mxu0 %v9371_v55  ;;  %v3675_v55 = vpop.f32.mrf.mxu3  ;;  %v9959_v57 = vor.u32 %v13870_v49, %v9956_v50 }
  0xcb   :  { %3903 = vmatpush.bf16.msrb.mxu1 %v10523_v58  ;;  %v9810_v58 = vld [vmem:[#allocation2 + $0x5d0] sm:$0xf] }
  0xcc   :  { %3916 = vmatpush.bf16.msrb.mxu2 %v9375_v59  ;;  %v13852_v59 = vld [vmem:[#allocation2 + $0x65c] sm:$0xf0] }
  0xcd   :  { %3929 = vmatpush.bf16.msrb.mxu3 %v10527_v1  ;;  %v14122_v1 = vld [vmem:[#allocation2 + $0xed4] sm:$0xf]  ;;  %v9811_v3 = vor.u32 %v13852_v59, %v9810_v58  ;;  %v9234_v58 = vld [vmem:[#allocation2 + $0x150] sm:$0xf]  ;;  %v13708_v59 = vld [vmem:[#allocation2 + $0x1dc] sm:$0xf0] }
  0xce   :  { %3891 = vmatpush.bf16.msrb.mxu0 %v9227_v8  ;;  %v13816_v8 = vld [vmem:[#allocation2 + $0x53c] sm:$0xf0] }
  0xcf   :  { %3904 = vmatpush.bf16.msrb.mxu1 %v10379_v11  ;;  %v10967_v11 = vor.u32 %v14122_v1, %v10964_v2  ;;  %v9236_v1 = vld [vmem:[#allocation2 + $0x1e0] sm:$0xf0]  ;;  %v13978_v2 = vld [vmem:[#allocation2 + $0xa54] sm:$0xf] }
  0xd0   :  { %3917 = vmatpush.bf16.msrb.mxu2 %v9231_v12  ;;  %v14104_v12 = vld [vmem:[#allocation2 + $0xe3c] sm:$0xf0] }
  0xd1   :  { %3930 = vmatpush.bf16.msrb.mxu3 %v10383_v19  ;;  %v9667_v19 = vor.u32 %v13816_v8, %v9666_v4  ;;  %v10819_v22 = vor.u32 %v14104_v12, %v10818_v9  ;;  %v9235_v4 = vor.u32 %v13708_v59, %v9234_v58  ;;  %v10387_v8 = vor.u32 %v13996_v63, %v10386_v60  ;;  %v13654_v12 = vld [vmem:[#allocation2 + $0x34] sm:$0xf]  ;;  %v9820_v58 = vld [vmem:[#allocation2 + $0x668] sm:$0xf0]  ;;  %v14123_v59 = vld [vmem:[#allocation2 + $0xedc] sm:$0xf] }
  0xd2   :  { %3892 = vmatpush.bf16.msrb.mxu0 %v9083_v28  ;;  %v3686_v21 = vpop.f32.mrf.mxu0  ;;  %v9239_v9 = vor.u32 %v13690_v0, %v9236_v1  ;;  %v10972_v60 = vld [vmem:[#allocation2 + $0xf68] sm:$0xf0]  ;;  %v13817_v1 = vld [vmem:[#allocation2 + $0x544] sm:$0xf0] }
  0xd3   :  { %3905 = vmatpush.bf16.msrb.mxu1 %v10235_v34  ;;  %v3687_v27 = vadd.f32 %v3686_v21, %v668_v10  ;;  %v3699_v28 = vpop.f32.mrf.mxu1  ;;  %v14050_v34 = vld [vmem:[#allocation2 + $0xc94] sm:$0xf]  ;;  %v10242_v10 = vld [vmem:[#allocation2 + $0x930] sm:$0xf]  ;;  %v10106_v21 = vld [vmem:[#allocation2 + $0x818] sm:$0xf] }
  0xd4   :  { %3918 = vmatpush.bf16.msrb.mxu2 %v9087_v35  ;;  %v10676_v35 = vld [vmem:[#allocation2 + $0xd20] sm:$0xf0] }
  0xd5   :  { %3931 = vmatpush.bf16.msrb.mxu3 %v10239_v40  ;;  %3893 = vmatmul.bf16.vlgmr.msrb.gmra.mxu0 %v14964_v15  ;;  %v15002_v36 = vadd.f32 %v3699_v28, %v3687_v27  ;;  %v9527_v40 = vor.u32 %v13762_v30, %v9524_v31  ;;  %v10679_v45 = vor.u32 %v14050_v34, %v10676_v35  ;;  %v10108_v27 = vld [vmem:[#allocation2 + $0x8a8] sm:$0xf0]  ;;  %v14195_v30 = vld [vmem:[#allocation2 + $0x111c] sm:$0xf] }
  0xd6   :  { %3937 = vmatpush.bf16.msra.mxu0 %v10099_v41  ;;  %3906 = vmatmul.bf16.vlgmr.msrb.gmra.mxu1 %v14966_v16  ;;  %v9378_v41 = vld [vmem:[#allocation2 + $0x270] sm:$0xf]  ;;  %v11260_v31 = vld [vmem:[#allocation2 + $0x11a8] sm:$0xf0] }
  0xd7   :  { %3950 = vmatpush.bf16.msra.mxu1 %v11251_v42  ;;  %3919 = vmatmul.bf16.vlgmr.msrb.gmra.mxu2 %v14964_v15  ;;  %v13744_v42 = vld [vmem:[#allocation2 + $0x2fc] sm:$0xf0] }
  0xd8   :  { %3963 = vmatpush.bf16.msra.mxu2 %v10103_v43  ;;  %3932 = vmatmul.bf16.vlgmr.msrb.gmra.mxu3 %v14966_v16  ;;  %v10530_v43 = vld [vmem:[#allocation2 + $0xb70] sm:$0xf]  ;;  %v9379_v53 = vor.u32 %v13744_v42, %v9378_v41  ;;  %v11114_v41 = vld [vmem:[#allocation2 + $0xff8] sm:$0xf]  ;;  %v11263_v42 = vor.u32 %v14195_v30, %v11260_v31 }
  0xd9   :  { %3976 = vmatpush.bf16.msra.mxu3 %v11255_v47  ;;  %v13726_v47 = vld [vmem:[#allocation2 + $0x274] sm:$0xf] }
  0xda   :  { %3938 = vmatpush.bf16.msra.mxu0 %v9955_v54  ;;  %v3712_v44 = vpop.f32.mrf.mxu2  ;;  %v3688_v55 = vpop.f32.mrf.mxu0 }
  0xdb   :  { %3951 = vmatpush.bf16.msra.mxu1 %v11107_v56  ;;  %v3713_v49 = vadd.f32 %v3712_v44, %v669_v33  ;;  %v3725_v50 = vpop.f32.mrf.mxu3  ;;  %v10531_v56 = vor.u32 %v14032_v46, %v10530_v43  ;;  %v14177_v43 = vld [vmem:[#allocation2 + $0x1084] sm:$0xf0]  ;;  %v13871_v44 = vld [vmem:[#allocation2 + $0x6fc] sm:$0xf] }
  0xdc   :  { %3964 = vmatpush.bf16.msra.mxu2 %v9959_v57  ;;  %v9383_v57 = vor.u32 %v13726_v47, %v9380_v48  ;;  %v14159_v46 = vld [vmem:[#allocation2 + $0xffc] sm:$0xf]  ;;  %v11116_v47 = vld [vmem:[#allocation2 + $0x1088] sm:$0xf0] }
  0xdd   :  { %3977 = vmatpush.bf16.msra.mxu3 %v11111_v61  ;;  %v15004_v54 = vadd.f32 %v3725_v50, %v3713_v49  ;;  %v3701_v61 = vpop.f32.mrf.mxu1  ;;  %v11115_v49 = vor.u32 %v14177_v43, %v11114_v41  ;;  %v11119_v55 = vor.u32 %v14159_v46, %v11116_v47  ;;  %v14033_v41 = vld [vmem:[#allocation2 + $0xc04] sm:$0xf0]  ;;  %v9388_v43 = vld [vmem:[#allocation2 + $0x308] sm:$0xf0]  ;;  %v14015_v46 = vld [vmem:[#allocation2 + $0xb7c] sm:$0xf] }
  0xde   :  { %3939 = vmatpush.bf16.msra.mxu0 %v9811_v3  ;;  %v10388_v3 = vld [vmem:[#allocation2 + $0xae0] sm:$0xf0]  ;;  %v9819_v61 = vor.u32 %v13853_v52, %v9818_v51  ;;  %v10540_v47 = vld [vmem:[#allocation2 + $0xc08] sm:$0xf0] }
  0xdf   :  { %3952 = vmatpush.bf16.msra.mxu1 %v10963_v5  ;;  %v9090_v5 = vld [vmem:[#allocation2 + $0x30] sm:$0xf]  ;;  %v10391_v14 = vor.u32 %v13978_v2, %v10388_v3  ;;  %v10826_v2 = vld [vmem:[#allocation2 + $0xdb8] sm:$0xf]  ;;  %v670_v3 = vperm.slane %v14988_v39, 4 }
  0xe0   :  { %3965 = vmatpush.bf16.msra.mxu2 %v9815_v6  ;;  %v13672_v6 = vld [vmem:[#allocation2 + $0xbc] sm:$0xf0] }
  0xe1   :  { %3978 = vmatpush.bf16.msra.mxu3 %v10967_v11  ;;  %v13960_v11 = vld [vmem:[#allocation2 + $0x9bc] sm:$0xf0]  ;;  %v9091_v24 = vor.u32 %v13672_v6, %v9090_v5  ;;  %v14105_v5 = vld [vmem:[#allocation2 + $0xe44] sm:$0xf0]  ;;  %v13799_v6 = vld [vmem:[#allocation2 + $0x4bc] sm:$0xf] }
  0xe2   :  { %3940 = vmatpush.bf16.msra.mxu0 %v9667_v19  ;;  %v3714_v13 = vpop.f32.mrf.mxu2  ;;  %v10244_v19 = vld [vmem:[#allocation2 + $0x9c0] sm:$0xf0]  ;;  %v10243_v28 = vor.u32 %v13960_v11, %v10242_v10  ;;  %v10828_v10 = vld [vmem:[#allocation2 + $0xe48] sm:$0xf0] }
  0xe3   :  { %3953 = vmatpush.bf16.msra.mxu1 %v10819_v22  ;;  %v3727_v20 = vpop.f32.mrf.mxu3  ;;  %v13925_v22 = vld [vmem:[#allocation2 + $0x8a4] sm:$0xf0]  ;;  %v10247_v33 = vor.u32 %v13942_v18, %v10244_v19  ;;  %v10682_v19 = vld [vmem:[#allocation2 + $0xc98] sm:$0xf] }
  0xe4   :  { %3966 = vmatpush.bf16.msra.mxu2 %v9671_v23  ;;  %v11258_v23 = vld [vmem:[#allocation2 + $0x1118] sm:$0xf]  ;;  %v10107_v34 = vor.u32 %v13925_v22, %v10106_v21  ;;  %v13781_v18 = vld [vmem:[#allocation2 + $0x424] sm:$0xf0] }
  0xe5   :  { %3979 = vmatpush.bf16.msra.mxu3 %v10823_v29  ;;  %v9095_v29 = vor.u32 %v13654_v12, %v9092_v17  ;;  %v11259_v35 = vor.u32 %v14213_v25, %v11258_v23  ;;  %v9530_v12 = vld [vmem:[#allocation2 + $0x398] sm:$0xf]  ;;  %v14069_v20 = vld [vmem:[#allocation2 + $0xd24] sm:$0xf0]  ;;  %v9532_v25 = vld [vmem:[#allocation2 + $0x428] sm:$0xf0] }
  0xe6   :  { %3941 = vmatpush.bf16.msra.mxu0 %v9523_v37  ;;  %v10111_v37 = vor.u32 %v13907_v26, %v10108_v27  ;;  %v671_v26 = vperm.slane %v14988_v39, 5  ;;  %v14051_v27 = vld [vmem:[#allocation2 + $0xc9c] sm:$0xf]  ;;  %v9531_v30 = vor.u32 %v13781_v18, %v9530_v12  ;;  %v10683_v31 = vor.u32 %v14069_v20, %v10682_v19  ;;  %v13926_v18 = vld [vmem:[#allocation2 + $0x8ac] sm:$0xf0] }
  0xe7   :  { %3954 = vmatpush.bf16.msra.mxu1 %v10675_v38  ;;  %v9962_v38 = vld [vmem:[#allocation2 + $0x6f8] sm:$0xf]  ;;  %v13943_v12 = vld [vmem:[#allocation2 + $0x93c] sm:$0xf]  ;;  %v11266_v19 = vld [vmem:[#allocation2 + $0x1120] sm:$0xf] }
  0xe8   :  { %3967 = vmatpush.bf16.msra.mxu2 %v9527_v40  ;;  %v13889_v40 = vld [vmem:[#allocation2 + $0x784] sm:$0xf0] }
  0xe9   :  { %3980 = vmatpush.bf16.msra.mxu3 %v10679_v45  ;;  %v9964_v45 = vld [vmem:[#allocation2 + $0x788] sm:$0xf0]  ;;  %v9963_v48 = vor.u32 %v13889_v40, %v9962_v38 }
  0xea   :  { %3942 = vmatpush.bf16.msra.mxu0 %v9379_v53  ;;  %v9967_v50 = vor.u32 %v13871_v44, %v9964_v45  ;;  %v10970_v53 = vld [vmem:[#allocation2 + $0xed8] sm:$0xf] }
  0xeb   :  { %3955 = vmatpush.bf16.msra.mxu1 %v10531_v56  ;;  %v14141_v56 = vld [vmem:[#allocation2 + $0xf64] sm:$0xf0] }
  0xec   :  { %3968 = vmatpush.bf16.msra.mxu2 %v9383_v57  ;;  %v13835_v57 = vld [vmem:[#allocation2 + $0x5dc] sm:$0xf]  ;;  %v10971_v63 = vor.u32 %v14141_v56, %v10970_v53  ;;  %v9242_v53 = vld [vmem:[#allocation2 + $0x158] sm:$0xf] }
  0xed   :  { %3981 = vmatpush.bf16.msra.mxu3 %v10535_v62  ;;  %v9674_v62 = vld [vmem:[#allocation2 + $0x4b8] sm:$0xf]  ;;  %v9823_v0 = vor.u32 %v13835_v57, %v9820_v58  ;;  %v10543_v58 = vor.u32 %v14015_v46, %v10540_v47 }
  0xee   :  { %3943 = vmatpush.bf16.msra.mxu0 %v9235_v4  ;;  %v10975_v4 = vor.u32 %v14123_v59, %v10972_v60  ;;  %v9675_v11 = vor.u32 %v13817_v1, %v9674_v62  ;;  %v10394_v56 = vld [vmem:[#allocation2 + $0xa58] sm:$0xf]  ;;  %v13997_v59 = vld [vmem:[#allocation2 + $0xae4] sm:$0xf0]  ;;  %v13691_v60 = vld [vmem:[#allocation2 + $0x15c] sm:$0xf] }
  0xef   :  { %3956 = vmatpush.bf16.msra.mxu1 %v10387_v8  ;;  %v9676_v8 = vld [vmem:[#allocation2 + $0x548] sm:$0xf0]  ;;  %v13979_v62 = vld [vmem:[#allocation2 + $0xa5c] sm:$0xf]  ;;  %v9098_v1 = vld [vmem:[#allocation2 + $0x38] sm:$0xf] }
  0xf0   :  { %3969 = vmatpush.bf16.msra.mxu2 %v9239_v9  ;;  %v14087_v9 = vld [vmem:[#allocation2 + $0xdbc] sm:$0xf]  ;;  %v9679_v17 = vor.u32 %v13799_v6, %v9676_v8  ;;  %v13961_v6 = vld [vmem:[#allocation2 + $0x9c4] sm:$0xf0] }
  0xf1   :  { %3982 = vmatpush.bf16.msra.mxu3 %v10391_v14  ;;  %v10827_v14 = vor.u32 %v14105_v5, %v10826_v2  ;;  %v10831_v23 = vor.u32 %v14087_v9, %v10828_v10  ;;  %v13673_v2 = vld [vmem:[#allocation2 + $0xc4] sm:$0xf0]  ;;  %v10250_v5 = vld [vmem:[#allocation2 + $0x938] sm:$0xf]  ;;  %v13655_v8 = vld [vmem:[#allocation2 + $0x3c] sm:$0xf] }
  0xf2   :  { %3944 = vmatpush.bf16.msra.mxu0 %v9091_v24  ;;  %v3738_v13 = vpop.f32.mrf.mxu0  ;;  %v13763_v24 = vld [vmem:[#allocation2 + $0x39c] sm:$0xf]  ;;  %v9099_v20 = vor.u32 %v13673_v2, %v9098_v1  ;;  %v672_v1 = vperm.slane %v14988_v39, 6 }
  0xf3   :  { %3957 = vmatpush.bf16.msra.mxu1 %v10243_v28  ;;  %v3739_v21 = vadd.f32 %v3738_v13, %v670_v3  ;;  %v3751_v22 = vpop.f32.mrf.mxu1  ;;  %v10684_v28 = vld [vmem:[#allocation2 + $0xd28] sm:$0xf0]  ;;  %v10395_v3 = vor.u32 %v13997_v59, %v10394_v56  ;;  %v9828_v56 = vld [vmem:[#allocation2 + $0x670] sm:$0xf0] }
  0xf4   :  { %3970 = vmatpush.bf16.msra.mxu2 %v9095_v29  ;;  %v10687_v40 = vor.u32 %v14051_v27, %v10684_v28  ;;  %v10252_v13 = vld [vmem:[#allocation2 + $0x9c8] sm:$0xf0]  ;;  %v11268_v27 = vld [vmem:[#allocation2 + $0x11b0] sm:$0xf0] }
  0xf5   :  { %3983 = vmatpush.bf16.msra.mxu3 %v10247_v33  ;;  %3945 = vmatmul.bf16.vlgmr.msra.gmra.mxu0 %v14964_v15  ;;  %v15012_v29 = vadd.f32 %v3751_v22, %v3739_v21  ;;  %v9535_v33 = vor.u32 %v13763_v24, %v9532_v25  ;;  %v14214_v21 = vld [vmem:[#allocation2 + $0x11ac] sm:$0xf0]  ;;  %v13908_v22 = vld [vmem:[#allocation2 + $0x824] sm:$0xf]  ;;  %v10251_v24 = vor.u32 %v13961_v6, %v10250_v5  ;;  %v9684_v5 = vld [vmem:[#allocation2 + $0x550] sm:$0xf0] }
  0xf6   :  { %3989 = vmatpush.bf16.msrb.mxu0 %v10107_v34  ;;  %3958 = vmatmul.bf16.vlgmr.msra.gmra.mxu1 %v14966_v16  ;;  %v9386_v34 = vld [vmem:[#allocation2 + $0x278] sm:$0xf]  ;;  %v10255_v28 = vor.u32 %v13943_v12, %v10252_v13  ;;  %v14088_v6 = vld [vmem:[#allocation2 + $0xdc4] sm:$0xf] }
  0xf7   :  { %4002 = vmatpush.bf16.msrb.mxu1 %v11259_v35  ;;  %3971 = vmatmul.bf16.vlgmr.msra.gmra.mxu2 %v14964_v15  ;;  %v13745_v35 = vld [vmem:[#allocation2 + $0x304] sm:$0xf0] }
  0xf8   :  { %4015 = vmatpush.bf16.msrb.mxu2 %v10111_v37  ;;  %3984 = vmatmul.bf16.vlgmr.msra.gmra.mxu3 %v14966_v16  ;;  %v10538_v37 = vld [vmem:[#allocation2 + $0xb78] sm:$0xf] }
  0xf9   :  { %4028 = vmatpush.bf16.msrb.mxu3 %v11263_v42  ;;  %v13727_v42 = vld [vmem:[#allocation2 + $0x27c] sm:$0xf]  ;;  %v10539_v51 = vor.u32 %v14033_v41, %v10538_v37  ;;  %v11122_v37 = vld [vmem:[#allocation2 + $0x1000] sm:$0xf]  ;;  %v13872_v41 = vld [vmem:[#allocation2 + $0x704] sm:$0xf] }
  0xfa   :  { %3990 = vmatpush.bf16.msrb.mxu0 %v9963_v48  ;;  %v3764_v38 = vpop.f32.mrf.mxu2  ;;  %v9387_v48 = vor.u32 %v13745_v35, %v9386_v34  ;;  %v9391_v52 = vor.u32 %v13727_v42, %v9388_v43  ;;  %v9970_v34 = vld [vmem:[#allocation2 + $0x700] sm:$0xf]  ;;  %v13890_v35 = vld [vmem:[#allocation2 + $0x78c] sm:$0xf0]  ;;  %v9972_v42 = vld [vmem:[#allocation2 + $0x790] sm:$0xf0] }
  0xfb   :  { %4003 = vmatpush.bf16.msrb.mxu1 %v11115_v49  ;;  %v3765_v44 = vadd.f32 %v3764_v38, %v671_v26  ;;  %v3777_v45 = vpop.f32.mrf.mxu3  ;;  %v3753_v57 = vpop.f32.mrf.mxu1  ;;  %v14196_v26 = vld [vmem:[#allocation2 + $0x1124] sm:$0xf]  ;;  %v9975_v47 = vor.u32 %v13872_v41, %v9972_v42  ;;  %v9396_v42 = vld [vmem:[#allocation2 + $0x310] sm:$0xf0] }
  0xfc   :  { %4016 = vmatpush.bf16.msrb.mxu2 %v9967_v50  ;;  %v3740_v50 = vpop.f32.mrf.mxu0  ;;  %v11271_v38 = vor.u32 %v14196_v26, %v11268_v27  ;;  %v14160_v43 = vld [vmem:[#allocation2 + $0x1004] sm:$0xf]  ;;  %v10692_v26 = vld [vmem:[#allocation2 + $0xd30] sm:$0xf0] }
  0xfd   :  { %4029 = vmatpush.bf16.msrb.mxu3 %v11119_v55  ;;  %v15014_v49 = vadd.f32 %v3777_v45, %v3765_v44  ;;  %v13709_v55 = vld [vmem:[#allocation2 + $0x1e4] sm:$0xf0]  ;;  %v11124_v44 = vld [vmem:[#allocation2 + $0x1090] sm:$0xf0]  ;;  %v9971_v45 = vor.u32 %v13890_v35, %v9970_v34  ;;  %v13854_v50 = vld [vmem:[#allocation2 + $0x66c] sm:$0xf0] }
  0xfe   :  { %3991 = vmatpush.bf16.msrb.mxu0 %v9819_v61  ;;  %v9244_v61 = vld [vmem:[#allocation2 + $0x1e8] sm:$0xf0]  ;;  %v14124_v57 = vld [vmem:[#allocation2 + $0xee4] sm:$0xf]  ;;  %v13746_v34 = vld [vmem:[#allocation2 + $0x30c] sm:$0xf0] }
  0xff   :  { %4004 = vmatpush.bf16.msrb.mxu1 %v10971_v63  ;;  %v10396_v63 = vld [vmem:[#allocation2 + $0xae8] sm:$0xf0]  ;;  %v10546_v35 = vld [vmem:[#allocation2 + $0xb80] sm:$0xf]  ;;  %v13728_v41 = vld [vmem:[#allocation2 + $0x284] sm:$0xf] }
 0x100   :  { %4017 = vmatpush.bf16.msrb.mxu2 %v9823_v0  ;;  %v9243_v0 = vor.u32 %v13709_v55, %v9242_v53  ;;  %v10399_v10 = vor.u32 %v13979_v62, %v10396_v63  ;;  %v14142_v53 = vld [vmem:[#allocation2 + $0xf6c] sm:$0xf0]  ;;  %v13836_v55 = vld [vmem:[#allocation2 + $0x5e4] sm:$0xf] }
 0x101   :  { %4030 = vmatpush.bf16.msrb.mxu3 %v10975_v4  ;;  %v9247_v4 = vor.u32 %v13691_v60, %v9244_v61  ;;  %v9682_v60 = vld [vmem:[#allocation2 + $0x4c0] sm:$0xf]  ;;  %v9831_v62 = vor.u32 %v13836_v55, %v9828_v56  ;;  %v13818_v63 = vld [vmem:[#allocation2 + $0x54c] sm:$0xf0] }
 0x102   :  { %3992 = vmatpush.bf16.msrb.mxu0 %v9675_v11  ;;  %v3766_v9 = vpop.f32.mrf.mxu2  ;;  %v9100_v11 = vld [vmem:[#allocation2 + $0xc8] sm:$0xf0]  ;;  %v10402_v55 = vld [vmem:[#allocation2 + $0xa60] sm:$0xf] }
 0x103   :  { %4005 = vmatpush.bf16.msrb.mxu1 %v10827_v14  ;;  %v3779_v14 = vpop.f32.mrf.mxu3  ;;  %v9103_v25 = vor.u32 %v13655_v8, %v9100_v11  ;;  %v10836_v8 = vld [vmem:[#allocation2 + $0xe50] sm:$0xf0]  ;;  %v9683_v9 = vor.u32 %v13818_v63, %v9682_v60 }
 0x104   :  { %4018 = vmatpush.bf16.msrb.mxu2 %v9679_v17  ;;  %v10114_v17 = vld [vmem:[#allocation2 + $0x820] sm:$0xf]  ;;  %v13782_v14 = vld [vmem:[#allocation2 + $0x42c] sm:$0xf0]  ;;  %v9252_v60 = vld [vmem:[#allocation2 + $0x1f0] sm:$0xf0] }
 0x105   :  { %4031 = vmatpush.bf16.msrb.mxu3 %v10831_v23  ;;  %v10116_v23 = vld [vmem:[#allocation2 + $0x8b0] sm:$0xf0] }
 0x106   :  { %3993 = vmatpush.bf16.msrb.mxu0 %v9531_v30  ;;  %v10115_v30 = vor.u32 %v13926_v18, %v10114_v17  ;;  %v10690_v17 = vld [vmem:[#allocation2 + $0xca0] sm:$0xf]  ;;  %v14070_v18 = vld [vmem:[#allocation2 + $0xd2c] sm:$0xf0] }
 0x107   :  { %4006 = vmatpush.bf16.msrb.mxu1 %v10683_v31  ;;  %v11267_v31 = vor.u32 %v14214_v21, %v11266_v19  ;;  %v10839_v21 = vor.u32 %v14088_v6, %v10836_v8  ;;  %v13656_v6 = vld [vmem:[#allocation2 + $0x44] sm:$0xf] }
 0x108   :  { %4019 = vmatpush.bf16.msrb.mxu2 %v9535_v33  ;;  %v10119_v33 = vor.u32 %v13908_v22, %v10116_v23  ;;  %v13764_v22 = vld [vmem:[#allocation2 + $0x3a4] sm:$0xf]  ;;  %v9540_v23 = vld [vmem:[#allocation2 + $0x430] sm:$0xf0] }
 0x109   :  { %4032 = vmatpush.bf16.msrb.mxu3 %v10687_v40  ;;  %v14178_v40 = vld [vmem:[#allocation2 + $0x108c] sm:$0xf0] }
 0x10a   :  { %3994 = vmatpush.bf16.msrb.mxu0 %v9387_v48  ;;  %v11123_v46 = vor.u32 %v14178_v40, %v11122_v37  ;;  %v9826_v48 = vld [vmem:[#allocation2 + $0x5e0] sm:$0xf]  ;;  %v14034_v40 = vld [vmem:[#allocation2 + $0xc0c] sm:$0xf0] }
 0x10b   :  { %4007 = vmatpush.bf16.msrb.mxu1 %v10539_v51  ;;  %v10978_v51 = vld [vmem:[#allocation2 + $0xee0] sm:$0xf]  ;;  %v9827_v59 = vor.u32 %v13854_v50, %v9826_v48  ;;  %v10547_v50 = vor.u32 %v14034_v40, %v10546_v35  ;;  %v13891_v35 = vld [vmem:[#allocation2 + $0x794] sm:$0xf0] }
 0x10c   :  { %4020 = vmatpush.bf16.msrb.mxu2 %v9391_v52  ;;  %v11127_v52 = vor.u32 %v14160_v43, %v11124_v44  ;;  %v10979_v61 = vor.u32 %v14142_v53, %v10978_v51  ;;  %v14016_v44 = vld [vmem:[#allocation2 + $0xb84] sm:$0xf]  ;;  %v9399_v51 = vor.u32 %v13728_v41, %v9396_v42  ;;  %v13710_v53 = vld [vmem:[#allocation2 + $0x1ec] sm:$0xf0]  ;;  %v14179_v40 = vld [vmem:[#allocation2 + $0x1094] sm:$0xf0] }
 0x10d   :  { %4033 = vmatpush.bf16.msrb.mxu3 %v10543_v58  ;;  %v10980_v58 = vld [vmem:[#allocation2 + $0xf70] sm:$0xf0]  ;;  %v13873_v41 = vld [vmem:[#allocation2 + $0x70c] sm:$0xf]  ;;  %v9980_v42 = vld [vmem:[#allocation2 + $0x798] sm:$0xf0] }
 0x10e   :  { %3995 = vmatpush.bf16.msrb.mxu0 %v9243_v0  ;;  %v10834_v0 = vld [vmem:[#allocation2 + $0xdc0] sm:$0xf]  ;;  %v10983_v2 = vor.u32 %v14124_v57, %v10980_v58  ;;  %v13998_v58 = vld [vmem:[#allocation2 + $0xaec] sm:$0xf0] }
 0x10f   :  { %4008 = vmatpush.bf16.msrb.mxu1 %v10395_v3  ;;  %v14106_v3 = vld [vmem:[#allocation2 + $0xe4c] sm:$0xf0] }
 0x110   :  { %4021 = vmatpush.bf16.msrb.mxu2 %v9247_v4  ;;  %v13800_v4 = vld [vmem:[#allocation2 + $0x4c4] sm:$0xf]  ;;  %v10835_v12 = vor.u32 %v14106_v3, %v10834_v0  ;;  %v9106_v0 = vld [vmem:[#allocation2 + $0x40] sm:$0xf] }
 0x111   :  { %4034 = vmatpush.bf16.msrb.mxu3 %v10399_v10  ;;  %v9538_v10 = vld [vmem:[#allocation2 + $0x3a0] sm:$0xf]  ;;  %v9687_v13 = vor.u32 %v13800_v4, %v9684_v5  ;;  %v13962_v5 = vld [vmem:[#allocation2 + $0x9cc] sm:$0xf0] }
 0x112   :  { %3996 = vmatpush.bf16.msrb.mxu0 %v9099_v20  ;;  %v3790_v11 = vpop.f32.mrf.mxu0  ;;  %v10258_v4 = vld [vmem:[#allocation2 + $0x940] sm:$0xf] }
 0x113   :  { %4009 = vmatpush.bf16.msrb.mxu1 %v10251_v24  ;;  %v3791_v19 = vadd.f32 %v3790_v11, %v672_v1  ;;  %v3803_v20 = vpop.f32.mrf.mxu1  ;;  %v673_v24 = vperm.slane %v14988_v39, 7  ;;  %v13674_v1 = vld [vmem:[#allocation2 + $0xcc] sm:$0xf0]  ;;  %v13944_v11 = vld [vmem:[#allocation2 + $0x944] sm:$0xf] }
 0x114   :  { %4022 = vmatpush.bf16.msrb.mxu2 %v9103_v25  ;;  %v14052_v25 = vld [vmem:[#allocation2 + $0xca4] sm:$0xf] }
 0x115   :  { %4035 = vmatpush.bf16.msrb.mxu3 %v10255_v28  ;;  %3997 = vmatmul.bf16.vlgmr.msrb.gmra.mxu0 %v14964_v15  ;;  %v15022_v27 = vadd.f32 %v3803_v20, %v3791_v19  ;;  %v9539_v28 = vor.u32 %v13782_v14, %v9538_v10  ;;  %v9108_v10 = vld [vmem:[#allocation2 + $0xd0] sm:$0xf0]  ;;  %v10122_v14 = vld [vmem:[#allocation2 + $0x828] sm:$0xf]  ;;  %v9107_v19 = vor.u32 %v13674_v1, %v9106_v0  ;;  %v14215_v20 = vld [vmem:[#allocation2 + $0x11b4] sm:$0xf0] }
 0x116   :  { %4041 = vmatpush.bf16.msra.mxu0 %v10115_v30  ;;  %4010 = vmatmul.bf16.vlgmr.msrb.gmra.mxu1 %v14966_v16  ;;  %v10691_v30 = vor.u32 %v14070_v18, %v10690_v17  ;;  %v13927_v17 = vld [vmem:[#allocation2 + $0x8b4] sm:$0xf0]  ;;  %v11274_v18 = vld [vmem:[#allocation2 + $0x1128] sm:$0xf] }
 0x117   :  { %4054 = vmatpush.bf16.msra.mxu1 %v11267_v31  ;;  %4023 = vmatmul.bf16.vlgmr.msrb.gmra.mxu2 %v14964_v15  ;;  %v9543_v31 = vor.u32 %v13764_v22, %v9540_v23  ;;  %v10124_v22 = vld [vmem:[#allocation2 + $0x8b8] sm:$0xf0]  ;;  %v10259_v23 = vor.u32 %v13962_v5, %v10258_v4  ;;  %v13819_v0 = vld [vmem:[#allocation2 + $0x554] sm:$0xf0]  ;;  %v10842_v1 = vld [vmem:[#allocation2 + $0xdc8] sm:$0xf] }
 0x118   :  { %4067 = vmatpush.bf16.msra.mxu2 %v10119_v33  ;;  %4036 = vmatmul.bf16.vlgmr.msrb.gmra.mxu3 %v14966_v16  ;;  %v9394_v33 = vld [vmem:[#allocation2 + $0x280] sm:$0xf]  ;;  %v14107_v4 = vld [vmem:[#allocation2 + $0xe54] sm:$0xf0]  ;;  %v13801_v5 = vld [vmem:[#allocation2 + $0x4cc] sm:$0xf] }
 0x119   :  { %4080 = vmatpush.bf16.msra.mxu3 %v11271_v38  ;;  %v10695_v38 = vor.u32 %v14052_v25, %v10692_v26  ;;  %v14197_v25 = vld [vmem:[#allocation2 + $0x112c] sm:$0xf]  ;;  %v11276_v26 = vld [vmem:[#allocation2 + $0x11b8] sm:$0xf0] }
 0x11a   :  { %4042 = vmatpush.bf16.msra.mxu0 %v9971_v45  ;;  %v3816_v37 = vpop.f32.mrf.mxu2  ;;  %v10548_v45 = vld [vmem:[#allocation2 + $0xc10] sm:$0xf0]  ;;  %v3792_v48 = vpop.f32.mrf.mxu0 }
 0x11b   :  { %4055 = vmatpush.bf16.msra.mxu1 %v11123_v46  ;;  %v3817_v39 = vadd.f32 %v3816_v37, %v673_v24  ;;  %v3829_v43 = vpop.f32.mrf.mxu3  ;;  %v9395_v46 = vor.u32 %v13746_v34, %v9394_v33  ;;  %v3805_v56 = vpop.f32.mrf.mxu1  ;;  %v10551_v57 = vor.u32 %v14016_v44, %v10548_v45  ;;  %v9111_v24 = vor.u32 %v13656_v6, %v9108_v10  ;;  %v9978_v34 = vld [vmem:[#allocation2 + $0x708] sm:$0xf]  ;;  %v9692_v6 = vld [vmem:[#allocation2 + $0x558] sm:$0xf0] }
 0x11c   :  { %4068 = vmatpush.bf16.msra.mxu2 %v9975_v47  ;;  %v11130_v37 = vld [vmem:[#allocation2 + $0x1008] sm:$0xf]  ;;  %v9979_v44 = vor.u32 %v13891_v35, %v9978_v34  ;;  %v9836_v56 = vld [vmem:[#allocation2 + $0x678] sm:$0xf0] }
 0x11d   :  { %4081 = vmatpush.bf16.msra.mxu3 %v11127_v52  ;;  %v15024_v47 = vadd.f32 %v3829_v43, %v3817_v39  ;;  %v9250_v52 = vld [vmem:[#allocation2 + $0x160] sm:$0xf]  ;;  %v14161_v39 = vld [vmem:[#allocation2 + $0x100c] sm:$0xf]  ;;  %v11132_v43 = vld [vmem:[#allocation2 + $0x1098] sm:$0xf0]  ;;  %v11131_v45 = vor.u32 %v14179_v40, %v11130_v37 }
 0x11e   :  { %4043 = vmatpush.bf16.msra.mxu0 %v9827_v59  ;;  %v13692_v59 = vld [vmem:[#allocation2 + $0x164] sm:$0xf]  ;;  %v9251_v63 = vor.u32 %v13710_v53, %v9250_v52  ;;  %v9834_v48 = vld [vmem:[#allocation2 + $0x5e8] sm:$0xf]  ;;  %v11135_v52 = vor.u32 %v14161_v39, %v11132_v43  ;;  %v14143_v53 = vld [vmem:[#allocation2 + $0xf74] sm:$0xf0] }
 0x11f   :  { %4056 = vmatpush.bf16.msra.mxu1 %v10979_v61  ;;  %v13980_v61 = vld [vmem:[#allocation2 + $0xa64] sm:$0xf]  ;;  %v9255_v3 = vor.u32 %v13692_v59, %v9252_v60  ;;  %v9690_v60 = vld [vmem:[#allocation2 + $0x4c8] sm:$0xf]  ;;  %v13747_v37 = vld [vmem:[#allocation2 + $0x314] sm:$0xf0] }
 0x120   :  { %4069 = vmatpush.bf16.msra.mxu2 %v9831_v62  ;;  %v10404_v62 = vld [vmem:[#allocation2 + $0xaf0] sm:$0xf0]  ;;  %v9691_v10 = vor.u32 %v13819_v0, %v9690_v60  ;;  %v9402_v35 = vld [vmem:[#allocation2 + $0x288] sm:$0xf]  ;;  %v13729_v39 = vld [vmem:[#allocation2 + $0x28c] sm:$0xf] }
 0x121   :  { %4082 = vmatpush.bf16.msra.mxu3 %v10983_v2  ;;  %v10403_v2 = vor.u32 %v13998_v58, %v10402_v55  ;;  %v13837_v55 = vld [vmem:[#allocation2 + $0x5ec] sm:$0xf]  ;;  %v10988_v58 = vld [vmem:[#allocation2 + $0xf78] sm:$0xf0] }
 0x122   :  { %4044 = vmatpush.bf16.msra.mxu0 %v9683_v9  ;;  %v3818_v8 = vpop.f32.mrf.mxu2  ;;  %v10407_v9 = vor.u32 %v13980_v61, %v10404_v62  ;;  %v15030_v61 = vld [vmem:[#allocation4 + $0x8] sm:$0xff]  ;;  %v9404_v43 = vld [vmem:[#allocation2 + $0x318] sm:$0xf0] }
 0x123   :  { %4057 = vmatpush.bf16.msra.mxu1 %v10835_v12  ;;  %v10260_v12 = vld [vmem:[#allocation2 + $0x9d0] sm:$0xf0]  ;;  %v14089_v8 = vld [vmem:[#allocation2 + $0xdcc] sm:$0xf]  ;;  %v9260_v0 = vld [vmem:[#allocation2 + $0x1f8] sm:$0xf0] }
 0x124   :  { %4070 = vmatpush.bf16.msra.mxu2 %v9687_v13  ;;  %v3831_v13 = vpop.f32.mrf.mxu3 }
 0x125   :  { %4083 = vmatpush.bf16.msra.mxu3 %v10839_v21  ;;  %v13909_v21 = vld [vmem:[#allocation2 + $0x82c] sm:$0xf]  ;;  %v10843_v13 = vor.u32 %v14107_v4, %v10842_v1  ;;  %v9114_v4 = vld [vmem:[#allocation2 + $0x48] sm:$0xf] }
 0x126   :  { %4045 = vmatpush.bf16.msra.mxu0 %v9539_v28  ;;  %v10263_v28 = vor.u32 %v13944_v11, %v10260_v12  ;;  %v10127_v33 = vor.u32 %v13909_v21, %v10124_v22  ;;  %v9546_v11 = vld [vmem:[#allocation2 + $0x3a8] sm:$0xf]  ;;  %v13981_v1 = vld [vmem:[#allocation2 + $0xa6c] sm:$0xf] }
 0x127   :  { %4058 = vmatpush.bf16.msra.mxu1 %v10691_v30  ;;  %v10123_v30 = vor.u32 %v13927_v17, %v10122_v14  ;;  %v9695_v14 = vor.u32 %v13801_v5, %v9692_v6  ;;  %v13783_v17 = vld [vmem:[#allocation2 + $0x434] sm:$0xf0] }
 0x128   :  { %4071 = vmatpush.bf16.msra.mxu2 %v9543_v31  ;;  %v11275_v31 = vor.u32 %v14215_v20, %v11274_v18  ;;  %v10698_v18 = vld [vmem:[#allocation2 + $0xca8] sm:$0xf]  ;;  %v13675_v5 = vld [vmem:[#allocation2 + $0xd4] sm:$0xf0] }
 0x129   :  { %4084 = vmatpush.bf16.msra.mxu3 %v10695_v38  ;;  %v11279_v38 = vor.u32 %v14197_v25, %v11276_v26  ;;  %v675_v25 = vperm.slane %v15030_v61, 1  ;;  %v14053_v26 = vld [vmem:[#allocation2 + $0xcac] sm:$0xf] }
 0x12a   :  { %4046 = vmatpush.bf16.msra.mxu0 %v9395_v46  ;;  %v9983_v46 = vor.u32 %v13873_v41, %v9980_v42  ;;  %v14035_v42 = vld [vmem:[#allocation2 + $0xc14] sm:$0xf0] }
 0x12b   :  { %4059 = vmatpush.bf16.msra.mxu1 %v10547_v50  ;;  %v13855_v50 = vld [vmem:[#allocation2 + $0x674] sm:$0xf0] }
 0x12c   :  { %4072 = vmatpush.bf16.msra.mxu2 %v9399_v51  ;;  %v10986_v51 = vld [vmem:[#allocation2 + $0xee8] sm:$0xf]  ;;  %v9835_v59 = vor.u32 %v13855_v50, %v9834_v48  ;;  %v10556_v48 = vld [vmem:[#allocation2 + $0xc18] sm:$0xf0]  ;;  %v9403_v50 = vor.u32 %v13747_v37, %v9402_v35 }
 0x12d   :  { %4085 = vmatpush.bf16.msra.mxu3 %v10551_v57  ;;  %v14125_v57 = vld [vmem:[#allocation2 + $0xeec] sm:$0xf]  ;;  %v10987_v62 = vor.u32 %v14143_v53, %v10986_v51 }
 0x12e   :  { %4047 = vmatpush.bf16.msra.mxu0 %v9251_v63  ;;  %v9839_v63 = vor.u32 %v13837_v55, %v9836_v56  ;;  %v9407_v55 = vor.u32 %v13729_v39, %v9404_v43  ;;  %v9258_v56 = vld [vmem:[#allocation2 + $0x168] sm:$0xf]  ;;  %v11138_v39 = vld [vmem:[#allocation2 + $0x1010] sm:$0xf] }
 0x12f   :  { %4060 = vmatpush.bf16.msra.mxu1 %v10403_v2  ;;  %v674_v2 = vperm.slane %v15030_v61, 0 }
 0x130   :  { %4073 = vmatpush.bf16.msra.mxu2 %v9255_v3  ;;  %v10991_v3 = vor.u32 %v14125_v57, %v10988_v58  ;;  %v13711_v57 = vld [vmem:[#allocation2 + $0x1f4] sm:$0xf0]  ;;  %v10410_v58 = vld [vmem:[#allocation2 + $0xa68] sm:$0xf] }
 0x131   :  { %4086 = vmatpush.bf16.msra.mxu3 %v10407_v9  ;;  %v10844_v9 = vld [vmem:[#allocation2 + $0xe58] sm:$0xf0] }
 0x132   :  { %4048 = vmatpush.bf16.msra.mxu0 %v9107_v19  ;;  %v3842_v12 = vpop.f32.mrf.mxu0  ;;  %v14071_v19 = vld [vmem:[#allocation2 + $0xd34] sm:$0xf0]  ;;  %v10847_v22 = vor.u32 %v14089_v8, %v10844_v9  ;;  %v10266_v9 = vld [vmem:[#allocation2 + $0x948] sm:$0xf] }
 0x133   :  { %4061 = vmatpush.bf16.msra.mxu1 %v10259_v23  ;;  %v3843_v20 = vadd.f32 %v3842_v12, %v674_v2  ;;  %v3855_v21 = vpop.f32.mrf.mxu1  ;;  %v13765_v23 = vld [vmem:[#allocation2 + $0x3ac] sm:$0xf]  ;;  %v10412_v2 = vld [vmem:[#allocation2 + $0xaf8] sm:$0xf0] }
 0x134   :  { %4074 = vmatpush.bf16.msra.mxu2 %v9111_v24  ;;  %v9548_v24 = vld [vmem:[#allocation2 + $0x438] sm:$0xf0] }
 0x135   :  { %4087 = vmatpush.bf16.msra.mxu3 %v10263_v28  ;;  %4049 = vmatmul.bf16.vlgmr.msra.gmra.mxu0 %v14964_v15  ;;  %v10700_v28 = vld [vmem:[#allocation2 + $0xd38] sm:$0xf0]  ;;  %v9551_v34 = vor.u32 %v13765_v23, %v9548_v24  ;;  %v9115_v23 = vor.u32 %v13675_v5, %v9114_v4  ;;  %v14216_v24 = vld [vmem:[#allocation2 + $0x11bc] sm:$0xf0] }
 0x136   :  { %4093 = vmatpush.bf16.msrb.mxu0 %v10123_v30  ;;  %4062 = vmatmul.bf16.vlgmr.msra.gmra.mxu1 %v14966_v16  ;;  %v15034_v30 = vadd.f32 %v3855_v21, %v3843_v20  ;;  %v10703_v41 = vor.u32 %v14053_v26, %v10700_v28  ;;  %v10130_v20 = vld [vmem:[#allocation2 + $0x830] sm:$0xf]  ;;  %v13928_v21 = vld [vmem:[#allocation2 + $0x8bc] sm:$0xf0]  ;;  %v10132_v26 = vld [vmem:[#allocation2 + $0x8c0] sm:$0xf0] }
 0x137   :  { %4106 = vmatpush.bf16.msrb.mxu1 %v11275_v31  ;;  %4075 = vmatmul.bf16.vlgmr.msra.gmra.mxu2 %v14964_v15  ;;  %v9547_v31 = vor.u32 %v13783_v17, %v9546_v11  ;;  %v13657_v11 = vld [vmem:[#allocation2 + $0x4c] sm:$0xf]  ;;  %v10131_v37 = vor.u32 %v13928_v21, %v10130_v20 }
 0x138   :  { %4119 = vmatpush.bf16.msrb.mxu2 %v10127_v33  ;;  %4088 = vmatmul.bf16.vlgmr.msra.gmra.mxu3 %v14966_v16  ;;  %v10699_v33 = vor.u32 %v14071_v19, %v10698_v18  ;;  %v13945_v17 = vld [vmem:[#allocation2 + $0x94c] sm:$0xf]  ;;  %v10268_v18 = vld [vmem:[#allocation2 + $0x9d8] sm:$0xf0] }
 0x139   :  { %4132 = vmatpush.bf16.msrb.mxu3 %v11279_v38  ;;  %v10554_v38 = vld [vmem:[#allocation2 + $0xb88] sm:$0xf]  ;;  %v10271_v35 = vor.u32 %v13945_v17, %v10268_v18  ;;  %v10852_v17 = vld [vmem:[#allocation2 + $0xe60] sm:$0xf0] }
 0x13a   :  { %4094 = vmatpush.bf16.msrb.mxu0 %v9979_v44  ;;  %v3868_v40 = vpop.f32.mrf.mxu2  ;;  %v10555_v53 = vor.u32 %v14035_v42, %v10554_v38  ;;  %v13892_v42 = vld [vmem:[#allocation2 + $0x79c] sm:$0xf0] }
 0x13b   :  { %4107 = vmatpush.bf16.msrb.mxu1 %v11131_v45  ;;  %v3869_v44 = vadd.f32 %v3868_v40, %v675_v25  ;;  %v3881_v45 = vpop.f32.mrf.mxu3  ;;  %v13910_v25 = vld [vmem:[#allocation2 + $0x834] sm:$0xf] }
 0x13c   :  { %4120 = vmatpush.bf16.msrb.mxu2 %v9983_v46  ;;  %v14017_v46 = vld [vmem:[#allocation2 + $0xb8c] sm:$0xf]  ;;  %v10135_v40 = vor.u32 %v13910_v25, %v10132_v26  ;;  %v14072_v25 = vld [vmem:[#allocation2 + $0xd3c] sm:$0xf0] }
 0x13d   :  { %4133 = vmatpush.bf16.msrb.mxu3 %v11135_v52  ;;  %v15036_v51 = vadd.f32 %v3881_v45, %v3869_v44  ;;  %v3844_v52 = vpop.f32.mrf.mxu0  ;;  %v10559_v60 = vor.u32 %v14017_v46, %v10556_v48  ;;  %v14180_v44 = vld [vmem:[#allocation2 + $0x109c] sm:$0xf0]  ;;  %v13874_v45 = vld [vmem:[#allocation2 + $0x714] sm:$0xf]  ;;  %v9988_v46 = vld [vmem:[#allocation2 + $0x7a0] sm:$0xf0] }
 0x13e   :  { %4095 = vmatpush.bf16.msrb.mxu0 %v9835_v59  ;;  %v3857_v59 = vpop.f32.mrf.mxu1  ;;  %v14162_v48 = vld [vmem:[#allocation2 + $0x1014] sm:$0xf] }
 0x13f   :  { %4108 = vmatpush.bf16.msrb.mxu1 %v10987_v62  ;;  %v13999_v62 = vld [vmem:[#allocation2 + $0xaf4] sm:$0xf0] }
 0x140   :  { %4121 = vmatpush.bf16.msrb.mxu2 %v9839_v63  ;;  %v13693_v63 = vld [vmem:[#allocation2 + $0x16c] sm:$0xf]  ;;  %v10411_v6 = vor.u32 %v13999_v62, %v10410_v58  ;;  %v10994_v58 = vld [vmem:[#allocation2 + $0xef0] sm:$0xf]  ;;  %v13838_v62 = vld [vmem:[#allocation2 + $0x5f4] sm:$0xf] }
 0x141   :  { %4134 = vmatpush.bf16.msrb.mxu3 %v10991_v3  ;;  %v9259_v3 = vor.u32 %v13711_v57, %v9258_v56  ;;  %v9263_v8 = vor.u32 %v13693_v63, %v9260_v0  ;;  %v9842_v56 = vld [vmem:[#allocation2 + $0x5f0] sm:$0xf]  ;;  %v13856_v57 = vld [vmem:[#allocation2 + $0x67c] sm:$0xf0]  ;;  %v9844_v63 = vld [vmem:[#allocation2 + $0x680] sm:$0xf0] }
 0x142   :  { %4096 = vmatpush.bf16.msrb.mxu0 %v9691_v10  ;;  %v13963_v10 = vld [vmem:[#allocation2 + $0x9d4] sm:$0xf0]  ;;  %v3870_v12 = vpop.f32.mrf.mxu2  ;;  %v14126_v0 = vld [vmem:[#allocation2 + $0xef4] sm:$0xf]  ;;  %v9847_v5 = vor.u32 %v13838_v62, %v9844_v63 }
 0x143   :  { %4109 = vmatpush.bf16.msrb.mxu1 %v10843_v13  ;;  %v10415_v13 = vor.u32 %v13981_v1, %v10412_v2  ;;  %v3883_v19 = vpop.f32.mrf.mxu3  ;;  %v10267_v28 = vor.u32 %v13963_v10, %v10266_v9  ;;  %v10996_v1 = vld [vmem:[#allocation2 + $0xf80] sm:$0xf0]  ;;  %v9843_v2 = vor.u32 %v13856_v57, %v9842_v56  ;;  %v676_v9 = vperm.slane %v15030_v61, 2  ;;  %v13802_v12 = vld [vmem:[#allocation2 + $0x4d4] sm:$0xf] }
 0x144   :  { %4122 = vmatpush.bf16.msrb.mxu2 %v9695_v14  ;;  %v9116_v14 = vld [vmem:[#allocation2 + $0xd8] sm:$0xf0]  ;;  %v10999_v10 = vor.u32 %v14126_v0, %v10996_v1  ;;  %v9554_v19 = vld [vmem:[#allocation2 + $0x3b0] sm:$0xf]  ;;  %v14018_v57 = vld [vmem:[#allocation2 + $0xb94] sm:$0xf] }
 0x145   :  { %4135 = vmatpush.bf16.msrb.mxu3 %v10847_v22  ;;  %v11282_v22 = vld [vmem:[#allocation2 + $0x1130] sm:$0xf] }
 0x146   :  { %4097 = vmatpush.bf16.msrb.mxu0 %v9547_v31  ;;  %v9119_v31 = vor.u32 %v13657_v11, %v9116_v14  ;;  %v11283_v38 = vor.u32 %v14216_v24, %v11282_v22  ;;  %v14108_v11 = vld [vmem:[#allocation2 + $0xe5c] sm:$0xf0]  ;;  %v14090_v14 = vld [vmem:[#allocation2 + $0xdd4] sm:$0xf]  ;;  %v10706_v24 = vld [vmem:[#allocation2 + $0xcb0] sm:$0xf] }
 0x147   :  { %4110 = vmatpush.bf16.msrb.mxu1 %v10699_v33  ;;  %v14198_v33 = vld [vmem:[#allocation2 + $0x1134] sm:$0xf]  ;;  %v9266_v1 = vld [vmem:[#allocation2 + $0x170] sm:$0xf] }
 0x148   :  { %4123 = vmatpush.bf16.msrb.mxu2 %v9551_v34  ;;  %v11284_v34 = vld [vmem:[#allocation2 + $0x11c0] sm:$0xf0] }
 0x149   :  { %4136 = vmatpush.bf16.msrb.mxu3 %v10703_v41  ;;  %v9986_v41 = vld [vmem:[#allocation2 + $0x710] sm:$0xf]  ;;  %v11287_v43 = vor.u32 %v14198_v33, %v11284_v34  ;;  %v13766_v33 = vld [vmem:[#allocation2 + $0x3b4] sm:$0xf]  ;;  %v9556_v34 = vld [vmem:[#allocation2 + $0x440] sm:$0xf0] }
 0x14a   :  { %4098 = vmatpush.bf16.msrb.mxu0 %v9403_v50  ;;  %v11140_v50 = vld [vmem:[#allocation2 + $0x10a0] sm:$0xf0]  ;;  %v9987_v52 = vor.u32 %v13892_v42, %v9986_v41  ;;  %v10707_v42 = vor.u32 %v14072_v25, %v10706_v24  ;;  %v13946_v25 = vld [vmem:[#allocation2 + $0x954] sm:$0xf] }
 0x14b   :  { %4111 = vmatpush.bf16.msrb.mxu1 %v10555_v53  ;;  %v11139_v53 = vor.u32 %v14180_v44, %v11138_v39  ;;  %v11143_v59 = vor.u32 %v14162_v48, %v11140_v50  ;;  %v9559_v39 = vor.u32 %v13766_v33, %v9556_v34  ;;  %v13748_v44 = vld [vmem:[#allocation2 + $0x31c] sm:$0xf0]  ;;  %v9124_v24 = vld [vmem:[#allocation2 + $0xe0] sm:$0xf0]  ;;  %v13929_v33 = vld [vmem:[#allocation2 + $0x8c4] sm:$0xf0] }
 0x14c   :  { %4124 = vmatpush.bf16.msrb.mxu2 %v9407_v55  ;;  %v9991_v55 = vor.u32 %v13874_v45, %v9988_v46  ;;  %v10562_v45 = vld [vmem:[#allocation2 + $0xb90] sm:$0xf]  ;;  %v14036_v50 = vld [vmem:[#allocation2 + $0xc1c] sm:$0xf0]  ;;  %v11290_v34 = vld [vmem:[#allocation2 + $0x1138] sm:$0xf] }
 0x14d   :  { %4137 = vmatpush.bf16.msrb.mxu3 %v10559_v60  ;;  %v14144_v60 = vld [vmem:[#allocation2 + $0xf7c] sm:$0xf0]  ;;  %v10563_v63 = vor.u32 %v14036_v50, %v10562_v45 }
 0x14e   :  { %4099 = vmatpush.bf16.msrb.mxu0 %v9259_v3  ;;  %v9698_v3 = vld [vmem:[#allocation2 + $0x4d0] sm:$0xf]  ;;  %v10995_v4 = vor.u32 %v14144_v60, %v10994_v58  ;;  %v10564_v58 = vld [vmem:[#allocation2 + $0xc20] sm:$0xf0] }
 0x14f   :  { %4112 = vmatpush.bf16.msrb.mxu1 %v10411_v6  ;;  %v13820_v6 = vld [vmem:[#allocation2 + $0x55c] sm:$0xf0] }
 0x150   :  { %4125 = vmatpush.bf16.msrb.mxu2 %v9263_v8  ;;  %v10850_v8 = vld [vmem:[#allocation2 + $0xdd0] sm:$0xf]  ;;  %v9699_v18 = vor.u32 %v13820_v6, %v9698_v3  ;;  %v14000_v6 = vld [vmem:[#allocation2 + $0xafc] sm:$0xf0] }
 0x151   :  { %4138 = vmatpush.bf16.msrb.mxu3 %v10415_v13  ;;  %v9700_v13 = vld [vmem:[#allocation2 + $0x560] sm:$0xf0]  ;;  %v10851_v21 = vor.u32 %v14108_v11, %v10850_v8  ;;  %v10418_v3 = vld [vmem:[#allocation2 + $0xa70] sm:$0xf]  ;;  %v13694_v8 = vld [vmem:[#allocation2 + $0x174] sm:$0xf] }
 0x152   :  { %4100 = vmatpush.bf16.msrb.mxu0 %v9115_v23  ;;  %v3894_v20 = vpop.f32.mrf.mxu0  ;;  %v9703_v22 = vor.u32 %v13802_v12, %v9700_v13  ;;  %v13784_v23 = vld [vmem:[#allocation2 + $0x43c] sm:$0xf0]  ;;  %v10420_v11 = vld [vmem:[#allocation2 + $0xb00] sm:$0xf0]  ;;  %v9122_v13 = vld [vmem:[#allocation2 + $0x50] sm:$0xf] }
 0x153   :  { %4113 = vmatpush.bf16.msrb.mxu1 %v10267_v28  ;;  %v3895_v26 = vadd.f32 %v3894_v20, %v676_v9  ;;  %v3907_v28 = vpop.f32.mrf.mxu1  ;;  %v9555_v41 = vor.u32 %v13784_v23, %v9554_v19  ;;  %v9268_v9 = vld [vmem:[#allocation2 + $0x200] sm:$0xf0]  ;;  %v10274_v19 = vld [vmem:[#allocation2 + $0x950] sm:$0xf]  ;;  %v13964_v20 = vld [vmem:[#allocation2 + $0x9dc] sm:$0xf0] }
 0x154   :  { %4126 = vmatpush.bf16.msrb.mxu2 %v9119_v31  ;;  %v10855_v31 = vor.u32 %v14090_v14, %v10852_v17  ;;  %v13676_v14 = vld [vmem:[#allocation2 + $0xdc] sm:$0xf0]  ;;  %v10419_v17 = vor.u32 %v14000_v6, %v10418_v3  ;;  %v9850_v3 = vld [vmem:[#allocation2 + $0x5f8] sm:$0xf] }
 0x155   :  { %4139 = vmatpush.bf16.msrb.mxu3 %v10271_v35  ;;  %4101 = vmatmul.bf16.vlgmr.msrb.gmra.mxu0 %v14964_v15  ;;  %v677_v35 = vperm.slane %v15030_v61, 3 }
 0x156   :  { %4145 = vmatpush.bf16.msra.mxu0 %v10131_v37  ;;  %4114 = vmatmul.bf16.vlgmr.msrb.gmra.mxu1 %v14966_v16  ;;  %v14054_v37 = vld [vmem:[#allocation2 + $0xcb4] sm:$0xf] }
 0x157   :  { %4158 = vmatpush.bf16.msra.mxu1 %v11283_v38  ;;  %4127 = vmatmul.bf16.vlgmr.msrb.gmra.mxu2 %v14964_v15  ;;  %v10708_v38 = vld [vmem:[#allocation2 + $0xd40] sm:$0xf0] }
 0x158   :  { %4171 = vmatpush.bf16.msra.mxu2 %v10135_v40  ;;  %4140 = vmatmul.bf16.vlgmr.msrb.gmra.mxu3 %v14966_v16  ;;  %v15044_v40 = vadd.f32 %v3907_v28, %v3895_v26  ;;  %v10711_v48 = vor.u32 %v14054_v37, %v10708_v38  ;;  %v10276_v26 = vld [vmem:[#allocation2 + $0x9e0] sm:$0xf0]  ;;  %v14217_v37 = vld [vmem:[#allocation2 + $0x11c4] sm:$0xf0]  ;;  %v13911_v38 = vld [vmem:[#allocation2 + $0x83c] sm:$0xf] }
 0x159   :  { %4184 = vmatpush.bf16.msra.mxu3 %v11287_v43  ;;  %v9410_v43 = vld [vmem:[#allocation2 + $0x290] sm:$0xf]  ;;  %v10279_v45 = vor.u32 %v13946_v25, %v10276_v26  ;;  %v9708_v25 = vld [vmem:[#allocation2 + $0x568] sm:$0xf0]  ;;  %v14091_v26 = vld [vmem:[#allocation2 + $0xddc] sm:$0xf] }
 0x15a   :  { %4146 = vmatpush.bf16.msra.mxu0 %v9987_v52  ;;  %v3920_v46 = vpop.f32.mrf.mxu2  ;;  %v13730_v52 = vld [vmem:[#allocation2 + $0x294] sm:$0xf]  ;;  %v3896_v62 = vpop.f32.mrf.mxu0 }
 0x15b   :  { %4159 = vmatpush.bf16.msra.mxu1 %v11139_v53  ;;  %v9412_v53 = vld [vmem:[#allocation2 + $0x320] sm:$0xf0]  ;;  %v3933_v56 = vpop.f32.mrf.mxu3  ;;  %v14163_v62 = vld [vmem:[#allocation2 + $0x101c] sm:$0xf] }
 0x15c   :  { %4172 = vmatpush.bf16.msra.mxu2 %v9991_v55  ;;  %v3921_v55 = vadd.f32 %v3920_v46, %v677_v35  ;;  %v9415_v0 = vor.u32 %v13730_v52, %v9412_v53  ;;  %v9123_v35 = vor.u32 %v13676_v14, %v9122_v13  ;;  %v9994_v52 = vld [vmem:[#allocation2 + $0x718] sm:$0xf]  ;;  %v13893_v53 = vld [vmem:[#allocation2 + $0x7a4] sm:$0xf0] }
 0x15d   :  { %4185 = vmatpush.bf16.msra.mxu3 %v11143_v59  ;;  %v9411_v59 = vor.u32 %v13748_v44, %v9410_v43  ;;  %v14199_v43 = vld [vmem:[#allocation2 + $0x113c] sm:$0xf]  ;;  %v11292_v44 = vld [vmem:[#allocation2 + $0x11c8] sm:$0xf0]  ;;  %v9706_v14 = vld [vmem:[#allocation2 + $0x4d8] sm:$0xf] }
 0x15e   :  { %4147 = vmatpush.bf16.msra.mxu0 %v9843_v2  ;;  %v15046_v60 = vadd.f32 %v3933_v56, %v3921_v55  ;;  %v13712_v2 = vld [vmem:[#allocation2 + $0x1fc] sm:$0xf0]  ;;  %v11146_v55 = vld [vmem:[#allocation2 + $0x1018] sm:$0xf]  ;;  %v11295_v56 = vor.u32 %v14199_v43, %v11292_v44 }
 0x15f   :  { %4160 = vmatpush.bf16.msra.mxu1 %v10995_v4  ;;  %v3909_v4 = vpop.f32.mrf.mxu1  ;;  %v9267_v12 = vor.u32 %v13712_v2, %v9266_v1 }
 0x160   :  { %4173 = vmatpush.bf16.msra.mxu2 %v9847_v5  ;;  %v10567_v5 = vor.u32 %v14018_v57, %v10564_v58  ;;  %v14181_v57 = vld [vmem:[#allocation2 + $0x10a4] sm:$0xf0]  ;;  %v13875_v58 = vld [vmem:[#allocation2 + $0x71c] sm:$0xf] }
 0x161   :  { %4186 = vmatpush.bf16.msra.mxu3 %v10999_v10  ;;  %v13982_v10 = vld [vmem:[#allocation2 + $0xa74] sm:$0xf]  ;;  %v11147_v1 = vor.u32 %v14181_v57, %v11146_v55  ;;  %v13857_v4 = vld [vmem:[#allocation2 + $0x684] sm:$0xf0] }
 0x162   :  { %4148 = vmatpush.bf16.msra.mxu0 %v9699_v18  ;;  %v9271_v18 = vor.u32 %v13694_v8, %v9268_v9  ;;  %v10423_v23 = vor.u32 %v13982_v10, %v10420_v11  ;;  %v14145_v8 = vld [vmem:[#allocation2 + $0xf84] sm:$0xf0]  ;;  %v13839_v9 = vld [vmem:[#allocation2 + $0x5fc] sm:$0xf]  ;;  %v9852_v10 = vld [vmem:[#allocation2 + $0x688] sm:$0xf0]  ;;  %v9851_v13 = vor.u32 %v13857_v4, %v9850_v3 }
 0x163   :  { %4161 = vmatpush.bf16.msra.mxu1 %v10851_v21  ;;  %v13658_v21 = vld [vmem:[#allocation2 + $0x54] sm:$0xf]  ;;  %v3935_v28 = vpop.f32.mrf.mxu3  ;;  %v14127_v11 = vld [vmem:[#allocation2 + $0xefc] sm:$0xf]  ;;  %v9420_v3 = vld [vmem:[#allocation2 + $0x328] sm:$0xf0] }
 0x164   :  { %4174 = vmatpush.bf16.msra.mxu2 %v9703_v22  ;;  %v3922_v22 = vpop.f32.mrf.mxu2  ;;  %v10860_v28 = vld [vmem:[#allocation2 + $0xe68] sm:$0xf0] }
 0x165   :  { %4187 = vmatpush.bf16.msra.mxu3 %v10855_v31  ;;  %v10138_v31 = vld [vmem:[#allocation2 + $0x838] sm:$0xf]  ;;  %v10863_v44 = vor.u32 %v14091_v26, %v10860_v28 }
 0x166   :  { %4149 = vmatpush.bf16.msra.mxu0 %v9555_v41  ;;  %v10140_v41 = vld [vmem:[#allocation2 + $0x8c8] sm:$0xf0]  ;;  %v10139_v46 = vor.u32 %v13929_v33, %v10138_v31  ;;  %v9562_v33 = vld [vmem:[#allocation2 + $0x3b8] sm:$0xf] }
 0x167   :  { %4162 = vmatpush.bf16.msra.mxu1 %v10707_v42  ;;  %v10275_v42 = vor.u32 %v13964_v20, %v10274_v19  ;;  %v10143_v50 = vor.u32 %v13911_v38, %v10140_v41  ;;  %v13821_v19 = vld [vmem:[#allocation2 + $0x564] sm:$0xf0]  ;;  %v10858_v20 = vld [vmem:[#allocation2 + $0xdd8] sm:$0xf] }
 0x168   :  { %4175 = vmatpush.bf16.msra.mxu2 %v9559_v39  ;;  %v9127_v39 = vor.u32 %v13658_v21, %v9124_v24  ;;  %v678_v21 = vperm.slane %v15030_v61, 4  ;;  %v13803_v24 = vld [vmem:[#allocation2 + $0x4dc] sm:$0xf]  ;;  %v9707_v31 = vor.u32 %v13821_v19, %v9706_v14  ;;  %v13785_v38 = vld [vmem:[#allocation2 + $0x444] sm:$0xf0] }
 0x169   :  { %4188 = vmatpush.bf16.msra.mxu3 %v10711_v48  ;;  %v11291_v48 = vor.u32 %v14217_v37, %v11290_v34  ;;  %v9711_v37 = vor.u32 %v13803_v24, %v9708_v25  ;;  %v10714_v41 = vld [vmem:[#allocation2 + $0xcb8] sm:$0xf]  ;;  %v9563_v55 = vor.u32 %v13785_v38, %v9562_v33  ;;  %v13983_v24 = vld [vmem:[#allocation2 + $0xa7c] sm:$0xf]  ;;  %v10428_v25 = vld [vmem:[#allocation2 + $0xb08] sm:$0xf0] }
 0x16a   :  { %4150 = vmatpush.bf16.msra.mxu0 %v9411_v59  ;;  %v9996_v59 = vld [vmem:[#allocation2 + $0x7a8] sm:$0xf0]  ;;  %v9274_v14 = vld [vmem:[#allocation2 + $0x178] sm:$0xf]  ;;  %v13659_v38 = vld [vmem:[#allocation2 + $0x5c] sm:$0xf] }
 0x16b   :  { %4163 = vmatpush.bf16.msra.mxu1 %v10563_v63  ;;  %v11148_v63 = vld [vmem:[#allocation2 + $0x10a8] sm:$0xf0]  ;;  %v9999_v2 = vor.u32 %v13875_v58, %v9996_v59  ;;  %v9418_v58 = vld [vmem:[#allocation2 + $0x298] sm:$0xf]  ;;  %v13749_v59 = vld [vmem:[#allocation2 + $0x324] sm:$0xf0] }
 0x16c   :  { %4176 = vmatpush.bf16.msra.mxu2 %v9415_v0  ;;  %v9995_v0 = vor.u32 %v13893_v53, %v9994_v52  ;;  %v11151_v6 = vor.u32 %v14163_v62, %v11148_v63  ;;  %v10716_v52 = vld [vmem:[#allocation2 + $0xd48] sm:$0xf0]  ;;  %v10570_v62 = vld [vmem:[#allocation2 + $0xb98] sm:$0xf] }
 0x16d   :  { %4189 = vmatpush.bf16.msra.mxu3 %v10567_v5  ;;  %v11002_v5 = vld [vmem:[#allocation2 + $0xef8] sm:$0xf] }
 0x16e   :  { %4151 = vmatpush.bf16.msra.mxu0 %v9267_v12  ;;  %v11004_v12 = vld [vmem:[#allocation2 + $0xf88] sm:$0xf0]  ;;  %v9130_v28 = vld [vmem:[#allocation2 + $0x58] sm:$0xf] }
 0x16f   :  { %4164 = vmatpush.bf16.msra.mxu1 %v10419_v17  ;;  %v11003_v17 = vor.u32 %v14145_v8, %v11002_v5  ;;  %v11007_v22 = vor.u32 %v14127_v11, %v11004_v12  ;;  %v10572_v8 = vld [vmem:[#allocation2 + $0xc28] sm:$0xf0] }
 0x170   :  { %4177 = vmatpush.bf16.msra.mxu2 %v9271_v18  ;;  %v9855_v18 = vor.u32 %v13839_v9, %v9852_v10  ;;  %v9419_v9 = vor.u32 %v13749_v59, %v9418_v58 }
 0x171   :  { %4190 = vmatpush.bf16.msra.mxu3 %v10423_v23  ;;  %v14109_v23 = vld [vmem:[#allocation2 + $0xe64] sm:$0xf0] }
 0x172   :  { %4152 = vmatpush.bf16.msra.mxu0 %v9123_v35  ;;  %v3946_v34 = vpop.f32.mrf.mxu0  ;;  %v10859_v35 = vor.u32 %v14109_v23, %v10858_v20  ;;  %v9276_v23 = vld [vmem:[#allocation2 + $0x208] sm:$0xf0] }
 0x173   :  { %4165 = vmatpush.bf16.msra.mxu1 %v10275_v42  ;;  %v14073_v42 = vld [vmem:[#allocation2 + $0xd44] sm:$0xf0]  ;;  %v3959_v43 = vpop.f32.mrf.mxu1 }
 0x174   :  { %4178 = vmatpush.bf16.msra.mxu2 %v9127_v39  ;;  %v3947_v39 = vadd.f32 %v3946_v34, %v678_v21  ;;  %v14001_v21 = vld [vmem:[#allocation2 + $0xb04] sm:$0xf0] }
 0x175   :  { %4191 = vmatpush.bf16.msra.mxu3 %v10279_v45  ;;  %4153 = vmatmul.bf16.vlgmr.msra.gmra.mxu0 %v14964_v15  ;;  %v13767_v45 = vld [vmem:[#allocation2 + $0x3bc] sm:$0xf] }
 0x176   :  { %4197 = vmatpush.bf16.msrb.mxu0 %v10139_v46  ;;  %4166 = vmatmul.bf16.vlgmr.msra.gmra.mxu1 %v14966_v16  ;;  %v9564_v46 = vld [vmem:[#allocation2 + $0x448] sm:$0xf0]  ;;  %v15054_v53 = vadd.f32 %v3959_v43, %v3947_v39  ;;  %v13947_v43 = vld [vmem:[#allocation2 + $0x95c] sm:$0xf] }
 0x177   :  { %4210 = vmatpush.bf16.msrb.mxu1 %v11291_v48  ;;  %4179 = vmatmul.bf16.vlgmr.msra.gmra.mxu2 %v14964_v15  ;;  %v679_v48 = vperm.slane %v15030_v61, 5  ;;  %v9567_v57 = vor.u32 %v13767_v45, %v9564_v46  ;;  %v9132_v39 = vld [vmem:[#allocation2 + $0xe8] sm:$0xf0]  ;;  %v10146_v46 = vld [vmem:[#allocation2 + $0x840] sm:$0xf] }
 0x178   :  { %4223 = vmatpush.bf16.msrb.mxu2 %v10143_v50  ;;  %4192 = vmatmul.bf16.vlgmr.msra.gmra.mxu3 %v14966_v16  ;;  %v14055_v50 = vld [vmem:[#allocation2 + $0xcbc] sm:$0xf]  ;;  %v9135_v59 = vor.u32 %v13659_v38, %v9132_v39  ;;  %v13822_v38 = vld [vmem:[#allocation2 + $0x56c] sm:$0xf0] }
 0x179   :  { %4236 = vmatpush.bf16.msrb.mxu3 %v11295_v56  ;;  %v10715_v56 = vor.u32 %v14073_v42, %v10714_v41  ;;  %v10431_v42 = vor.u32 %v13983_v24, %v10428_v25  ;;  %v14146_v24 = vld [vmem:[#allocation2 + $0xf8c] sm:$0xf0]  ;;  %v13840_v25 = vld [vmem:[#allocation2 + $0x604] sm:$0xf] }
 0x17a   :  { %4198 = vmatpush.bf16.msrb.mxu0 %v9995_v0  ;;  %v3972_v63 = vpop.f32.mrf.mxu2  ;;  %v10719_v0 = vor.u32 %v14055_v50, %v10716_v52  ;;  %v3948_v11 = vpop.f32.mrf.mxu0  ;;  %v11298_v50 = vld [vmem:[#allocation2 + $0x1140] sm:$0xf] }
 0x17b   :  { %4211 = vmatpush.bf16.msrb.mxu1 %v11147_v1  ;;  %v14037_v1 = vld [vmem:[#allocation2 + $0xc24] sm:$0xf0]  ;;  %v3973_v4 = vadd.f32 %v3972_v63, %v679_v48  ;;  %v3985_v5 = vpop.f32.mrf.mxu3  ;;  %v3961_v19 = vpop.f32.mrf.mxu1  ;;  %v13930_v48 = vld [vmem:[#allocation2 + $0x8cc] sm:$0xf0]  ;;  %v11300_v63 = vld [vmem:[#allocation2 + $0x11d0] sm:$0xf0] }
 0x17c   :  { %4224 = vmatpush.bf16.msrb.mxu2 %v9999_v2  ;;  %v13731_v2 = vld [vmem:[#allocation2 + $0x29c] sm:$0xf]  ;;  %v10571_v12 = vor.u32 %v14037_v1, %v10570_v62  ;;  %v14200_v62 = vld [vmem:[#allocation2 + $0x1144] sm:$0xf]  ;;  %v10147_v1 = vor.u32 %v13930_v48, %v10146_v46  ;;  %v10868_v48 = vld [vmem:[#allocation2 + $0xe70] sm:$0xf0] }
 0x17d   :  { %4237 = vmatpush.bf16.msrb.mxu3 %v11151_v6  ;;  %v14019_v6 = vld [vmem:[#allocation2 + $0xb9c] sm:$0xf]  ;;  %v15056_v10 = vadd.f32 %v3985_v5, %v3973_v4  ;;  %v10002_v4 = vld [vmem:[#allocation2 + $0x720] sm:$0xf]  ;;  %v13894_v5 = vld [vmem:[#allocation2 + $0x7ac] sm:$0xf0] }
 0x17e   :  { %4199 = vmatpush.bf16.msrb.mxu0 %v9851_v13  ;;  %v9423_v13 = vor.u32 %v13731_v2, %v9420_v3  ;;  %v10575_v20 = vor.u32 %v14019_v6, %v10572_v8  ;;  %v11154_v6 = vld [vmem:[#allocation2 + $0x1020] sm:$0xf]  ;;  %v11303_v8 = vor.u32 %v14200_v62, %v11300_v63  ;;  %v13876_v11 = vld [vmem:[#allocation2 + $0x724] sm:$0xf]  ;;  %v14074_v62 = vld [vmem:[#allocation2 + $0xd4c] sm:$0xf0] }
 0x17f   :  { %4212 = vmatpush.bf16.msrb.mxu1 %v11003_v17  ;;  %v13713_v17 = vld [vmem:[#allocation2 + $0x204] sm:$0xf0]  ;;  %v14092_v46 = vld [vmem:[#allocation2 + $0xde4] sm:$0xf] }
 0x180   :  { %4225 = vmatpush.bf16.msrb.mxu2 %v9855_v18  ;;  %v10426_v18 = vld [vmem:[#allocation2 + $0xa78] sm:$0xf]  ;;  %v9275_v26 = vor.u32 %v13713_v17, %v9274_v14  ;;  %v11156_v14 = vld [vmem:[#allocation2 + $0x10b0] sm:$0xf0]  ;;  %v10003_v17 = vor.u32 %v13894_v5, %v10002_v4  ;;  %v681_v4 = vperm.slane %v15030_v61, 7 }
 0x181   :  { %4238 = vmatpush.bf16.msrb.mxu3 %v11007_v22  ;;  %v13695_v22 = vld [vmem:[#allocation2 + $0x17c] sm:$0xf]  ;;  %v10427_v33 = vor.u32 %v14001_v21, %v10426_v18  ;;  %v13858_v21 = vld [vmem:[#allocation2 + $0x68c] sm:$0xf0]  ;;  %v14056_v5 = vld [vmem:[#allocation2 + $0xcc4] sm:$0xf] }
 0x182   :  { %4200 = vmatpush.bf16.msrb.mxu0 %v9707_v31  ;;  %v13677_v31 = vld [vmem:[#allocation2 + $0xe4] sm:$0xf0]  ;;  %v9279_v34 = vor.u32 %v13695_v22, %v9276_v23  ;;  %v3974_v41 = vpop.f32.mrf.mxu2  ;;  %v11010_v22 = vld [vmem:[#allocation2 + $0xf00] sm:$0xf] }
 0x183   :  { %4213 = vmatpush.bf16.msrb.mxu1 %v10859_v35  ;;  %v10282_v35 = vld [vmem:[#allocation2 + $0x958] sm:$0xf]  ;;  %v3987_v45 = vpop.f32.mrf.mxu3  ;;  %v9131_v52 = vor.u32 %v13677_v31, %v9130_v28  ;;  %v14128_v28 = vld [vmem:[#allocation2 + $0xf04] sm:$0xf]  ;;  %v11012_v31 = vld [vmem:[#allocation2 + $0xf90] sm:$0xf0] }
 0x184   :  { %4226 = vmatpush.bf16.msrb.mxu2 %v9711_v37  ;;  %v13965_v37 = vld [vmem:[#allocation2 + $0x9e4] sm:$0xf0]  ;;  %v10866_v41 = vld [vmem:[#allocation2 + $0xde0] sm:$0xf]  ;;  %v11015_v39 = vor.u32 %v14128_v28, %v11012_v31  ;;  %v9716_v45 = vld [vmem:[#allocation2 + $0x570] sm:$0xf0] }
 0x185   :  { %4239 = vmatpush.bf16.msrb.mxu3 %v10863_v44  ;;  %v10284_v44 = vld [vmem:[#allocation2 + $0x9e8] sm:$0xf0]  ;;  %v10283_v58 = vor.u32 %v13965_v37, %v10282_v35  ;;  %v11011_v35 = vor.u32 %v14146_v24, %v11010_v22  ;;  %v9428_v22 = vld [vmem:[#allocation2 + $0x330] sm:$0xf0]  ;;  %v14020_v24 = vld [vmem:[#allocation2 + $0xba4] sm:$0xf] }
 0x186   :  { %4201 = vmatpush.bf16.msrb.mxu0 %v9563_v55  ;;  %v14218_v55 = vld [vmem:[#allocation2 + $0x11cc] sm:$0xf0] }
 0x187   :  { %4214 = vmatpush.bf16.msrb.mxu1 %v10715_v56  ;;  %v13912_v56 = vld [vmem:[#allocation2 + $0x844] sm:$0xf]  ;;  %v11299_v2 = vor.u32 %v14218_v55, %v11298_v50 }
 0x188   :  { %4227 = vmatpush.bf16.msrb.mxu2 %v9567_v57  ;;  %v10148_v57 = vld [vmem:[#allocation2 + $0x8d0] sm:$0xf0] }
 0x189   :  { %4240 = vmatpush.bf16.msrb.mxu3 %v10719_v0  ;;  %v10287_v0 = vor.u32 %v13947_v43, %v10284_v44  ;;  %v10151_v3 = vor.u32 %v13912_v56, %v10148_v57  ;;  %v14110_v43 = vld [vmem:[#allocation2 + $0xe6c] sm:$0xf0]  ;;  %v13804_v44 = vld [vmem:[#allocation2 + $0x4e4] sm:$0xf] }
 0x18a   :  { %4202 = vmatpush.bf16.msrb.mxu0 %v9419_v9  ;;  %v14182_v9 = vld [vmem:[#allocation2 + $0x10ac] sm:$0xf0]  ;;  %v10867_v56 = vor.u32 %v14110_v43, %v10866_v41  ;;  %v9719_v57 = vor.u32 %v13804_v44, %v9716_v45  ;;  %v13696_v43 = vld [vmem:[#allocation2 + $0x184] sm:$0xf]  ;;  %v9284_v44 = vld [vmem:[#allocation2 + $0x210] sm:$0xf0] }
 0x18b   :  { %4215 = vmatpush.bf16.msrb.mxu1 %v10571_v12  ;;  %v10004_v12 = vld [vmem:[#allocation2 + $0x7b0] sm:$0xf0]  ;;  %v11155_v18 = vor.u32 %v14182_v9, %v11154_v6  ;;  %v13984_v45 = vld [vmem:[#allocation2 + $0xa84] sm:$0xf] }
 0x18c   :  { %4228 = vmatpush.bf16.msrb.mxu2 %v9423_v13  ;;  %v14164_v13 = vld [vmem:[#allocation2 + $0x1024] sm:$0xf]  ;;  %v10007_v19 = vor.u32 %v13876_v11, %v10004_v12  ;;  %v10724_v6 = vld [vmem:[#allocation2 + $0xd50] sm:$0xf0] }
 0x18d   :  { %4241 = vmatpush.bf16.msrb.mxu3 %v10575_v20  ;;  %v9858_v20 = vld [vmem:[#allocation2 + $0x600] sm:$0xf]  ;;  %v11159_v23 = vor.u32 %v14164_v13, %v11156_v14  ;;  %v13750_v14 = vld [vmem:[#allocation2 + $0x32c] sm:$0xf0] }
 0x18e   :  { %4203 = vmatpush.bf16.msrb.mxu0 %v9275_v26  ;;  %v9860_v26 = vld [vmem:[#allocation2 + $0x690] sm:$0xf0]  ;;  %v9426_v13 = vld [vmem:[#allocation2 + $0x2a0] sm:$0xf] }
 0x18f   :  { %4216 = vmatpush.bf16.msrb.mxu1 %v10427_v33  ;;  %v9859_v33 = vor.u32 %v13858_v21, %v9858_v20  ;;  %v9863_v37 = vor.u32 %v13840_v25, %v9860_v26  ;;  %v14038_v20 = vld [vmem:[#allocation2 + $0xc2c] sm:$0xf0]  ;;  %v13732_v21 = vld [vmem:[#allocation2 + $0x2a4] sm:$0xf]  ;;  %v10580_v25 = vld [vmem:[#allocation2 + $0xc30] sm:$0xf0]  ;;  %v9427_v26 = vor.u32 %v13750_v14, %v9426_v13 }
 0x190   :  { %4229 = vmatpush.bf16.msrb.mxu2 %v9279_v34  ;;  %v9714_v34 = vld [vmem:[#allocation2 + $0x4e0] sm:$0xf]  ;;  %v10156_v13 = vld [vmem:[#allocation2 + $0x8d8] sm:$0xf0] }
 0x191   :  { %4242 = vmatpush.bf16.msrb.mxu3 %v10431_v42  ;;  %v680_v42 = vperm.slane %v15030_v61, 6  ;;  %v9715_v50 = vor.u32 %v13822_v38, %v9714_v34  ;;  %v9431_v34 = vor.u32 %v13732_v21, %v9428_v22  ;;  %v10434_v38 = vld [vmem:[#allocation2 + $0xa80] sm:$0xf] }
 0x192   :  { %4204 = vmatpush.bf16.msrb.mxu0 %v9131_v52  ;;  %v9570_v52 = vld [vmem:[#allocation2 + $0x3c0] sm:$0xf]  ;;  %v3998_v55 = vpop.f32.mrf.mxu0 }
 0x193   :  { %4217 = vmatpush.bf16.msrb.mxu1 %v10283_v58  ;;  %v13786_v58 = vld [vmem:[#allocation2 + $0x44c] sm:$0xf0]  ;;  %v3999_v63 = vadd.f32 %v3998_v55, %v680_v42  ;;  %v10583_v42 = vor.u32 %v14020_v24, %v10580_v25  ;;  %v13895_v24 = vld [vmem:[#allocation2 + $0x7b4] sm:$0xf0]  ;;  %v11162_v25 = vld [vmem:[#allocation2 + $0x1028] sm:$0xf] }
 0x194   :  { %4230 = vmatpush.bf16.msrb.mxu2 %v9135_v59  ;;  %v10722_v59 = vld [vmem:[#allocation2 + $0xcc0] sm:$0xf]  ;;  %v9571_v9 = vor.u32 %v13786_v58, %v9570_v52  ;;  %v13678_v52 = vld [vmem:[#allocation2 + $0xec] sm:$0xf0] }
 0x195   :  { %4243 = vmatpush.bf16.msrb.mxu3 %v10287_v0  ;;  %4205 = vmatmul.bf16.vlgmr.msrb.gmra.mxu0 %v14964_v15  ;;  %v4011_v0 = vpop.f32.mrf.mxu1  ;;  %v10723_v11 = vor.u32 %v14074_v62, %v10722_v59  ;;  %v13966_v58 = vld [vmem:[#allocation2 + $0x9ec] sm:$0xf0]  ;;  %v13660_v59 = vld [vmem:[#allocation2 + $0x64] sm:$0xf] }
 0x196   :  { %4249 = vmatpush.bf16.msra.mxu0 %v10147_v1  ;;  %4218 = vmatmul.bf16.vlgmr.msrb.gmra.mxu1 %v14966_v16  ;;  %v10871_v1 = vor.u32 %v14092_v46, %v10868_v48  ;;  %v10436_v46 = vld [vmem:[#allocation2 + $0xb10] sm:$0xf0] }
 0x197   :  { %4262 = vmatpush.bf16.msra.mxu1 %v11299_v2  ;;  %4231 = vmatmul.bf16.vlgmr.msrb.gmra.mxu2 %v14964_v15  ;;  %v13768_v2 = vld [vmem:[#allocation2 + $0x3c4] sm:$0xf] }
 0x198   :  { %4275 = vmatpush.bf16.msra.mxu2 %v10151_v3  ;;  %4244 = vmatmul.bf16.vlgmr.msrb.gmra.mxu3 %v14966_v16  ;;  %v9572_v3 = vld [vmem:[#allocation2 + $0x450] sm:$0xf0] }
 0x199   :  { %4288 = vmatpush.bf16.msra.mxu3 %v11303_v8  ;;  %v15064_v8 = vadd.f32 %v4011_v0, %v3999_v63  ;;  %v9575_v12 = vor.u32 %v13768_v2, %v9572_v3  ;;  %v10439_v63 = vor.u32 %v13984_v45, %v10436_v46  ;;  %v9140_v0 = vld [vmem:[#allocation2 + $0xf0] sm:$0xf0]  ;;  %v14147_v46 = vld [vmem:[#allocation2 + $0xf94] sm:$0xf0] }
 0x19a   :  { %4250 = vmatpush.bf16.msra.mxu0 %v10003_v17  ;;  %v10578_v17 = vld [vmem:[#allocation2 + $0xba0] sm:$0xf]  ;;  %v4000_v31 = vpop.f32.mrf.mxu0  ;;  %v10292_v2 = vld [vmem:[#allocation2 + $0x9f0] sm:$0xf0] }
 0x19b   :  { %4263 = vmatpush.bf16.msra.mxu1 %v11155_v18  ;;  %v4024_v18 = vpop.f32.mrf.mxu2  ;;  %v14183_v31 = vld [vmem:[#allocation2 + $0x10b4] sm:$0xf0] }
 0x19c   :  { %4276 = vmatpush.bf16.msra.mxu2 %v10007_v19  ;;  %v10727_v19 = vor.u32 %v14056_v5, %v10724_v6  ;;  %v4025_v61 = vadd.f32 %v4024_v18, %v681_v4  ;;  %v10154_v4 = vld [vmem:[#allocation2 + $0x848] sm:$0xf]  ;;  %v13931_v5 = vld [vmem:[#allocation2 + $0x8d4] sm:$0xf0]  ;;  %v14201_v18 = vld [vmem:[#allocation2 + $0x114c] sm:$0xf] }
 0x19d   :  { %4289 = vmatpush.bf16.msra.mxu3 %v11159_v23  ;;  %v4037_v23 = vpop.f32.mrf.mxu3  ;;  %v4013_v41 = vpop.f32.mrf.mxu1  ;;  %v11306_v6 = vld [vmem:[#allocation2 + $0x1148] sm:$0xf]  ;;  %v10155_v21 = vor.u32 %v13931_v5, %v10154_v4  ;;  %v13805_v4 = vld [vmem:[#allocation2 + $0x4ec] sm:$0xf]  ;;  %v9724_v5 = vld [vmem:[#allocation2 + $0x578] sm:$0xf0] }
 0x19e   :  { %4251 = vmatpush.bf16.msra.mxu0 %v9859_v33  ;;  %v15066_v28 = vadd.f32 %v4037_v23, %v4025_v61  ;;  %v10579_v33 = vor.u32 %v14038_v20, %v10578_v17  ;;  %v9143_v17 = vor.u32 %v13660_v59, %v9140_v0  ;;  %v10010_v23 = vld [vmem:[#allocation2 + $0x728] sm:$0xf]  ;;  %v11163_v41 = vor.u32 %v14183_v31, %v11162_v25  ;;  %v10732_v31 = vld [vmem:[#allocation2 + $0xd58] sm:$0xf0] }
 0x19f   :  { %4264 = vmatpush.bf16.msra.mxu1 %v11011_v35  ;;  %v9282_v35 = vld [vmem:[#allocation2 + $0x180] sm:$0xf]  ;;  %v10874_v0 = vld [vmem:[#allocation2 + $0xde8] sm:$0xf] }
 0x1a0   :  { %4277 = vmatpush.bf16.msra.mxu2 %v9863_v37  ;;  %v13714_v37 = vld [vmem:[#allocation2 + $0x20c] sm:$0xf0] }
 0x1a1   :  { %4290 = vmatpush.bf16.msra.mxu3 %v11015_v39  ;;  %v14002_v39 = vld [vmem:[#allocation2 + $0xb0c] sm:$0xf0]  ;;  %v9283_v48 = vor.u32 %v13714_v37, %v9282_v35  ;;  %v14165_v35 = vld [vmem:[#allocation2 + $0x102c] sm:$0xf]  ;;  %v11164_v37 = vld [vmem:[#allocation2 + $0x10b8] sm:$0xf0] }
 0x1a2   :  { %4252 = vmatpush.bf16.msra.mxu0 %v9715_v50  ;;  %v9138_v50 = vld [vmem:[#allocation2 + $0x60] sm:$0xf]  ;;  %v10435_v55 = vor.u32 %v14002_v39, %v10434_v38  ;;  %v10011_v38 = vor.u32 %v13895_v24, %v10010_v23  ;;  %v9866_v39 = vld [vmem:[#allocation2 + $0x608] sm:$0xf]  ;;  %v11167_v45 = vor.u32 %v14165_v35, %v11164_v37  ;;  %v13769_v23 = vld [vmem:[#allocation2 + $0x3cc] sm:$0xf] }
 0x1a3   :  { %4265 = vmatpush.bf16.msra.mxu1 %v10867_v56  ;;  %v9287_v56 = vor.u32 %v13696_v43, %v9284_v44  ;;  %v4026_v62 = vpop.f32.mrf.mxu2  ;;  %v13859_v43 = vld [vmem:[#allocation2 + $0x694] sm:$0xf0]  ;;  %v11018_v44 = vld [vmem:[#allocation2 + $0xf08] sm:$0xf]  ;;  %v9580_v24 = vld [vmem:[#allocation2 + $0x458] sm:$0xf0] }
 0x1a4   :  { %4278 = vmatpush.bf16.msra.mxu2 %v9719_v57  ;;  %v10290_v57 = vld [vmem:[#allocation2 + $0x960] sm:$0xf]  ;;  %v11019_v59 = vor.u32 %v14147_v46, %v11018_v44  ;;  %v9583_v37 = vor.u32 %v13769_v23, %v9580_v24  ;;  %v14039_v44 = vld [vmem:[#allocation2 + $0xc34] sm:$0xf0]  ;;  %v9436_v46 = vld [vmem:[#allocation2 + $0x338] sm:$0xf0] }
 0x1a5   :  { %4291 = vmatpush.bf16.msra.mxu3 %v10871_v1  ;;  %v13948_v1 = vld [vmem:[#allocation2 + $0x964] sm:$0xf]  ;;  %v4039_v3 = vpop.f32.mrf.mxu3  ;;  %v10291_v14 = vor.u32 %v13966_v58, %v10290_v57  ;;  %v9722_v57 = vld [vmem:[#allocation2 + $0x4e8] sm:$0xf]  ;;  %v15072_v58 = vld [vmem:[#allocation4 + $0x10] sm:$0xff] }
 0x1a6   :  { %4253 = vmatpush.bf16.msra.mxu0 %v9571_v9  ;;  %v9139_v9 = vor.u32 %v13678_v52, %v9138_v50  ;;  %v10295_v20 = vor.u32 %v13948_v1, %v10292_v2  ;;  %v9868_v50 = vld [vmem:[#allocation2 + $0x698] sm:$0xf0]  ;;  %v14129_v52 = vld [vmem:[#allocation2 + $0xf0c] sm:$0xf]  ;;  %v682_v1 = vperm.slane %v15072_v58, 0  ;;  %v683_v25 = vperm.slane %v15072_v58, 1 }
 0x1a7   :  { %4266 = vmatpush.bf16.msra.mxu1 %v10723_v11  ;;  %v14219_v11 = vld [vmem:[#allocation2 + $0x11d4] sm:$0xf0]  ;;  %v9148_v24 = vld [vmem:[#allocation2 + $0xf8] sm:$0xf0] }
 0x1a8   :  { %4279 = vmatpush.bf16.msra.mxu2 %v9575_v12  ;;  %v13913_v12 = vld [vmem:[#allocation2 + $0x84c] sm:$0xf]  ;;  %v11307_v22 = vor.u32 %v14219_v11, %v11306_v6  ;;  %v14111_v3 = vld [vmem:[#allocation2 + $0xe74] sm:$0xf0] }
 0x1a9   :  { %4292 = vmatpush.bf16.msra.mxu3 %v10727_v19  ;;  %v11308_v19 = vld [vmem:[#allocation2 + $0x11d8] sm:$0xf0]  ;;  %v10159_v61 = vor.u32 %v13913_v12, %v10156_v13  ;;  %v14093_v6 = vld [vmem:[#allocation2 + $0xdec] sm:$0xf]  ;;  %v9578_v12 = vld [vmem:[#allocation2 + $0x3c8] sm:$0xf] }
 0x1aa   :  { %4254 = vmatpush.bf16.msra.mxu0 %v9427_v26  ;;  %v11311_v26 = vor.u32 %v14201_v18, %v11308_v19  ;;  %v13787_v18 = vld [vmem:[#allocation2 + $0x454] sm:$0xf0]  ;;  %v10730_v19 = vld [vmem:[#allocation2 + $0xcc8] sm:$0xf] }
 0x1ab   :  { %4267 = vmatpush.bf16.msra.mxu1 %v10579_v33  ;;  %v13877_v33 = vld [vmem:[#allocation2 + $0x72c] sm:$0xf] }
 0x1ac   :  { %4280 = vmatpush.bf16.msra.mxu2 %v9431_v34  ;;  %v10012_v34 = vld [vmem:[#allocation2 + $0x7b8] sm:$0xf0] }
 0x1ad   :  { %4293 = vmatpush.bf16.msra.mxu3 %v10583_v42  ;;  %v10015_v42 = vor.u32 %v13877_v33, %v10012_v34  ;;  %v9579_v34 = vor.u32 %v13787_v18, %v9578_v12  ;;  %v10444_v12 = vld [vmem:[#allocation2 + $0xb18] sm:$0xf0] }
 0x1ae   :  { %4255 = vmatpush.bf16.msra.mxu0 %v9283_v48  ;;  %v13841_v48 = vld [vmem:[#allocation2 + $0x60c] sm:$0xf] }
 0x1af   :  { %4268 = vmatpush.bf16.msra.mxu1 %v10435_v55  ;;  %v11020_v55 = vld [vmem:[#allocation2 + $0xf98] sm:$0xf0]  ;;  %v9871_v62 = vor.u32 %v13841_v48, %v9868_v50 }
 0x1b0   :  { %4281 = vmatpush.bf16.msra.mxu2 %v9287_v56  ;;  %v9867_v56 = vor.u32 %v13859_v43, %v9866_v39  ;;  %v11023_v2 = vor.u32 %v14129_v52, %v11020_v55  ;;  %v14021_v52 = vld [vmem:[#allocation2 + $0xbac] sm:$0xf]  ;;  %v10588_v55 = vld [vmem:[#allocation2 + $0xc38] sm:$0xf0] }
 0x1b1   :  { %4294 = vmatpush.bf16.msra.mxu3 %v10439_v63  ;;  %v13823_v63 = vld [vmem:[#allocation2 + $0x574] sm:$0xf0] }
 0x1b2   :  { %4256 = vmatpush.bf16.msra.mxu0 %v9139_v9  ;;  %v10876_v9 = vld [vmem:[#allocation2 + $0xe78] sm:$0xf0]  ;;  %v9723_v11 = vor.u32 %v13823_v63, %v9722_v57  ;;  %v4050_v13 = vpop.f32.mrf.mxu0 }
 0x1b3   :  { %4269 = vmatpush.bf16.msra.mxu1 %v10291_v14  ;;  %v10875_v14 = vor.u32 %v14111_v3, %v10874_v0  ;;  %v9290_v0 = vld [vmem:[#allocation2 + $0x188] sm:$0xf] }
 0x1b4   :  { %4282 = vmatpush.bf16.msra.mxu2 %v9143_v17  ;;  %v9727_v17 = vor.u32 %v13805_v4, %v9724_v5  ;;  %v10591_v4 = vor.u32 %v14021_v52, %v10588_v55  ;;  %v14003_v5 = vld [vmem:[#allocation2 + $0xb14] sm:$0xf0] }
 0x1b5   :  { %4295 = vmatpush.bf16.msra.mxu3 %v10295_v20  ;;  %4257 = vmatmul.bf16.vlgmr.msra.gmra.mxu0 %v14964_v15  ;;  %v14075_v20 = vld [vmem:[#allocation2 + $0xd54] sm:$0xf0] }
 0x1b6   :  { %4301 = vmatpush.bf16.msrb.mxu0 %v10155_v21  ;;  %4270 = vmatmul.bf16.vlgmr.msra.gmra.mxu1 %v14966_v16  ;;  %v4051_v21 = vadd.f32 %v4050_v13, %v682_v1  ;;  %v10731_v35 = vor.u32 %v14075_v20, %v10730_v19  ;;  %v13715_v1 = vld [vmem:[#allocation2 + $0x214] sm:$0xf0]  ;;  %v10298_v20 = vld [vmem:[#allocation2 + $0x968] sm:$0xf] }
 0x1b7   :  { %4314 = vmatpush.bf16.msrb.mxu1 %v11307_v22  ;;  %4283 = vmatmul.bf16.vlgmr.msra.gmra.mxu2 %v14964_v15  ;;  %v4063_v22 = vpop.f32.mrf.mxu1  ;;  %v9291_v13 = vor.u32 %v13715_v1, %v9290_v0  ;;  %v14184_v0 = vld [vmem:[#allocation2 + $0x10bc] sm:$0xf0]  ;;  %v13878_v1 = vld [vmem:[#allocation2 + $0x734] sm:$0xf] }
 0x1b8   :  { %4327 = vmatpush.bf16.msrb.mxu2 %v10159_v61  ;;  %4296 = vmatmul.bf16.vlgmr.msra.gmra.mxu3 %v14966_v16  ;;  %v10879_v61 = vor.u32 %v14093_v6, %v10876_v9  ;;  %v15076_v33 = vadd.f32 %v4063_v22, %v4051_v21  ;;  %v13697_v6 = vld [vmem:[#allocation2 + $0x18c] sm:$0xf]  ;;  %v9292_v9 = vld [vmem:[#allocation2 + $0x218] sm:$0xf0]  ;;  %v13967_v21 = vld [vmem:[#allocation2 + $0x9f4] sm:$0xf0] }
 0x1b9   :  { %4340 = vmatpush.bf16.msrb.mxu3 %v11311_v26  ;;  %v14057_v26 = vld [vmem:[#allocation2 + $0xccc] sm:$0xf]  ;;  %v9295_v19 = vor.u32 %v13697_v6, %v9292_v9 }
 0x1ba   :  { %4302 = vmatpush.bf16.msrb.mxu0 %v10011_v38  ;;  %v9434_v38 = vld [vmem:[#allocation2 + $0x2a8] sm:$0xf]  ;;  %v4076_v39 = vpop.f32.mrf.mxu2  ;;  %v10735_v43 = vor.u32 %v14057_v26, %v10732_v31  ;;  %v13661_v22 = vld [vmem:[#allocation2 + $0x6c] sm:$0xf]  ;;  %v10300_v26 = vld [vmem:[#allocation2 + $0x9f8] sm:$0xf0] }
 0x1bb   :  { %4315 = vmatpush.bf16.msrb.mxu1 %v11163_v41  ;;  %v13751_v41 = vld [vmem:[#allocation2 + $0x334] sm:$0xf0]  ;;  %v4077_v48 = vadd.f32 %v4076_v39, %v683_v25  ;;  %v4089_v50 = vpop.f32.mrf.mxu3  ;;  %v13949_v25 = vld [vmem:[#allocation2 + $0x96c] sm:$0xf]  ;;  %v10164_v39 = vld [vmem:[#allocation2 + $0x8e0] sm:$0xf0] }
 0x1bc   :  { %4328 = vmatpush.bf16.msrb.mxu2 %v10015_v42  ;;  %v10586_v42 = vld [vmem:[#allocation2 + $0xba8] sm:$0xf] }
 0x1bd   :  { %4341 = vmatpush.bf16.msrb.mxu3 %v11167_v45  ;;  %v13733_v45 = vld [vmem:[#allocation2 + $0x2ac] sm:$0xf]  ;;  %v15078_v57 = vadd.f32 %v4089_v50, %v4077_v48  ;;  %v10303_v48 = vor.u32 %v13949_v25, %v10300_v26  ;;  %v13824_v25 = vld [vmem:[#allocation2 + $0x57c] sm:$0xf0]  ;;  %v10882_v26 = vld [vmem:[#allocation2 + $0xdf0] sm:$0xf] }
 0x1be   :  { %4303 = vmatpush.bf16.msrb.mxu0 %v9867_v56  ;;  %v9435_v56 = vor.u32 %v13751_v41, %v9434_v38  ;;  %v9439_v63 = vor.u32 %v13733_v45, %v9436_v46  ;;  %v14220_v41 = vld [vmem:[#allocation2 + $0x11dc] sm:$0xf0]  ;;  %v14202_v45 = vld [vmem:[#allocation2 + $0x1154] sm:$0xf]  ;;  %v11316_v46 = vld [vmem:[#allocation2 + $0x11e0] sm:$0xf0] }
 0x1bf   :  { %4316 = vmatpush.bf16.msrb.mxu1 %v11019_v59  ;;  %v4052_v59 = vpop.f32.mrf.mxu0  ;;  %v4065_v3 = vpop.f32.mrf.mxu1 }
 0x1c0   :  { %4329 = vmatpush.bf16.msrb.mxu2 %v9871_v62  ;;  %v10587_v62 = vor.u32 %v14039_v44, %v10586_v42  ;;  %v13914_v42 = vld [vmem:[#allocation2 + $0x854] sm:$0xf]  ;;  %v9151_v44 = vor.u32 %v13661_v22, %v9148_v24  ;;  %v13896_v59 = vld [vmem:[#allocation2 + $0x7bc] sm:$0xf0] }
 0x1c1   :  { %4342 = vmatpush.bf16.msrb.mxu3 %v11023_v2  ;;  %v10442_v2 = vld [vmem:[#allocation2 + $0xa88] sm:$0xf]  ;;  %v10167_v55 = vor.u32 %v13914_v42, %v10164_v39  ;;  %v14166_v3 = vld [vmem:[#allocation2 + $0x1034] sm:$0xf]  ;;  %v10884_v42 = vld [vmem:[#allocation2 + $0xe80] sm:$0xf0] }
 0x1c2   :  { %4304 = vmatpush.bf16.msrb.mxu0 %v9723_v11  ;;  %v13985_v11 = vld [vmem:[#allocation2 + $0xa8c] sm:$0xf]  ;;  %v10443_v18 = vor.u32 %v14003_v5, %v10442_v2  ;;  %v10020_v2 = vld [vmem:[#allocation2 + $0x7c0] sm:$0xf0] }
 0x1c3   :  { %4317 = vmatpush.bf16.msrb.mxu1 %v10875_v14  ;;  %v9146_v14 = vld [vmem:[#allocation2 + $0x68] sm:$0xf]  ;;  %v10447_v23 = vor.u32 %v13985_v11, %v10444_v12  ;;  %v4091_v31 = vpop.f32.mrf.mxu3  ;;  %v10023_v9 = vor.u32 %v13878_v1, %v10020_v2  ;;  %v9874_v11 = vld [vmem:[#allocation2 + $0x610] sm:$0xf]  ;;  %v13860_v12 = vld [vmem:[#allocation2 + $0x69c] sm:$0xf0] }
 0x1c4   :  { %4330 = vmatpush.bf16.msrb.mxu2 %v9727_v17  ;;  %v13679_v17 = vld [vmem:[#allocation2 + $0xf4] sm:$0xf0]  ;;  %v9875_v22 = vor.u32 %v13860_v12, %v9874_v11  ;;  %v684_v31 = vperm.slane %v15072_v58, 2  ;;  %v14058_v1 = vld [vmem:[#allocation2 + $0xcd4] sm:$0xf] }
 0x1c5   :  { %4343 = vmatpush.bf16.msrb.mxu3 %v10879_v61  ;;  %v4078_v61 = vpop.f32.mrf.mxu2  ;;  %v9147_v38 = vor.u32 %v13679_v17, %v9146_v14  ;;  %v14148_v17 = vld [vmem:[#allocation2 + $0xf9c] sm:$0xf0]  ;;  %v10740_v2 = vld [vmem:[#allocation2 + $0xd60] sm:$0xf0]  ;;  %v10594_v12 = vld [vmem:[#allocation2 + $0xbb0] sm:$0xf] }
 0x1c6   :  { %4305 = vmatpush.bf16.msrb.mxu0 %v9579_v34  ;;  %v10162_v34 = vld [vmem:[#allocation2 + $0x850] sm:$0xf]  ;;  %v13752_v11 = vld [vmem:[#allocation2 + $0x33c] sm:$0xf0] }
 0x1c7   :  { %4318 = vmatpush.bf16.msrb.mxu1 %v10731_v35  ;;  %v13932_v35 = vld [vmem:[#allocation2 + $0x8dc] sm:$0xf0]  ;;  %v9730_v61 = vld [vmem:[#allocation2 + $0x4f0] sm:$0xf] }
 0x1c8   :  { %4331 = vmatpush.bf16.msrb.mxu2 %v9583_v37  ;;  %v11314_v37 = vld [vmem:[#allocation2 + $0x1150] sm:$0xf]  ;;  %v10163_v50 = vor.u32 %v13932_v35, %v10162_v34  ;;  %v14112_v35 = vld [vmem:[#allocation2 + $0xe7c] sm:$0xf0]  ;;  %v9731_v39 = vor.u32 %v13824_v25, %v9730_v61  ;;  %v10596_v61 = vld [vmem:[#allocation2 + $0xc40] sm:$0xf0] }
 0x1c9   :  { %4344 = vmatpush.bf16.msrb.mxu3 %v10735_v43  ;;  %v10299_v43 = vor.u32 %v13967_v21, %v10298_v20  ;;  %v11315_v52 = vor.u32 %v14220_v41, %v11314_v37  ;;  %v14130_v20 = vld [vmem:[#allocation2 + $0xf14] sm:$0xf]  ;;  %v11028_v21 = vld [vmem:[#allocation2 + $0xfa0] sm:$0xf0] }
 0x1ca   :  { %4306 = vmatpush.bf16.msrb.mxu0 %v9435_v56  ;;  %v10018_v56 = vld [vmem:[#allocation2 + $0x730] sm:$0xf]  ;;  %v11031_v34 = vor.u32 %v14130_v20, %v11028_v21  ;;  %v13806_v37 = vld [vmem:[#allocation2 + $0x4f4] sm:$0xf] }
 0x1cb   :  { %4319 = vmatpush.bf16.msrb.mxu1 %v10587_v62  ;;  %v11170_v62 = vld [vmem:[#allocation2 + $0x1030] sm:$0xf]  ;;  %v10019_v5 = vor.u32 %v13896_v59, %v10018_v56  ;;  %v14094_v41 = vld [vmem:[#allocation2 + $0xdf4] sm:$0xf] }
 0x1cc   :  { %4332 = vmatpush.bf16.msrb.mxu2 %v9439_v63  ;;  %v11319_v63 = vor.u32 %v14202_v45, %v11316_v46  ;;  %v11171_v6 = vor.u32 %v14184_v0, %v11170_v62  ;;  %v10883_v45 = vor.u32 %v14112_v35, %v10882_v26  ;;  %v10887_v59 = vor.u32 %v14094_v41, %v10884_v42  ;;  %v13770_v62 = vld [vmem:[#allocation2 + $0x3d4] sm:$0xf]  ;;  %v13716_v35 = vld [vmem:[#allocation2 + $0x21c] sm:$0xf0] }
 0x1cd   :  { %4345 = vmatpush.bf16.msrb.mxu3 %v10591_v4  ;;  %v11172_v4 = vld [vmem:[#allocation2 + $0x10c0] sm:$0xf0]  ;;  %v685_v0 = vperm.slane %v15072_v58, 3  ;;  %v14004_v42 = vld [vmem:[#allocation2 + $0xb1c] sm:$0xf0] }
 0x1ce   :  { %4307 = vmatpush.bf16.msrb.mxu0 %v9291_v13  ;;  %v11026_v13 = vld [vmem:[#allocation2 + $0xf10] sm:$0xf]  ;;  %v11175_v14 = vor.u32 %v14166_v3, %v11172_v4 }
 0x1cf   :  { %4320 = vmatpush.bf16.msrb.mxu1 %v10443_v18  ;;  %v13842_v18 = vld [vmem:[#allocation2 + $0x614] sm:$0xf] }
 0x1d0   :  { %4333 = vmatpush.bf16.msrb.mxu2 %v9295_v19  ;;  %v9876_v19 = vld [vmem:[#allocation2 + $0x6a0] sm:$0xf0] }
 0x1d1   :  { %4346 = vmatpush.bf16.msrb.mxu3 %v10447_v23  ;;  %v11027_v23 = vor.u32 %v14148_v17, %v11026_v13  ;;  %v9879_v24 = vor.u32 %v13842_v18, %v9876_v19  ;;  %v14040_v17 = vld [vmem:[#allocation2 + $0xc3c] sm:$0xf0]  ;;  %v13734_v18 = vld [vmem:[#allocation2 + $0x2b4] sm:$0xf]  ;;  %v9444_v19 = vld [vmem:[#allocation2 + $0x340] sm:$0xf0] }
 0x1d2   :  { %4308 = vmatpush.bf16.msrb.mxu0 %v9147_v38  ;;  %v9732_v38 = vld [vmem:[#allocation2 + $0x580] sm:$0xf0]  ;;  %v10595_v26 = vor.u32 %v14040_v17, %v10594_v12  ;;  %v10172_v17 = vld [vmem:[#allocation2 + $0x8e8] sm:$0xf0] }
 0x1d3   :  { %4321 = vmatpush.bf16.msrb.mxu1 %v10299_v43  ;;  %v9586_v43 = vld [vmem:[#allocation2 + $0x3d0] sm:$0xf]  ;;  %v9735_v46 = vor.u32 %v13806_v37, %v9732_v38  ;;  %v4115_v56 = vpop.f32.mrf.mxu1 }
 0x1d4   :  { %4334 = vmatpush.bf16.msrb.mxu2 %v9151_v44  ;;  %v4102_v44 = vpop.f32.mrf.mxu0  ;;  %v10450_v37 = vld [vmem:[#allocation2 + $0xa90] sm:$0xf] }
 0x1d5   :  { %4347 = vmatpush.bf16.msrb.mxu3 %v10303_v48  ;;  %4309 = vmatmul.bf16.vlgmr.msrb.gmra.mxu0 %v14964_v15  ;;  %v13788_v48 = vld [vmem:[#allocation2 + $0x45c] sm:$0xf0] }
 0x1d6   :  { %4353 = vmatpush.bf16.msra.mxu0 %v10163_v50  ;;  %4322 = vmatmul.bf16.vlgmr.msrb.gmra.mxu1 %v14966_v16  ;;  %v10738_v50 = vld [vmem:[#allocation2 + $0xcd0] sm:$0xf]  ;;  %v9587_v4 = vor.u32 %v13788_v48, %v9586_v43  ;;  %v9300_v43 = vld [vmem:[#allocation2 + $0x220] sm:$0xf0] }
 0x1d7   :  { %4366 = vmatpush.bf16.msra.mxu1 %v11315_v52  ;;  %4335 = vmatmul.bf16.vlgmr.msrb.gmra.mxu2 %v14964_v15  ;;  %v14076_v52 = vld [vmem:[#allocation2 + $0xd5c] sm:$0xf0]  ;;  %v9154_v48 = vld [vmem:[#allocation2 + $0x70] sm:$0xf] }
 0x1d8   :  { %4379 = vmatpush.bf16.msra.mxu2 %v10167_v55  ;;  %4348 = vmatmul.bf16.vlgmr.msrb.gmra.mxu3 %v14966_v16  ;;  %v4103_v55 = vadd.f32 %v4102_v44, %v684_v31  ;;  %v9447_v31 = vor.u32 %v13734_v18, %v9444_v19  ;;  %v13986_v44 = vld [vmem:[#allocation2 + $0xa94] sm:$0xf] }
 0x1d9   :  { %4392 = vmatpush.bf16.msra.mxu3 %v11319_v63  ;;  %v9588_v63 = vld [vmem:[#allocation2 + $0x460] sm:$0xf0] }
 0x1da   :  { %4354 = vmatpush.bf16.msra.mxu0 %v10019_v5  ;;  %v15086_v3 = vadd.f32 %v4115_v56, %v4103_v55  ;;  %v10739_v5 = vor.u32 %v14076_v52, %v10738_v50  ;;  %v4128_v13 = vpop.f32.mrf.mxu2  ;;  %v13680_v50 = vld [vmem:[#allocation2 + $0xfc] sm:$0xf0]  ;;  %v10451_v52 = vor.u32 %v14004_v42, %v10450_v37  ;;  %v10306_v56 = vld [vmem:[#allocation2 + $0x970] sm:$0xf]  ;;  %v14185_v37 = vld [vmem:[#allocation2 + $0x10c4] sm:$0xf0] }
 0x1db   :  { %4367 = vmatpush.bf16.msra.mxu1 %v11171_v6  ;;  %v9591_v6 = vor.u32 %v13770_v62, %v9588_v63  ;;  %v4129_v20 = vadd.f32 %v4128_v13, %v685_v0  ;;  %v4141_v21 = vpop.f32.mrf.mxu3  ;;  %v4117_v38 = vpop.f32.mrf.mxu1  ;;  %v13662_v62 = vld [vmem:[#allocation2 + $0x74] sm:$0xf]  ;;  %v9155_v12 = vor.u32 %v13680_v50, %v9154_v48  ;;  %v14221_v13 = vld [vmem:[#allocation2 + $0x11e4] sm:$0xf0]  ;;  %v14167_v42 = vld [vmem:[#allocation2 + $0x103c] sm:$0xf] }
 0x1dc   :  { %4380 = vmatpush.bf16.msra.mxu2 %v10023_v9  ;;  %v9442_v9 = vld [vmem:[#allocation2 + $0x2b0] sm:$0xf]  ;;  %v4104_v25 = vpop.f32.mrf.mxu0  ;;  %v13879_v38 = vld [vmem:[#allocation2 + $0x73c] sm:$0xf]  ;;  %v13861_v48 = vld [vmem:[#allocation2 + $0x6a4] sm:$0xf0] }
 0x1dd   :  { %4393 = vmatpush.bf16.msra.mxu3 %v11175_v14  ;;  %v10743_v14 = vor.u32 %v14058_v1, %v10740_v2  ;;  %v9156_v1 = vld [vmem:[#allocation2 + $0x100] sm:$0xf0]  ;;  %v13950_v2 = vld [vmem:[#allocation2 + $0x974] sm:$0xf]  ;;  %v11034_v50 = vld [vmem:[#allocation2 + $0xf18] sm:$0xf] }
 0x1de   :  { %4355 = vmatpush.bf16.msra.mxu0 %v9875_v22  ;;  %v14022_v22 = vld [vmem:[#allocation2 + $0xbb4] sm:$0xf]  ;;  %v9159_v19 = vor.u32 %v13662_v62, %v9156_v1  ;;  %v14131_v62 = vld [vmem:[#allocation2 + $0xf1c] sm:$0xf]  ;;  %v9738_v1 = vld [vmem:[#allocation2 + $0x4f8] sm:$0xf] }
 0x1df   :  { %4368 = vmatpush.bf16.msra.mxu1 %v11027_v23  ;;  %v9443_v23 = vor.u32 %v13752_v11, %v9442_v9  ;;  %v10599_v41 = vor.u32 %v14022_v22, %v10596_v61  ;;  %v13933_v9 = vld [vmem:[#allocation2 + $0x8e4] sm:$0xf0]  ;;  %v11322_v11 = vld [vmem:[#allocation2 + $0x1158] sm:$0xf] }
 0x1e0   :  { %4381 = vmatpush.bf16.msra.mxu2 %v9879_v24  ;;  %v15088_v24 = vadd.f32 %v4141_v21, %v4129_v20  ;;  %v14203_v20 = vld [vmem:[#allocation2 + $0x115c] sm:$0xf]  ;;  %v11324_v21 = vld [vmem:[#allocation2 + $0x11e8] sm:$0xf0] }
 0x1e1   :  { %4394 = vmatpush.bf16.msra.mxu3 %v11031_v34  ;;  %v9298_v34 = vld [vmem:[#allocation2 + $0x190] sm:$0xf] }
 0x1e2   :  { %4356 = vmatpush.bf16.msra.mxu0 %v9731_v39  ;;  %v13698_v39 = vld [vmem:[#allocation2 + $0x194] sm:$0xf]  ;;  %v4130_v63 = vpop.f32.mrf.mxu2 }
 0x1e3   :  { %4369 = vmatpush.bf16.msra.mxu1 %v10883_v45  ;;  %v10452_v45 = vld [vmem:[#allocation2 + $0xb20] sm:$0xf0]  ;;  %v9303_v55 = vor.u32 %v13698_v39, %v9300_v43  ;;  %v11180_v39 = vld [vmem:[#allocation2 + $0x10c8] sm:$0xf0] }
 0x1e4   :  { %4382 = vmatpush.bf16.msra.mxu2 %v9735_v46  ;;  %v9299_v46 = vor.u32 %v13716_v35, %v9298_v34  ;;  %v10455_v0 = vor.u32 %v13986_v44, %v10452_v45  ;;  %v11178_v34 = vld [vmem:[#allocation2 + $0x1038] sm:$0xf]  ;;  %v11327_v35 = vor.u32 %v14203_v20, %v11324_v21  ;;  %v11036_v63 = vld [vmem:[#allocation2 + $0xfa8] sm:$0xf0] }
 0x1e5   :  { %4395 = vmatpush.bf16.msra.mxu3 %v10887_v59  ;;  %v13968_v59 = vld [vmem:[#allocation2 + $0x9fc] sm:$0xf0]  ;;  %v11179_v44 = vor.u32 %v14185_v37, %v11178_v34  ;;  %v9594_v20 = vld [vmem:[#allocation2 + $0x3d8] sm:$0xf]  ;;  %v13771_v37 = vld [vmem:[#allocation2 + $0x3dc] sm:$0xf] }
 0x1e6   :  { %4357 = vmatpush.bf16.msra.mxu0 %v9587_v4  ;;  %v10308_v4 = vld [vmem:[#allocation2 + $0xa00] sm:$0xf0]  ;;  %v10307_v18 = vor.u32 %v13968_v59, %v10306_v56  ;;  %v13843_v56 = vld [vmem:[#allocation2 + $0x61c] sm:$0xf]  ;;  %v9884_v59 = vld [vmem:[#allocation2 + $0x6a8] sm:$0xf0] }
 0x1e7   :  { %4370 = vmatpush.bf16.msra.mxu1 %v10739_v5  ;;  %v4143_v5 = vpop.f32.mrf.mxu3  ;;  %v10311_v22 = vor.u32 %v13950_v2, %v10308_v4  ;;  %v9887_v4 = vor.u32 %v13843_v56, %v9884_v59  ;;  %v14041_v59 = vld [vmem:[#allocation2 + $0xc44] sm:$0xf0] }
 0x1e8   :  { %4383 = vmatpush.bf16.msra.mxu2 %v9591_v6  ;;  %v10170_v6 = vld [vmem:[#allocation2 + $0x858] sm:$0xf]  ;;  %v13825_v5 = vld [vmem:[#allocation2 + $0x584] sm:$0xf0] }
 0x1e9   :  { %4396 = vmatpush.bf16.msra.mxu3 %v10743_v14  ;;  %v13915_v14 = vld [vmem:[#allocation2 + $0x85c] sm:$0xf]  ;;  %v10171_v61 = vor.u32 %v13933_v9, %v10170_v6  ;;  %v10890_v6 = vld [vmem:[#allocation2 + $0xdf8] sm:$0xf]  ;;  %v686_v9 = vperm.slane %v15072_v58, 4 }
 0x1ea   :  { %4358 = vmatpush.bf16.msra.mxu0 %v9443_v23  ;;  %v11323_v23 = vor.u32 %v14221_v13, %v11322_v11  ;;  %v10175_v25 = vor.u32 %v13915_v14, %v10172_v17  ;;  %v11039_v11 = vor.u32 %v14131_v62, %v11036_v63  ;;  %v13807_v13 = vld [vmem:[#allocation2 + $0x4fc] sm:$0xf]  ;;  %v9740_v14 = vld [vmem:[#allocation2 + $0x588] sm:$0xf0] }
 0x1eb   :  { %4371 = vmatpush.bf16.msra.mxu1 %v10595_v26  ;;  %v10026_v26 = vld [vmem:[#allocation2 + $0x738] sm:$0xf]  ;;  %v14095_v17 = vld [vmem:[#allocation2 + $0xdfc] sm:$0xf]  ;;  %v9452_v63 = vld [vmem:[#allocation2 + $0x348] sm:$0xf0] }
 0x1ec   :  { %4384 = vmatpush.bf16.msra.mxu2 %v9447_v31  ;;  %v13897_v31 = vld [vmem:[#allocation2 + $0x7c4] sm:$0xf0]  ;;  %v13735_v62 = vld [vmem:[#allocation2 + $0x2bc] sm:$0xf] }
 0x1ed   :  { %4397 = vmatpush.bf16.msra.mxu3 %v10599_v41  ;;  %v10028_v41 = vld [vmem:[#allocation2 + $0x7c8] sm:$0xf0]  ;;  %v10027_v43 = vor.u32 %v13897_v31, %v10026_v26  ;;  %v14077_v26 = vld [vmem:[#allocation2 + $0xd64] sm:$0xf0] }
 0x1ee   :  { %4359 = vmatpush.bf16.msra.mxu0 %v9299_v46  ;;  %v10031_v45 = vor.u32 %v13879_v38, %v10028_v41  ;;  %v9882_v46 = vld [vmem:[#allocation2 + $0x618] sm:$0xf]  ;;  %v9596_v38 = vld [vmem:[#allocation2 + $0x468] sm:$0xf0]  ;;  %v687_v41 = vperm.slane %v15072_v58, 5 }
 0x1ef   :  { %4372 = vmatpush.bf16.msra.mxu1 %v10451_v52  ;;  %v11183_v52 = vor.u32 %v14167_v42, %v11180_v39  ;;  %v14059_v42 = vld [vmem:[#allocation2 + $0xcdc] sm:$0xf]  ;;  %v10748_v39 = vld [vmem:[#allocation2 + $0xd68] sm:$0xf0] }
 0x1f0   :  { %4385 = vmatpush.bf16.msra.mxu2 %v9303_v55  ;;  %v14149_v55 = vld [vmem:[#allocation2 + $0xfa4] sm:$0xf0]  ;;  %v10751_v56 = vor.u32 %v14059_v42, %v10748_v39 }
 0x1f1   :  { %4398 = vmatpush.bf16.msra.mxu3 %v10455_v0  ;;  %v9883_v0 = vor.u32 %v13861_v48, %v9882_v46  ;;  %v11035_v2 = vor.u32 %v14149_v55, %v11034_v50  ;;  %v9599_v46 = vor.u32 %v13771_v37, %v9596_v38  ;;  %v9450_v48 = vld [vmem:[#allocation2 + $0x2b8] sm:$0xf]  ;;  %v13753_v50 = vld [vmem:[#allocation2 + $0x344] sm:$0xf0] }
 0x1f2   :  { %4360 = vmatpush.bf16.msra.mxu0 %v9155_v12  ;;  %v14113_v12 = vld [vmem:[#allocation2 + $0xe84] sm:$0xf0]  ;;  %v4154_v21 = vpop.f32.mrf.mxu0  ;;  %v10314_v37 = vld [vmem:[#allocation2 + $0x978] sm:$0xf] }
 0x1f3   :  { %4373 = vmatpush.bf16.msra.mxu1 %v10307_v18  ;;  %v10892_v18 = vld [vmem:[#allocation2 + $0xe88] sm:$0xf0]  ;;  %v4155_v31 = vadd.f32 %v4154_v21, %v686_v9  ;;  %v4167_v34 = vpop.f32.mrf.mxu1  ;;  %v13699_v21 = vld [vmem:[#allocation2 + $0x19c] sm:$0xf]  ;;  %v13969_v38 = vld [vmem:[#allocation2 + $0xa04] sm:$0xf0] }
 0x1f4   :  { %4386 = vmatpush.bf16.msra.mxu2 %v9159_v19  ;;  %v9739_v19 = vor.u32 %v13825_v5, %v9738_v1  ;;  %v9451_v5 = vor.u32 %v13753_v50, %v9450_v48  ;;  %v10178_v50 = vld [vmem:[#allocation2 + $0x860] sm:$0xf] }
 0x1f5   :  { %4399 = vmatpush.bf16.msra.mxu3 %v10311_v22  ;;  %4361 = vmatmul.bf16.vlgmr.msra.gmra.mxu0 %v14964_v15  ;;  %v10891_v22 = vor.u32 %v14113_v12, %v10890_v6  ;;  %v9455_v12 = vor.u32 %v13735_v62, %v9452_v63  ;;  %v13916_v62 = vld [vmem:[#allocation2 + $0x864] sm:$0xf]  ;;  %v10180_v63 = vld [vmem:[#allocation2 + $0x8f0] sm:$0xf0] }
 0x1f6   :  { %4405 = vmatpush.bf16.msrb.mxu0 %v10171_v61  ;;  %4374 = vmatmul.bf16.vlgmr.msra.gmra.mxu1 %v14966_v16  ;;  %v9743_v61 = vor.u32 %v13807_v13, %v9740_v14  ;;  %v9306_v13 = vld [vmem:[#allocation2 + $0x198] sm:$0xf]  ;;  %v13717_v14 = vld [vmem:[#allocation2 + $0x224] sm:$0xf0] }
 0x1f7   :  { %4418 = vmatpush.bf16.msrb.mxu1 %v11323_v23  ;;  %4387 = vmatmul.bf16.vlgmr.msra.gmra.mxu2 %v14964_v15  ;;  %v13789_v23 = vld [vmem:[#allocation2 + $0x464] sm:$0xf0] }
 0x1f8   :  { %4431 = vmatpush.bf16.msrb.mxu2 %v10175_v25  ;;  %4400 = vmatmul.bf16.vlgmr.msra.gmra.mxu3 %v14966_v16  ;;  %v10746_v25 = vld [vmem:[#allocation2 + $0xcd8] sm:$0xf] }
 0x1f9   :  { %4444 = vmatpush.bf16.msrb.mxu3 %v11327_v35  ;;  %v10895_v35 = vor.u32 %v14095_v17, %v10892_v18  ;;  %v10458_v17 = vld [vmem:[#allocation2 + $0xa98] sm:$0xf] }
 0x1fa   :  { %4406 = vmatpush.bf16.msrb.mxu0 %v10027_v43  ;;  %v15096_v43 = vadd.f32 %v4167_v34, %v4155_v31  ;;  %v4180_v55 = vpop.f32.mrf.mxu2  ;;  %v4156_v9 = vpop.f32.mrf.mxu0  ;;  %v13681_v31 = vld [vmem:[#allocation2 + $0x104] sm:$0xf0] }
 0x1fb   :  { %4419 = vmatpush.bf16.msrb.mxu1 %v11179_v44  ;;  %v9595_v44 = vor.u32 %v13789_v23, %v9594_v20  ;;  %v4193_v1 = vpop.f32.mrf.mxu3  ;;  %v4169_v18 = vpop.f32.mrf.mxu1  ;;  %v14005_v20 = vld [vmem:[#allocation2 + $0xb24] sm:$0xf0]  ;;  %v10460_v23 = vld [vmem:[#allocation2 + $0xb28] sm:$0xf0] }
 0x1fc   :  { %4432 = vmatpush.bf16.msrb.mxu2 %v10031_v45  ;;  %v10747_v45 = vor.u32 %v14077_v26, %v10746_v25  ;;  %v9307_v25 = vor.u32 %v13717_v14, %v9306_v13  ;;  %v9162_v26 = vld [vmem:[#allocation2 + $0x78] sm:$0xf]  ;;  %v10459_v34 = vor.u32 %v14005_v20, %v10458_v17  ;;  %v10034_v13 = vld [vmem:[#allocation2 + $0x740] sm:$0xf]  ;;  %v13898_v14 = vld [vmem:[#allocation2 + $0x7cc] sm:$0xf0] }
 0x1fd   :  { %4445 = vmatpush.bf16.msrb.mxu3 %v11183_v52  ;;  %v10602_v52 = vld [vmem:[#allocation2 + $0xbb8] sm:$0xf]  ;;  %v11186_v17 = vld [vmem:[#allocation2 + $0x1040] sm:$0xf]  ;;  %v13880_v20 = vld [vmem:[#allocation2 + $0x744] sm:$0xf] }
 0x1fe   :  { %4407 = vmatpush.bf16.msrb.mxu0 %v9883_v0  ;;  %v4181_v0 = vadd.f32 %v4180_v55, %v687_v41  ;;  %v13663_v41 = vld [vmem:[#allocation2 + $0x7c] sm:$0xf]  ;;  %v11330_v55 = vld [vmem:[#allocation2 + $0x1160] sm:$0xf] }
 0x1ff   :  { %4420 = vmatpush.bf16.msrb.mxu1 %v11035_v2  ;;  %v14023_v2 = vld [vmem:[#allocation2 + $0xbbc] sm:$0xf] }
 0x200   :  { %4433 = vmatpush.bf16.msrb.mxu2 %v9887_v4  ;;  %v10604_v4 = vld [vmem:[#allocation2 + $0xc48] sm:$0xf0]  ;;  %v15098_v6 = vadd.f32 %v4193_v1, %v4181_v0  ;;  %v10315_v0 = vor.u32 %v13969_v38, %v10314_v37  ;;  %v14150_v38 = vld [vmem:[#allocation2 + $0xfac] sm:$0xf0] }
 0x201   :  { %4446 = vmatpush.bf16.msrb.mxu3 %v11039_v11  ;;  %v10603_v11 = vor.u32 %v14041_v59, %v10602_v52  ;;  %v13934_v52 = vld [vmem:[#allocation2 + $0x8ec] sm:$0xf0] }
 0x202   :  { %4408 = vmatpush.bf16.msrb.mxu0 %v9739_v19  ;;  %v10607_v19 = vor.u32 %v14023_v2, %v10604_v4  ;;  %v4182_v42 = vpop.f32.mrf.mxu2  ;;  %v14222_v59 = vld [vmem:[#allocation2 + $0x11ec] sm:$0xf0]  ;;  %v14204_v2 = vld [vmem:[#allocation2 + $0x1164] sm:$0xf]  ;;  %v11332_v4 = vld [vmem:[#allocation2 + $0x11f0] sm:$0xf0]  ;;  %v10179_v9 = vor.u32 %v13934_v52, %v10178_v50 }
 0x203   :  { %4421 = vmatpush.bf16.msrb.mxu1 %v10891_v22  ;;  %v9308_v22 = vld [vmem:[#allocation2 + $0x228] sm:$0xf0]  ;;  %v4195_v48 = vpop.f32.mrf.mxu3  ;;  %v11335_v18 = vor.u32 %v14204_v2, %v11332_v4  ;;  %v9892_v42 = vld [vmem:[#allocation2 + $0x6b0] sm:$0xf0]  ;;  %v13826_v52 = vld [vmem:[#allocation2 + $0x58c] sm:$0xf0] }
 0x204   :  { %4434 = vmatpush.bf16.msrb.mxu2 %v9743_v61  ;;  %v13987_v61 = vld [vmem:[#allocation2 + $0xa9c] sm:$0xf]  ;;  %v10900_v2 = vld [vmem:[#allocation2 + $0xe90] sm:$0xf0] }
 0x205   :  { %4447 = vmatpush.bf16.msrb.mxu3 %v10895_v35  ;;  %v9311_v35 = vor.u32 %v13699_v21, %v9308_v22  ;;  %v10463_v39 = vor.u32 %v13987_v61, %v10460_v23  ;;  %v10036_v21 = vld [vmem:[#allocation2 + $0x7d0] sm:$0xf0]  ;;  %v14168_v22 = vld [vmem:[#allocation2 + $0x1044] sm:$0xf]  ;;  %v10035_v23 = vor.u32 %v13898_v14, %v10034_v13  ;;  %v13790_v13 = vld [vmem:[#allocation2 + $0x46c] sm:$0xf0] }
 0x206   :  { %4409 = vmatpush.bf16.msrb.mxu0 %v9595_v44  ;;  %v9164_v44 = vld [vmem:[#allocation2 + $0x108] sm:$0xf0]  ;;  %v11188_v61 = vld [vmem:[#allocation2 + $0x10d0] sm:$0xf0]  ;;  %v10754_v14 = vld [vmem:[#allocation2 + $0xce0] sm:$0xf] }
 0x207   :  { %4422 = vmatpush.bf16.msrb.mxu1 %v10747_v45  ;;  %v13951_v45 = vld [vmem:[#allocation2 + $0x97c] sm:$0xf]  ;;  %v9167_v1 = vor.u32 %v13663_v41, %v9164_v44  ;;  %v11191_v37 = vor.u32 %v14168_v22, %v11188_v61  ;;  %v13844_v41 = vld [vmem:[#allocation2 + $0x624] sm:$0xf]  ;;  %v11044_v44 = vld [vmem:[#allocation2 + $0xfb0] sm:$0xf0] }
 0x208   :  { %4435 = vmatpush.bf16.msrb.mxu2 %v9599_v46  ;;  %v10316_v46 = vld [vmem:[#allocation2 + $0xa08] sm:$0xf0]  ;;  %v9895_v50 = vor.u32 %v13844_v41, %v9892_v42  ;;  %v9604_v22 = vld [vmem:[#allocation2 + $0x470] sm:$0xf0]  ;;  %v689_v61 = vperm.slane %v15072_v58, 7 }
 0x209   :  { %4448 = vmatpush.bf16.msrb.mxu3 %v10751_v56  ;;  %v9163_v56 = vor.u32 %v13681_v31, %v9162_v26  ;;  %v10039_v26 = vor.u32 %v13880_v20, %v10036_v21  ;;  %v9890_v31 = vld [vmem:[#allocation2 + $0x620] sm:$0xf]  ;;  %v13772_v21 = vld [vmem:[#allocation2 + $0x3e4] sm:$0xf] }
 0x20a   :  { %4410 = vmatpush.bf16.msrb.mxu0 %v9451_v5  ;;  %v10319_v5 = vor.u32 %v13951_v45, %v10316_v46  ;;  %v9746_v46 = vld [vmem:[#allocation2 + $0x500] sm:$0xf] }
 0x20b   :  { %4423 = vmatpush.bf16.msrb.mxu1 %v10603_v11  ;;  %v11331_v11 = vor.u32 %v14222_v59, %v11330_v55  ;;  %v10898_v55 = vld [vmem:[#allocation2 + $0xe00] sm:$0xf]  ;;  %v9747_v4 = vor.u32 %v13826_v52, %v9746_v46  ;;  %v9460_v46 = vld [vmem:[#allocation2 + $0x350] sm:$0xf0] }
 0x20c   :  { %4436 = vmatpush.bf16.msrb.mxu2 %v9455_v12  ;;  %v10183_v12 = vor.u32 %v13916_v62, %v10180_v63  ;;  %v14114_v62 = vld [vmem:[#allocation2 + $0xe8c] sm:$0xf0]  ;;  %v13808_v63 = vld [vmem:[#allocation2 + $0x504] sm:$0xf]  ;;  %v10610_v41 = vld [vmem:[#allocation2 + $0xbc0] sm:$0xf] }
 0x20d   :  { %4449 = vmatpush.bf16.msrb.mxu3 %v10607_v19  ;;  %v14186_v19 = vld [vmem:[#allocation2 + $0x10cc] sm:$0xf0]  ;;  %v10612_v52 = vld [vmem:[#allocation2 + $0xc50] sm:$0xf0] }
 0x20e   :  { %4411 = vmatpush.bf16.msrb.mxu0 %v9307_v25  ;;  %v11187_v25 = vor.u32 %v14186_v19, %v11186_v17  ;;  %v14078_v17 = vld [vmem:[#allocation2 + $0xd6c] sm:$0xf0] }
 0x20f   :  { %4424 = vmatpush.bf16.msrb.mxu1 %v10459_v34  ;;  %v13862_v34 = vld [vmem:[#allocation2 + $0x6ac] sm:$0xf0] }
 0x210   :  { %4437 = vmatpush.bf16.msrb.mxu2 %v9311_v35  ;;  %v11042_v35 = vld [vmem:[#allocation2 + $0xf20] sm:$0xf]  ;;  %v9891_v45 = vor.u32 %v13862_v34, %v9890_v31  ;;  %v10755_v34 = vor.u32 %v14078_v17, %v10754_v14  ;;  %v10468_v14 = vld [vmem:[#allocation2 + $0xb30] sm:$0xf0] }
 0x211   :  { %4450 = vmatpush.bf16.msrb.mxu3 %v10463_v39  ;;  %v14132_v39 = vld [vmem:[#allocation2 + $0xf24] sm:$0xf]  ;;  %v11043_v48 = vor.u32 %v14150_v38, %v11042_v35  ;;  %v9607_v35 = vor.u32 %v13772_v21, %v9604_v22  ;;  %v13754_v38 = vld [vmem:[#allocation2 + $0x34c] sm:$0xf0]  ;;  %v10322_v22 = vld [vmem:[#allocation2 + $0x980] sm:$0xf] }
 0x212   :  { %4412 = vmatpush.bf16.msrb.mxu0 %v9163_v56  ;;  %v688_v56 = vperm.slane %v15072_v58, 6  ;;  %v11047_v59 = vor.u32 %v14132_v39, %v11044_v44  ;;  %v14042_v44 = vld [vmem:[#allocation2 + $0xc4c] sm:$0xf0] }
 0x213   :  { %4425 = vmatpush.bf16.msrb.mxu1 %v10315_v0  ;;  %v9748_v0 = vld [vmem:[#allocation2 + $0x590] sm:$0xf0]  ;;  %v4219_v19 = vpop.f32.mrf.mxu1 }
 0x214   :  { %4438 = vmatpush.bf16.msrb.mxu2 %v9167_v1  ;;  %v14096_v1 = vld [vmem:[#allocation2 + $0xe04] sm:$0xf] }
 0x215   :  { %4451 = vmatpush.bf16.msrb.mxu3 %v10319_v5  ;;  %4413 = vmatmul.bf16.vlgmr.msrb.gmra.mxu0 %v14964_v15  ;;  %v9602_v5 = vld [vmem:[#allocation2 + $0x3e0] sm:$0xf]  ;;  %v10903_v20 = vor.u32 %v14096_v1, %v10900_v2  ;;  %v13718_v1 = vld [vmem:[#allocation2 + $0x22c] sm:$0xf0] }
 0x216   :  { %4457 = vmatpush.bf16.msra.mxu0 %v10179_v9  ;;  %4426 = vmatmul.bf16.vlgmr.msrb.gmra.mxu1 %v14966_v16  ;;  %v4206_v9 = vpop.f32.mrf.mxu0  ;;  %v9603_v31 = vor.u32 %v13790_v13, %v9602_v5  ;;  %v10466_v2 = vld [vmem:[#allocation2 + $0xaa0] sm:$0xf]  ;;  %v13988_v13 = vld [vmem:[#allocation2 + $0xaa4] sm:$0xf] }
 0x217   :  { %4470 = vmatpush.bf16.msra.mxu1 %v11331_v11  ;;  %4439 = vmatmul.bf16.vlgmr.msrb.gmra.mxu2 %v14964_v15  ;;  %v10899_v11 = vor.u32 %v14114_v62, %v10898_v55  ;;  %v10611_v62 = vor.u32 %v14042_v44, %v10610_v41  ;;  %v10186_v41 = vld [vmem:[#allocation2 + $0x868] sm:$0xf] }
 0x218   :  { %4483 = vmatpush.bf16.msra.mxu2 %v10183_v12  ;;  %4452 = vmatmul.bf16.vlgmr.msrb.gmra.mxu3 %v14966_v16  ;;  %v9751_v12 = vor.u32 %v13808_v63, %v9748_v0  ;;  %v9314_v0 = vld [vmem:[#allocation2 + $0x1a0] sm:$0xf] }
 0x219   :  { %4496 = vmatpush.bf16.msra.mxu3 %v11335_v18  ;;  %v4207_v18 = vadd.f32 %v4206_v9, %v688_v56  ;;  %v14006_v9 = vld [vmem:[#allocation2 + $0xb2c] sm:$0xf0]  ;;  %v9315_v17 = vor.u32 %v13718_v1, %v9314_v0  ;;  %v10042_v1 = vld [vmem:[#allocation2 + $0x748] sm:$0xf] }
 0x21a   :  { %4458 = vmatpush.bf16.msra.mxu0 %v10035_v23  ;;  %v14060_v23 = vld [vmem:[#allocation2 + $0xce4] sm:$0xf]  ;;  %v4232_v42 = vpop.f32.mrf.mxu2 }
 0x21b   :  { %4471 = vmatpush.bf16.msra.mxu1 %v11187_v25  ;;  %v10756_v25 = vld [vmem:[#allocation2 + $0xd70] sm:$0xf0]  ;;  %v4233_v58 = vadd.f32 %v4232_v42, %v689_v61  ;;  %v13970_v61 = vld [vmem:[#allocation2 + $0xa0c] sm:$0xf0]  ;;  %v13935_v42 = vld [vmem:[#allocation2 + $0x8f4] sm:$0xf0] }
 0x21c   :  { %4484 = vmatpush.bf16.msra.mxu2 %v10039_v26  ;;  %v15106_v26 = vadd.f32 %v4219_v19, %v4207_v18  ;;  %v10759_v39 = vor.u32 %v14060_v23, %v10756_v25  ;;  %v9170_v18 = vld [vmem:[#allocation2 + $0x80] sm:$0xf]  ;;  %v13682_v19 = vld [vmem:[#allocation2 + $0x10c] sm:$0xf0]  ;;  %v13664_v23 = vld [vmem:[#allocation2 + $0x84] sm:$0xf] }
 0x21d   :  { %4497 = vmatpush.bf16.msra.mxu3 %v11191_v37  ;;  %v9458_v37 = vld [vmem:[#allocation2 + $0x2c0] sm:$0xf]  ;;  %v9171_v44 = vor.u32 %v13682_v19, %v9170_v18 }
 0x21e   :  { %4459 = vmatpush.bf16.msra.mxu0 %v9891_v45  ;;  %v13736_v45 = vld [vmem:[#allocation2 + $0x2c4] sm:$0xf]  ;;  %v9459_v55 = vor.u32 %v13754_v38, %v9458_v37  ;;  %v10324_v37 = vld [vmem:[#allocation2 + $0xa10] sm:$0xf0] }
 0x21f   :  { %4472 = vmatpush.bf16.msra.mxu1 %v11043_v48  ;;  %v4245_v48 = vpop.f32.mrf.mxu3  ;;  %v9463_v63 = vor.u32 %v13736_v45, %v9460_v46  ;;  %v14223_v45 = vld [vmem:[#allocation2 + $0x11f4] sm:$0xf0]  ;;  %v13917_v46 = vld [vmem:[#allocation2 + $0x86c] sm:$0xf] }
 0x220   :  { %4485 = vmatpush.bf16.msra.mxu2 %v9895_v50  ;;  %v14024_v50 = vld [vmem:[#allocation2 + $0xbc4] sm:$0xf]  ;;  %v15108_v56 = vadd.f32 %v4245_v48, %v4233_v58  ;;  %v10188_v58 = vld [vmem:[#allocation2 + $0x8f8] sm:$0xf0]  ;;  %v10323_v48 = vor.u32 %v13970_v61, %v10322_v22  ;;  %v11050_v22 = vld [vmem:[#allocation2 + $0xf28] sm:$0xf] }
 0x221   :  { %4498 = vmatpush.bf16.msra.mxu3 %v11047_v59  ;;  %v4208_v59 = vpop.f32.mrf.mxu0  ;;  %v10615_v5 = vor.u32 %v14024_v50, %v10612_v52  ;;  %v14205_v52 = vld [vmem:[#allocation2 + $0x116c] sm:$0xf]  ;;  %v10191_v0 = vor.u32 %v13917_v46, %v10188_v58 }
 0x222   :  { %4460 = vmatpush.bf16.msra.mxu0 %v9747_v4  ;;  %v4221_v4 = vpop.f32.mrf.mxu1  ;;  %v4234_v25 = vpop.f32.mrf.mxu2 }
 0x223   :  { %4473 = vmatpush.bf16.msra.mxu1 %v10899_v11  ;;  %v13700_v11 = vld [vmem:[#allocation2 + $0x1a4] sm:$0xf]  ;;  %v11194_v4 = vld [vmem:[#allocation2 + $0x1048] sm:$0xf]  ;;  %v13845_v25 = vld [vmem:[#allocation2 + $0x62c] sm:$0xf] }
 0x224   :  { %4486 = vmatpush.bf16.msra.mxu2 %v9751_v12  ;;  %v9316_v12 = vld [vmem:[#allocation2 + $0x230] sm:$0xf0] }
 0x225   :  { %4499 = vmatpush.bf16.msra.mxu3 %v10903_v20  ;;  %v10467_v20 = vor.u32 %v14006_v9, %v10466_v2  ;;  %v9319_v21 = vor.u32 %v13700_v11, %v9316_v12  ;;  %v13899_v2 = vld [vmem:[#allocation2 + $0x7d4] sm:$0xf0]  ;;  %v13881_v11 = vld [vmem:[#allocation2 + $0x74c] sm:$0xf]  ;;  %v10044_v12 = vld [vmem:[#allocation2 + $0x7d8] sm:$0xf0] }
 0x226   :  { %4461 = vmatpush.bf16.msra.mxu0 %v9603_v31  ;;  %v10471_v31 = vor.u32 %v13988_v13, %v10468_v14  ;;  %v14187_v9 = vld [vmem:[#allocation2 + $0x10d4] sm:$0xf0]  ;;  %v14169_v13 = vld [vmem:[#allocation2 + $0x104c] sm:$0xf]  ;;  %v11196_v14 = vld [vmem:[#allocation2 + $0x10d8] sm:$0xf0]  ;;  %v10047_v19 = vor.u32 %v13881_v11, %v10044_v12 }
 0x227   :  { %4474 = vmatpush.bf16.msra.mxu1 %v10755_v34  ;;  %v9172_v34 = vld [vmem:[#allocation2 + $0x110] sm:$0xf0]  ;;  %v4247_v38 = vpop.f32.mrf.mxu3  ;;  %v11195_v18 = vor.u32 %v14187_v9, %v11194_v4  ;;  %v11199_v61 = vor.u32 %v14169_v13, %v11196_v14  ;;  %v13791_v4 = vld [vmem:[#allocation2 + $0x474] sm:$0xf0]  ;;  %v13773_v14 = vld [vmem:[#allocation2 + $0x3ec] sm:$0xf] }
 0x228   :  { %4487 = vmatpush.bf16.msra.mxu2 %v9607_v35  ;;  %v13952_v35 = vld [vmem:[#allocation2 + $0x984] sm:$0xf]  ;;  %v9175_v50 = vor.u32 %v13664_v23, %v9172_v34  ;;  %v14151_v23 = vld [vmem:[#allocation2 + $0xfb4] sm:$0xf0]  ;;  %v14133_v34 = vld [vmem:[#allocation2 + $0xf2c] sm:$0xf] }
 0x229   :  { %4500 = vmatpush.bf16.msra.mxu3 %v10759_v39  ;;  %v11338_v39 = vld [vmem:[#allocation2 + $0x1168] sm:$0xf]  ;;  %v10327_v59 = vor.u32 %v13952_v35, %v10324_v37  ;;  %v11052_v35 = vld [vmem:[#allocation2 + $0xfb8] sm:$0xf0]  ;;  %v14079_v9 = vld [vmem:[#allocation2 + $0xd74] sm:$0xf0] }
 0x22a   :  { %4462 = vmatpush.bf16.msra.mxu0 %v9459_v55  ;;  %v11340_v55 = vld [vmem:[#allocation2 + $0x11f8] sm:$0xf0]  ;;  %v9754_v38 = vld [vmem:[#allocation2 + $0x508] sm:$0xf]  ;;  %v11055_v58 = vor.u32 %v14133_v34, %v11052_v35 }
 0x22b   :  { %4475 = vmatpush.bf16.msra.mxu1 %v10611_v62  ;;  %v10187_v62 = vor.u32 %v13935_v42, %v10186_v41  ;;  %v15114_v41 = vld [vmem:[#allocation4 + $0x18] sm:$0xff]  ;;  %v11051_v42 = vor.u32 %v14151_v23, %v11050_v22  ;;  %v10618_v34 = vld [vmem:[#allocation2 + $0xbc8] sm:$0xf] }
 0x22c   :  { %4488 = vmatpush.bf16.msra.mxu2 %v9463_v63  ;;  %v11339_v63 = vor.u32 %v14223_v45, %v11338_v39  ;;  %v10906_v45 = vld [vmem:[#allocation2 + $0xe08] sm:$0xf]  ;;  %v690_v46 = vperm.slane %v15114_v41, 0 }
 0x22d   :  { %4501 = vmatpush.bf16.msra.mxu3 %v10615_v5  ;;  %v11343_v5 = vor.u32 %v14205_v52, %v11340_v55  ;;  %v9756_v52 = vld [vmem:[#allocation2 + $0x598] sm:$0xf0]  ;;  %v14097_v55 = vld [vmem:[#allocation2 + $0xe0c] sm:$0xf] }
 0x22e   :  { %4463 = vmatpush.bf16.msra.mxu0 %v9315_v17  ;;  %v10043_v17 = vor.u32 %v13899_v2, %v10042_v1 }
 0x22f   :  { %4476 = vmatpush.bf16.msra.mxu1 %v10467_v20  ;;  %v9898_v20 = vld [vmem:[#allocation2 + $0x628] sm:$0xf] }
 0x230   :  { %4489 = vmatpush.bf16.msra.mxu2 %v9319_v21  ;;  %v13863_v21 = vld [vmem:[#allocation2 + $0x6b4] sm:$0xf0] }
 0x231   :  { %4502 = vmatpush.bf16.msra.mxu3 %v10471_v31  ;;  %v9900_v31 = vld [vmem:[#allocation2 + $0x6b8] sm:$0xf0]  ;;  %v9899_v37 = vor.u32 %v13863_v21, %v9898_v20 }
 0x232   :  { %4464 = vmatpush.bf16.msra.mxu0 %v9171_v44  ;;  %v9903_v39 = vor.u32 %v13845_v25, %v9900_v31  ;;  %v13827_v44 = vld [vmem:[#allocation2 + $0x594] sm:$0xf0]  ;;  %v10764_v20 = vld [vmem:[#allocation2 + $0xd78] sm:$0xf0]  ;;  %v9466_v25 = vld [vmem:[#allocation2 + $0x2c8] sm:$0xf] }
 0x233   :  { %4477 = vmatpush.bf16.msra.mxu1 %v10323_v48  ;;  %v14115_v48 = vld [vmem:[#allocation2 + $0xe94] sm:$0xf0]  ;;  %v4271_v12 = vpop.f32.mrf.mxu1 }
 0x234   :  { %4490 = vmatpush.bf16.msra.mxu2 %v9175_v50  ;;  %v13809_v50 = vld [vmem:[#allocation2 + $0x50c] sm:$0xf]  ;;  %v10907_v1 = vor.u32 %v14115_v48, %v10906_v45  ;;  %v13755_v31 = vld [vmem:[#allocation2 + $0x354] sm:$0xf0] }
 0x235   :  { %4503 = vmatpush.bf16.msra.mxu3 %v10327_v59  ;;  %4465 = vmatmul.bf16.vlgmr.msra.gmra.mxu0 %v14964_v15  ;;  %v10908_v59 = vld [vmem:[#allocation2 + $0xe98] sm:$0xf0]  ;;  %v9759_v2 = vor.u32 %v13809_v50, %v9756_v52  ;;  %v9467_v48 = vor.u32 %v13755_v31, %v9466_v25 }
 0x236   :  { %4509 = vmatpush.bf16.msrb.mxu0 %v10187_v62  ;;  %4478 = vmatmul.bf16.vlgmr.msra.gmra.mxu1 %v14966_v16  ;;  %v9755_v62 = vor.u32 %v13827_v44, %v9754_v38  ;;  %v10911_v13 = vor.u32 %v14097_v55, %v10908_v59  ;;  %v14043_v38 = vld [vmem:[#allocation2 + $0xc54] sm:$0xf0]  ;;  %v9180_v31 = vld [vmem:[#allocation2 + $0x118] sm:$0xf0] }
 0x237   :  { %4522 = vmatpush.bf16.msrb.mxu1 %v11339_v63  ;;  %4491 = vmatmul.bf16.vlgmr.msra.gmra.mxu2 %v14964_v15  ;;  %v9610_v63 = vld [vmem:[#allocation2 + $0x3e8] sm:$0xf]  ;;  %v10619_v55 = vor.u32 %v14043_v38, %v10618_v34  ;;  %v13953_v34 = vld [vmem:[#allocation2 + $0x98c] sm:$0xf]  ;;  %v11402_v38 = vld [vmem:[#allocation6 + $0x70] sm:$0xf] }
 0x238   :  { %4535 = vmatpush.bf16.msrb.mxu2 %v10191_v0  ;;  %4504 = vmatmul.bf16.vlgmr.msra.gmra.mxu3 %v14966_v16  ;;  %v4258_v0 = vpop.f32.mrf.mxu0  ;;  %v9611_v22 = vor.u32 %v13791_v4, %v9610_v63  ;;  %v13719_v63 = vld [vmem:[#allocation2 + $0x234] sm:$0xf0] }
 0x239   :  { %4548 = vmatpush.bf16.msrb.mxu3 %v11343_v5  ;;  %v10762_v5 = vld [vmem:[#allocation2 + $0xce8] sm:$0xf]  ;;  %v4259_v11 = vadd.f32 %v4258_v0, %v690_v46  ;;  %v14025_v46 = vld [vmem:[#allocation2 + $0xbcc] sm:$0xf]  ;;  %v14007_v4 = vld [vmem:[#allocation2 + $0xb34] sm:$0xf0] }
 0x23a   :  { %4510 = vmatpush.bf16.msrb.mxu0 %v10043_v17  ;;  %v9612_v17 = vld [vmem:[#allocation2 + $0x478] sm:$0xf0]  ;;  %v4284_v35 = vpop.f32.mrf.mxu2  ;;  %v10474_v0 = vld [vmem:[#allocation2 + $0xaa8] sm:$0xf] }
 0x23b   :  { %4523 = vmatpush.bf16.msrb.mxu1 %v11195_v18  ;;  %v691_v18 = vperm.slane %v15114_v41, 1  ;;  %v15118_v21 = vadd.f32 %v4271_v12, %v4259_v11  ;;  %v9615_v23 = vor.u32 %v13773_v14, %v9612_v17  ;;  %v4297_v45 = vpop.f32.mrf.mxu3  ;;  %v13989_v11 = vld [vmem:[#allocation2 + $0xaac] sm:$0xf]  ;;  %v10476_v12 = vld [vmem:[#allocation2 + $0xb38] sm:$0xf0] }
 0x23c   :  { %4536 = vmatpush.bf16.msrb.mxu2 %v10047_v19  ;;  %v14061_v19 = vld [vmem:[#allocation2 + $0xcec] sm:$0xf]  ;;  %v9178_v14 = vld [vmem:[#allocation2 + $0x88] sm:$0xf]  ;;  %v13683_v17 = vld [vmem:[#allocation2 + $0x114] sm:$0xf0]  ;;  %v10479_v25 = vor.u32 %v13989_v11, %v10476_v12 }
 0x23d   :  { %4549 = vmatpush.bf16.msrb.mxu3 %v11199_v61  ;;  %v10763_v61 = vor.u32 %v14079_v9, %v10762_v5  ;;  %v4285_v44 = vadd.f32 %v4284_v35, %v691_v18  ;;  %v13701_v5 = vld [vmem:[#allocation2 + $0x1ac] sm:$0xf]  ;;  %v9324_v9 = vld [vmem:[#allocation2 + $0x238] sm:$0xf0]  ;;  %v10475_v18 = vor.u32 %v14007_v4, %v10474_v0  ;;  %v11522_v12 = vld [vmem:[#allocation6 + $0x160] sm:$0xf] }
 0x23e   :  { %4511 = vmatpush.bf16.msrb.mxu0 %v9899_v37  ;;  %v10767_v37 = vor.u32 %v14061_v19, %v10764_v20  ;;  %v9327_v19 = vor.u32 %v13701_v5, %v9324_v9  ;;  %v10330_v20 = vld [vmem:[#allocation2 + $0x988] sm:$0xf]  ;;  %v10332_v35 = vld [vmem:[#allocation2 + $0xa18] sm:$0xf0]  ;;  %v14237_v4 = vld [vmem:[#allocation6 + $0x64] sm:$0xf0] }
 0x23f   :  { %4524 = vmatpush.bf16.msrb.mxu1 %v11051_v42  ;;  %v13737_v42 = vld [vmem:[#allocation2 + $0x2cc] sm:$0xf]  ;;  %v15120_v50 = vadd.f32 %v4297_v45, %v4285_v44  ;;  %v9179_v44 = vor.u32 %v13683_v17, %v9178_v14  ;;  %v14255_v45 = vld [vmem:[#allocation6 + $0xf4] sm:$0xf0]  ;;  %v11458_v5 = vld [vmem:[#allocation6 + $0xe0] sm:$0xf] }
 0x240   :  { %4537 = vmatpush.bf16.msrb.mxu2 %v9903_v39  ;;  %v9468_v39 = vld [vmem:[#allocation2 + $0x358] sm:$0xf0]  ;;  %v4260_v52 = vpop.f32.mrf.mxu0  ;;  %v14253_v11 = vld [vmem:[#allocation6 + $0xe4] sm:$0xf0]  ;;  %v11586_v14 = vld [vmem:[#allocation6 + $0x1e0] sm:$0xf] }
 0x241   :  { %4550 = vmatpush.bf16.msrb.mxu3 %v11055_v58  ;;  %v10620_v58 = vld [vmem:[#allocation2 + $0xc58] sm:$0xf0]  ;;  %v9471_v59 = vor.u32 %v13737_v42, %v9468_v39  ;;  %v11466_v39 = vld [vmem:[#allocation6 + $0xf0] sm:$0xf]  ;;  %v14285_v17 = vld [vmem:[#allocation6 + $0x1e4] sm:$0xf0] }
 0x242   :  { %4512 = vmatpush.bf16.msrb.mxu0 %v9755_v62  ;;  %v9322_v62 = vld [vmem:[#allocation2 + $0x1a8] sm:$0xf]  ;;  %v14239_v42 = vld [vmem:[#allocation6 + $0x74] sm:$0xf0]  ;;  %v11467_v0 = vor.u32 %v14255_v45, %v11466_v39  ;;  %v11378_v39 = vld [vmem:[#allocation6 + $0x40] sm:$0xf] }
 0x243   :  { %4525 = vmatpush.bf16.msrb.mxu1 %v10907_v1  ;;  %v4273_v1 = vpop.f32.mrf.mxu1 }
 0x244   :  { %4538 = vmatpush.bf16.msrb.mxu2 %v9759_v2  ;;  %v10623_v2 = vor.u32 %v14025_v46, %v10620_v58  ;;  %v11530_v46 = vld [vmem:[#allocation6 + $0x170] sm:$0xf]  ;;  %v14271_v58 = vld [vmem:[#allocation6 + $0x174] sm:$0xf0] }
 0x245   :  { %4551 = vmatpush.bf16.msrb.mxu3 %v10911_v13  ;;  %v9323_v13 = vor.u32 %v13719_v63, %v9322_v62  ;;  %v10335_v62 = vor.u32 %v13953_v34, %v10332_v35  ;;  %v11403_v63 = vor.u32 %v14239_v42, %v11402_v38  ;;  %v11531_v1 = vor.u32 %v14271_v58, %v11530_v46  ;;  %v11514_v34 = vld [vmem:[#allocation6 + $0x150] sm:$0xf]  ;;  %v14267_v35 = vld [vmem:[#allocation6 + $0x154] sm:$0xf0]  ;;  %v14233_v46 = vld [vmem:[#allocation6 + $0x44] sm:$0xf0] }
 0x246   :  { %4513 = vmatpush.bf16.msrb.mxu0 %v9611_v22  ;;  %v13971_v22 = vld [vmem:[#allocation2 + $0xa14] sm:$0xf0]  ;;  %v14283_v38 = vld [vmem:[#allocation6 + $0x1d4] sm:$0xf0]  ;;  %v11515_v45 = vor.u32 %v14267_v35, %v11514_v34  ;;  %v11442_v58 = vld [vmem:[#allocation6 + $0xc0] sm:$0xf] }
 0x247   :  { %4526 = vmatpush.bf16.msrb.mxu1 %v10763_v61  ;;  %v13665_v61 = vld [vmem:[#allocation2 + $0x8c] sm:$0xf]  ;;  %v11362_v34 = vld [vmem:[#allocation6 + $0x20] sm:$0xf] }
 0x248   :  { %4539 = vmatpush.bf16.msrb.mxu2 %v9615_v23  ;;  %v4286_v23 = vpop.f32.mrf.mxu2  ;;  %v9183_v52 = vor.u32 %v13665_v61, %v9180_v31  ;;  %v14235_v61 = vld [vmem:[#allocation6 + $0x54] sm:$0xf0]  ;;  %v14229_v35 = vld [vmem:[#allocation6 + $0x24] sm:$0xf0] }
 0x249   :  { %4552 = vmatpush.bf16.msrb.mxu3 %v10767_v37  ;;  %v4299_v37 = vpop.f32.mrf.mxu3  ;;  %v11450_v23 = vld [vmem:[#allocation6 + $0xd0] sm:$0xf]  ;;  %v14251_v31 = vld [vmem:[#allocation6 + $0xd4] sm:$0xf0] }
 0x24a   :  { %4514 = vmatpush.bf16.msrb.mxu0 %v9467_v48  ;;  %v10331_v48 = vor.u32 %v13971_v22, %v10330_v20  ;;  %v11386_v22 = vld [vmem:[#allocation6 + $0x50] sm:$0xf] }
 0x24b   :  { %4527 = vmatpush.bf16.msrb.mxu1 %v10619_v55  ;;  %v11594_v55 = vld [vmem:[#allocation6 + $0x1f0] sm:$0xf]  ;;  %v11387_v42 = vor.u32 %v14235_v61, %v11386_v22  ;;  %v14279_v22 = vld [vmem:[#allocation6 + $0x1b4] sm:$0xf0] }
 0x24c   :  { %4540 = vmatpush.bf16.msrb.mxu2 %v9471_v59  ;;  %v14287_v59 = vld [vmem:[#allocation6 + $0x1f4] sm:$0xf0]  ;;  %v11578_v37 = vld [vmem:[#allocation6 + $0x1d0] sm:$0xf] }
 0x24d   :  { %4553 = vmatpush.bf16.msrb.mxu3 %v10623_v2  ;;  %v11394_v2 = vld [vmem:[#allocation6 + $0x60] sm:$0xf]  ;;  %v11595_v9 = vor.u32 %v14287_v59, %v11594_v55  ;;  %v14249_v55 = vld [vmem:[#allocation6 + $0xc4] sm:$0xf0] }
 0x24e   :  { %4515 = vmatpush.bf16.msrb.mxu0 %v9323_v13  ;;  %v14269_v13 = vld [vmem:[#allocation6 + $0x164] sm:$0xf0]  ;;  %v11506_v59 = vld [vmem:[#allocation6 + $0x140] sm:$0xf] }
 0x24f   :  { %4528 = vmatpush.bf16.msrb.mxu1 %v10475_v18  ;;  %v11395_v18 = vor.u32 %v14237_v4, %v11394_v2  ;;  %v11523_v20 = vor.u32 %v14269_v13, %v11522_v12 }
 0x250   :  { %4541 = vmatpush.bf16.msrb.mxu2 %v9327_v19  ;;  %v11459_v19 = vor.u32 %v14253_v11, %v11458_v5  ;;  %v14231_v5 = vld [vmem:[#allocation6 + $0x34] sm:$0xf0] }
 0x251   :  { %4554 = vmatpush.bf16.msrb.mxu3 %v10479_v25  ;;  %v11587_v25 = vor.u32 %v14285_v17, %v11586_v14  ;;  %v14247_v11 = vld [vmem:[#allocation6 + $0xb4] sm:$0xf0]  ;;  %v11498_v17 = vld [vmem:[#allocation6 + $0x130] sm:$0xf] }
 0x252   :  { %4516 = vmatpush.bf16.msrb.mxu0 %v9179_v44  ;;  %v11451_v44 = vor.u32 %v14251_v31, %v11450_v23  ;;  %v4310_v2 = vpop.f32.mrf.mxu0 }
 0x253   :  { %4529 = vmatpush.bf16.msrb.mxu1 %v10331_v48  ;;  %v692_v48 = vperm.slane %v15114_v41, 2  ;;  %v4323_v13 = vpop.f32.mrf.mxu1 }
 0x254   :  { %4542 = vmatpush.bf16.msrb.mxu2 %v9183_v52  ;;  %v11579_v52 = vor.u32 %v14283_v38, %v11578_v37  ;;  %v11426_v37 = vld [vmem:[#allocation6 + $0xa0] sm:$0xf] }
 0x255   :  { %4555 = vmatpush.bf16.msrb.mxu3 %v10335_v62  ;;  %4517 = vmatmul.bf16.vlgmr.msrb.gmra.mxu0 %v14964_v15  ;;  %v14265_v62 = vld [vmem:[#allocation6 + $0x144] sm:$0xf0]  ;;  %v4311_v12 = vadd.f32 %v4310_v2, %v692_v48  ;;  %v11554_v48 = vld [vmem:[#allocation6 + $0x1a0] sm:$0xf]  ;;  %v11418_v2 = vld [vmem:[#allocation6 + $0x90] sm:$0xf] }
 0x256   :  { %8095 = vmatpush.bf16.msra.mxu0 %v11403_v63  ;;  %4530 = vmatmul.bf16.vlgmr.msrb.gmra.mxu1 %v14966_v16  ;;  %v11570_v63 = vld [vmem:[#allocation6 + $0x1c0] sm:$0xf]  ;;  %v11507_v4 = vor.u32 %v14265_v62, %v11506_v59 }
 0x257   :  { %8108 = vmatpush.bf16.msra.mxu1 %v11467_v0  ;;  %4543 = vmatmul.bf16.vlgmr.msrb.gmra.mxu2 %v14964_v15  ;;  %v14281_v15 = vld [vmem:[#allocation6 + $0x1c4] sm:$0xf0]  ;;  %v11379_v0 = vor.u32 %v14233_v46, %v11378_v39  ;;  %v15128_v61 = vadd.f32 %v4323_v13, %v4311_v12  ;;  %v11546_v12 = vld [vmem:[#allocation6 + $0x190] sm:$0xf]  ;;  %v14275_v13 = vld [vmem:[#allocation6 + $0x194] sm:$0xf0] }
 0x258   :  { %8121 = vmatpush.bf16.msra.mxu2 %v11531_v1  ;;  %4556 = vmatmul.bf16.vlgmr.msrb.gmra.mxu3 %v14966_v16  ;;  %v11370_v1 = vld [vmem:[#allocation6 + $0x30] sm:$0xf]  ;;  %v11443_v16 = vor.u32 %v14249_v55, %v11442_v58  ;;  %v11571_v14 = vor.u32 %v14281_v15, %v11570_v63  ;;  %v14245_v39 = vld [vmem:[#allocation6 + $0xa4] sm:$0xf0]  ;;  %v11363_v55 = vor.u32 %v14229_v35, %v11362_v34 }
 0x259   :  { %8134 = vmatpush.bf16.msra.mxu3 %v11595_v9  ;;  %v11434_v9 = vld [vmem:[#allocation6 + $0xb0] sm:$0xf]  ;;  %v11371_v23 = vor.u32 %v14231_v5, %v11370_v1  ;;  %v11427_v63 = vor.u32 %v14245_v39, %v11426_v37  ;;  %v14227_v1 = vld [vmem:[#allocation6 + $0x14] sm:$0xf0]  ;;  %v11547_v34 = vor.u32 %v14275_v13, %v11546_v12  ;;  %v14257_v35 = vld [vmem:[#allocation6 + $0x104] sm:$0xf0] }
 0x25a   :  { %8096 = vmatpush.bf16.msra.mxu0 %v11395_v18  ;;  %v14263_v18 = vld [vmem:[#allocation6 + $0x134] sm:$0xf0]  ;;  %v4336_v38 = vpop.f32.mrf.mxu2  ;;  %v4312_v62 = vpop.f32.mrf.mxu0  ;;  %v11538_v37 = vld [vmem:[#allocation6 + $0x180] sm:$0xf]  ;;  %v11658_v39 = vld [vmem:[#allocation6 + $0x270] sm:$0xf] }
 0x25b   :  { %8109 = vmatpush.bf16.msra.mxu1 %v11459_v19  ;;  %v693_v19 = vperm.slane %v15114_v41, 3  ;;  %v11499_v31 = vor.u32 %v14263_v18, %v11498_v17  ;;  %v4349_v58 = vpop.f32.mrf.mxu3  ;;  %v14243_v5 = vld [vmem:[#allocation6 + $0x94] sm:$0xf0]  ;;  %v11346_v17 = vld [vmem:[#allocation6] sm:$0xf]  ;;  %v4562_v62 = vmax.f32 %v14994_v32, 0.0 }
 0x25c   :  { %8122 = vmatpush.bf16.msra.mxu2 %v11523_v20  ;;  %v11562_v20 = vld [vmem:[#allocation6 + $0x1b0] sm:$0xf]  ;;  %v14225_v18 = vld [vmem:[#allocation6 + $0x4] sm:$0xf0]  ;;  %v11650_v12 = vld [vmem:[#allocation6 + $0x260] sm:$0xf] }
 0x25d   :  { %8135 = vmatpush.bf16.msra.mxu3 %v11587_v25  ;;  %v11435_v25 = vor.u32 %v14247_v11, %v11434_v9  ;;  %v4337_v46 = vadd.f32 %v4336_v38, %v693_v19  ;;  %v11482_v9 = vld [vmem:[#allocation6 + $0x110] sm:$0xf]  ;;  %v14259_v11 = vld [vmem:[#allocation6 + $0x114] sm:$0xf0]  ;;  %v11419_v19 = vor.u32 %v14243_v5, %v11418_v2  ;;  %v14273_v38 = vld [vmem:[#allocation6 + $0x184] sm:$0xf0] }
 0x25e   :  { %8097 = vmatpush.bf16.msra.mxu0 %v11387_v42  ;;  %v11563_v42 = vor.u32 %v14279_v22, %v11562_v20  ;;  %v11483_v20 = vor.u32 %v14259_v11, %v11482_v9  ;;  %v11410_v22 = vld [vmem:[#allocation6 + $0x80] sm:$0xf]  ;;  %v4563_v2 = vmax.f32 %v15002_v36, 0.0  ;;  %v14301_v13 = vld [vmem:[#allocation6 + $0x264] sm:$0xf0] }
 0x25f   :  { %8110 = vmatpush.bf16.msra.mxu1 %v11451_v44  ;;  %v11490_v44 = vld [vmem:[#allocation6 + $0x120] sm:$0xf]  ;;  %v15130_v59 = vadd.f32 %v4349_v58, %v4337_v46  ;;  %v11347_v46 = vor.u32 %v14225_v18, %v11346_v17  ;;  %v14319_v58 = vld [vmem:[#allocation6 + $0x2f4] sm:$0xf0]  ;;  %v14333_v18 = vld [vmem:[#allocation6 + $0x364] sm:$0xf0] }
 0x260   :  { %8123 = vmatpush.bf16.msra.mxu2 %v11515_v45  ;;  %v14261_v45 = vld [vmem:[#allocation6 + $0x124] sm:$0xf0]  ;;  %v11778_v17 = vld [vmem:[#allocation6 + $0x360] sm:$0xf] }
 0x261   :  { %8136 = vmatpush.bf16.msra.mxu3 %v11579_v52  ;;  %v14277_v52 = vld [vmem:[#allocation6 + $0x1a4] sm:$0xf0]  ;;  %v11491_v15 = vor.u32 %v14261_v45, %v11490_v44  ;;  %v14303_v44 = vld [vmem:[#allocation6 + $0x274] sm:$0xf0]  ;;  %v11722_v45 = vld [vmem:[#allocation6 + $0x2f0] sm:$0xf] }
 0x262   :  { %8098 = vmatpush.bf16.msra.mxu0 %v11379_v0  ;;  %v11354_v0 = vld [vmem:[#allocation6 + $0x10] sm:$0xf]  ;;  %v11659_v5 = vor.u32 %v14303_v44, %v11658_v39  ;;  %v11723_v9 = vor.u32 %v14319_v58, %v11722_v45  ;;  %v14315_v39 = vld [vmem:[#allocation6 + $0x2d4] sm:$0xf0] }
 0x263   :  { %8111 = vmatpush.bf16.msra.mxu1 %v11443_v16  ;;  %v4325_v16 = vpop.f32.mrf.mxu1  ;;  %v11770_v44 = vld [vmem:[#allocation6 + $0x350] sm:$0xf]  ;;  %v14331_v45 = vld [vmem:[#allocation6 + $0x354] sm:$0xf0] }
 0x264   :  { %8124 = vmatpush.bf16.msra.mxu2 %v11507_v4  ;;  %v11555_v4 = vor.u32 %v14277_v52, %v11554_v48  ;;  %v11786_v48 = vld [vmem:[#allocation6 + $0x370] sm:$0xf]  ;;  %v14335_v52 = vld [vmem:[#allocation6 + $0x374] sm:$0xf0]  ;;  %v4564_v16 = vmax.f32 %v15004_v54, 0.0  ;;  %v15138_v54 = vpack.c.bf16 %v4562_v62, %v4562_v62  ;;  %v11771_v62 = vor.u32 %v14331_v45, %v11770_v44 }
 0x265   :  { %8137 = vmatpush.bf16.msra.mxu3 %v11571_v14  ;;  %v11355_v14 = vor.u32 %v14227_v1, %v11354_v0  ;;  %v11850_v0 = vld [vmem:[#allocation6 + $0x3f0] sm:$0xf]  ;;  %v14351_v1 = vld [vmem:[#allocation6 + $0x3f4] sm:$0xf0]  ;;  %v11787_v11 = vor.u32 %v14335_v52, %v11786_v48  ;;  %v11634_v52 = vld [vmem:[#allocation6 + $0x240] sm:$0xf] }
 0x266   :  { %8099 = vmatpush.bf16.msra.mxu0 %v11371_v23  ;;  %v14241_v23 = vld [vmem:[#allocation6 + $0x84] sm:$0xf0]  ;;  %v11851_v32 = vor.u32 %v14351_v1, %v11850_v0  ;;  %v14347_v58 = vld [vmem:[#allocation6 + $0x3d4] sm:$0xf0]  ;;  %v694_v0 = vperm.slane %v15114_v41, 4 }
 0x267   :  { %8112 = vmatpush.bf16.msra.mxu1 %v11435_v25  ;;  %v11474_v25 = vld [vmem:[#allocation6 + $0x100] sm:$0xf] }
 0x268   :  { %8125 = vmatpush.bf16.msra.mxu2 %v11499_v31  ;;  %v4338_v31 = vpop.f32.mrf.mxu2 }
 0x269   :  { %8138 = vmatpush.bf16.msra.mxu3 %v11563_v42  ;;  %v4351_v42 = vpop.f32.mrf.mxu3  ;;  %v11779_v31 = vor.u32 %v14333_v18, %v11778_v17  ;;  %v11690_v17 = vld [vmem:[#allocation6 + $0x2b0] sm:$0xf]  ;;  %v14311_v18 = vld [vmem:[#allocation6 + $0x2b4] sm:$0xf0] }
 0x26a   :  { %8100 = vmatpush.bf16.msra.mxu0 %v11363_v55  ;;  %v4561_v55 = vmax.f32 %v14992_v7, 0.0  ;;  %v11714_v7 = vld [vmem:[#allocation6 + $0x2e0] sm:$0xf]  ;;  %v11691_v44 = vor.u32 %v14311_v18, %v11690_v17  ;;  %v14307_v18 = vld [vmem:[#allocation6 + $0x294] sm:$0xf0] }
 0x26b   :  { %8113 = vmatpush.bf16.msra.mxu1 %v11427_v63  ;;  %v11411_v63 = vor.u32 %v14241_v23, %v11410_v22  ;;  %v11651_v22 = vor.u32 %v14301_v13, %v11650_v12  ;;  %v15140_v23 = vpack.c.bf16 %v4563_v2, %v4563_v2  ;;  %v14313_v2 = vld [vmem:[#allocation6 + $0x2c4] sm:$0xf0]  ;;  %v11626_v12 = vld [vmem:[#allocation6 + $0x230] sm:$0xf] }
 0x26c   :  { %8126 = vmatpush.bf16.msra.mxu2 %v11491_v15  ;;  %v11475_v15 = vor.u32 %v14257_v35, %v11474_v25  ;;  %v15136_v36 = vpack.c.bf16 %v4561_v55, %v4561_v55  ;;  %v14299_v35 = vld [vmem:[#allocation6 + $0x254] sm:$0xf0] }
 0x26d   :  { %8139 = vmatpush.bf16.msra.mxu3 %v11555_v4  ;;  %v11539_v4 = vor.u32 %v14273_v38, %v11538_v37  ;;  %v11706_v37 = vld [vmem:[#allocation6 + $0x2d0] sm:$0xf]  ;;  %v15142_v38 = vpack.c.bf16 %v4564_v16, %v4564_v16  ;;  %v11762_v16 = vld [vmem:[#allocation6 + $0x340] sm:$0xf] }
 0x26e   :  { %8101 = vmatpush.bf16.msra.mxu0 %v11355_v14  ;;  %v14317_v14 = vld [vmem:[#allocation6 + $0x2e4] sm:$0xf0]  ;;  %v11707_v55 = vor.u32 %v14315_v39, %v11706_v37  ;;  %v14343_v37 = vld [vmem:[#allocation6 + $0x3b4] sm:$0xf0] }
 0x26f   :  { %8114 = vmatpush.bf16.msra.mxu1 %v11419_v19  ;;  %v11842_v19 = vld [vmem:[#allocation6 + $0x3e0] sm:$0xf]  ;;  %v11715_v25 = vor.u32 %v14317_v14, %v11714_v7  ;;  %v14295_v14 = vld [vmem:[#allocation6 + $0x234] sm:$0xf0] }
 0x270   :  { %8127 = vmatpush.bf16.msra.mxu2 %v11483_v20  ;;  %v14349_v20 = vld [vmem:[#allocation6 + $0x3e4] sm:$0xf0]  ;;  %v11627_v39 = vor.u32 %v14295_v14, %v11626_v12 }
 0x271   :  { %8140 = vmatpush.bf16.msra.mxu3 %v11547_v34  ;;  %v11642_v34 = vld [vmem:[#allocation6 + $0x250] sm:$0xf]  ;;  %v11843_v42 = vor.u32 %v14349_v20, %v11842_v19 }
 0x272   :  { %8102 = vmatpush.bf16.msra.mxu0 %v11347_v46  ;;  %v11834_v46 = vld [vmem:[#allocation6 + $0x3d0] sm:$0xf]  ;;  %v11643_v48 = vor.u32 %v14299_v35, %v11642_v34  ;;  %v4362_v13 = vpop.f32.mrf.mxu0  ;;  %v695_v34 = vperm.slane %v15114_v41, 5 }
 0x273   :  { %8115 = vmatpush.bf16.msra.mxu1 %v11411_v63  ;;  %v14297_v63 = vld [vmem:[#allocation6 + $0x244] sm:$0xf0]  ;;  %v11835_v1 = vor.u32 %v14347_v58, %v11834_v46  ;;  %v4363_v19 = vadd.f32 %v4362_v13, %v694_v0  ;;  %v4375_v20 = vpop.f32.mrf.mxu1  ;;  %v11818_v35 = vld [vmem:[#allocation6 + $0x3b0] sm:$0xf]  ;;  %v11618_v46 = vld [vmem:[#allocation6 + $0x220] sm:$0xf] }
 0x274   :  { %8128 = vmatpush.bf16.msra.mxu2 %v11475_v15  ;;  %v11698_v15 = vld [vmem:[#allocation6 + $0x2c0] sm:$0xf]  ;;  %v14293_v58 = vld [vmem:[#allocation6 + $0x224] sm:$0xf0]  ;;  %v11610_v13 = vld [vmem:[#allocation6 + $0x210] sm:$0xf] }
 0x275   :  { %8141 = vmatpush.bf16.msra.mxu3 %v11539_v4  ;;  %8103 = vmatmul.bf16.vlgmr.msra.gmra.mxu0 %v15136_v36  ;;  %v14329_v4 = vld [vmem:[#allocation6 + $0x344] sm:$0xf0]  ;;  %v11699_v7 = vor.u32 %v14313_v2, %v11698_v15  ;;  %v11810_v2 = vld [vmem:[#allocation6 + $0x3a0] sm:$0xf] }
 0x276   :  { %8147 = vmatpush.bf16.msrb.mxu0 %v11659_v5  ;;  %8116 = vmatmul.bf16.vlgmr.msra.gmra.mxu1 %v15138_v54  ;;  %v11826_v5 = vld [vmem:[#allocation6 + $0x3c0] sm:$0xf]  ;;  %v14325_v15 = vld [vmem:[#allocation6 + $0x324] sm:$0xf0] }
 0x277   :  { %8160 = vmatpush.bf16.msrb.mxu1 %v11723_v9  ;;  %8129 = vmatmul.bf16.vlgmr.msra.gmra.mxu2 %v15140_v23  ;;  %v14345_v9 = vld [vmem:[#allocation6 + $0x3c4] sm:$0xf0] }
 0x278   :  { %8173 = vmatpush.bf16.msrb.mxu2 %v11787_v11  ;;  %8142 = vmatmul.bf16.vlgmr.msra.gmra.mxu3 %v15142_v38  ;;  %v11635_v11 = vor.u32 %v14297_v63, %v11634_v52  ;;  %v11746_v63 = vld [vmem:[#allocation6 + $0x320] sm:$0xf] }
 0x279   :  { %8186 = vmatpush.bf16.msrb.mxu3 %v11851_v32  ;;  %v11763_v32 = vor.u32 %v14329_v4, %v11762_v16  ;;  %v14341_v16 = vld [vmem:[#allocation6 + $0x3a4] sm:$0xf0]  ;;  %v11619_v4 = vor.u32 %v14293_v58, %v11618_v46  ;;  %v11747_v12 = vor.u32 %v14325_v15, %v11746_v63  ;;  %v11730_v46 = vld [vmem:[#allocation6 + $0x300] sm:$0xf]  ;;  %v11914_v15 = vld [vmem:[#allocation6 + $0x470] sm:$0xf] }
 0x27a   :  { %8148 = vmatpush.bf16.msrb.mxu0 %v11651_v22  ;;  %v11827_v22 = vor.u32 %v14345_v9, %v11826_v5  ;;  %v4388_v52 = vpop.f32.mrf.mxu2  ;;  %v4364_v9 = vpop.f32.mrf.mxu0  ;;  %v11811_v17 = vor.u32 %v14341_v16, %v11810_v2  ;;  %v14383_v16 = vld [vmem:[#allocation6 + $0x4f4] sm:$0xf0] }
 0x27b   :  { %8161 = vmatpush.bf16.msrb.mxu1 %v11715_v25  ;;  %v11754_v25 = vld [vmem:[#allocation6 + $0x330] sm:$0xf]  ;;  %v4389_v0 = vadd.f32 %v4388_v52, %v695_v34  ;;  %v4377_v14 = vpop.f32.mrf.mxu1  ;;  %v11602_v34 = vld [vmem:[#allocation6 + $0x200] sm:$0xf]  ;;  %v14321_v52 = vld [vmem:[#allocation6 + $0x304] sm:$0xf0] }
 0x27c   :  { %8174 = vmatpush.bf16.msrb.mxu2 %v11779_v31  ;;  %v14327_v31 = vld [vmem:[#allocation6 + $0x334] sm:$0xf0] }
 0x27d   :  { %8187 = vmatpush.bf16.msrb.mxu3 %v11843_v42  ;;  %v15150_v42 = vadd.f32 %v4375_v20, %v4363_v19  ;;  %v11755_v45 = vor.u32 %v14327_v31, %v11754_v25  ;;  %v11738_v19 = vld [vmem:[#allocation6 + $0x310] sm:$0xf]  ;;  %v14323_v20 = vld [vmem:[#allocation6 + $0x314] sm:$0xf0] }
 0x27e   :  { %8149 = vmatpush.bf16.msrb.mxu0 %v11643_v48  ;;  %v11682_v48 = vld [vmem:[#allocation6 + $0x2a0] sm:$0xf]  ;;  %v14339_v25 = vld [vmem:[#allocation6 + $0x394] sm:$0xf0] }
 0x27f   :  { %8162 = vmatpush.bf16.msrb.mxu1 %v11707_v55  ;;  %v11819_v55 = vor.u32 %v14343_v37, %v11818_v35  ;;  %v14289_v35 = vld [vmem:[#allocation6 + $0x204] sm:$0xf0]  ;;  %v14399_v9 = vld [vmem:[#allocation6 + $0x574] sm:$0xf0] }
 0x280   :  { %8175 = vmatpush.bf16.msrb.mxu2 %v11771_v62  ;;  %v14309_v62 = vld [vmem:[#allocation6 + $0x2a4] sm:$0xf0]  ;;  %v11603_v2 = vor.u32 %v14289_v35, %v11602_v34  ;;  %v14415_v14 = vld [vmem:[#allocation6 + $0x5f4] sm:$0xf0] }
 0x281   :  { %8188 = vmatpush.bf16.msrb.mxu3 %v11835_v1  ;;  %v4401_v1 = vpop.f32.mrf.mxu3  ;;  %v14365_v34 = vld [vmem:[#allocation6 + $0x464] sm:$0xf0] }
 0x282   :  { %8150 = vmatpush.bf16.msrb.mxu0 %v11635_v11  ;;  %v15152_v5 = vadd.f32 %v4401_v1, %v4389_v0  ;;  %v11683_v11 = vor.u32 %v14309_v62, %v11682_v48  ;;  %v4390_v58 = vpop.f32.mrf.mxu2  ;;  %v14337_v62 = vld [vmem:[#allocation6 + $0x384] sm:$0xf0]  ;;  %v14367_v0 = vld [vmem:[#allocation6 + $0x474] sm:$0xf0]  ;;  %v11978_v1 = vld [vmem:[#allocation6 + $0x4f0] sm:$0xf] }
 0x283   :  { %8163 = vmatpush.bf16.msrb.mxu1 %v11699_v7  ;;  %v14291_v7 = vld [vmem:[#allocation6 + $0x214] sm:$0xf0]  ;;  %v14381_v35 = vld [vmem:[#allocation6 + $0x4e4] sm:$0xf0] }
 0x284   :  { %8176 = vmatpush.bf16.msrb.mxu2 %v11763_v32  ;;  %v11674_v32 = vld [vmem:[#allocation6 + $0x290] sm:$0xf]  ;;  %v11611_v31 = vor.u32 %v14291_v7, %v11610_v13  ;;  %v11731_v7 = vor.u32 %v14321_v52, %v11730_v46 }
 0x285   :  { %8189 = vmatpush.bf16.msrb.mxu3 %v11827_v22  ;;  %v11802_v22 = vld [vmem:[#allocation6 + $0x390] sm:$0xf]  ;;  %v11675_v37 = vor.u32 %v14307_v18, %v11674_v32  ;;  %v4568_v18 = vmax.f32 %v15024_v47, 0.0 }
 0x286   :  { %8151 = vmatpush.bf16.msrb.mxu0 %v11627_v39  ;;  %v11739_v39 = vor.u32 %v14323_v20, %v11738_v19  ;;  %v11803_v48 = vor.u32 %v14339_v25, %v11802_v22  ;;  %v12106_v32 = vld [vmem:[#allocation6 + $0x5f0] sm:$0xf]  ;;  %v11915_v20 = vor.u32 %v14367_v0, %v11914_v15  ;;  %v11979_v22 = vor.u32 %v14383_v16, %v11978_v1  ;;  %v14379_v1 = vld [vmem:[#allocation6 + $0x4d4] sm:$0xf0] }
 0x287   :  { %8164 = vmatpush.bf16.msrb.mxu1 %v11691_v44  ;;  %v11666_v44 = vld [vmem:[#allocation6 + $0x280] sm:$0xf]  ;;  %v15164_v15 = vpack.c.bf16 %v4568_v18, %v4568_v18  ;;  %v14395_v16 = vld [vmem:[#allocation6 + $0x554] sm:$0xf0] }
 0x288   :  { %8177 = vmatpush.bf16.msrb.mxu2 %v11755_v45  ;;  %v14305_v45 = vld [vmem:[#allocation6 + $0x284] sm:$0xf0] }
 0x289   :  { %8190 = vmatpush.bf16.msrb.mxu3 %v11819_v55  ;;  %v11794_v55 = vld [vmem:[#allocation6 + $0x380] sm:$0xf]  ;;  %v4403_v63 = vpop.f32.mrf.mxu3  ;;  %v11667_v13 = vor.u32 %v14305_v45, %v11666_v44  ;;  %v14413_v45 = vld [vmem:[#allocation6 + $0x5e4] sm:$0xf0] }
 0x28a   :  { %8152 = vmatpush.bf16.msrb.mxu0 %v11619_v4  ;;  %v12042_v4 = vld [vmem:[#allocation6 + $0x570] sm:$0xf]  ;;  %v11795_v19 = vor.u32 %v14337_v62, %v11794_v55  ;;  %v12098_v44 = vld [vmem:[#allocation6 + $0x5e0] sm:$0xf]  ;;  %v14363_v62 = vld [vmem:[#allocation6 + $0x454] sm:$0xf0] }
 0x28b   :  { %8165 = vmatpush.bf16.msrb.mxu1 %v11683_v11  ;;  %v4565_v11 = vmax.f32 %v15012_v29, 0.0  ;;  %v12043_v25 = vor.u32 %v14399_v9, %v12042_v4  ;;  %v11970_v29 = vld [vmem:[#allocation6 + $0x4e0] sm:$0xf]  ;;  %v11898_v55 = vld [vmem:[#allocation6 + $0x450] sm:$0xf]  ;;  %v12099_v0 = vor.u32 %v14413_v45, %v12098_v44 }
 0x28c   :  { %8178 = vmatpush.bf16.msrb.mxu2 %v11747_v12  ;;  %v4566_v12 = vmax.f32 %v15014_v49, 0.0  ;;  %v12107_v49 = vor.u32 %v14415_v14, %v12106_v32  ;;  %v11962_v63 = vld [vmem:[#allocation6 + $0x4d0] sm:$0xf]  ;;  %v14411_v9 = vld [vmem:[#allocation6 + $0x5d4] sm:$0xf0] }
 0x28d   :  { %8191 = vmatpush.bf16.msrb.mxu3 %v11811_v17  ;;  %v4567_v17 = vmax.f32 %v15022_v27, 0.0  ;;  %v15158_v27 = vpack.c.bf16 %v4565_v11, %v4565_v11  ;;  %v12090_v4 = vld [vmem:[#allocation6 + $0x5d0] sm:$0xf]  ;;  %v11899_v11 = vor.u32 %v14363_v62, %v11898_v55  ;;  %v14361_v32 = vld [vmem:[#allocation6 + $0x444] sm:$0xf0] }
 0x28e   :  { %8153 = vmatpush.bf16.msrb.mxu0 %v11611_v31  ;;  %v11906_v31 = vld [vmem:[#allocation6 + $0x460] sm:$0xf]  ;;  %v15160_v47 = vpack.c.bf16 %v4566_v12, %v4566_v12  ;;  %v12091_v18 = vor.u32 %v14411_v9, %v12090_v4  ;;  %v11946_v44 = vld [vmem:[#allocation6 + $0x4b0] sm:$0xf]  ;;  %v14375_v45 = vld [vmem:[#allocation6 + $0x4b4] sm:$0xf0] }
 0x28f   :  { %8166 = vmatpush.bf16.msrb.mxu1 %v11675_v37  ;;  %v12034_v37 = vld [vmem:[#allocation6 + $0x560] sm:$0xf]  ;;  %v11907_v46 = vor.u32 %v14365_v34, %v11906_v31  ;;  %v15162_v58 = vpack.c.bf16 %v4567_v17, %v4567_v17  ;;  %v696_v17 = vperm.slane %v15114_v41, 6  ;;  %v14409_v31 = vld [vmem:[#allocation6 + $0x5c4] sm:$0xf0]  ;;  %v11947_v4 = vor.u32 %v14375_v45, %v11946_v44 }
 0x290   :  { %8179 = vmatpush.bf16.msrb.mxu2 %v11739_v39  ;;  %v14397_v39 = vld [vmem:[#allocation6 + $0x564] sm:$0xf0]  ;;  %v11890_v12 = vld [vmem:[#allocation6 + $0x440] sm:$0xf]  ;;  %v12010_v55 = vld [vmem:[#allocation6 + $0x530] sm:$0xf] }
 0x291   :  { %8192 = vmatpush.bf16.msrb.mxu3 %v11803_v48  ;;  %v11971_v48 = vor.u32 %v14381_v35, %v11970_v29  ;;  %v12035_v52 = vor.u32 %v14397_v39, %v12034_v37  ;;  %v11954_v14 = vld [vmem:[#allocation6 + $0x4c0] sm:$0xf]  ;;  %v11891_v34 = vor.u32 %v14361_v32, %v11890_v12  ;;  %v11882_v29 = vld [vmem:[#allocation6 + $0x430] sm:$0xf]  ;;  %v14359_v39 = vld [vmem:[#allocation6 + $0x434] sm:$0xf0] }
 0x292   :  { %8154 = vmatpush.bf16.msrb.mxu0 %v11603_v2  ;;  %v12026_v2 = vld [vmem:[#allocation6 + $0x550] sm:$0xf]  ;;  %v14391_v62 = vld [vmem:[#allocation6 + $0x534] sm:$0xf0]  ;;  %v14357_v12 = vld [vmem:[#allocation6 + $0x424] sm:$0xf0] }
 0x293   :  { %8167 = vmatpush.bf16.msrb.mxu1 %v11667_v13  ;;  %v11963_v13 = vor.u32 %v14379_v1, %v11962_v63  ;;  %v697_v63 = vperm.slane %v15114_v41, 7  ;;  %v14407_v1 = vld [vmem:[#allocation6 + $0x5b4] sm:$0xf0]  ;;  %v12011_v9 = vor.u32 %v14391_v62, %v12010_v55  ;;  %v12058_v55 = vld [vmem:[#allocation6 + $0x590] sm:$0xf] }
 0x294   :  { %8180 = vmatpush.bf16.msrb.mxu2 %v11731_v7  ;;  %v12027_v7 = vor.u32 %v14395_v16, %v12026_v2  ;;  %v11883_v16 = vor.u32 %v14359_v39, %v11882_v29  ;;  %v11930_v39 = vld [vmem:[#allocation6 + $0x490] sm:$0xf]  ;;  %v14403_v62 = vld [vmem:[#allocation6 + $0x594] sm:$0xf0] }
 0x295   :  { %8193 = vmatpush.bf16.msrb.mxu3 %v11795_v19  ;;  %8155 = vmatmul.bf16.vlgmr.msrb.gmra.mxu0 %v15158_v27  ;;  %v14377_v19 = vld [vmem:[#allocation6 + $0x4c4] sm:$0xf0] }
 0x296   :  { %8199 = vmatpush.bf16.msra.mxu0 %v11915_v20  ;;  %8168 = vmatmul.bf16.vlgmr.msrb.gmra.mxu1 %v15160_v47  ;;  %v12018_v20 = vld [vmem:[#allocation6 + $0x540] sm:$0xf]  ;;  %v11955_v35 = vor.u32 %v14377_v19, %v11954_v14  ;;  %v14373_v14 = vld [vmem:[#allocation6 + $0x4a4] sm:$0xf0] }
 0x297   :  { %8212 = vmatpush.bf16.msra.mxu1 %v11979_v22  ;;  %8181 = vmatmul.bf16.vlgmr.msrb.gmra.mxu2 %v15162_v58  ;;  %v14393_v22 = vld [vmem:[#allocation6 + $0x544] sm:$0xf0] }
 0x298   :  { %8225 = vmatpush.bf16.msra.mxu2 %v12043_v25  ;;  %8194 = vmatmul.bf16.vlgmr.msrb.gmra.mxu3 %v15164_v15  ;;  %v12082_v25 = vld [vmem:[#allocation6 + $0x5c0] sm:$0xf]  ;;  %v12019_v37 = vor.u32 %v14393_v22, %v12018_v20  ;;  %v14405_v22 = vld [vmem:[#allocation6 + $0x5a4] sm:$0xf0] }
 0x299   :  { %8238 = vmatpush.bf16.msra.mxu3 %v12107_v49  ;;  %v4414_v49 = vpop.f32.mrf.mxu0  ;;  %v12066_v20 = vld [vmem:[#allocation6 + $0x5a0] sm:$0xf] }
 0x29a   :  { %8200 = vmatpush.bf16.msra.mxu0 %v11907_v46  ;;  %v4415_v46 = vadd.f32 %v4414_v49, %v696_v17  ;;  %v12002_v17 = vld [vmem:[#allocation6 + $0x520] sm:$0xf]  ;;  %v12067_v45 = vor.u32 %v14405_v22, %v12066_v20  ;;  %v12234_v20 = vld [vmem:[#allocation6 + $0x6f0] sm:$0xf] }
 0x29b   :  { %8213 = vmatpush.bf16.msra.mxu1 %v11971_v48  ;;  %v4427_v48 = vpop.f32.mrf.mxu1  ;;  %v4453_v19 = vpop.f32.mrf.mxu3 }
 0x29c   :  { %8226 = vmatpush.bf16.msra.mxu2 %v12035_v52  ;;  %v12083_v52 = vor.u32 %v14409_v31, %v12082_v25  ;;  %v15172_v2 = vadd.f32 %v4427_v48, %v4415_v46  ;;  %v14371_v46 = vld [vmem:[#allocation6 + $0x494] sm:$0xf0]  ;;  %v11994_v48 = vld [vmem:[#allocation6 + $0x510] sm:$0xf] }
 0x29d   :  { %8239 = vmatpush.bf16.msra.mxu3 %v12099_v0  ;;  %v12074_v0 = vld [vmem:[#allocation6 + $0x5b0] sm:$0xf] }
 0x29e   :  { %8201 = vmatpush.bf16.msra.mxu0 %v11899_v11  ;;  %v11874_v11 = vld [vmem:[#allocation6 + $0x420] sm:$0xf]  ;;  %v12075_v32 = vor.u32 %v14407_v1, %v12074_v0  ;;  %v14353_v1 = vld [vmem:[#allocation6 + $0x404] sm:$0xf0] }
 0x29f   :  { %8214 = vmatpush.bf16.msra.mxu1 %v11963_v13  ;;  %v11938_v13 = vld [vmem:[#allocation6 + $0x4a0] sm:$0xf]  ;;  %v11875_v25 = vor.u32 %v14357_v12, %v11874_v11  ;;  %v14369_v11 = vld [vmem:[#allocation6 + $0x484] sm:$0xf0] }
 0x2a0   :  { %8227 = vmatpush.bf16.msra.mxu2 %v12027_v7  ;;  %v4440_v7 = vpop.f32.mrf.mxu2  ;;  %v11939_v29 = vor.u32 %v14373_v14, %v11938_v13  ;;  %v11858_v0 = vld [vmem:[#allocation6 + $0x400] sm:$0xf] }
 0x2a1   :  { %8240 = vmatpush.bf16.msra.mxu3 %v12091_v18  ;;  %v14389_v18 = vld [vmem:[#allocation6 + $0x524] sm:$0xf0]  ;;  %v4441_v41 = vadd.f32 %v4440_v7, %v697_v63  ;;  %v11986_v12 = vld [vmem:[#allocation6 + $0x500] sm:$0xf]  ;;  %v12059_v7 = vor.u32 %v14403_v62, %v12058_v55  ;;  %v11859_v22 = vor.u32 %v14353_v1, %v11858_v0 }
 0x2a2   :  { %8202 = vmatpush.bf16.msra.mxu0 %v11891_v34  ;;  %v4416_v34 = vpop.f32.mrf.mxu0  ;;  %v12003_v49 = vor.u32 %v14389_v18, %v12002_v17  ;;  %v12050_v14 = vld [vmem:[#allocation6 + $0x580] sm:$0xf]  ;;  %v14401_v17 = vld [vmem:[#allocation6 + $0x584] sm:$0xf0] }
 0x2a3   :  { %8215 = vmatpush.bf16.msra.mxu1 %v11955_v35  ;;  %v15174_v31 = vadd.f32 %v4453_v19, %v4441_v41  ;;  %v11866_v35 = vld [vmem:[#allocation6 + $0x410] sm:$0xf]  ;;  %v4429_v44 = vpop.f32.mrf.mxu1  ;;  %v4455_v18 = vpop.f32.mrf.mxu3  ;;  %v14431_v19 = vld [vmem:[#allocation6 + $0x674] sm:$0xf0]  ;;  %v12162_v0 = vld [vmem:[#allocation6 + $0x660] sm:$0xf] }
 0x2a4   :  { %8228 = vmatpush.bf16.msra.mxu2 %v12019_v37  ;;  %v14355_v37 = vld [vmem:[#allocation6 + $0x414] sm:$0xf0]  ;;  %v12170_v41 = vld [vmem:[#allocation6 + $0x670] sm:$0xf]  ;;  %v14429_v1 = vld [vmem:[#allocation6 + $0x664] sm:$0xf0] }
 0x2a5   :  { %8241 = vmatpush.bf16.msra.mxu3 %v12083_v52  ;;  %v14387_v52 = vld [vmem:[#allocation6 + $0x514] sm:$0xf0]  ;;  %v11867_v63 = vor.u32 %v14355_v37, %v11866_v35  ;;  %v12298_v34 = vld [vmem:[#allocation6 + $0x770] sm:$0xf]  ;;  %v4570_v35 = vmax.f32 %v15036_v51, 0.0  ;;  %v12171_v55 = vor.u32 %v14431_v19, %v12170_v41 }
 0x2a6   :  { %8203 = vmatpush.bf16.msra.mxu0 %v11883_v16  ;;  %v11931_v16 = vor.u32 %v14371_v46, %v11930_v39  ;;  %v12362_v44 = vld [vmem:[#allocation6 + $0x7f0] sm:$0xf]  ;;  %v4571_v46 = vmax.f32 %v15044_v40, 0.0  ;;  %v14427_v18 = vld [vmem:[#allocation6 + $0x654] sm:$0xf0] }
 0x2a7   :  { %8216 = vmatpush.bf16.msra.mxu1 %v11947_v4  ;;  %v11995_v4 = vor.u32 %v14387_v52, %v11994_v48  ;;  %v4572_v48 = vmax.f32 %v15046_v60, 0.0  ;;  %v12051_v52 = vor.u32 %v14401_v17, %v12050_v14  ;;  %v15182_v60 = vpack.c.bf16 %v4570_v35, %v4570_v35  ;;  %v12154_v17 = vld [vmem:[#allocation6 + $0x650] sm:$0xf] }
 0x2a8   :  { %8229 = vmatpush.bf16.msra.mxu2 %v12011_v9  ;;  %v11922_v9 = vld [vmem:[#allocation6 + $0x480] sm:$0xf]  ;;  %v4442_v13 = vpop.f32.mrf.mxu2  ;;  %v12218_v41 = vld [vmem:[#allocation6 + $0x6d0] sm:$0xf]  ;;  %v12155_v35 = vor.u32 %v14427_v18, %v12154_v17 }
 0x2a9   :  { %8242 = vmatpush.bf16.msra.mxu3 %v12075_v32  ;;  %v14385_v32 = vld [vmem:[#allocation6 + $0x504] sm:$0xf0]  ;;  %v11923_v37 = vor.u32 %v14369_v11, %v11922_v9  ;;  %v12354_v11 = vld [vmem:[#allocation6 + $0x7e0] sm:$0xf]  ;;  %v12163_v13 = vor.u32 %v14429_v1, %v12162_v0  ;;  %v15186_v19 = vpack.c.bf16 %v4572_v48, %v4572_v48 }
 0x2aa   :  { %8204 = vmatpush.bf16.msra.mxu0 %v11875_v25  ;;  %v14447_v25 = vld [vmem:[#allocation6 + $0x6f4] sm:$0xf0]  ;;  %v11987_v39 = vor.u32 %v14385_v32, %v11986_v12  ;;  %v14461_v9 = vld [vmem:[#allocation6 + $0x764] sm:$0xf0]  ;;  %v12210_v48 = vld [vmem:[#allocation6 + $0x6c0] sm:$0xf] }
 0x2ab   :  { %8217 = vmatpush.bf16.msra.mxu1 %v11939_v29  ;;  %v14463_v29 = vld [vmem:[#allocation6 + $0x774] sm:$0xf0]  ;;  %v12235_v62 = vor.u32 %v14447_v25, %v12234_v20  ;;  %v14477_v12 = vld [vmem:[#allocation6 + $0x7e4] sm:$0xf0]  ;;  %15405 = vst [vmem:[#allocation12_spill] sm:$0xff] %v15186_v19 }
 0x2ac   :  { %8230 = vmatpush.bf16.msra.mxu2 %v12003_v49  ;;  %v4569_v49 = vmax.f32 %v15034_v30, 0.0  ;;  %v12226_v30 = vld [vmem:[#allocation6 + $0x6e0] sm:$0xf]  ;;  %v12355_v20 = vor.u32 %v14477_v12, %v12354_v11  ;;  %v12282_v25 = vld [vmem:[#allocation6 + $0x750] sm:$0xf] }
 0x2ad   :  { %8243 = vmatpush.bf16.msra.mxu3 %v12067_v45  ;;  %v14479_v45 = vld [vmem:[#allocation6 + $0x7f4] sm:$0xf0]  ;;  %v14457_v0 = vld [vmem:[#allocation6 + $0x744] sm:$0xf0]  ;;  %v12338_v1 = vld [vmem:[#allocation6 + $0x7c0] sm:$0xf] }
 0x2ae   :  { %8205 = vmatpush.bf16.msra.mxu0 %v11867_v63  ;;  %v12299_v63 = vor.u32 %v14463_v29, %v12298_v34  ;;  %v12363_v51 = vor.u32 %v14479_v45, %v12362_v44  ;;  %v15180_v40 = vpack.c.bf16 %v4569_v49, %v4569_v49  ;;  %v14459_v34 = vld [vmem:[#allocation6 + $0x754] sm:$0xf0]  ;;  %v12346_v29 = vld [vmem:[#allocation6 + $0x7d0] sm:$0xf] }
 0x2af   :  { %8218 = vmatpush.bf16.msra.mxu1 %v11931_v16  ;;  %v14445_v16 = vld [vmem:[#allocation6 + $0x6e4] sm:$0xf0]  ;;  %v14475_v49 = vld [vmem:[#allocation6 + $0x7d4] sm:$0xf0]  ;;  %v12283_v45 = vor.u32 %v14459_v34, %v12282_v25  ;;  %v12330_v25 = vld [vmem:[#allocation6 + $0x7b0] sm:$0xf] }
 0x2b0   :  { %8231 = vmatpush.bf16.msra.mxu2 %v11995_v4  ;;  %v12290_v4 = vld [vmem:[#allocation6 + $0x760] sm:$0xf]  ;;  %v12227_v32 = vor.u32 %v14445_v16, %v12226_v30  ;;  %v14473_v30 = vld [vmem:[#allocation6 + $0x7c4] sm:$0xf0]  ;;  %v12138_v16 = vld [vmem:[#allocation6 + $0x630] sm:$0xf] }
 0x2b1   :  { %8244 = vmatpush.bf16.msra.mxu3 %v12059_v7  ;;  %v15184_v7 = vpack.c.bf16 %v4571_v46, %v4571_v46  ;;  %v12291_v14 = vor.u32 %v14461_v9, %v12290_v4  ;;  %v14425_v46 = vld [vmem:[#allocation6 + $0x644] sm:$0xf0]  ;;  %v14423_v12 = vld [vmem:[#allocation6 + $0x634] sm:$0xf0]  ;;  %v12339_v18 = vor.u32 %v14473_v30, %v12338_v1  ;;  %v12322_v30 = vld [vmem:[#allocation6 + $0x7a0] sm:$0xf] }
 0x2b2   :  { %8206 = vmatpush.bf16.msra.mxu0 %v11859_v22  ;;  %v14443_v22 = vld [vmem:[#allocation6 + $0x6d4] sm:$0xf0]  ;;  %v4466_v4 = vpop.f32.mrf.mxu0 }
 0x2b3   :  { %8219 = vmatpush.bf16.msra.mxu1 %v11923_v37  ;;  %v12146_v37 = vld [vmem:[#allocation6 + $0x640] sm:$0xf]  ;;  %v12219_v44 = vor.u32 %v14443_v22, %v12218_v41  ;;  %v4479_v17 = vpop.f32.mrf.mxu1  ;;  %v12266_v41 = vld [vmem:[#allocation6 + $0x730] sm:$0xf]  ;;  %v14471_v34 = vld [vmem:[#allocation6 + $0x7b4] sm:$0xf0] }
 0x2b4   :  { %8232 = vmatpush.bf16.msra.mxu2 %v11987_v39  ;;  %v15192_v39 = vld [vmem:[#allocation4 + $0x20] sm:$0xf] }
 0x2b5   :  { %8245 = vmatpush.bf16.msra.mxu3 %v12051_v52  ;;  %8207 = vmatmul.bf16.vlgmr.msra.gmra.mxu0 %v15180_v40  ;;  %v698_v52 = vperm.slane %v15192_v39, 0  ;;  %v699_v22 = vperm.slane %v15192_v39, 1 }
 0x2b6   :  { %8251 = vmatpush.bf16.msrb.mxu0 %v12171_v55  ;;  %8220 = vmatmul.bf16.vlgmr.msra.gmra.mxu1 %v15182_v60  ;;  %v12347_v55 = vor.u32 %v14475_v49, %v12346_v29  ;;  %v12139_v49 = vor.u32 %v14423_v12, %v12138_v16 }
 0x2b7   :  { %8264 = vmatpush.bf16.msrb.mxu1 %v12235_v62  ;;  %8233 = vmatmul.bf16.vlgmr.msra.gmra.mxu2 %v15184_v7  ;;  %v14441_v62 = vld [vmem:[#allocation6 + $0x6c4] sm:$0xf0] }
 0x2b8   :  { %8277 = vmatpush.bf16.msrb.mxu2 %v12299_v63  ;;  %8246 = vmatmul.bf16.vlgmr.msra.gmra.mxu3 %v15186_v19  ;;  %v12274_v63 = vld [vmem:[#allocation6 + $0x740] sm:$0xf]  ;;  %v12211_v9 = vor.u32 %v14441_v62, %v12210_v48  ;;  %v14493_v19 = vld [vmem:[#allocation6 + $0x864] sm:$0xf0] }
 0x2b9   :  { %8290 = vmatpush.bf16.msrb.mxu3 %v12363_v51  ;;  %v12147_v51 = vor.u32 %v14425_v46, %v12146_v37  ;;  %v12275_v11 = vor.u32 %v14457_v0, %v12274_v63  ;;  %v12194_v46 = vld [vmem:[#allocation6 + $0x6a0] sm:$0xf]  ;;  %v14453_v63 = vld [vmem:[#allocation6 + $0x724] sm:$0xf0] }
 0x2ba   :  { %8252 = vmatpush.bf16.msrb.mxu0 %v12163_v13  ;;  %v12202_v13 = vld [vmem:[#allocation6 + $0x6b0] sm:$0xf]  ;;  %v4492_v48 = vpop.f32.mrf.mxu2  ;;  %v12258_v62 = vld [vmem:[#allocation6 + $0x720] sm:$0xf] }
 0x2bb   :  { %8265 = vmatpush.bf16.msrb.mxu1 %v12227_v32  ;;  %v14439_v32 = vld [vmem:[#allocation6 + $0x6b4] sm:$0xf0]  ;;  %v4493_v0 = vadd.f32 %v4492_v48, %v699_v22  ;;  %v4505_v1 = vpop.f32.mrf.mxu3  ;;  %v12259_v12 = vor.u32 %v14453_v63, %v12258_v62  ;;  %v14433_v48 = vld [vmem:[#allocation6 + $0x684] sm:$0xf0] }
 0x2bc   :  { %8278 = vmatpush.bf16.msrb.mxu2 %v12291_v14  ;;  %v4467_v14 = vadd.f32 %v4466_v4, %v698_v52  ;;  %v12331_v52 = vor.u32 %v14471_v34, %v12330_v25  ;;  %v14469_v4 = vld [vmem:[#allocation6 + $0x7a4] sm:$0xf0]  ;;  %v14451_v22 = vld [vmem:[#allocation6 + $0x714] sm:$0xf0]  ;;  %v12314_v25 = vld [vmem:[#allocation6 + $0x790] sm:$0xf] }
 0x2bd   :  { %8291 = vmatpush.bf16.msrb.mxu3 %v12355_v20  ;;  %v14455_v20 = vld [vmem:[#allocation6 + $0x734] sm:$0xf0]  ;;  %v15198_v16 = vadd.f32 %v4505_v1, %v4493_v0  ;;  %v14449_v63 = vld [vmem:[#allocation6 + $0x704] sm:$0xf0]  ;;  %v12306_v0 = vld [vmem:[#allocation6 + $0x780] sm:$0xf] }
 0x2be   :  { %8253 = vmatpush.bf16.msrb.mxu0 %v12155_v35  ;;  %v15196_v29 = vadd.f32 %v4479_v17, %v4467_v14  ;;  %v12203_v35 = vor.u32 %v14439_v32, %v12202_v13  ;;  %v12267_v37 = vor.u32 %v14455_v20, %v12266_v41  ;;  %v12122_v13 = vld [vmem:[#allocation6 + $0x610] sm:$0xf]  ;;  %v14419_v32 = vld [vmem:[#allocation6 + $0x614] sm:$0xf0]  ;;  %v4481_v17 = vpop.f32.mrf.mxu1  ;;  %v14465_v1 = vld [vmem:[#allocation6 + $0x784] sm:$0xf0] }
 0x2bf   :  { %8266 = vmatpush.bf16.msrb.mxu1 %v12219_v44  ;;  %v12130_v44 = vld [vmem:[#allocation6 + $0x620] sm:$0xf]  ;;  %v12186_v14 = vld [vmem:[#allocation6 + $0x690] sm:$0xf]  ;;  %v14435_v41 = vld [vmem:[#allocation6 + $0x694] sm:$0xf0] }
 0x2c0   :  { %8279 = vmatpush.bf16.msrb.mxu2 %v12283_v45  ;;  %v14421_v45 = vld [vmem:[#allocation6 + $0x624] sm:$0xf0]  ;;  %v12250_v20 = vld [vmem:[#allocation6 + $0x710] sm:$0xf]  ;;  %v14467_v34 = vld [vmem:[#allocation6 + $0x794] sm:$0xf0] }
 0x2c1   :  { %8292 = vmatpush.bf16.msrb.mxu3 %v12347_v55  ;;  %v14437_v55 = vld [vmem:[#allocation6 + $0x6a4] sm:$0xf0]  ;;  %v4574_v17 = vmax.f32 %v15056_v10, 0.0 }
 0x2c2   :  { %8254 = vmatpush.bf16.msrb.mxu0 %v12147_v51  ;;  %v12131_v51 = vor.u32 %v14421_v45, %v12130_v44  ;;  %v12114_v44 = vld [vmem:[#allocation6 + $0x600] sm:$0xf]  ;;  %v14417_v45 = vld [vmem:[#allocation6 + $0x604] sm:$0xf0]  ;;  %v4494_v62 = vpop.f32.mrf.mxu2 }
 0x2c3   :  { %8267 = vmatpush.bf16.msrb.mxu1 %v12211_v9  ;;  %v4468_v9 = vpop.f32.mrf.mxu0 }
 0x2c4   :  { %8280 = vmatpush.bf16.msrb.mxu2 %v12275_v11  ;;  %v12195_v11 = vor.u32 %v14437_v55, %v12194_v46  ;;  %v12178_v46 = vld [vmem:[#allocation6 + $0x680] sm:$0xf]  ;;  %v14495_v9 = vld [vmem:[#allocation6 + $0x874] sm:$0xf0] }
 0x2c5   :  { %8293 = vmatpush.bf16.msrb.mxu3 %v12339_v18  ;;  %v12323_v18 = vor.u32 %v14469_v4, %v12322_v30  ;;  %v12242_v55 = vld [vmem:[#allocation6 + $0x700] sm:$0xf]  ;;  %v4507_v30 = vpop.f32.mrf.mxu3  ;;  %v12426_v4 = vld [vmem:[#allocation6 + $0x870] sm:$0xf] }
 0x2c6   :  { %8255 = vmatpush.bf16.msrb.mxu0 %v12139_v49  ;;  %v12123_v49 = vor.u32 %v14419_v32, %v12122_v13  ;;  %v12115_v13 = vor.u32 %v14417_v45, %v12114_v44  ;;  %v14511_v32 = vld [vmem:[#allocation6 + $0x8f4] sm:$0xf0]  ;;  %v12427_v44 = vor.u32 %v14495_v9, %v12426_v4  ;;  %v12418_v30 = vld [vmem:[#allocation6 + $0x860] sm:$0xf]  ;;  %v12410_v4 = vld [vmem:[#allocation6 + $0x850] sm:$0xf] }
 0x2c7   :  { %8268 = vmatpush.bf16.msrb.mxu1 %v12203_v35  ;;  %v12187_v35 = vor.u32 %v14435_v41, %v12186_v14  ;;  %v4573_v14 = vmax.f32 %v15054_v53, 0.0  ;;  %v12243_v41 = vor.u32 %v14449_v63, %v12242_v55  ;;  %v12482_v53 = vld [vmem:[#allocation6 + $0x8e0] sm:$0xf]  ;;  %v14541_v55 = vld [vmem:[#allocation6 + $0x9e4] sm:$0xf0] }
 0x2c8   :  { %8281 = vmatpush.bf16.msrb.mxu2 %v12267_v37  ;;  %v12251_v37 = vor.u32 %v14451_v22, %v12250_v20  ;;  %v12618_v20 = vld [vmem:[#allocation6 + $0x9f0] sm:$0xf]  ;;  %v14543_v22 = vld [vmem:[#allocation6 + $0x9f4] sm:$0xf0] }
 0x2c9   :  { %8294 = vmatpush.bf16.msrb.mxu3 %v12331_v52  ;;  %v12315_v52 = vor.u32 %v14467_v34, %v12314_v25  ;;  %v4575_v25 = vmax.f32 %v15064_v8, 0.0  ;;  %v4576_v34 = vmax.f32 %v15066_v28, 0.0  ;;  %v12619_v10 = vor.u32 %v14543_v22, %v12618_v20  ;;  %v14491_v9 = vld [vmem:[#allocation6 + $0x854] sm:$0xf0] }
 0x2ca   :  { %8256 = vmatpush.bf16.msrb.mxu0 %v12131_v51  ;;  %v12490_v51 = vld [vmem:[#allocation6 + $0x8f0] sm:$0xf]  ;;  %v15204_v8 = vpack.c.bf16 %v4573_v14, %v4573_v14  ;;  %v15206_v28 = vpack.c.bf16 %v4574_v17, %v4574_v17  ;;  %v14523_v14 = vld [vmem:[#allocation6 + $0x954] sm:$0xf0] }
 0x2cb   :  { %8269 = vmatpush.bf16.msrb.mxu1 %v12195_v11  ;;  %v12554_v11 = vld [vmem:[#allocation6 + $0x970] sm:$0xf]  ;;  %v12491_v45 = vor.u32 %v14511_v32, %v12490_v51  ;;  %v15208_v63 = vpack.c.bf16 %v4575_v25, %v4575_v25  ;;  %v14539_v17 = vld [vmem:[#allocation6 + $0x9d4] sm:$0xf0]  ;;  %v12402_v25 = vld [vmem:[#allocation6 + $0x840] sm:$0xf] }
 0x2cc   :  { %8282 = vmatpush.bf16.msrb.mxu2 %v12259_v12  ;;  %v14527_v12 = vld [vmem:[#allocation6 + $0x974] sm:$0xf0]  ;;  %v12474_v51 = vld [vmem:[#allocation6 + $0x8d0] sm:$0xf] }
 0x2cd   :  { %8295 = vmatpush.bf16.msrb.mxu3 %v12323_v18  ;;  %v12179_v18 = vor.u32 %v14433_v48, %v12178_v46  ;;  %v12555_v62 = vor.u32 %v14527_v12, %v12554_v11  ;;  %v14525_v46 = vld [vmem:[#allocation6 + $0x964] sm:$0xf0]  ;;  %v12610_v48 = vld [vmem:[#allocation6 + $0x9e0] sm:$0xf]  ;;  %v14507_v11 = vld [vmem:[#allocation6 + $0x8d4] sm:$0xf0] }
 0x2ce   :  { %8257 = vmatpush.bf16.msrb.mxu0 %v12123_v49  ;;  %v12307_v49 = vor.u32 %v14465_v1, %v12306_v0  ;;  %v12611_v32 = vor.u32 %v14541_v55, %v12610_v48  ;;  %v12538_v12 = vld [vmem:[#allocation6 + $0x950] sm:$0xf]  ;;  %v12475_v20 = vor.u32 %v14507_v11, %v12474_v51  ;;  %v14503_v51 = vld [vmem:[#allocation6 + $0x8b4] sm:$0xf0] }
 0x2cf   :  { %8270 = vmatpush.bf16.msrb.mxu1 %v12187_v35  ;;  %v14509_v35 = vld [vmem:[#allocation6 + $0x8e4] sm:$0xf0]  ;;  %v12539_v22 = vor.u32 %v14523_v14, %v12538_v12  ;;  %v14519_v11 = vld [vmem:[#allocation6 + $0x934] sm:$0xf0]  ;;  %v12586_v14 = vld [vmem:[#allocation6 + $0x9b0] sm:$0xf] }
 0x2d0   :  { %8283 = vmatpush.bf16.msrb.mxu2 %v12251_v37  ;;  %v12546_v37 = vld [vmem:[#allocation6 + $0x960] sm:$0xf]  ;;  %v12483_v0 = vor.u32 %v14509_v35, %v12482_v53 }
 0x2d1   :  { %8296 = vmatpush.bf16.msrb.mxu3 %v12315_v52  ;;  %v12419_v52 = vor.u32 %v14493_v19, %v12418_v30  ;;  %v12547_v1 = vor.u32 %v14525_v46, %v12546_v37  ;;  %v12602_v19 = vld [vmem:[#allocation6 + $0x9d0] sm:$0xf]  ;;  %v14521_v30 = vld [vmem:[#allocation6 + $0x944] sm:$0xf0]  ;;  %v12594_v53 = vld [vmem:[#allocation6 + $0x9c0] sm:$0xf] }
 0x2d2   :  { %8258 = vmatpush.bf16.msrb.mxu0 %v12115_v13  ;;  %v15210_v13 = vpack.c.bf16 %v4576_v34, %v4576_v34  ;;  %v14489_v34 = vld [vmem:[#allocation6 + $0x844] sm:$0xf0]  ;;  %v4518_v35 = vpop.f32.mrf.mxu0 }
 0x2d3   :  { %8271 = vmatpush.bf16.msrb.mxu1 %v12179_v18  ;;  %v12411_v18 = vor.u32 %v14491_v9, %v12410_v4  ;;  %v12403_v37 = vor.u32 %v14489_v34, %v12402_v25  ;;  %v4531_v48 = vpop.f32.mrf.mxu1  ;;  %v12458_v4 = vld [vmem:[#allocation6 + $0x8b0] sm:$0xf]  ;;  %v14485_v25 = vld [vmem:[#allocation6 + $0x824] sm:$0xf0]  ;;  %v12450_v34 = vld [vmem:[#allocation6 + $0x8a0] sm:$0xf] }
 0x2d4   :  { %8284 = vmatpush.bf16.msrb.mxu2 %v12243_v41  ;;  %15406 = vst [vmem:[#allocation13_spill] sm:$0xff] %v15210_v13  ;;  %v700_v41 = vperm.slane %v15192_v39, 2 }
 0x2d5   :  { %8297 = vmatpush.bf16.msrb.mxu3 %v12307_v49  ;;  %8259 = vmatmul.bf16.vlgmr.msrb.gmra.mxu0 %v15204_v8  ;;  %v12466_v49 = vld [vmem:[#allocation6 + $0x8c0] sm:$0xf] }
 0x2d6   :  { %8303 = vmatpush.bf16.msra.mxu0 %v12427_v44  ;;  %8272 = vmatmul.bf16.vlgmr.msrb.gmra.mxu1 %v15206_v28  ;;  %v12603_v44 = vor.u32 %v14539_v17, %v12602_v19  ;;  %v4519_v46 = vadd.f32 %v4518_v35, %v700_v41  ;;  %v14535_v19 = vld [vmem:[#allocation6 + $0x9b4] sm:$0xf0]  ;;  %v701_v17 = vperm.slane %v15192_v39, 3  ;;  %v12459_v41 = vor.u32 %v14503_v51, %v12458_v4  ;;  %v12442_v4 = vld [vmem:[#allocation6 + $0x890] sm:$0xf] }
 0x2d7   :  { %8316 = vmatpush.bf16.msra.mxu1 %v12491_v45  ;;  %8285 = vmatmul.bf16.vlgmr.msrb.gmra.mxu2 %v15208_v63  ;;  %v14505_v45 = vld [vmem:[#allocation6 + $0x8c4] sm:$0xf0] }
 0x2d8   :  { %8329 = vmatpush.bf16.msra.mxu2 %v12555_v62  ;;  %8298 = vmatmul.bf16.vlgmr.msrb.gmra.mxu3 %v15210_v13  ;;  %v12530_v62 = vld [vmem:[#allocation6 + $0x940] sm:$0xf]  ;;  %v12467_v55 = vor.u32 %v14505_v45, %v12466_v49  ;;  %v15217_v12 = vadd.f32 %v4531_v48, %v4519_v46  ;;  %v12587_v49 = vor.u32 %v14535_v19, %v12586_v14  ;;  %v14515_v14 = vld [vmem:[#allocation6 + $0x914] sm:$0xf0]  ;;  %v12570_v19 = vld [vmem:[#allocation6 + $0x990] sm:$0xf] }
 0x2d9   :  { %8342 = vmatpush.bf16.msra.mxu3 %v12619_v10  ;;  %v14537_v10 = vld [vmem:[#allocation6 + $0x9c4] sm:$0xf0]  ;;  %v12514_v45 = vld [vmem:[#allocation6 + $0x920] sm:$0xf] }
 0x2da   :  { %8304 = vmatpush.bf16.msra.mxu0 %v12419_v52  ;;  %v12531_v52 = vor.u32 %v14521_v30, %v12530_v62  ;;  %v12595_v9 = vor.u32 %v14537_v10, %v12594_v53  ;;  %v14517_v62 = vld [vmem:[#allocation6 + $0x924] sm:$0xf0]  ;;  %v4544_v30 = vpop.f32.mrf.mxu2  ;;  %v12578_v53 = vld [vmem:[#allocation6 + $0x9a0] sm:$0xf]  ;;  %v4520_v39 = vpop.f32.mrf.mxu0 }
 0x2db   :  { %8317 = vmatpush.bf16.msra.mxu1 %v12483_v0  ;;  %v12394_v0 = vld [vmem:[#allocation6 + $0x830] sm:$0xf]  ;;  %v14533_v10 = vld [vmem:[#allocation6 + $0x9a4] sm:$0xf0]  ;;  %v4545_v35 = vadd.f32 %v4544_v30, %v701_v17  ;;  %v4557_v46 = vpop.f32.mrf.mxu3  ;;  %v4533_v48 = vpop.f32.mrf.mxu1  ;;  %v14531_v17 = vld [vmem:[#allocation6 + $0x994] sm:$0xf0] }
 0x2dc   :  { %8330 = vmatpush.bf16.msra.mxu2 %v12547_v1  ;;  %v14487_v1 = vld [vmem:[#allocation6 + $0x834] sm:$0xf0]  ;;  %v12579_v51 = vor.u32 %v14533_v10, %v12578_v53  ;;  %v12562_v30 = vld [vmem:[#allocation6 + $0x980] sm:$0xf]  ;;  %v14529_v53 = vld [vmem:[#allocation6 + $0x984] sm:$0xf0] }
 0x2dd   :  { %8343 = vmatpush.bf16.msra.mxu3 %v12611_v32  ;;  %v12522_v32 = vld [vmem:[#allocation6 + $0x930] sm:$0xf]  ;;  %v14557_v13 = vld [vmem:[#allocation6 + $0xa64] sm:$0xf0] }
 0x2de   :  { %8305 = vmatpush.bf16.msra.mxu0 %v12411_v18  ;;  %v12395_v18 = vor.u32 %v14487_v1, %v12394_v0  ;;  %v12378_v0 = vld [vmem:[#allocation6 + $0x810] sm:$0xf]  ;;  %v14483_v1 = vld [vmem:[#allocation6 + $0x814] sm:$0xf0] }
 0x2df   :  { %8318 = vmatpush.bf16.msra.mxu1 %v12475_v20  ;;  %v12523_v20 = vor.u32 %v14519_v11, %v12522_v32  ;;  %v14499_v32 = vld [vmem:[#allocation6 + $0x894] sm:$0xf0]  ;;  %v12506_v11 = vld [vmem:[#allocation6 + $0x910] sm:$0xf] }
 0x2e0   :  { %8331 = vmatpush.bf16.msra.mxu2 %v12539_v22  ;;  %v12386_v22 = vld [vmem:[#allocation6 + $0x820] sm:$0xf]  ;;  %v12746_v39 = vld [vmem:[#allocation6 + $0xaf0] sm:$0xf] }
 0x2e1   :  { %8344 = vmatpush.bf16.msra.mxu3 %v12603_v44  ;;  %v14501_v44 = vld [vmem:[#allocation6 + $0x8a4] sm:$0xf0] }
 0x2e2   :  { %8306 = vmatpush.bf16.msra.mxu0 %v12403_v37  ;;  %v12387_v37 = vor.u32 %v14485_v25, %v12386_v22  ;;  %v12370_v22 = vld [vmem:[#allocation6 + $0x800] sm:$0xf]  ;;  %v14481_v25 = vld [vmem:[#allocation6 + $0x804] sm:$0xf0]  ;;  %v4546_v10 = vpop.f32.mrf.mxu2 }
 0x2e3   :  { %8319 = vmatpush.bf16.msra.mxu1 %v12467_v55  ;;  %v12451_v55 = vor.u32 %v14501_v44, %v12450_v34  ;;  %v12434_v34 = vld [vmem:[#allocation6 + $0x880] sm:$0xf]  ;;  %v14497_v44 = vld [vmem:[#allocation6 + $0x884] sm:$0xf0]  ;;  %v12371_v48 = vor.u32 %v14481_v25, %v12370_v22 }
 0x2e4   :  { %8332 = vmatpush.bf16.msra.mxu2 %v12531_v52  ;;  %v12515_v52 = vor.u32 %v14517_v62, %v12514_v45  ;;  %v12498_v45 = vld [vmem:[#allocation6 + $0x900] sm:$0xf]  ;;  %v12571_v62 = vor.u32 %v14531_v17, %v12570_v19  ;;  %v4579_v19 = vmax.f32 %v15086_v3, 0.0  ;;  %v4580_v17 = vmax.f32 %v15088_v24, 0.0 }
 0x2e5   :  { %8345 = vmatpush.bf16.msra.mxu3 %v12595_v9  ;;  %v15220_v9 = vadd.f32 %v4557_v46, %v4545_v35  ;;  %v12682_v35 = vld [vmem:[#allocation6 + $0xa70] sm:$0xf]  ;;  %v14559_v46 = vld [vmem:[#allocation6 + $0xa74] sm:$0xf0] }
 0x2e6   :  { %8307 = vmatpush.bf16.msra.mxu0 %v12395_v18  ;;  %v12379_v18 = vor.u32 %v14483_v1, %v12378_v0  ;;  %v14575_v0 = vld [vmem:[#allocation6 + $0xaf4] sm:$0xf0]  ;;  %v4577_v1 = vmax.f32 %v15076_v33, 0.0  ;;  %v12683_v22 = vor.u32 %v14559_v46, %v12682_v35  ;;  %v12738_v33 = vld [vmem:[#allocation6 + $0xae0] sm:$0xf] }
 0x2e7   :  { %8320 = vmatpush.bf16.msra.mxu1 %v12459_v41  ;;  %v12443_v41 = vor.u32 %v14499_v32, %v12442_v4  ;;  %v4578_v4 = vmax.f32 %v15078_v57, 0.0  ;;  %v12747_v25 = vor.u32 %v14575_v0, %v12746_v39  ;;  %v14555_v46 = vld [vmem:[#allocation6 + $0xa54] sm:$0xf0]  ;;  %v12730_v39 = vld [vmem:[#allocation6 + $0xad0] sm:$0xf]  ;;  %v15232_v0 = vpack.c.bf16 %v4580_v17, %v4580_v17 }
 0x2e8   :  { %8333 = vmatpush.bf16.msra.mxu2 %v12523_v20  ;;  %v12507_v20 = vor.u32 %v14515_v14, %v12506_v11  ;;  %v12874_v11 = vld [vmem:[#allocation6 + $0xbf0] sm:$0xf]  ;;  %v14607_v14 = vld [vmem:[#allocation6 + $0xbf4] sm:$0xf0]  ;;  %v15226_v3 = vpack.c.bf16 %v4577_v1, %v4577_v1  ;;  %v12658_v17 = vld [vmem:[#allocation6 + $0xa40] sm:$0xf] }
 0x2e9   :  { %8346 = vmatpush.bf16.msra.mxu3 %v12587_v49  ;;  %v14513_v49 = vld [vmem:[#allocation6 + $0x904] sm:$0xf0]  ;;  %v12875_v57 = vor.u32 %v14607_v14, %v12874_v11  ;;  %v15228_v24 = vpack.c.bf16 %v4578_v4, %v4578_v4  ;;  %15407 = vst [vmem:[#allocation14_spill] sm:$0xff] %v15232_v0  ;;  %v12794_v1 = vld [vmem:[#allocation6 + $0xb50] sm:$0xf] }
 0x2ea   :  { %8308 = vmatpush.bf16.msra.mxu0 %v12387_v37  ;;  %v4559_v37 = vpop.f32.mrf.mxu3  ;;  %v12499_v32 = vor.u32 %v14513_v49, %v12498_v45  ;;  %v14605_v45 = vld [vmem:[#allocation6 + $0xbe4] sm:$0xf0]  ;;  %v12666_v49 = vld [vmem:[#allocation6 + $0xa50] sm:$0xf]  ;;  %v14587_v4 = vld [vmem:[#allocation6 + $0xb54] sm:$0xf0] }
 0x2eb   :  { %8321 = vmatpush.bf16.msra.mxu1 %v12451_v55  ;;  %v12810_v55 = vld [vmem:[#allocation6 + $0xb70] sm:$0xf]  ;;  %v12674_v37 = vld [vmem:[#allocation6 + $0xa60] sm:$0xf] }
 0x2ec   :  { %8334 = vmatpush.bf16.msra.mxu2 %v12515_v52  ;;  %v14591_v52 = vld [vmem:[#allocation6 + $0xb74] sm:$0xf0] }
 0x2ed   :  { %8347 = vmatpush.bf16.msra.mxu3 %v12579_v51  ;;  %v12435_v51 = vor.u32 %v14497_v44, %v12434_v34  ;;  %v12811_v10 = vor.u32 %v14591_v52, %v12810_v55  ;;  %v14589_v34 = vld [vmem:[#allocation6 + $0xb64] sm:$0xf0]  ;;  %v12866_v44 = vld [vmem:[#allocation6 + $0xbe0] sm:$0xf]  ;;  %v14571_v52 = vld [vmem:[#allocation6 + $0xad4] sm:$0xf0] }
 0x2ee   :  { %8309 = vmatpush.bf16.msra.mxu0 %v12379_v18  ;;  %v12563_v18 = vor.u32 %v14529_v53, %v12562_v30  ;;  %v15230_v30 = vpack.c.bf16 %v4579_v19, %v4579_v19  ;;  %v12867_v55 = vor.u32 %v14605_v45, %v12866_v44  ;;  %v12731_v14 = vor.u32 %v14571_v52, %v12730_v39  ;;  %v12778_v52 = vld [vmem:[#allocation6 + $0xb30] sm:$0xf] }
 0x2ef   :  { %8322 = vmatpush.bf16.msra.mxu1 %v12443_v41  ;;  %v14573_v41 = vld [vmem:[#allocation6 + $0xae4] sm:$0xf0]  ;;  %v12795_v19 = vor.u32 %v14587_v4, %v12794_v1  ;;  %v14583_v1 = vld [vmem:[#allocation6 + $0xb34] sm:$0xf0]  ;;  %v12842_v4 = vld [vmem:[#allocation6 + $0xbb0] sm:$0xf] }
 0x2f0   :  { %8335 = vmatpush.bf16.msra.mxu2 %v12507_v20  ;;  %v12802_v20 = vld [vmem:[#allocation6 + $0xb60] sm:$0xf]  ;;  %v12739_v53 = vor.u32 %v14573_v41, %v12738_v33  ;;  %v14585_v33 = vld [vmem:[#allocation6 + $0xb44] sm:$0xf0] }
 0x2f1   :  { %8348 = vmatpush.bf16.msra.mxu3 %v12571_v62  ;;  %v12675_v62 = vor.u32 %v14557_v13, %v12674_v37  ;;  %v12803_v35 = vor.u32 %v14589_v34, %v12802_v20  ;;  %v12858_v13 = vld [vmem:[#allocation6 + $0xbd0] sm:$0xf]  ;;  %v12786_v37 = vld [vmem:[#allocation6 + $0xb40] sm:$0xf]  ;;  %v14601_v20 = vld [vmem:[#allocation6 + $0xbc4] sm:$0xf0] }
 0x2f2   :  { %8310 = vmatpush.bf16.msra.mxu0 %v12371_v48  ;;  %v5209_v48 = vld [vmem:[#allocation7] sm:$0x3] }
 0x2f3   :  { %8323 = vmatpush.bf16.msra.mxu1 %v12435_v51  ;;  %v14603_v51 = vld [vmem:[#allocation6 + $0xbd4] sm:$0xf0]  ;;  %v5211_v11 = vperm.slane %v5209_v48, 0  ;;  %v12850_v41 = vld [vmem:[#allocation6 + $0xbc0] sm:$0xf]  ;;  %v8117_v44 = vpop.f32.mrf.mxu1 }
 0x2f4   :  { %8336 = vmatpush.bf16.msra.mxu2 %v12499_v32  ;;  %v12667_v32 = vor.u32 %v14555_v46, %v12666_v49  ;;  %v12787_v49 = vor.u32 %v14585_v33, %v12786_v37  ;;  %v12714_v46 = vld [vmem:[#allocation6 + $0xab0] sm:$0xf]  ;;  %v12851_v48 = vor.u32 %v14601_v20, %v12850_v41  ;;  %v14581_v37 = vld [vmem:[#allocation6 + $0xb24] sm:$0xf0]  ;;  %v12834_v20 = vld [vmem:[#allocation6 + $0xba0] sm:$0xf] }
 0x2f5   :  { %8349 = vmatpush.bf16.msra.mxu3 %v12563_v18  ;;  %8311 = vmatmul.bf16.vlgmr.msra.gmra.mxu0 %v15226_v3  ;;  %v14553_v18 = vld [vmem:[#allocation6 + $0xa44] sm:$0xf0] }
 0x2f6   :  { %8355 = vmatpush.bf16.msrb.mxu0 %v12683_v22  ;;  %8324 = vmatmul.bf16.vlgmr.msra.gmra.mxu1 %v15228_v24  ;;  %v12722_v22 = vld [vmem:[#allocation6 + $0xac0] sm:$0xf]  ;;  %v12659_v45 = vor.u32 %v14553_v18, %v12658_v17 }
 0x2f7   :  { %8368 = vmatpush.bf16.msrb.mxu1 %v12747_v25  ;;  %8337 = vmatmul.bf16.vlgmr.msra.gmra.mxu2 %v15230_v30  ;;  %v12859_v25 = vor.u32 %v14603_v51, %v12858_v13  ;;  %v14599_v13 = vld [vmem:[#allocation6 + $0xbb4] sm:$0xf0]  ;;  %v12706_v17 = vld [vmem:[#allocation6 + $0xaa0] sm:$0xf] }
 0x2f8   :  { %8381 = vmatpush.bf16.msrb.mxu2 %v12811_v10  ;;  %8350 = vmatmul.bf16.vlgmr.msra.gmra.mxu3 %v15232_v0  ;;  %v14569_v10 = vld [vmem:[#allocation6 + $0xac4] sm:$0xf0]  ;;  %v12843_v18 = vor.u32 %v14599_v13, %v12842_v4  ;;  %v12826_v4 = vld [vmem:[#allocation6 + $0xb90] sm:$0xf]  ;;  %v14595_v13 = vld [vmem:[#allocation6 + $0xb94] sm:$0xf0] }
 0x2f9   :  { %8394 = vmatpush.bf16.msrb.mxu3 %v12875_v57  ;;  %v8104_v57 = vpop.f32.mrf.mxu0  ;;  %v14621_v0 = vld [vmem:[#allocation6 + $0xc64] sm:$0xf0] }
 0x2fa   :  { %8356 = vmatpush.bf16.msrb.mxu0 %v12675_v62  ;;  %v8105_v34 = vadd.f32 %v8104_v57, %v5211_v11  ;;  %v12723_v62 = vor.u32 %v14569_v10, %v12722_v22  ;;  %v12779_v11 = vor.u32 %v14583_v1, %v12778_v52  ;;  %v8130_v22 = vpop.f32.mrf.mxu2  ;;  %v12770_v10 = vld [vmem:[#allocation6 + $0xb20] sm:$0xf]  ;;  %v14563_v52 = vld [vmem:[#allocation6 + $0xa94] sm:$0xf0] }
 0x2fb   :  { %8369 = vmatpush.bf16.msrb.mxu1 %v12739_v53  ;;  %v12650_v53 = vld [vmem:[#allocation6 + $0xa30] sm:$0xf]  ;;  %v8143_v57 = vpop.f32.mrf.mxu3  ;;  %v14579_v1 = vld [vmem:[#allocation6 + $0xb14] sm:$0xf0] }
 0x2fc   :  { %8382 = vmatpush.bf16.msrb.mxu2 %v12803_v35  ;;  %v14551_v35 = vld [vmem:[#allocation6 + $0xa34] sm:$0xf0]  ;;  %v8118_v39 = vadd.f32 %v8117_v44, %v8105_v34  ;;  %v14597_v34 = vld [vmem:[#allocation6 + $0xba4] sm:$0xf0]  ;;  %v8119_v44 = vpop.f32.mrf.mxu1 }
 0x2fd   :  { %8395 = vmatpush.bf16.msrb.mxu3 %v12867_v55  ;;  %v14567_v55 = vld [vmem:[#allocation6 + $0xab4] sm:$0xf0]  ;;  %v12651_v51 = vor.u32 %v14551_v35, %v12650_v53  ;;  %v12771_v53 = vor.u32 %v14581_v37, %v12770_v10  ;;  %v12634_v35 = vld [vmem:[#allocation6 + $0xa10] sm:$0xf]  ;;  %v12827_v10 = vor.u32 %v14595_v13, %v12826_v4  ;;  %v14577_v37 = vld [vmem:[#allocation6 + $0xb04] sm:$0xf0] }
 0x2fe   :  { %8357 = vmatpush.bf16.msrb.mxu0 %v12667_v32  ;;  %v12715_v32 = vor.u32 %v14567_v55, %v12714_v46  ;;  %v8131_v33 = vadd.f32 %v8130_v22, %v8118_v39  ;;  %v14547_v46 = vld [vmem:[#allocation6 + $0xa14] sm:$0xf0]  ;;  %v12835_v55 = vor.u32 %v14597_v34, %v12834_v20  ;;  %v12762_v39 = vld [vmem:[#allocation6 + $0xb10] sm:$0xf]  ;;  %v12626_v22 = vld [vmem:[#allocation6 + $0xa00] sm:$0xf] }
 0x2ff   :  { %8370 = vmatpush.bf16.msrb.mxu1 %v12731_v14  ;;  %v12642_v14 = vld [vmem:[#allocation6 + $0xa20] sm:$0xf]  ;;  %v12938_v20 = vld [vmem:[#allocation6 + $0xc70] sm:$0xf]  ;;  %v14623_v34 = vld [vmem:[#allocation6 + $0xc74] sm:$0xf0] }
 0x300   :  { %8383 = vmatpush.bf16.msrb.mxu2 %v12795_v19  ;;  %v14549_v19 = vld [vmem:[#allocation6 + $0xa24] sm:$0xf0]  ;;  %v13002_v44 = vld [vmem:[#allocation6 + $0xcf0] sm:$0xf]  ;;  %v4583_v4 = vmax.f32 %v15106_v26, 0.0  ;;  %v4584_v13 = vmax.f32 %v15108_v56, 0.0 }
 0x301   :  { %8396 = vmatpush.bf16.msrb.mxu3 %v12859_v25  ;;  %v14565_v25 = vld [vmem:[#allocation6 + $0xaa4] sm:$0xf0]  ;;  %v8106_v41 = vpop.f32.mrf.mxu0 }
 0x302   :  { %8358 = vmatpush.bf16.msrb.mxu0 %v12659_v45  ;;  %v12643_v45 = vor.u32 %v14549_v19, %v12642_v14  ;;  %v14545_v14 = vld [vmem:[#allocation6 + $0xa04] sm:$0xf0]  ;;  %v12690_v19 = vld [vmem:[#allocation6 + $0xa80] sm:$0xf] }
 0x303   :  { %8371 = vmatpush.bf16.msrb.mxu1 %v12723_v62  ;;  %v15238_v62 = vadd.f32 %v8143_v57, %v8131_v33  ;;  %v12818_v33 = vld [vmem:[#allocation6 + $0xb80] sm:$0xf]  ;;  %v14593_v57 = vld [vmem:[#allocation6 + $0xb84] sm:$0xf0]  ;;  %v8145_v41 = vpop.f32.mrf.mxu3 }
 0x304   :  { %8384 = vmatpush.bf16.msrb.mxu2 %v12787_v49  ;;  %v12707_v49 = vor.u32 %v14565_v25, %v12706_v17  ;;  %v14561_v17 = vld [vmem:[#allocation6 + $0xa84] sm:$0xf0]  ;;  %v12754_v25 = vld [vmem:[#allocation6 + $0xb00] sm:$0xf] }
 0x305   :  { %8397 = vmatpush.bf16.msrb.mxu3 %v12851_v48  ;;  %v12698_v48 = vld [vmem:[#allocation6 + $0xa90] sm:$0xf]  ;;  %v12930_v41 = vld [vmem:[#allocation6 + $0xc60] sm:$0xf] }
 0x306   :  { %8359 = vmatpush.bf16.msrb.mxu0 %v12651_v51  ;;  %v12635_v51 = vor.u32 %v14547_v46, %v12634_v35  ;;  %v14639_v35 = vld [vmem:[#allocation6 + $0xcf4] sm:$0xf0]  ;;  %v4581_v46 = vmax.f32 %v15096_v43, 0.0  ;;  %v12994_v43 = vld [vmem:[#allocation6 + $0xce0] sm:$0xf] }
 0x307   :  { %8372 = vmatpush.bf16.msrb.mxu1 %v12715_v32  ;;  %v12699_v32 = vor.u32 %v14563_v52, %v12698_v48  ;;  %v4582_v48 = vmax.f32 %v15098_v6, 0.0  ;;  %v12755_v52 = vor.u32 %v14577_v37, %v12754_v25  ;;  %v14669_v25 = vld [vmem:[#allocation6 + $0xde4] sm:$0xf0]  ;;  %v15248_v37 = vpack.c.bf16 %v4583_v4, %v4583_v4 }
 0x308   :  { %8385 = vmatpush.bf16.msrb.mxu2 %v12779_v11  ;;  %v12763_v11 = vor.u32 %v14579_v1, %v12762_v39  ;;  %v13130_v39 = vld [vmem:[#allocation6 + $0xdf0] sm:$0xf]  ;;  %v14671_v1 = vld [vmem:[#allocation6 + $0xdf4] sm:$0xf0]  ;;  %v15244_v26 = vpack.c.bf16 %v4581_v46, %v4581_v46  ;;  %v14617_v4 = vld [vmem:[#allocation6 + $0xc44] sm:$0xf0] }
 0x309   :  { %8398 = vmatpush.bf16.msrb.mxu3 %v12843_v18  ;;  %v8132_v18 = vpop.f32.mrf.mxu2  ;;  %v13131_v6 = vor.u32 %v14671_v1, %v13130_v39  ;;  %v15246_v56 = vpack.c.bf16 %v4582_v48, %v4582_v48  ;;  %v14651_v46 = vld [vmem:[#allocation6 + $0xd54] sm:$0xf0]  ;;  %v12914_v1 = vld [vmem:[#allocation6 + $0xc40] sm:$0xf] }
 0x30a   :  { %8360 = vmatpush.bf16.msrb.mxu0 %v12643_v45  ;;  %v12627_v45 = vor.u32 %v14545_v14, %v12626_v22  ;;  %v12939_v22 = vor.u32 %v14623_v34, %v12938_v20  ;;  %v13003_v14 = vor.u32 %v14639_v35, %v13002_v44  ;;  %v12922_v20 = vld [vmem:[#allocation6 + $0xc50] sm:$0xf]  ;;  %v14619_v34 = vld [vmem:[#allocation6 + $0xc54] sm:$0xf0] }
 0x30b   :  { %8373 = vmatpush.bf16.msrb.mxu1 %v12707_v49  ;;  %v13066_v49 = vld [vmem:[#allocation6 + $0xd70] sm:$0xf]  ;;  %v14667_v48 = vld [vmem:[#allocation6 + $0xdd4] sm:$0xf0] }
 0x30c   :  { %8386 = vmatpush.bf16.msrb.mxu2 %v12771_v53  ;;  %v14655_v53 = vld [vmem:[#allocation6 + $0xd74] sm:$0xf0]  ;;  %v12986_v44 = vld [vmem:[#allocation6 + $0xcd0] sm:$0xf] }
 0x30d   :  { %8399 = vmatpush.bf16.msrb.mxu3 %v12835_v55  ;;  %v12691_v55 = vor.u32 %v14561_v17, %v12690_v19  ;;  %v13067_v18 = vor.u32 %v14655_v53, %v13066_v49  ;;  %v14653_v19 = vld [vmem:[#allocation6 + $0xd64] sm:$0xf0]  ;;  %v13122_v17 = vld [vmem:[#allocation6 + $0xde0] sm:$0xf]  ;;  %v14635_v49 = vld [vmem:[#allocation6 + $0xcd4] sm:$0xf0] }
 0x30e   :  { %8361 = vmatpush.bf16.msrb.mxu0 %v12635_v51  ;;  %v12819_v51 = vor.u32 %v14593_v57, %v12818_v33  ;;  %v13123_v35 = vor.u32 %v14669_v25, %v13122_v17  ;;  %v13050_v53 = vld [vmem:[#allocation6 + $0xd50] sm:$0xf] }
 0x30f   :  { %8374 = vmatpush.bf16.msrb.mxu1 %v12699_v32  ;;  %v14637_v32 = vld [vmem:[#allocation6 + $0xce4] sm:$0xf0]  ;;  %v13051_v39 = vor.u32 %v14651_v46, %v13050_v53  ;;  %v13098_v53 = vld [vmem:[#allocation6 + $0xdb0] sm:$0xf]  ;;  %v14663_v46 = vld [vmem:[#allocation6 + $0xdb4] sm:$0xf0] }
 0x310   :  { %8387 = vmatpush.bf16.msrb.mxu2 %v12763_v11  ;;  %v13058_v11 = vld [vmem:[#allocation6 + $0xd60] sm:$0xf]  ;;  %v12995_v33 = vor.u32 %v14637_v32, %v12994_v43 }
 0x311   :  { %8400 = vmatpush.bf16.msrb.mxu3 %v12827_v10  ;;  %v12931_v10 = vor.u32 %v14621_v0, %v12930_v41  ;;  %v13059_v57 = vor.u32 %v14653_v19, %v13058_v11  ;;  %v13114_v0 = vld [vmem:[#allocation6 + $0xdd0] sm:$0xf]  ;;  %v13106_v43 = vld [vmem:[#allocation6 + $0xdc0] sm:$0xf]  ;;  %v12915_v19 = vor.u32 %v14617_v4, %v12914_v1  ;;  %v13099_v1 = vor.u32 %v14663_v46, %v13098_v53  ;;  %v14659_v53 = vld [vmem:[#allocation6 + $0xd94] sm:$0xf0] }
 0x312   :  { %8362 = vmatpush.bf16.msrb.mxu0 %v12627_v45  ;;  %v15250_v45 = vpack.c.bf16 %v4584_v13, %v4584_v13  ;;  %v12978_v13 = vld [vmem:[#allocation6 + $0xcc0] sm:$0xf]  ;;  %v8156_v41 = vpop.f32.mrf.mxu0 }
 0x313   :  { %8375 = vmatpush.bf16.msrb.mxu1 %v12691_v55  ;;  %v12923_v55 = vor.u32 %v14619_v34, %v12922_v20  ;;  %v8157_v32 = vadd.f32 %v8156_v41, %v15238_v62  ;;  %v8169_v11 = vpop.f32.mrf.mxu1 }
 0x314   :  { %8388 = vmatpush.bf16.msrb.mxu2 %v12755_v52  ;;  %v12987_v52 = vor.u32 %v14635_v49, %v12986_v44  ;;  %v14631_v44 = vld [vmem:[#allocation6 + $0xcb4] sm:$0xf0] }
 0x315   :  { %8401 = vmatpush.bf16.msrb.mxu3 %v12819_v51  ;;  %8363 = vmatmul.bf16.vlgmr.msrb.gmra.mxu0 %v15244_v26  ;;  %v13115_v51 = vor.u32 %v14667_v48, %v13114_v0  ;;  %v8170_v20 = vadd.f32 %v8169_v11, %v8157_v32  ;;  %v14647_v49 = vld [vmem:[#allocation6 + $0xd34] sm:$0xf0] }
 0x316   :  { %8407 = vmatpush.bf16.msra.mxu0 %v12939_v22  ;;  %8376 = vmatmul.bf16.vlgmr.msrb.gmra.mxu1 %v15246_v56  ;;  %v14633_v22 = vld [vmem:[#allocation6 + $0xcc4] sm:$0xf0] }
 0x317   :  { %8420 = vmatpush.bf16.msra.mxu1 %v13003_v14  ;;  %8389 = vmatmul.bf16.vlgmr.msrb.gmra.mxu2 %v15248_v37  ;;  %v13042_v14 = vld [vmem:[#allocation6 + $0xd40] sm:$0xf]  ;;  %v12979_v17 = vor.u32 %v14633_v22, %v12978_v13  ;;  %v14629_v13 = vld [vmem:[#allocation6 + $0xca4] sm:$0xf0] }
 0x318   :  { %8433 = vmatpush.bf16.msra.mxu2 %v13067_v18  ;;  %8402 = vmatmul.bf16.vlgmr.msrb.gmra.mxu3 %v15250_v45  ;;  %v14649_v18 = vld [vmem:[#allocation6 + $0xd44] sm:$0xf0] }
 0x319   :  { %8446 = vmatpush.bf16.msra.mxu3 %v13131_v6  ;;  %v14665_v6 = vld [vmem:[#allocation6 + $0xdc4] sm:$0xf0]  ;;  %v13043_v25 = vor.u32 %v14649_v18, %v13042_v14 }
 0x31a   :  { %8408 = vmatpush.bf16.msra.mxu0 %v12931_v10  ;;  %v12906_v10 = vld [vmem:[#allocation6 + $0xc30] sm:$0xf]  ;;  %v13107_v34 = vor.u32 %v14665_v6, %v13106_v43  ;;  %v8182_v4 = vpop.f32.mrf.mxu2  ;;  %v14645_v22 = vld [vmem:[#allocation6 + $0xd24] sm:$0xf0]  ;;  %v8158_v41 = vpop.f32.mrf.mxu0  ;;  %v13090_v43 = vld [vmem:[#allocation6 + $0xda0] sm:$0xf] }
 0x31b   :  { %8421 = vmatpush.bf16.msra.mxu1 %v12995_v33  ;;  %v14615_v33 = vld [vmem:[#allocation6 + $0xc34] sm:$0xf0]  ;;  %v8183_v14 = vadd.f32 %v8182_v4, %v8170_v20  ;;  %v8195_v18 = vpop.f32.mrf.mxu3  ;;  %v14661_v6 = vld [vmem:[#allocation6 + $0xda4] sm:$0xf0]  ;;  %v8171_v32 = vpop.f32.mrf.mxu1  ;;  %v13018_v20 = vld [vmem:[#allocation6 + $0xd10] sm:$0xf] }
 0x31c   :  { %8434 = vmatpush.bf16.msra.mxu2 %v13059_v57  ;;  %v12970_v57 = vld [vmem:[#allocation6 + $0xcb0] sm:$0xf]  ;;  %v12907_v0 = vor.u32 %v14615_v33, %v12906_v10  ;;  %v14611_v33 = vld [vmem:[#allocation6 + $0xc14] sm:$0xf0]  ;;  %v13010_v4 = vld [vmem:[#allocation6 + $0xd00] sm:$0xf] }
 0x31d   :  { %8447 = vmatpush.bf16.msra.mxu3 %v13123_v35  ;;  %v13034_v35 = vld [vmem:[#allocation6 + $0xd30] sm:$0xf]  ;;  %v12971_v62 = vor.u32 %v14631_v44, %v12970_v57  ;;  %v14627_v44 = vld [vmem:[#allocation6 + $0xc94] sm:$0xf0] }
 0x31e   :  { %8409 = vmatpush.bf16.msra.mxu0 %v12923_v55  ;;  %v13035_v48 = vor.u32 %v14647_v49, %v13034_v35  ;;  %v12898_v55 = vld [vmem:[#allocation6 + $0xc20] sm:$0xf]  ;;  %v12890_v10 = vld [vmem:[#allocation6 + $0xc10] sm:$0xf]  ;;  %v14643_v35 = vld [vmem:[#allocation6 + $0xd14] sm:$0xf0] }
 0x31f   :  { %8422 = vmatpush.bf16.msra.mxu1 %v12987_v52  ;;  %v14613_v52 = vld [vmem:[#allocation6 + $0xc24] sm:$0xf0]  ;;  %v12954_v57 = vld [vmem:[#allocation6 + $0xc90] sm:$0xf]  ;;  %v12891_v46 = vor.u32 %v14611_v33, %v12890_v10  ;;  %v4585_v10 = vmax.f32 %v15118_v21, 0.0  ;;  %v4586_v33 = vmax.f32 %v15120_v50, 0.0 }
 0x320   :  { %8435 = vmatpush.bf16.msra.mxu2 %v13051_v39  ;;  %v12962_v39 = vld [vmem:[#allocation6 + $0xca0] sm:$0xf]  ;;  %v12899_v11 = vor.u32 %v14613_v52, %v12898_v55  ;;  %v13082_v49 = vld [vmem:[#allocation6 + $0xd90] sm:$0xf]  ;;  %v14609_v55 = vld [vmem:[#allocation6 + $0xc04] sm:$0xf0] }
 0x321   :  { %8448 = vmatpush.bf16.msra.mxu3 %v13115_v51  ;;  %v13026_v51 = vld [vmem:[#allocation6 + $0xd20] sm:$0xf]  ;;  %v13194_v41 = vld [vmem:[#allocation6 + $0xe70] sm:$0xf] }
 0x322   :  { %8410 = vmatpush.bf16.msra.mxu0 %v12915_v19  ;;  %v15257_v19 = vadd.f32 %v8195_v18, %v8183_v14  ;;  %v12946_v52 = vld [vmem:[#allocation6 + $0xc80] sm:$0xf]  ;;  %v14657_v14 = vld [vmem:[#allocation6 + $0xd84] sm:$0xf0] }
 0x323   :  { %8423 = vmatpush.bf16.msra.mxu1 %v12979_v17  ;;  %v12963_v17 = vor.u32 %v14629_v13, %v12962_v39  ;;  %v14625_v39 = vld [vmem:[#allocation6 + $0xc84] sm:$0xf0]  ;;  %v13083_v13 = vor.u32 %v14659_v53, %v13082_v49  ;;  %v8197_v18 = vpop.f32.mrf.mxu3  ;;  %v4588_v49 = vmax.f32 %v15130_v59, 0.0  ;;  %v13250_v21 = vld [vmem:[#allocation6 + $0xee0] sm:$0xf]  ;;  %v15265_v59 = vpack.c.bf16 %v4586_v33, %v4586_v33 }
 0x324   :  { %8436 = vmatpush.bf16.msra.mxu2 %v13043_v25  ;;  %v13027_v25 = vor.u32 %v14645_v22, %v13026_v51  ;;  %v14641_v51 = vld [vmem:[#allocation6 + $0xd04] sm:$0xf0]  ;;  %v13074_v22 = vld [vmem:[#allocation6 + $0xd80] sm:$0xf]  ;;  %v13370_v33 = vld [vmem:[#allocation6 + $0xfd0] sm:$0xf] }
 0x325   :  { %8449 = vmatpush.bf16.msra.mxu3 %v13107_v34  ;;  %v13091_v34 = vor.u32 %v14661_v6, %v13090_v43  ;;  %v14687_v43 = vld [vmem:[#allocation6 + $0xe74] sm:$0xf0]  ;;  %v13258_v6 = vld [vmem:[#allocation6 + $0xef0] sm:$0xf]  ;;  %v13075_v53 = vor.u32 %v14657_v14, %v13074_v22  ;;  %v14685_v18 = vld [vmem:[#allocation6 + $0xe64] sm:$0xf0] }
 0x326   :  { %8411 = vmatpush.bf16.msra.mxu0 %v12907_v0  ;;  %v12882_v0 = vld [vmem:[#allocation6 + $0xc00] sm:$0xf] }
 0x327   :  { %8424 = vmatpush.bf16.msra.mxu1 %v12971_v62  ;;  %v12955_v62 = vor.u32 %v14627_v44, %v12954_v57  ;;  %v12883_v32 = vor.u32 %v14609_v55, %v12882_v0  ;;  %v12947_v57 = vor.u32 %v14625_v39, %v12946_v52  ;;  %v13386_v44 = vld [vmem:[#allocation6 + $0xff0] sm:$0xf]  ;;  %v14717_v52 = vld [vmem:[#allocation6 + $0xf64] sm:$0xf0]  ;;  %v13378_v39 = vld [vmem:[#allocation6 + $0xfe0] sm:$0xf] }
 0x328   :  { %8437 = vmatpush.bf16.msra.mxu2 %v13035_v48  ;;  %v13019_v48 = vor.u32 %v14643_v35, %v13018_v20  ;;  %v14735_v20 = vld [vmem:[#allocation6 + $0xff4] sm:$0xf0]  ;;  %v4587_v35 = vmax.f32 %v15128_v61, 0.0  ;;  %v15263_v61 = vpack.c.bf16 %v4585_v10, %v4585_v10 }
 0x329   :  { %8450 = vmatpush.bf16.msra.mxu3 %v13099_v1  ;;  %v8184_v1 = vpop.f32.mrf.mxu2  ;;  %v13387_v50 = vor.u32 %v14735_v20, %v13386_v44  ;;  %v14715_v10 = vld [vmem:[#allocation6 + $0xf54] sm:$0xf0] }
 0x32a   :  { %8412 = vmatpush.bf16.msra.mxu0 %v12899_v11  ;;  %v14703_v11 = vld [vmem:[#allocation6 + $0xef4] sm:$0xf0]  ;;  %v13186_v1 = vld [vmem:[#allocation6 + $0xe60] sm:$0xf] }
 0x32b   :  { %8425 = vmatpush.bf16.msra.mxu1 %v12963_v17  ;;  %v13322_v17 = vld [vmem:[#allocation6 + $0xf70] sm:$0xf]  ;;  %v13259_v0 = vor.u32 %v14703_v11, %v13258_v6 }
 0x32c   :  { %8438 = vmatpush.bf16.msra.mxu2 %v13027_v25  ;;  %v14719_v25 = vld [vmem:[#allocation6 + $0xf74] sm:$0xf0]  ;;  %v13242_v6 = vld [vmem:[#allocation6 + $0xed0] sm:$0xf] }
 0x32d   :  { %8451 = vmatpush.bf16.msra.mxu3 %v13091_v34  ;;  %v13011_v34 = vor.u32 %v14641_v51, %v13010_v4  ;;  %v13323_v55 = vor.u32 %v14719_v25, %v13322_v17  ;;  %v14733_v4 = vld [vmem:[#allocation6 + $0xfe4] sm:$0xf0]  ;;  %v15267_v51 = vpack.c.bf16 %v4587_v35, %v4587_v35  ;;  %v14699_v17 = vld [vmem:[#allocation6 + $0xed4] sm:$0xf0]  ;;  %v13306_v25 = vld [vmem:[#allocation6 + $0xf50] sm:$0xf] }
 0x32e   :  { %8413 = vmatpush.bf16.msra.mxu0 %v12891_v46  ;;  %v13195_v46 = vor.u32 %v14687_v43, %v13194_v41  ;;  %v13178_v41 = vld [vmem:[#allocation6 + $0xe50] sm:$0xf]  ;;  %v14683_v43 = vld [vmem:[#allocation6 + $0xe54] sm:$0xf0]  ;;  %v13379_v11 = vor.u32 %v14733_v4, %v13378_v39  ;;  %v13243_v44 = vor.u32 %v14699_v17, %v13242_v6  ;;  %v13307_v20 = vor.u32 %v14715_v10, %v13306_v25  ;;  %v13170_v35 = vld [vmem:[#allocation6 + $0xe40] sm:$0xf] }
 0x32f   :  { %8426 = vmatpush.bf16.msra.mxu1 %v12955_v62  ;;  %v14701_v62 = vld [vmem:[#allocation6 + $0xee4] sm:$0xf0]  ;;  %v14695_v6 = vld [vmem:[#allocation6 + $0xeb4] sm:$0xf0]  ;;  %v13354_v25 = vld [vmem:[#allocation6 + $0xfb0] sm:$0xf] }
 0x330   :  { %8439 = vmatpush.bf16.msra.mxu2 %v13019_v48  ;;  %v13314_v48 = vld [vmem:[#allocation6 + $0xf60] sm:$0xf]  ;;  %v13251_v22 = vor.u32 %v14701_v62, %v13250_v21  ;;  %v14711_v17 = vld [vmem:[#allocation6 + $0xf34] sm:$0xf0] }
 0x331   :  { %8452 = vmatpush.bf16.msra.mxu3 %v13083_v13  ;;  %v13187_v13 = vor.u32 %v14685_v18, %v13186_v1  ;;  %v13315_v14 = vor.u32 %v14717_v52, %v13314_v48  ;;  %v14713_v1 = vld [vmem:[#allocation6 + $0xf44] sm:$0xf0]  ;;  %v13362_v21 = vld [vmem:[#allocation6 + $0xfc0] sm:$0xf]  ;;  %v14727_v10 = vld [vmem:[#allocation6 + $0xfb4] sm:$0xf0] }
 0x332   :  { %8414 = vmatpush.bf16.msra.mxu0 %v12883_v32  ;;  %v15269_v32 = vpack.c.bf16 %v4588_v49, %v4588_v49  ;;  %v14681_v49 = vld [vmem:[#allocation6 + $0xe44] sm:$0xf0]  ;;  %v8208_v18 = vpop.f32.mrf.mxu0 }
 0x333   :  { %8427 = vmatpush.bf16.msra.mxu1 %v12947_v57  ;;  %v14731_v57 = vld [vmem:[#allocation6 + $0xfd4] sm:$0xf0]  ;;  %v8209_v62 = vadd.f32 %v8208_v18, %v15257_v19  ;;  %v8221_v48 = vpop.f32.mrf.mxu1  ;;  %v13171_v52 = vor.u32 %v14681_v49, %v13170_v35  ;;  %v13355_v35 = vor.u32 %v14727_v10, %v13354_v25 }
 0x334   :  { %8440 = vmatpush.bf16.msra.mxu2 %v13011_v34  ;;  %v13179_v34 = vor.u32 %v14683_v43, %v13178_v41  ;;  %v14723_v25 = vld [vmem:[#allocation6 + $0xf94] sm:$0xf0] }
 0x335   :  { %8453 = vmatpush.bf16.msra.mxu3 %v13075_v53  ;;  %8415 = vmatmul.bf16.vlgmr.msra.gmra.mxu0 %v15263_v61  ;;  %v13234_v53 = vld [vmem:[#allocation6 + $0xec0] sm:$0xf]  ;;  %v8222_v41 = vadd.f32 %v8221_v48, %v8209_v62 }
 0x336   :  { %8459 = vmatpush.bf16.msrb.mxu0 %v13195_v46  ;;  %8428 = vmatmul.bf16.vlgmr.msra.gmra.mxu1 %v15265_v59  ;;  %v13371_v46 = vor.u32 %v14731_v57, %v13370_v33 }
 0x337   :  { %8472 = vmatpush.bf16.msrb.mxu1 %v13259_v0  ;;  %8441 = vmatmul.bf16.vlgmr.msra.gmra.mxu2 %v15267_v51  ;;  %v14697_v0 = vld [vmem:[#allocation6 + $0xec4] sm:$0xf0] }
 0x338   :  { %8485 = vmatpush.bf16.msrb.mxu2 %v13323_v55  ;;  %8454 = vmatmul.bf16.vlgmr.msra.gmra.mxu3 %v15269_v32  ;;  %v13298_v55 = vld [vmem:[#allocation6 + $0xf40] sm:$0xf]  ;;  %v13235_v39 = vor.u32 %v14697_v0, %v13234_v53  ;;  %v14693_v53 = vld [vmem:[#allocation6 + $0xea4] sm:$0xf0] }
 0x339   :  { %8498 = vmatpush.bf16.msrb.mxu3 %v13387_v50  ;;  %v14729_v50 = vld [vmem:[#allocation6 + $0xfc4] sm:$0xf0]  ;;  %v13299_v4 = vor.u32 %v14713_v1, %v13298_v55 }
 0x33a   :  { %8460 = vmatpush.bf16.msrb.mxu0 %v13187_v13  ;;  %v13162_v13 = vld [vmem:[#allocation6 + $0xe30] sm:$0xf]  ;;  %v13363_v43 = vor.u32 %v14729_v50, %v13362_v21  ;;  %v8234_v49 = vpop.f32.mrf.mxu2  ;;  %v14709_v0 = vld [vmem:[#allocation6 + $0xf24] sm:$0xf0]  ;;  %v8210_v18 = vpop.f32.mrf.mxu0  ;;  %v13346_v21 = vld [vmem:[#allocation6 + $0xfa0] sm:$0xf] }
 0x33b   :  { %8473 = vmatpush.bf16.msrb.mxu1 %v13251_v22  ;;  %v14679_v22 = vld [vmem:[#allocation6 + $0xe34] sm:$0xf0]  ;;  %v8235_v55 = vadd.f32 %v8234_v49, %v8222_v41  ;;  %v8247_v1 = vpop.f32.mrf.mxu3  ;;  %v14725_v50 = vld [vmem:[#allocation6 + $0xfa4] sm:$0xf0]  ;;  %v8223_v62 = vpop.f32.mrf.mxu1  ;;  %v13274_v41 = vld [vmem:[#allocation6 + $0xf10] sm:$0xf] }
 0x33c   :  { %8486 = vmatpush.bf16.msrb.mxu2 %v13315_v14  ;;  %v13226_v14 = vld [vmem:[#allocation6 + $0xeb0] sm:$0xf]  ;;  %v13163_v33 = vor.u32 %v14679_v22, %v13162_v13  ;;  %v14675_v22 = vld [vmem:[#allocation6 + $0xe14] sm:$0xf0]  ;;  %v13266_v49 = vld [vmem:[#allocation6 + $0xf00] sm:$0xf] }
 0x33d   :  { %8499 = vmatpush.bf16.msrb.mxu3 %v13379_v11  ;;  %v13290_v11 = vld [vmem:[#allocation6 + $0xf30] sm:$0xf]  ;;  %v13227_v19 = vor.u32 %v14695_v6, %v13226_v14  ;;  %v14691_v6 = vld [vmem:[#allocation6 + $0xe94] sm:$0xf0] }
 0x33e   :  { %8461 = vmatpush.bf16.msrb.mxu0 %v13179_v34  ;;  %v13291_v57 = vor.u32 %v14711_v17, %v13290_v11  ;;  %v13154_v34 = vld [vmem:[#allocation6 + $0xe20] sm:$0xf]  ;;  %v13146_v13 = vld [vmem:[#allocation6 + $0xe10] sm:$0xf]  ;;  %v14707_v11 = vld [vmem:[#allocation6 + $0xf14] sm:$0xf0] }
 0x33f   :  { %8474 = vmatpush.bf16.msrb.mxu1 %v13243_v44  ;;  %v14677_v44 = vld [vmem:[#allocation6 + $0xe24] sm:$0xf0]  ;;  %v13210_v14 = vld [vmem:[#allocation6 + $0xe90] sm:$0xf]  ;;  %v13147_v10 = vor.u32 %v14675_v22, %v13146_v13  ;;  %v4589_v13 = vmax.f32 %v15150_v42, 0.0  ;;  %v4590_v22 = vmax.f32 %v15152_v5, 0.0 }
 0x340   :  { %8487 = vmatpush.bf16.msrb.mxu2 %v13307_v20  ;;  %v13218_v20 = vld [vmem:[#allocation6 + $0xea0] sm:$0xf]  ;;  %v13155_v48 = vor.u32 %v14677_v44, %v13154_v34  ;;  %v13338_v17 = vld [vmem:[#allocation6 + $0xf90] sm:$0xf]  ;;  %v14673_v34 = vld [vmem:[#allocation6 + $0xe04] sm:$0xf0] }
 0x341   :  { %8500 = vmatpush.bf16.msrb.mxu3 %v13371_v46  ;;  %v13282_v46 = vld [vmem:[#allocation6 + $0xf20] sm:$0xf]  ;;  %v13450_v18 = vld [vmem:[#allocation6 + $0x1070] sm:$0xf] }
 0x342   :  { %8462 = vmatpush.bf16.msrb.mxu0 %v13171_v52  ;;  %v15276_v52 = vadd.f32 %v8247_v1, %v8235_v55  ;;  %v13202_v44 = vld [vmem:[#allocation6 + $0xe80] sm:$0xf]  ;;  %v14721_v55 = vld [vmem:[#allocation6 + $0xf84] sm:$0xf0] }
 0x343   :  { %8475 = vmatpush.bf16.msrb.mxu1 %v13235_v39  ;;  %v13219_v39 = vor.u32 %v14693_v53, %v13218_v20  ;;  %v14689_v20 = vld [vmem:[#allocation6 + $0xe84] sm:$0xf0]  ;;  %v13339_v53 = vor.u32 %v14723_v25, %v13338_v17  ;;  %v8249_v1 = vpop.f32.mrf.mxu3  ;;  %v4592_v17 = vmax.f32 %v15174_v31, 0.0  ;;  %v13506_v42 = vld [vmem:[#allocation6 + $0x10e0] sm:$0xf]  ;;  %v15284_v31 = vpack.c.bf16 %v4590_v22, %v4590_v22 }
 0x344   :  { %8488 = vmatpush.bf16.msrb.mxu2 %v13299_v4  ;;  %v13283_v4 = vor.u32 %v14709_v0, %v13282_v46  ;;  %v14705_v46 = vld [vmem:[#allocation6 + $0xf04] sm:$0xf0]  ;;  %v13330_v0 = vld [vmem:[#allocation6 + $0xf80] sm:$0xf]  ;;  %v13626_v22 = vld [vmem:[#allocation6 + $0x11d0] sm:$0xf] }
 0x345   :  { %8501 = vmatpush.bf16.msrb.mxu3 %v13363_v43  ;;  %v13347_v43 = vor.u32 %v14725_v50, %v13346_v21  ;;  %v14751_v21 = vld [vmem:[#allocation6 + $0x1074] sm:$0xf0]  ;;  %v13514_v50 = vld [vmem:[#allocation6 + $0x10f0] sm:$0xf]  ;;  %v13331_v25 = vor.u32 %v14721_v55, %v13330_v0  ;;  %v14749_v1 = vld [vmem:[#allocation6 + $0x1064] sm:$0xf0] }
 0x346   :  { %8463 = vmatpush.bf16.msrb.mxu0 %v13163_v33  ;;  %v13138_v33 = vld [vmem:[#allocation6 + $0xe00] sm:$0xf] }
 0x347   :  { %8476 = vmatpush.bf16.msrb.mxu1 %v13227_v19  ;;  %v13211_v19 = vor.u32 %v14691_v6, %v13210_v14  ;;  %v13139_v62 = vor.u32 %v14673_v34, %v13138_v33  ;;  %v13203_v14 = vor.u32 %v14689_v20, %v13202_v44  ;;  %v13642_v6 = vld [vmem:[#allocation6 + $0x11f0] sm:$0xf]  ;;  %v14781_v44 = vld [vmem:[#allocation6 + $0x1164] sm:$0xf0]  ;;  %v13634_v20 = vld [vmem:[#allocation6 + $0x11e0] sm:$0xf] }
 0x348   :  { %8489 = vmatpush.bf16.msrb.mxu2 %v13291_v57  ;;  %v13275_v57 = vor.u32 %v14707_v11, %v13274_v41  ;;  %v14799_v41 = vld [vmem:[#allocation6 + $0x11f4] sm:$0xf0]  ;;  %v4591_v11 = vmax.f32 %v15172_v2, 0.0  ;;  %v15282_v2 = vpack.c.bf16 %v4589_v13, %v4589_v13 }
 0x349   :  { %8502 = vmatpush.bf16.msrb.mxu3 %v13355_v35  ;;  %v8236_v35 = vpop.f32.mrf.mxu2  ;;  %v13643_v5 = vor.u32 %v14799_v41, %v13642_v6  ;;  %v14779_v13 = vld [vmem:[#allocation6 + $0x1154] sm:$0xf0] }
 0x34a   :  { %8464 = vmatpush.bf16.msrb.mxu0 %v13155_v48  ;;  %v14767_v48 = vld [vmem:[#allocation6 + $0x10f4] sm:$0xf0]  ;;  %v13442_v35 = vld [vmem:[#allocation6 + $0x1060] sm:$0xf] }
 0x34b   :  { %8477 = vmatpush.bf16.msrb.mxu1 %v13219_v39  ;;  %v13578_v39 = vld [vmem:[#allocation6 + $0x1170] sm:$0xf]  ;;  %v13515_v33 = vor.u32 %v14767_v48, %v13514_v50 }
 0x34c   :  { %8490 = vmatpush.bf16.msrb.mxu2 %v13283_v4  ;;  %v14783_v4 = vld [vmem:[#allocation6 + $0x1174] sm:$0xf0]  ;;  %v13498_v50 = vld [vmem:[#allocation6 + $0x10d0] sm:$0xf] }
 0x34d   :  { %8503 = vmatpush.bf16.msrb.mxu3 %v13347_v43  ;;  %v13267_v43 = vor.u32 %v14705_v46, %v13266_v49  ;;  %v13579_v34 = vor.u32 %v14783_v4, %v13578_v39  ;;  %v14797_v49 = vld [vmem:[#allocation6 + $0x11e4] sm:$0xf0]  ;;  %v15286_v46 = vpack.c.bf16 %v4591_v11, %v4591_v11  ;;  %v14763_v39 = vld [vmem:[#allocation6 + $0x10d4] sm:$0xf0]  ;;  %v13562_v4 = vld [vmem:[#allocation6 + $0x1150] sm:$0xf] }
 0x34e   :  { %8465 = vmatpush.bf16.msrb.mxu0 %v13147_v10  ;;  %v13451_v10 = vor.u32 %v14751_v21, %v13450_v18  ;;  %v13434_v18 = vld [vmem:[#allocation6 + $0x1050] sm:$0xf]  ;;  %v14747_v21 = vld [vmem:[#allocation6 + $0x1054] sm:$0xf0]  ;;  %v13635_v48 = vor.u32 %v14797_v49, %v13634_v20  ;;  %v13499_v6 = vor.u32 %v14763_v39, %v13498_v50  ;;  %v13563_v41 = vor.u32 %v14779_v13, %v13562_v4  ;;  %v13426_v11 = vld [vmem:[#allocation6 + $0x1040] sm:$0xf] }
 0x34f   :  { %8478 = vmatpush.bf16.msrb.mxu1 %v13211_v19  ;;  %v14765_v19 = vld [vmem:[#allocation6 + $0x10e4] sm:$0xf0]  ;;  %v14759_v50 = vld [vmem:[#allocation6 + $0x10b4] sm:$0xf0]  ;;  %v13610_v4 = vld [vmem:[#allocation6 + $0x11b0] sm:$0xf] }
 0x350   :  { %8491 = vmatpush.bf16.msrb.mxu2 %v13275_v57  ;;  %v13570_v57 = vld [vmem:[#allocation6 + $0x1160] sm:$0xf]  ;;  %v13507_v0 = vor.u32 %v14765_v19, %v13506_v42  ;;  %v14775_v39 = vld [vmem:[#allocation6 + $0x1134] sm:$0xf0] }
 0x351   :  { %8504 = vmatpush.bf16.msrb.mxu3 %v13339_v53  ;;  %v13443_v53 = vor.u32 %v14749_v1, %v13442_v35  ;;  %v13571_v55 = vor.u32 %v14781_v44, %v13570_v57  ;;  %v14777_v35 = vld [vmem:[#allocation6 + $0x1144] sm:$0xf0]  ;;  %v13618_v42 = vld [vmem:[#allocation6 + $0x11c0] sm:$0xf]  ;;  %v14791_v13 = vld [vmem:[#allocation6 + $0x11b4] sm:$0xf0] }
 0x352   :  { %8466 = vmatpush.bf16.msrb.mxu0 %v13139_v62  ;;  %v15288_v62 = vpack.c.bf16 %v4592_v17, %v4592_v17  ;;  %v14745_v17 = vld [vmem:[#allocation6 + $0x1044] sm:$0xf0]  ;;  %v8260_v1 = vpop.f32.mrf.mxu0 }
 0x353   :  { %8479 = vmatpush.bf16.msrb.mxu1 %v13203_v14  ;;  %v14795_v14 = vld [vmem:[#allocation6 + $0x11d4] sm:$0xf0]  ;;  %v8261_v19 = vadd.f32 %v8260_v1, %v15276_v52  ;;  %v8273_v57 = vpop.f32.mrf.mxu1  ;;  %v13427_v44 = vor.u32 %v14745_v17, %v13426_v11  ;;  %v13611_v11 = vor.u32 %v14791_v13, %v13610_v4 }
 0x354   :  { %8492 = vmatpush.bf16.msrb.mxu2 %v13267_v43  ;;  %v13435_v43 = vor.u32 %v14747_v21, %v13434_v18  ;;  %v14787_v4 = vld [vmem:[#allocation6 + $0x1194] sm:$0xf0] }
 0x355   :  { %8505 = vmatpush.bf16.msrb.mxu3 %v13331_v25  ;;  %8467 = vmatmul.bf16.vlgmr.msrb.gmra.mxu0 %v15282_v2  ;;  %v13490_v25 = vld [vmem:[#allocation6 + $0x10c0] sm:$0xf]  ;;  %v8274_v18 = vadd.f32 %v8273_v57, %v8261_v19 }
 0x356   :  { %8511 = vmatpush.bf16.msra.mxu0 %v13451_v10  ;;  %8480 = vmatmul.bf16.vlgmr.msrb.gmra.mxu1 %v15284_v31  ;;  %v13627_v10 = vor.u32 %v14795_v14, %v13626_v22 }
 0x357   :  { %8524 = vmatpush.bf16.msra.mxu1 %v13515_v33  ;;  %8493 = vmatmul.bf16.vlgmr.msrb.gmra.mxu2 %v15286_v46  ;;  %v14761_v33 = vld [vmem:[#allocation6 + $0x10c4] sm:$0xf0] }
 0x358   :  { %8537 = vmatpush.bf16.msra.mxu2 %v13579_v34  ;;  %8506 = vmatmul.bf16.vlgmr.msrb.gmra.mxu3 %v15288_v62  ;;  %v13554_v34 = vld [vmem:[#allocation6 + $0x1140] sm:$0xf]  ;;  %v13491_v20 = vor.u32 %v14761_v33, %v13490_v25  ;;  %v14757_v25 = vld [vmem:[#allocation6 + $0x10a4] sm:$0xf0] }
 0x359   :  { %8550 = vmatpush.bf16.msra.mxu3 %v13643_v5  ;;  %v14793_v5 = vld [vmem:[#allocation6 + $0x11c4] sm:$0xf0]  ;;  %v13555_v49 = vor.u32 %v14777_v35, %v13554_v34 }
 0x35a   :  { %8512 = vmatpush.bf16.msra.mxu0 %v13443_v53  ;;  %v13418_v53 = vld [vmem:[#allocation6 + $0x1030] sm:$0xf]  ;;  %v13619_v21 = vor.u32 %v14793_v5, %v13618_v42  ;;  %v8286_v17 = vpop.f32.mrf.mxu2  ;;  %v14773_v33 = vld [vmem:[#allocation6 + $0x1124] sm:$0xf0]  ;;  %v8262_v1 = vpop.f32.mrf.mxu0  ;;  %v13602_v42 = vld [vmem:[#allocation6 + $0x11a0] sm:$0xf] }
 0x35b   :  { %8525 = vmatpush.bf16.msra.mxu1 %v13507_v0  ;;  %v14743_v0 = vld [vmem:[#allocation6 + $0x1034] sm:$0xf0]  ;;  %v8287_v34 = vadd.f32 %v8286_v17, %v8274_v18  ;;  %v8299_v35 = vpop.f32.mrf.mxu3  ;;  %v14789_v5 = vld [vmem:[#allocation6 + $0x11a4] sm:$0xf0]  ;;  %v8275_v19 = vpop.f32.mrf.mxu1  ;;  %v13530_v18 = vld [vmem:[#allocation6 + $0x1110] sm:$0xf] }
 0x35c   :  { %8538 = vmatpush.bf16.msra.mxu2 %v13571_v55  ;;  %v13482_v55 = vld [vmem:[#allocation6 + $0x10b0] sm:$0xf]  ;;  %v13419_v22 = vor.u32 %v14743_v0, %v13418_v53  ;;  %v14739_v0 = vld [vmem:[#allocation6 + $0x1014] sm:$0xf0]  ;;  %v13522_v17 = vld [vmem:[#allocation6 + $0x1100] sm:$0xf] }
 0x35d   :  { %8551 = vmatpush.bf16.msra.mxu3 %v13635_v48  ;;  %v13546_v48 = vld [vmem:[#allocation6 + $0x1130] sm:$0xf]  ;;  %v13483_v52 = vor.u32 %v14759_v50, %v13482_v55  ;;  %v14755_v50 = vld [vmem:[#allocation6 + $0x1094] sm:$0xf0]  ;;  %v14238_v1 = vld [vmem:[#allocation6 + $0x74] sm:$0xf] }
 0x35e   :  { %8513 = vmatpush.bf16.msra.mxu0 %v13435_v43  ;;  %v13547_v14 = vor.u32 %v14775_v39, %v13546_v48  ;;  %v13410_v43 = vld [vmem:[#allocation6 + $0x1020] sm:$0xf]  ;;  %v13402_v53 = vld [vmem:[#allocation6 + $0x1010] sm:$0xf]  ;;  %v14771_v48 = vld [vmem:[#allocation6 + $0x1114] sm:$0xf0] }
 0x35f   :  { %8526 = vmatpush.bf16.msra.mxu1 %v13499_v6  ;;  %v14741_v6 = vld [vmem:[#allocation6 + $0x1024] sm:$0xf0]  ;;  %v13466_v55 = vld [vmem:[#allocation6 + $0x1090] sm:$0xf]  ;;  %v13403_v13 = vor.u32 %v14739_v0, %v13402_v53  ;;  %v4593_v53 = vmax.f32 %v15196_v29, 0.0  ;;  %v4594_v0 = vmax.f32 %v15198_v16, 0.0 }
 0x360   :  { %8539 = vmatpush.bf16.msra.mxu2 %v13563_v41  ;;  %v13474_v41 = vld [vmem:[#allocation6 + $0x10a0] sm:$0xf]  ;;  %v13411_v57 = vor.u32 %v14741_v6, %v13410_v43  ;;  %v13594_v39 = vld [vmem:[#allocation6 + $0x1190] sm:$0xf]  ;;  %v14737_v43 = vld [vmem:[#allocation6 + $0x1004] sm:$0xf0] }
 0x361   :  { %8552 = vmatpush.bf16.msra.mxu3 %v13627_v10  ;;  %v13538_v10 = vld [vmem:[#allocation6 + $0x1120] sm:$0xf]  ;;  %v14252_v29 = vld [vmem:[#allocation6 + $0xe4] sm:$0xf] }
 0x362   :  { %8514 = vmatpush.bf16.msra.mxu0 %v13427_v44  ;;  %v15295_v44 = vadd.f32 %v8299_v35, %v8287_v34  ;;  %v13458_v6 = vld [vmem:[#allocation6 + $0x1080] sm:$0xf]  ;;  %v14785_v34 = vld [vmem:[#allocation6 + $0x1184] sm:$0xf0] }
 0x363   :  { %8527 = vmatpush.bf16.msra.mxu1 %v13491_v20  ;;  %v13475_v20 = vor.u32 %v14757_v25, %v13474_v41  ;;  %v14753_v41 = vld [vmem:[#allocation6 + $0x1084] sm:$0xf0]  ;;  %v13595_v25 = vor.u32 %v14787_v4, %v13594_v39  ;;  %v8301_v35 = vpop.f32.mrf.mxu3  ;;  %v4596_v39 = vmax.f32 %v15220_v9, 0.0  ;;  %v15303_v9 = vpack.c.bf16 %v4594_v0, %v4594_v0  ;;  %v14282_v0 = vld [vmem:[#allocation6 + $0x1d4] sm:$0xf] }
 0x364   :  { %8540 = vmatpush.bf16.msra.mxu2 %v13555_v49  ;;  %v13539_v49 = vor.u32 %v14773_v33, %v13538_v10  ;;  %v14769_v10 = vld [vmem:[#allocation6 + $0x1104] sm:$0xf0]  ;;  %v13586_v33 = vld [vmem:[#allocation6 + $0x1180] sm:$0xf]  ;;  %v11396_v35 = vld [vmem:[#allocation6 + $0x68] sm:$0xf0] }
 0x365   :  { %8553 = vmatpush.bf16.msra.mxu3 %v13619_v21  ;;  %v13603_v21 = vor.u32 %v14789_v5, %v13602_v42  ;;  %v11404_v42 = vld [vmem:[#allocation6 + $0x78] sm:$0xf0]  ;;  %v14254_v5 = vld [vmem:[#allocation6 + $0xf4] sm:$0xf]  ;;  %v13587_v4 = vor.u32 %v14785_v34, %v13586_v33 }
 0x366   :  { %8515 = vmatpush.bf16.msra.mxu0 %v13419_v22  ;;  %v13394_v22 = vld [vmem:[#allocation6 + $0x1000] sm:$0xf] }
 0x367   :  { %8528 = vmatpush.bf16.msra.mxu1 %v13483_v52  ;;  %v13467_v52 = vor.u32 %v14755_v50, %v13466_v55  ;;  %v13395_v19 = vor.u32 %v14737_v43, %v13394_v22  ;;  %v13459_v55 = vor.u32 %v14753_v41, %v13458_v6  ;;  %v14286_v50 = vld [vmem:[#allocation6 + $0x1f4] sm:$0xf]  ;;  %v11524_v6 = vld [vmem:[#allocation6 + $0x168] sm:$0xf0]  ;;  %v14284_v41 = vld [vmem:[#allocation6 + $0x1e4] sm:$0xf] }
 0x368   :  { %8541 = vmatpush.bf16.msra.mxu2 %v13547_v14  ;;  %v13531_v14 = vor.u32 %v14771_v48, %v13530_v18  ;;  %v11596_v18 = vld [vmem:[#allocation6 + $0x1f8] sm:$0xf0]  ;;  %v4595_v48 = vmax.f32 %v15217_v12, 0.0  ;;  %v15301_v12 = vpack.c.bf16 %v4593_v53, %v4593_v53 }
 0x369   :  { %8554 = vmatpush.bf16.msra.mxu3 %v13611_v11  ;;  %v8288_v11 = vpop.f32.mrf.mxu2  ;;  %v11599_v16 = vor.u32 %v14286_v50, %v11596_v18  ;;  %v11516_v53 = vld [vmem:[#allocation6 + $0x158] sm:$0xf0] }
 0x36a   :  { %8516 = vmatpush.bf16.msra.mxu0 %v13411_v57  ;;  %v11468_v57 = vld [vmem:[#allocation6 + $0xf8] sm:$0xf0]  ;;  %v14236_v11 = vld [vmem:[#allocation6 + $0x64] sm:$0xf] }
 0x36b   :  { %8529 = vmatpush.bf16.msra.mxu1 %v13475_v20  ;;  %v14270_v20 = vld [vmem:[#allocation6 + $0x174] sm:$0xf]  ;;  %v11471_v22 = vor.u32 %v14254_v5, %v11468_v57 }
 0x36c   :  { %8542 = vmatpush.bf16.msra.mxu2 %v13539_v49  ;;  %v11532_v49 = vld [vmem:[#allocation6 + $0x178] sm:$0xf0]  ;;  %v14250_v5 = vld [vmem:[#allocation6 + $0xd4] sm:$0xf] }
 0x36d   :  { %8555 = vmatpush.bf16.msra.mxu3 %v13603_v21  ;;  %v13523_v21 = vor.u32 %v14769_v10, %v13522_v17  ;;  %v11535_v43 = vor.u32 %v14270_v20, %v11532_v49  ;;  %v11588_v17 = vld [vmem:[#allocation6 + $0x1e8] sm:$0xf0]  ;;  %v15305_v10 = vpack.c.bf16 %v4595_v48, %v4595_v48  ;;  %v11452_v20 = vld [vmem:[#allocation6 + $0xd8] sm:$0xf0]  ;;  %v14266_v49 = vld [vmem:[#allocation6 + $0x154] sm:$0xf] }
 0x36e   :  { %8517 = vmatpush.bf16.msra.mxu0 %v13403_v13  ;;  %v11407_v13 = vor.u32 %v14238_v1, %v11404_v42  ;;  %v14234_v1 = vld [vmem:[#allocation6 + $0x54] sm:$0xf]  ;;  %v11388_v42 = vld [vmem:[#allocation6 + $0x58] sm:$0xf0]  ;;  %v11591_v57 = vor.u32 %v14284_v41, %v11588_v17  ;;  %v11455_v50 = vor.u32 %v14250_v5, %v11452_v20  ;;  %v11519_v18 = vor.u32 %v14266_v49, %v11516_v53  ;;  %v14232_v48 = vld [vmem:[#allocation6 + $0x44] sm:$0xf] }
 0x36f   :  { %8530 = vmatpush.bf16.msra.mxu1 %v13467_v52  ;;  %v11460_v52 = vld [vmem:[#allocation6 + $0xe8] sm:$0xf0]  ;;  %v11436_v5 = vld [vmem:[#allocation6 + $0xb8] sm:$0xf0]  ;;  %v14278_v49 = vld [vmem:[#allocation6 + $0x1b4] sm:$0xf] }
 0x370   :  { %8543 = vmatpush.bf16.msra.mxu2 %v13531_v14  ;;  %v14268_v14 = vld [vmem:[#allocation6 + $0x164] sm:$0xf]  ;;  %v11463_v33 = vor.u32 %v14252_v29, %v11460_v52  ;;  %v11500_v20 = vld [vmem:[#allocation6 + $0x138] sm:$0xf0] }
 0x371   :  { %8556 = vmatpush.bf16.msra.mxu3 %v13595_v25  ;;  %v11399_v25 = vor.u32 %v14236_v11, %v11396_v35  ;;  %v11527_v34 = vor.u32 %v14268_v14, %v11524_v6  ;;  %v11508_v11 = vld [vmem:[#allocation6 + $0x148] sm:$0xf0]  ;;  %v14280_v29 = vld [vmem:[#allocation6 + $0x1c4] sm:$0xf]  ;;  %v11564_v53 = vld [vmem:[#allocation6 + $0x1b8] sm:$0xf0] }
 0x372   :  { %8518 = vmatpush.bf16.msra.mxu0 %v13395_v19  ;;  %v15307_v19 = vpack.c.bf16 %v4596_v39, %v4596_v39  ;;  %v11380_v39 = vld [vmem:[#allocation6 + $0x48] sm:$0xf0]  ;;  %v8312_v35 = vpop.f32.mrf.mxu0 }
 0x373   :  { %8531 = vmatpush.bf16.msra.mxu1 %v13459_v55  ;;  %v11580_v55 = vld [vmem:[#allocation6 + $0x1d8] sm:$0xf0]  ;;  %v8313_v52 = vadd.f32 %v8312_v35, %v15295_v44  ;;  %v8325_v14 = vpop.f32.mrf.mxu1  ;;  %v11383_v6 = vor.u32 %v14232_v48, %v11380_v39  ;;  %v11567_v48 = vor.u32 %v14278_v49, %v11564_v53 }
 0x374   :  { %8544 = vmatpush.bf16.msra.mxu2 %v13523_v21  ;;  %15408 = vst [vmem:[#allocation15_spill] sm:$0xff] %v15307_v19  ;;  %v11391_v21 = vor.u32 %v14234_v1, %v11388_v42  ;;  %v11548_v49 = vld [vmem:[#allocation6 + $0x198] sm:$0xf0] }
 0x375   :  { %8557 = vmatpush.bf16.msra.mxu3 %v13587_v4  ;;  %8519 = vmatmul.bf16.vlgmr.msra.gmra.mxu0 %v15301_v12  ;;  %v14248_v4 = vld [vmem:[#allocation6 + $0xc4] sm:$0xf]  ;;  %v8326_v1 = vadd.f32 %v8325_v14, %v8313_v52 }
 0x376   :  { %8563 = vmatpush.bf16.msrb.mxu0 %v11407_v13  ;;  %8532 = vmatmul.bf16.vlgmr.msra.gmra.mxu1 %v15303_v9  ;;  %v11583_v13 = vor.u32 %v14282_v0, %v11580_v55 }
 0x377   :  { %8576 = vmatpush.bf16.msrb.mxu1 %v11471_v22  ;;  %8545 = vmatmul.bf16.vlgmr.msra.gmra.mxu2 %v15305_v10  ;;  %v11444_v22 = vld [vmem:[#allocation6 + $0xc8] sm:$0xf0] }
 0x378   :  { %8589 = vmatpush.bf16.msrb.mxu2 %v11535_v43  ;;  %8558 = vmatmul.bf16.vlgmr.msra.gmra.mxu3 %v15307_v19  ;;  %v14264_v43 = vld [vmem:[#allocation6 + $0x144] sm:$0xf]  ;;  %v11447_v41 = vor.u32 %v14248_v4, %v11444_v22  ;;  %v11428_v4 = vld [vmem:[#allocation6 + $0xa8] sm:$0xf0] }
 0x379   :  { %8602 = vmatpush.bf16.msrb.mxu3 %v11599_v16  ;;  %v11572_v16 = vld [vmem:[#allocation6 + $0x1c8] sm:$0xf0]  ;;  %v11511_v17 = vor.u32 %v14264_v43, %v11508_v11 }
 0x37a   :  { %8564 = vmatpush.bf16.msrb.mxu0 %v11399_v25  ;;  %v14230_v25 = vld [vmem:[#allocation6 + $0x34] sm:$0xf]  ;;  %v11575_v42 = vor.u32 %v14280_v29, %v11572_v16  ;;  %v8338_v39 = vpop.f32.mrf.mxu2  ;;  %v11492_v22 = vld [vmem:[#allocation6 + $0x128] sm:$0xf0]  ;;  %v8314_v35 = vpop.f32.mrf.mxu0  ;;  %v14276_v29 = vld [vmem:[#allocation6 + $0x1a4] sm:$0xf] }
 0x37b   :  { %8577 = vmatpush.bf16.msrb.mxu1 %v11463_v33  ;;  %v11372_v33 = vld [vmem:[#allocation6 + $0x38] sm:$0xf0]  ;;  %v8339_v43 = vadd.f32 %v8338_v39, %v8326_v1  ;;  %v8351_v11 = vpop.f32.mrf.mxu3  ;;  %v11556_v16 = vld [vmem:[#allocation6 + $0x1a8] sm:$0xf0]  ;;  %v8327_v52 = vpop.f32.mrf.mxu1  ;;  %v14258_v1 = vld [vmem:[#allocation6 + $0x114] sm:$0xf] }
 0x37c   :  { %8590 = vmatpush.bf16.msrb.mxu2 %v11527_v34  ;;  %v14246_v34 = vld [vmem:[#allocation6 + $0xb4] sm:$0xf]  ;;  %v11375_v0 = vor.u32 %v14230_v25, %v11372_v33  ;;  %v11356_v33 = vld [vmem:[#allocation6 + $0x18] sm:$0xf0]  ;;  %v14256_v39 = vld [vmem:[#allocation6 + $0x104] sm:$0xf] }
 0x37d   :  { %8603 = vmatpush.bf16.msrb.mxu3 %v11591_v57  ;;  %v14262_v57 = vld [vmem:[#allocation6 + $0x134] sm:$0xf]  ;;  %v11439_v44 = vor.u32 %v14246_v34, %v11436_v5  ;;  %v11420_v5 = vld [vmem:[#allocation6 + $0x98] sm:$0xf0]  ;;  %v11780_v19 = vld [vmem:[#allocation6 + $0x368] sm:$0xf0] }
 0x37e   :  { %8565 = vmatpush.bf16.msrb.mxu0 %v11391_v21  ;;  %v11503_v55 = vor.u32 %v14262_v57, %v11500_v20  ;;  %v14228_v21 = vld [vmem:[#allocation6 + $0x24] sm:$0xf]  ;;  %v14226_v25 = vld [vmem:[#allocation6 + $0x14] sm:$0xf]  ;;  %v11484_v57 = vld [vmem:[#allocation6 + $0x118] sm:$0xf0] }
 0x37f   :  { %8578 = vmatpush.bf16.msrb.mxu1 %v11455_v50  ;;  %v11364_v50 = vld [vmem:[#allocation6 + $0x28] sm:$0xf0]  ;;  %v14242_v34 = vld [vmem:[#allocation6 + $0x94] sm:$0xf]  ;;  %v11359_v53 = vor.u32 %v14226_v25, %v11356_v33 }
 0x380   :  { %8591 = vmatpush.bf16.msrb.mxu2 %v11519_v18  ;;  %v14244_v18 = vld [vmem:[#allocation6 + $0xa4] sm:$0xf]  ;;  %v11367_v14 = vor.u32 %v14228_v21, %v11364_v50  ;;  %v14274_v20 = vld [vmem:[#allocation6 + $0x194] sm:$0xf]  ;;  %v11348_v21 = vld [vmem:[#allocation6 + $0x8] sm:$0xf0] }
 0x381   :  { %8604 = vmatpush.bf16.msrb.mxu3 %v11583_v13  ;;  %v14260_v13 = vld [vmem:[#allocation6 + $0x124] sm:$0xf]  ;;  %v14302_v35 = vld [vmem:[#allocation6 + $0x274] sm:$0xf] }
 0x382   :  { %8566 = vmatpush.bf16.msrb.mxu0 %v11383_v6  ;;  %v15314_v6 = vadd.f32 %v8351_v11, %v8339_v43  ;;  %v14240_v50 = vld [vmem:[#allocation6 + $0x84] sm:$0xf]  ;;  %v11540_v43 = vld [vmem:[#allocation6 + $0x188] sm:$0xf0] }
 0x383   :  { %8579 = vmatpush.bf16.msrb.mxu1 %v11447_v41  ;;  %v11431_v41 = vor.u32 %v14244_v18, %v11428_v4  ;;  %v11412_v18 = vld [vmem:[#allocation6 + $0x88] sm:$0xf0]  ;;  %v11551_v4 = vor.u32 %v14274_v20, %v11548_v49  ;;  %v8353_v11 = vpop.f32.mrf.mxu3  ;;  %v14300_v49 = vld [vmem:[#allocation6 + $0x264] sm:$0xf] }
 0x384   :  { %8592 = vmatpush.bf16.msrb.mxu2 %v11511_v17  ;;  %v11495_v17 = vor.u32 %v14260_v13, %v11492_v22  ;;  %v11476_v13 = vld [vmem:[#allocation6 + $0x108] sm:$0xf0]  ;;  %v14272_v22 = vld [vmem:[#allocation6 + $0x184] sm:$0xf]  ;;  %v11415_v25 = vor.u32 %v14240_v50, %v11412_v18 }
 0x385   :  { %8605 = vmatpush.bf16.msrb.mxu3 %v11575_v42  ;;  %v11559_v42 = vor.u32 %v14276_v29, %v11556_v16  ;;  %v11660_v29 = vld [vmem:[#allocation6 + $0x278] sm:$0xf0]  ;;  %v14318_v16 = vld [vmem:[#allocation6 + $0x2f4] sm:$0xf]  ;;  %v11479_v33 = vor.u32 %v14256_v39, %v11476_v13  ;;  %v14316_v11 = vld [vmem:[#allocation6 + $0x2e4] sm:$0xf] }
 0x386   :  { %8567 = vmatpush.bf16.msrb.mxu0 %v11375_v0  ;;  %v14224_v0 = vld [vmem:[#allocation6 + $0x4] sm:$0xf]  ;;  %v11644_v13 = vld [vmem:[#allocation6 + $0x258] sm:$0xf0] }
 0x387   :  { %8580 = vmatpush.bf16.msrb.mxu1 %v11439_v44  ;;  %v11423_v44 = vor.u32 %v14242_v34, %v11420_v5  ;;  %v11351_v52 = vor.u32 %v14224_v0, %v11348_v21  ;;  %v14350_v34 = vld [vmem:[#allocation6 + $0x3f4] sm:$0xf]  ;;  %v11543_v5 = vor.u32 %v14272_v22, %v11540_v43  ;;  %v11716_v0 = vld [vmem:[#allocation6 + $0x2e8] sm:$0xf0]  ;;  %v14332_v21 = vld [vmem:[#allocation6 + $0x364] sm:$0xf] }
 0x388   :  { %8593 = vmatpush.bf16.msrb.mxu2 %v11503_v55  ;;  %v11487_v55 = vor.u32 %v14258_v1, %v11484_v57  ;;  %v11663_v1 = vor.u32 %v14302_v35, %v11660_v29  ;;  %v11719_v18 = vor.u32 %v14316_v11, %v11716_v0  ;;  %v11783_v39 = vor.u32 %v14332_v21, %v11780_v19  ;;  %v14314_v22 = vld [vmem:[#allocation6 + $0x2d4] sm:$0xf]  ;;  %v11708_v35 = vld [vmem:[#allocation6 + $0x2d8] sm:$0xf0] }
 0x389   :  { %8606 = vmatpush.bf16.msrb.mxu3 %v11567_v48  ;;  %v8340_v48 = vpop.f32.mrf.mxu2  ;;  %v14330_v29 = vld [vmem:[#allocation6 + $0x354] sm:$0xf]  ;;  %v11628_v0 = vld [vmem:[#allocation6 + $0x238] sm:$0xf0] }
 0x38a   :  { %8568 = vmatpush.bf16.msrb.mxu0 %v11367_v14  ;;  %v11724_v14 = vld [vmem:[#allocation6 + $0x2f8] sm:$0xf0]  ;;  %v11652_v48 = vld [vmem:[#allocation6 + $0x268] sm:$0xf0]  ;;  %v14310_v21 = vld [vmem:[#allocation6 + $0x2b4] sm:$0xf] }
 0x38b   :  { %8581 = vmatpush.bf16.msrb.mxu1 %v11431_v41  ;;  %v14334_v41 = vld [vmem:[#allocation6 + $0x374] sm:$0xf]  ;;  %v11727_v57 = vor.u32 %v14318_v16, %v11724_v14  ;;  %v11655_v50 = vor.u32 %v14300_v49, %v11652_v48  ;;  %v11772_v16 = vld [vmem:[#allocation6 + $0x358] sm:$0xf0] }
 0x38c   :  { %8594 = vmatpush.bf16.msrb.mxu2 %v11495_v17  ;;  %v11788_v17 = vld [vmem:[#allocation6 + $0x378] sm:$0xf0] }
 0x38d   :  { %8607 = vmatpush.bf16.msrb.mxu3 %v11559_v42  ;;  %v11852_v42 = vld [vmem:[#allocation6 + $0x3f8] sm:$0xf0]  ;;  %v11791_v20 = vor.u32 %v14334_v41, %v11788_v17  ;;  %v11711_v41 = vor.u32 %v14314_v22, %v11708_v35  ;;  %v11775_v17 = vor.u32 %v14330_v29, %v11772_v16  ;;  %v14292_v35 = vld [vmem:[#allocation6 + $0x224] sm:$0xf]  ;;  %v11620_v29 = vld [vmem:[#allocation6 + $0x228] sm:$0xf0] }
 0x38e   :  { %8569 = vmatpush.bf16.msrb.mxu0 %v11359_v53  ;;  %v11855_v53 = vor.u32 %v14350_v34, %v11852_v42  ;;  %v11836_v14 = vld [vmem:[#allocation6 + $0x3d8] sm:$0xf0]  ;;  %v11700_v42 = vld [vmem:[#allocation6 + $0x2c8] sm:$0xf0]  ;;  %v14308_v16 = vld [vmem:[#allocation6 + $0x2a4] sm:$0xf] }
 0x38f   :  { %8582 = vmatpush.bf16.msrb.mxu1 %v11423_v44  ;;  %v14348_v44 = vld [vmem:[#allocation6 + $0x3e4] sm:$0xf] }
 0x390   :  { %8595 = vmatpush.bf16.msrb.mxu2 %v11487_v55  ;;  %v11844_v55 = vld [vmem:[#allocation6 + $0x3e8] sm:$0xf0] }
 0x391   :  { %8608 = vmatpush.bf16.msrb.mxu3 %v11551_v4  ;;  %v14298_v4 = vld [vmem:[#allocation6 + $0x254] sm:$0xf]  ;;  %v11847_v43 = vor.u32 %v14348_v44, %v11844_v55 }
 0x392   :  { %8570 = vmatpush.bf16.msrb.mxu0 %v11351_v52  ;;  %v14346_v52 = vld [vmem:[#allocation6 + $0x3d4] sm:$0xf]  ;;  %v11647_v19 = vor.u32 %v14298_v4, %v11644_v13  ;;  %v11820_v13 = vld [vmem:[#allocation6 + $0x3b8] sm:$0xf0] }
 0x393   :  { %8583 = vmatpush.bf16.msrb.mxu1 %v11415_v25  ;;  %v14296_v25 = vld [vmem:[#allocation6 + $0x244] sm:$0xf]  ;;  %v11839_v34 = vor.u32 %v14346_v52, %v11836_v14  ;;  %v14342_v4 = vld [vmem:[#allocation6 + $0x3b4] sm:$0xf] }
 0x394   :  { %8596 = vmatpush.bf16.msrb.mxu2 %v11479_v33  ;;  %v14312_v33 = vld [vmem:[#allocation6 + $0x2c4] sm:$0xf]  ;;  %v11823_v52 = vor.u32 %v14342_v4, %v11820_v13 }
 0x395   :  { %8609 = vmatpush.bf16.msrb.mxu3 %v11543_v5  ;;  %8571 = vmatmul.bf16.vlgmr.msrb.gmra.mxu0 %v15136_v36  ;;  %v11636_v36 = vld [vmem:[#allocation6 + $0x248] sm:$0xf0]  ;;  %v14328_v5 = vld [vmem:[#allocation6 + $0x344] sm:$0xf]  ;;  %v11703_v48 = vor.u32 %v14312_v33, %v11700_v42 }
 0x396   :  { %8615 = vmatpush.bf16.msra.mxu0 %v11663_v1  ;;  %8584 = vmatmul.bf16.vlgmr.msrb.gmra.mxu1 %v15138_v54  ;;  %v11764_v54 = vld [vmem:[#allocation6 + $0x348] sm:$0xf0]  ;;  %v8364_v1 = vpop.f32.mrf.mxu0  ;;  %v11639_v49 = vor.u32 %v14296_v25, %v11636_v36  ;;  %v14304_v13 = vld [vmem:[#allocation6 + $0x284] sm:$0xf] }
 0x397   :  { %8628 = vmatpush.bf16.msra.mxu1 %v11727_v57  ;;  %8597 = vmatmul.bf16.vlgmr.msrb.gmra.mxu2 %v15140_v23  ;;  %v14344_v23 = vld [vmem:[#allocation6 + $0x3c4] sm:$0xf]  ;;  %v11828_v57 = vld [vmem:[#allocation6 + $0x3c8] sm:$0xf0]  ;;  %v11767_v11 = vor.u32 %v14328_v5, %v11764_v54  ;;  %v11623_v54 = vor.u32 %v14292_v35, %v11620_v29 }
 0x398   :  { %8641 = vmatpush.bf16.msra.mxu2 %v11791_v20  ;;  %8610 = vmatmul.bf16.vlgmr.msrb.gmra.mxu3 %v15142_v38  ;;  %v8365_v38 = vadd.f32 %v8364_v1, %v15314_v6  ;;  %v8377_v20 = vpop.f32.mrf.mxu1  ;;  %v11831_v55 = vor.u32 %v14344_v23, %v11828_v57  ;;  %v11812_v42 = vld [vmem:[#allocation6 + $0x3a8] sm:$0xf0] }
 0x399   :  { %8654 = vmatpush.bf16.msra.mxu3 %v11855_v53  ;;  %v14294_v53 = vld [vmem:[#allocation6 + $0x234] sm:$0xf]  ;;  %v11732_v29 = vld [vmem:[#allocation6 + $0x308] sm:$0xf0] }
 0x39a   :  { %8616 = vmatpush.bf16.msra.mxu0 %v11655_v50  ;;  %v8378_v44 = vadd.f32 %v8377_v20, %v8365_v38  ;;  %v11692_v50 = vld [vmem:[#allocation6 + $0x2b8] sm:$0xf0]  ;;  %v11631_v22 = vor.u32 %v14294_v53, %v11628_v0  ;;  %v8390_v14 = vpop.f32.mrf.mxu2  ;;  %v14290_v38 = vld [vmem:[#allocation6 + $0x214] sm:$0xf] }
 0x39b   :  { %8629 = vmatpush.bf16.msra.mxu1 %v11719_v18  ;;  %v14326_v18 = vld [vmem:[#allocation6 + $0x334] sm:$0xf]  ;;  %v11695_v6 = vor.u32 %v14310_v21, %v11692_v50  ;;  %v8403_v36 = vpop.f32.mrf.mxu3  ;;  %v11612_v20 = vld [vmem:[#allocation6 + $0x218] sm:$0xf0]  ;;  %v14288_v50 = vld [vmem:[#allocation6 + $0x204] sm:$0xf] }
 0x39c   :  { %8642 = vmatpush.bf16.msra.mxu2 %v11783_v39  ;;  %v11756_v39 = vld [vmem:[#allocation6 + $0x338] sm:$0xf0]  ;;  %v8391_v25 = vadd.f32 %v8390_v14, %v8378_v44  ;;  %v14322_v53 = vld [vmem:[#allocation6 + $0x314] sm:$0xf] }
 0x39d   :  { %8655 = vmatpush.bf16.msra.mxu3 %v11847_v43  ;;  %v11759_v43 = vor.u32 %v14326_v18, %v11756_v39  ;;  %v11740_v0 = vld [vmem:[#allocation6 + $0x318] sm:$0xf0]  ;;  %v14338_v21 = vld [vmem:[#allocation6 + $0x394] sm:$0xf]  ;;  %v11604_v18 = vld [vmem:[#allocation6 + $0x208] sm:$0xf0] }
 0x39e   :  { %8617 = vmatpush.bf16.msra.mxu0 %v11647_v19  ;;  %v11684_v19 = vld [vmem:[#allocation6 + $0x2a8] sm:$0xf0]  ;;  %v8366_v33 = vpop.f32.mrf.mxu0  ;;  %v15321_v1 = vadd.f32 %v8403_v36, %v8391_v25  ;;  %v11804_v44 = vld [vmem:[#allocation6 + $0x398] sm:$0xf0]  ;;  %v11743_v4 = vor.u32 %v14322_v53, %v11740_v0  ;;  %v11607_v25 = vor.u32 %v14288_v50, %v11604_v18  ;;  %v14380_v53 = vld [vmem:[#allocation6 + $0x4e4] sm:$0xf] }
 0x39f   :  { %8630 = vmatpush.bf16.msra.mxu1 %v11711_v41  ;;  %v14324_v41 = vld [vmem:[#allocation6 + $0x324] sm:$0xf]  ;;  %v11687_v23 = vor.u32 %v14308_v16, %v11684_v19  ;;  %v14366_v19 = vld [vmem:[#allocation6 + $0x474] sm:$0xf]  ;;  %v11980_v36 = vld [vmem:[#allocation6 + $0x4f8] sm:$0xf0] }
 0x3a0   :  { %8643 = vmatpush.bf16.msra.mxu2 %v11775_v17  ;;  %v11748_v17 = vld [vmem:[#allocation6 + $0x328] sm:$0xf0]  ;;  %v8379_v5 = vpop.f32.mrf.mxu1  ;;  %v14336_v16 = vld [vmem:[#allocation6 + $0x384] sm:$0xf]  ;;  %v14398_v33 = vld [vmem:[#allocation6 + $0x574] sm:$0xf] }
 0x3a1   :  { %8656 = vmatpush.bf16.msra.mxu3 %v11839_v34  ;;  %v14340_v34 = vld [vmem:[#allocation6 + $0x3a4] sm:$0xf]  ;;  %v11751_v57 = vor.u32 %v14324_v41, %v11748_v17  ;;  %v11916_v41 = vld [vmem:[#allocation6 + $0x478] sm:$0xf0]  ;;  %v14382_v17 = vld [vmem:[#allocation6 + $0x4f4] sm:$0xf] }
 0x3a2   :  { %8618 = vmatpush.bf16.msra.mxu0 %v11639_v49  ;;  %v14306_v49 = vld [vmem:[#allocation6 + $0x294] sm:$0xf]  ;;  %v8392_v35 = vpop.f32.mrf.mxu2  ;;  %v14412_v50 = vld [vmem:[#allocation6 + $0x5e4] sm:$0xf]  ;;  %v12100_v18 = vld [vmem:[#allocation6 + $0x5e8] sm:$0xf0] }
 0x3a3   :  { %8631 = vmatpush.bf16.msra.mxu1 %v11703_v48  ;;  %v11815_v48 = vor.u32 %v14340_v34, %v11812_v42  ;;  %v8405_v14 = vpop.f32.mrf.mxu3  ;;  %v12044_v34 = vld [vmem:[#allocation6 + $0x578] sm:$0xf0]  ;;  %v12103_v35 = vor.u32 %v14412_v50, %v12100_v18 }
 0x3a4   :  { %8644 = vmatpush.bf16.msra.mxu2 %v11767_v11  ;;  %v11676_v11 = vld [vmem:[#allocation6 + $0x298] sm:$0xf0]  ;;  %v14410_v14 = vld [vmem:[#allocation6 + $0x5d4] sm:$0xf] }
 0x3a5   :  { %8657 = vmatpush.bf16.msra.mxu3 %v11831_v55  ;;  %v11615_v55 = vor.u32 %v14290_v38, %v11612_v20  ;;  %v11679_v39 = vor.u32 %v14306_v49, %v11676_v11  ;;  %v11919_v38 = vor.u32 %v14366_v19, %v11916_v41  ;;  %v11983_v20 = vor.u32 %v14382_v17, %v11980_v36  ;;  %v11908_v11 = vld [vmem:[#allocation6 + $0x468] sm:$0xf0]  ;;  %v12092_v19 = vld [vmem:[#allocation6 + $0x5d8] sm:$0xf0]  ;;  %v14360_v36 = vld [vmem:[#allocation6 + $0x444] sm:$0xf] }
 0x3a6   :  { %8619 = vmatpush.bf16.msra.mxu0 %v11631_v22  ;;  %v11668_v22 = vld [vmem:[#allocation6 + $0x288] sm:$0xf0]  ;;  %v12047_v49 = vor.u32 %v14398_v33, %v12044_v34  ;;  %v14376_v33 = vld [vmem:[#allocation6 + $0x4c4] sm:$0xf]  ;;  %v12095_v34 = vor.u32 %v14410_v14, %v12092_v19  ;;  %v12076_v50 = vld [vmem:[#allocation6 + $0x5b8] sm:$0xf0] }
 0x3a7   :  { %8632 = vmatpush.bf16.msra.mxu1 %v11695_v6  ;;  %v14320_v6 = vld [vmem:[#allocation6 + $0x304] sm:$0xf]  ;;  %v11671_v42 = vor.u32 %v14304_v13, %v11668_v22  ;;  %v14362_v22 = vld [vmem:[#allocation6 + $0x454] sm:$0xf] }
 0x3a8   :  { %8645 = vmatpush.bf16.msra.mxu2 %v11759_v43  ;;  %v11807_v43 = vor.u32 %v14338_v21, %v11804_v44  ;;  %v11735_v5 = vor.u32 %v14320_v6, %v11732_v29  ;;  %v11972_v21 = vld [vmem:[#allocation6 + $0x4e8] sm:$0xf0]  ;;  %v14396_v44 = vld [vmem:[#allocation6 + $0x564] sm:$0xf]  ;;  %v11900_v6 = vld [vmem:[#allocation6 + $0x458] sm:$0xf0] }
 0x3a9   :  { %8658 = vmatpush.bf16.msra.mxu3 %v11823_v52  ;;  %v11796_v52 = vld [vmem:[#allocation6 + $0x388] sm:$0xf0]  ;;  %v11964_v29 = vld [vmem:[#allocation6 + $0x4d8] sm:$0xf0]  ;;  %v11903_v41 = vor.u32 %v14362_v22, %v11900_v6  ;;  %v14372_v6 = vld [vmem:[#allocation6 + $0x4a4] sm:$0xf] }
 0x3aa   :  { %8620 = vmatpush.bf16.msra.mxu0 %v11623_v54  ;;  %v14414_v54 = vld [vmem:[#allocation6 + $0x5f4] sm:$0xf]  ;;  %v11876_v22 = vld [vmem:[#allocation6 + $0x428] sm:$0xf0] }
 0x3ab   :  { %8633 = vmatpush.bf16.msra.mxu1 %v11687_v23  ;;  %v12108_v23 = vld [vmem:[#allocation6 + $0x5f8] sm:$0xf0] }
 0x3ac   :  { %8646 = vmatpush.bf16.msra.mxu2 %v11751_v57  ;;  %v11799_v57 = vor.u32 %v14336_v16, %v11796_v52  ;;  %v12111_v0 = vor.u32 %v14414_v54, %v12108_v23  ;;  %v14394_v16 = vld [vmem:[#allocation6 + $0x554] sm:$0xf]  ;;  %v12028_v52 = vld [vmem:[#allocation6 + $0x558] sm:$0xf0]  ;;  %v12084_v23 = vld [vmem:[#allocation6 + $0x5c8] sm:$0xf0] }
 0x3ad   :  { %8659 = vmatpush.bf16.msra.mxu3 %v11815_v48  ;;  %v14364_v48 = vld [vmem:[#allocation6 + $0x464] sm:$0xf] }
 0x3ae   :  { %8621 = vmatpush.bf16.msra.mxu0 %v11615_v55  ;;  %v12036_v55 = vld [vmem:[#allocation6 + $0x568] sm:$0xf0] }
 0x3af   :  { %8634 = vmatpush.bf16.msra.mxu1 %v11679_v39  ;;  %v11911_v39 = vor.u32 %v14364_v48, %v11908_v11  ;;  %v12039_v13 = vor.u32 %v14396_v44, %v12036_v55  ;;  %v11884_v48 = vld [vmem:[#allocation6 + $0x438] sm:$0xf0]  ;;  %v14374_v11 = vld [vmem:[#allocation6 + $0x4b4] sm:$0xf] }
 0x3b0   :  { %8647 = vmatpush.bf16.msra.mxu2 %v11743_v4  ;;  %v11975_v4 = vor.u32 %v14380_v53, %v11972_v21  ;;  %v14390_v21 = vld [vmem:[#allocation6 + $0x534] sm:$0xf]  ;;  %v12012_v44 = vld [vmem:[#allocation6 + $0x538] sm:$0xf0] }
 0x3b1   :  { %8660 = vmatpush.bf16.msra.mxu3 %v11807_v43  ;;  %v14378_v43 = vld [vmem:[#allocation6 + $0x4d4] sm:$0xf] }
 0x3b2   :  { %8622 = vmatpush.bf16.msra.mxu0 %v11607_v25  ;;  %v11967_v17 = vor.u32 %v14378_v43, %v11964_v29  ;;  %v12031_v25 = vor.u32 %v14394_v16, %v12028_v52  ;;  %v15327_v54 = vpop.f32.mrf.mxu0  ;;  %v14406_v55 = vld [vmem:[#allocation6 + $0x5b4] sm:$0xf]  ;;  %v11940_v29 = vld [vmem:[#allocation6 + $0x4a8] sm:$0xf0]  ;;  %v14388_v16 = vld [vmem:[#allocation6 + $0x524] sm:$0xf] }
 0x3b3   :  { %8635 = vmatpush.bf16.msra.mxu1 %v11671_v42  ;;  %v11956_v42 = vld [vmem:[#allocation6 + $0x4c8] sm:$0xf0]  ;;  %v12079_v43 = vor.u32 %v14406_v55, %v12076_v50  ;;  %v14384_v55 = vld [vmem:[#allocation6 + $0x504] sm:$0xf] }
 0x3b4   :  { %8648 = vmatpush.bf16.msra.mxu2 %v11735_v5  ;;  %v14392_v5 = vld [vmem:[#allocation6 + $0x544] sm:$0xf]  ;;  %v12004_v52 = vld [vmem:[#allocation6 + $0x528] sm:$0xf0] }
 0x3b5   :  { %8661 = vmatpush.bf16.msra.mxu3 %v11799_v57  ;;  %8623 = vmatmul.bf16.vlgmr.msra.gmra.mxu0 %v15158_v27  ;;  %v11892_v27 = vld [vmem:[#allocation6 + $0x448] sm:$0xf0] }
 0x3b6   :  { %8667 = vmatpush.bf16.msrb.mxu0 %v11919_v38  ;;  %8636 = vmatmul.bf16.vlgmr.msra.gmra.mxu1 %v15160_v47  ;;  %v12020_v47 = vld [vmem:[#allocation6 + $0x548] sm:$0xf0]  ;;  %v11895_v57 = vor.u32 %v14360_v36, %v11892_v27  ;;  %v11959_v38 = vor.u32 %v14376_v33, %v11956_v42  ;;  %v11943_v27 = vor.u32 %v14372_v6, %v11940_v29  ;;  %v11868_v42 = vld [vmem:[#allocation6 + $0x418] sm:$0xf0]  ;;  %v14430_v6 = vld [vmem:[#allocation6 + $0x674] sm:$0xf] }
 0x3b7   :  { %8680 = vmatpush.bf16.msrb.mxu1 %v11983_v20  ;;  %8649 = vmatmul.bf16.vlgmr.msra.gmra.mxu2 %v15162_v58  ;;  %v14408_v58 = vld [vmem:[#allocation6 + $0x5c4] sm:$0xf]  ;;  %v12023_v20 = vor.u32 %v14392_v5, %v12020_v47  ;;  %v12007_v33 = vor.u32 %v14388_v16, %v12004_v52  ;;  %v14370_v5 = vld [vmem:[#allocation6 + $0x494] sm:$0xf]  ;;  %v12236_v52 = vld [vmem:[#allocation6 + $0x6f8] sm:$0xf0] }
 0x3b8   :  { %8693 = vmatpush.bf16.msrb.mxu2 %v12047_v49  ;;  %8662 = vmatmul.bf16.vlgmr.msra.gmra.mxu3 %v15164_v15  ;;  %v15329_v15 = vpop.f32.mrf.mxu1  ;;  %v14358_v49 = vld [vmem:[#allocation6 + $0x434] sm:$0xf]  ;;  %v12087_v53 = vor.u32 %v14408_v58, %v12084_v23  ;;  %v11932_v58 = vld [vmem:[#allocation6 + $0x498] sm:$0xf0] }
 0x3b9   :  { %8706 = vmatpush.bf16.msrb.mxu3 %v12111_v0  ;;  %v11948_v0 = vld [vmem:[#allocation6 + $0x4b8] sm:$0xf0]  ;;  %v11887_v18 = vor.u32 %v14358_v49, %v11884_v48  ;;  %v14386_v23 = vld [vmem:[#allocation6 + $0x514] sm:$0xf]  ;;  %v14352_v48 = vld [vmem:[#allocation6 + $0x404] sm:$0xf] }
 0x3ba   :  { %8668 = vmatpush.bf16.msrb.mxu0 %v11911_v39  ;;  %v11951_v39 = vor.u32 %v14374_v11, %v11948_v0  ;;  %v8418_v19 = vpop.f32.mrf.mxu0  ;;  %v11860_v11 = vld [vmem:[#allocation6 + $0x408] sm:$0xf0]  ;;  %v14446_v29 = vld [vmem:[#allocation6 + $0x6f4] sm:$0xf] }
 0x3bb   :  { %8681 = vmatpush.bf16.msrb.mxu1 %v11975_v4  ;;  %v12015_v4 = vor.u32 %v14390_v21, %v12012_v44  ;;  %v15333_v14 = vpop.f32.mrf.mxu3  ;;  %v14368_v21 = vld [vmem:[#allocation6 + $0x484] sm:$0xf]  ;;  %v11924_v44 = vld [vmem:[#allocation6 + $0x488] sm:$0xf0]  ;;  %v11863_v16 = vor.u32 %v14352_v48, %v11860_v11  ;;  %v14462_v19 = vld [vmem:[#allocation6 + $0x774] sm:$0xf] }
 0x3bc   :  { %8694 = vmatpush.bf16.msrb.mxu2 %v12039_v13  ;;  %v14356_v13 = vld [vmem:[#allocation6 + $0x424] sm:$0xf]  ;;  %v12356_v11 = vld [vmem:[#allocation6 + $0x7e8] sm:$0xf0] }
 0x3bd   :  { %8707 = vmatpush.bf16.msrb.mxu3 %v12103_v35  ;;  %v15331_v35 = vpop.f32.mrf.mxu2  ;;  %v11879_v36 = vor.u32 %v14356_v13, %v11876_v22  ;;  %v12052_v13 = vld [vmem:[#allocation6 + $0x588] sm:$0xf0]  ;;  %v14476_v48 = vld [vmem:[#allocation6 + $0x7e4] sm:$0xf] }
 0x3be   :  { %8669 = vmatpush.bf16.msrb.mxu0 %v11903_v41  ;;  %v14404_v41 = vld [vmem:[#allocation6 + $0x5a4] sm:$0xf] }
 0x3bf   :  { %8682 = vmatpush.bf16.msrb.mxu1 %v11967_v17  ;;  %v12068_v17 = vld [vmem:[#allocation6 + $0x5a8] sm:$0xf0] }
 0x3c0   :  { %8695 = vmatpush.bf16.msrb.mxu2 %v12031_v25  ;;  %v8431_v25 = vpop.f32.mrf.mxu1  ;;  %v12071_v47 = vor.u32 %v14404_v41, %v12068_v17  ;;  %v12300_v41 = vld [vmem:[#allocation6 + $0x778] sm:$0xf0]  ;;  %v11927_v17 = vor.u32 %v14368_v21, %v11924_v44  ;;  %v14426_v44 = vld [vmem:[#allocation6 + $0x654] sm:$0xf] }
 0x3c1   :  { %8708 = vmatpush.bf16.msrb.mxu3 %v12095_v34  ;;  %v14354_v34 = vld [vmem:[#allocation6 + $0x414] sm:$0xf] }
 0x3c2   :  { %8670 = vmatpush.bf16.msrb.mxu0 %v11895_v57  ;;  %v11996_v57 = vld [vmem:[#allocation6 + $0x518] sm:$0xf0]  ;;  %v11871_v49 = vor.u32 %v14354_v34, %v11868_v42  ;;  %v12239_v42 = vor.u32 %v14446_v29, %v12236_v52 }
 0x3c3   :  { %8683 = vmatpush.bf16.msrb.mxu1 %v11959_v38  ;;  %v14402_v38 = vld [vmem:[#allocation6 + $0x594] sm:$0xf]  ;;  %v11999_v0 = vor.u32 %v14386_v23, %v11996_v57  ;;  %v8457_v22 = vpop.f32.mrf.mxu3  ;;  %v14444_v23 = vld [vmem:[#allocation6 + $0x6e4] sm:$0xf] }
 0x3c4   :  { %8696 = vmatpush.bf16.msrb.mxu2 %v12023_v20  ;;  %v12060_v20 = vld [vmem:[#allocation6 + $0x598] sm:$0xf0]  ;;  %v14474_v22 = vld [vmem:[#allocation6 + $0x7d4] sm:$0xf] }
 0x3c5   :  { %8709 = vmatpush.bf16.msrb.mxu3 %v12087_v53  ;;  %v11935_v53 = vor.u32 %v14370_v5, %v11932_v58  ;;  %v12063_v50 = vor.u32 %v14402_v38, %v12060_v20  ;;  %v12303_v5 = vor.u32 %v14462_v19, %v12300_v41  ;;  %v12164_v58 = vld [vmem:[#allocation6 + $0x668] sm:$0xf0]  ;;  %v14460_v20 = vld [vmem:[#allocation6 + $0x764] sm:$0xf] }
 0x3c6   :  { %8671 = vmatpush.bf16.msrb.mxu0 %v11887_v18  ;;  %v8444_v18 = vpop.f32.mrf.mxu2  ;;  %v12228_v38 = vld [vmem:[#allocation6 + $0x6e8] sm:$0xf0]  ;;  %v14424_v19 = vld [vmem:[#allocation6 + $0x644] sm:$0xf] }
 0x3c7   :  { %8684 = vmatpush.bf16.msrb.mxu1 %v11951_v39  ;;  %v11988_v39 = vld [vmem:[#allocation6 + $0x508] sm:$0xf0]  ;;  %v12359_v18 = vor.u32 %v14476_v48, %v12356_v11  ;;  %v14440_v41 = vld [vmem:[#allocation6 + $0x6c4] sm:$0xf]  ;;  %v12268_v48 = vld [vmem:[#allocation6 + $0x738] sm:$0xf0] }
 0x3c8   :  { %8697 = vmatpush.bf16.msrb.mxu2 %v12015_v4  ;;  %v14400_v4 = vld [vmem:[#allocation6 + $0x584] sm:$0xf]  ;;  %v11991_v25 = vor.u32 %v14384_v55, %v11988_v39  ;;  %v12156_v55 = vld [vmem:[#allocation6 + $0x658] sm:$0xf0]  ;;  %v14470_v11 = vld [vmem:[#allocation6 + $0x7b4] sm:$0xf] }
 0x3c9   :  { %8710 = vmatpush.bf16.msrb.mxu3 %v12079_v43  ;;  %v12172_v43 = vld [vmem:[#allocation6 + $0x678] sm:$0xf0]  ;;  %v12159_v29 = vor.u32 %v14426_v44, %v12156_v55  ;;  %v14420_v55 = vld [vmem:[#allocation6 + $0x624] sm:$0xf] }
 0x3ca   :  { %8672 = vmatpush.bf16.msrb.mxu0 %v11879_v36  ;;  %v14478_v36 = vld [vmem:[#allocation6 + $0x7f4] sm:$0xf]  ;;  %v12175_v34 = vor.u32 %v14430_v6, %v12172_v43  ;;  %v12220_v39 = vld [vmem:[#allocation6 + $0x6d8] sm:$0xf0]  ;;  %v15409_v43 = vld [vmem:[#allocation12_spill] sm:$0xff] }
 0x3cb   :  { %8685 = vmatpush.bf16.msrb.mxu1 %v11943_v27  ;;  %v12364_v27 = vld [vmem:[#allocation6 + $0x7f8] sm:$0xf0] }
 0x3cc   :  { %8698 = vmatpush.bf16.msrb.mxu2 %v12007_v33  ;;  %v12055_v33 = vor.u32 %v14400_v4, %v12052_v13  ;;  %v12367_v57 = vor.u32 %v14478_v36, %v12364_v27  ;;  %v14458_v4 = vld [vmem:[#allocation6 + $0x754] sm:$0xf]  ;;  %v12284_v13 = vld [vmem:[#allocation6 + $0x758] sm:$0xf0]  ;;  %v14456_v36 = vld [vmem:[#allocation6 + $0x744] sm:$0xf] }
 0x3cd   :  { %8711 = vmatpush.bf16.msrb.mxu3 %v12071_v47  ;;  %v14428_v47 = vld [vmem:[#allocation6 + $0x664] sm:$0xf]  ;;  %v12348_v6 = vld [vmem:[#allocation6 + $0x7d8] sm:$0xf0]  ;;  %v12287_v52 = vor.u32 %v14458_v4, %v12284_v13  ;;  %v12196_v13 = vld [vmem:[#allocation6 + $0x6a8] sm:$0xf0] }
 0x3ce   :  { %8673 = vmatpush.bf16.msrb.mxu0 %v11871_v49  ;;  %v12292_v49 = vld [vmem:[#allocation6 + $0x768] sm:$0xf0] }
 0x3cf   :  { %8686 = vmatpush.bf16.msrb.mxu1 %v11935_v53  ;;  %v12167_v53 = vor.u32 %v14428_v47, %v12164_v58  ;;  %v12295_v21 = vor.u32 %v14460_v20, %v12292_v49  ;;  %v14422_v58 = vld [vmem:[#allocation6 + $0x634] sm:$0xf]  ;;  %v12204_v20 = vld [vmem:[#allocation6 + $0x6b8] sm:$0xf0] }
 0x3d0   :  { %8699 = vmatpush.bf16.msrb.mxu2 %v11999_v0  ;;  %v12231_v0 = vor.u32 %v14444_v23, %v12228_v38  ;;  %v12140_v23 = vld [vmem:[#allocation6 + $0x638] sm:$0xf0]  ;;  %v14454_v49 = vld [vmem:[#allocation6 + $0x734] sm:$0xf] }
 0x3d1   :  { %8712 = vmatpush.bf16.msrb.mxu3 %v12063_v50  ;;  %v14442_v50 = vld [vmem:[#allocation6 + $0x6d4] sm:$0xf]  ;;  %v12271_v44 = vor.u32 %v14454_v49, %v12268_v48 }
 0x3d2   :  { %8674 = vmatpush.bf16.msrb.mxu0 %v11863_v16  ;;  %v12223_v16 = vor.u32 %v14442_v50, %v12220_v39  ;;  %v15339_v27 = vpop.f32.mrf.mxu0  ;;  %v12132_v50 = vld [vmem:[#allocation6 + $0x628] sm:$0xf0] }
 0x3d3   :  { %8687 = vmatpush.bf16.msrb.mxu1 %v11927_v17  ;;  %v12351_v17 = vor.u32 %v14474_v22, %v12348_v6  ;;  %v14452_v22 = vld [vmem:[#allocation6 + $0x724] sm:$0xf]  ;;  %v12260_v6 = vld [vmem:[#allocation6 + $0x728] sm:$0xf0] }
 0x3d4   :  { %8700 = vmatpush.bf16.msrb.mxu2 %v11991_v25  ;;  %v12212_v25 = vld [vmem:[#allocation6 + $0x6c8] sm:$0xf0] }
 0x3d5   :  { %8713 = vmatpush.bf16.msrb.mxu3 %v12055_v33  ;;  %8675 = vmatmul.bf16.vlgmr.msrb.gmra.mxu0 %v15180_v40  ;;  %v12148_v40 = vld [vmem:[#allocation6 + $0x648] sm:$0xf0] }
 0x3d6   :  { %8719 = vmatpush.bf16.msra.mxu0 %v12175_v34  ;;  %8688 = vmatmul.bf16.vlgmr.msrb.gmra.mxu1 %v15182_v60  ;;  %v12276_v60 = vld [vmem:[#allocation6 + $0x748] sm:$0xf0]  ;;  %v15341_v34 = vpop.f32.mrf.mxu1 }
 0x3d7   :  { %8732 = vmatpush.bf16.msra.mxu1 %v12239_v42  ;;  %8701 = vmatmul.bf16.vlgmr.msrb.gmra.mxu2 %v15184_v7  ;;  %v14472_v7 = vld [vmem:[#allocation6 + $0x7c4] sm:$0xf]  ;;  %v12340_v33 = vld [vmem:[#allocation6 + $0x7c8] sm:$0xf0]  ;;  %v12151_v42 = vor.u32 %v14424_v19, %v12148_v40  ;;  %v12279_v47 = vor.u32 %v14456_v36, %v12276_v60  ;;  %v14418_v36 = vld [vmem:[#allocation6 + $0x614] sm:$0xf] }
 0x3d8   :  { %8745 = vmatpush.bf16.msra.mxu2 %v12303_v5  ;;  %8714 = vmatmul.bf16.vlgmr.msrb.gmra.mxu3 %v15409_v43  ;;  %v12215_v5 = vor.u32 %v14440_v41, %v12212_v25  ;;  %v12343_v38 = vor.u32 %v14472_v7, %v12340_v33  ;;  %v8417_v43 = vadd.f32 %v15327_v54, %v15321_v1  ;;  %v12324_v19 = vld [vmem:[#allocation6 + $0x7a8] sm:$0xf0]  ;;  %v12124_v60 = vld [vmem:[#allocation6 + $0x618] sm:$0xf0]  ;;  %v14434_v7 = vld [vmem:[#allocation6 + $0x694] sm:$0xf] }
 0x3d9   :  { %8758 = vmatpush.bf16.msra.mxu3 %v12367_v57  ;;  %v14438_v57 = vld [vmem:[#allocation6 + $0x6b4] sm:$0xf]  ;;  %v12135_v41 = vor.u32 %v14420_v55, %v12132_v50  ;;  %v12263_v25 = vor.u32 %v14452_v22, %v12260_v6  ;;  %v12252_v1 = vld [vmem:[#allocation6 + $0x718] sm:$0xf0]  ;;  %v12244_v55 = vld [vmem:[#allocation6 + $0x708] sm:$0xf0] }
 0x3da   :  { %8720 = vmatpush.bf16.msra.mxu0 %v12167_v53  ;;  %v12332_v53 = vld [vmem:[#allocation6 + $0x7b8] sm:$0xf0]  ;;  %v15343_v4 = vpop.f32.mrf.mxu2  ;;  %v8430_v54 = vadd.f32 %v15329_v15, %v8417_v43  ;;  %v14464_v15 = vld [vmem:[#allocation6 + $0x784] sm:$0xf]  ;;  %v12308_v50 = vld [vmem:[#allocation6 + $0x788] sm:$0xf0] }
 0x3db   :  { %8733 = vmatpush.bf16.msra.mxu1 %v12231_v0  ;;  %v12143_v0 = vor.u32 %v14422_v58, %v12140_v23  ;;  %v12335_v39 = vor.u32 %v14470_v11, %v12332_v53  ;;  %v12316_v58 = vld [vmem:[#allocation6 + $0x798] sm:$0xf0]  ;;  %v12127_v23 = vor.u32 %v14418_v36, %v12124_v60  ;;  %v14432_v11 = vld [vmem:[#allocation6 + $0x684] sm:$0xf]  ;;  %v12180_v53 = vld [vmem:[#allocation6 + $0x688] sm:$0xf0] }
 0x3dc   :  { %8746 = vmatpush.bf16.msra.mxu2 %v12295_v21  ;;  %v12207_v21 = vor.u32 %v14438_v57, %v12204_v20  ;;  %v14416_v57 = vld [vmem:[#allocation6 + $0x604] sm:$0xf]  ;;  %v8443_v20 = vadd.f32 %v15331_v35, %v8430_v54  ;;  %v14510_v22 = vld [vmem:[#allocation6 + $0x8f4] sm:$0xf]  ;;  %v12492_v35 = vld [vmem:[#allocation6 + $0x8f8] sm:$0xf0] }
 0x3dd   :  { %8759 = vmatpush.bf16.msra.mxu3 %v12359_v18  ;;  %v14436_v18 = vld [vmem:[#allocation6 + $0x6a4] sm:$0xf]  ;;  %v14526_v43 = vld [vmem:[#allocation6 + $0x974] sm:$0xf] }
 0x3de   :  { %8721 = vmatpush.bf16.msra.mxu0 %v12159_v29  ;;  %v15347_v29 = vpop.f32.mrf.mxu3  ;;  %v8483_v40 = vpop.f32.mrf.mxu1 }
 0x3df   :  { %8734 = vmatpush.bf16.msra.mxu1 %v12223_v16  ;;  %v8470_v16 = vpop.f32.mrf.mxu0 }
 0x3e0   :  { %8747 = vmatpush.bf16.msra.mxu2 %v12287_v52  ;;  %v14468_v52 = vld [vmem:[#allocation6 + $0x7a4] sm:$0xf]  ;;  %v12556_v16 = vld [vmem:[#allocation6 + $0x978] sm:$0xf0] }
 0x3e1   :  { %8760 = vmatpush.bf16.msra.mxu3 %v12351_v17  ;;  %v12199_v17 = vor.u32 %v14436_v18, %v12196_v13  ;;  %v12327_v33 = vor.u32 %v14468_v52, %v12324_v19  ;;  %v12428_v13 = vld [vmem:[#allocation6 + $0x878] sm:$0xf0]  ;;  %v8456_v52 = vadd.f32 %v15333_v14, %v8443_v20  ;;  %v12183_v19 = vor.u32 %v14432_v11, %v12180_v53  ;;  %v14524_v14 = vld [vmem:[#allocation6 + $0x964] sm:$0xf]  ;;  %v14506_v53 = vld [vmem:[#allocation6 + $0x8d4] sm:$0xf] }
 0x3e2   :  { %8722 = vmatpush.bf16.msra.mxu0 %v12151_v42  ;;  %v12188_v42 = vld [vmem:[#allocation6 + $0x698] sm:$0xf0] }
 0x3e3   :  { %8735 = vmatpush.bf16.msra.mxu1 %v12215_v5  ;;  %v14450_v5 = vld [vmem:[#allocation6 + $0x714] sm:$0xf]  ;;  %v12191_v49 = vor.u32 %v14434_v7, %v12188_v42  ;;  %v8469_v60 = vadd.f32 %v15339_v27, %v8456_v52  ;;  %v12495_v7 = vor.u32 %v14510_v22, %v12492_v35  ;;  %v14492_v42 = vld [vmem:[#allocation6 + $0x864] sm:$0xf]  ;;  %v12412_v11 = vld [vmem:[#allocation6 + $0x858] sm:$0xf0] }
 0x3e4   :  { %8748 = vmatpush.bf16.msra.mxu2 %v12279_v47  ;;  %v14466_v47 = vld [vmem:[#allocation6 + $0x794] sm:$0xf]  ;;  %v12255_v48 = vor.u32 %v14450_v5, %v12252_v1  ;;  %v12420_v5 = vld [vmem:[#allocation6 + $0x868] sm:$0xf0]  ;;  %v14508_v1 = vld [vmem:[#allocation6 + $0x8e4] sm:$0xf] }
 0x3e5   :  { %8761 = vmatpush.bf16.msra.mxu3 %v12343_v38  ;;  %v12116_v38 = vld [vmem:[#allocation6 + $0x608] sm:$0xf0]  ;;  %v8482_v20 = vadd.f32 %v15341_v34, %v8469_v60  ;;  %v14538_v34 = vld [vmem:[#allocation6 + $0x9d4] sm:$0xf]  ;;  %v14488_v22 = vld [vmem:[#allocation6 + $0x844] sm:$0xf] }
 0x3e6   :  { %8723 = vmatpush.bf16.msra.mxu0 %v12143_v0  ;;  %v14448_v0 = vld [vmem:[#allocation6 + $0x704] sm:$0xf]  ;;  %v8509_v18 = vpop.f32.mrf.mxu3  ;;  %v12119_v6 = vor.u32 %v14416_v57, %v12116_v38  ;;  %v12612_v57 = vld [vmem:[#allocation6 + $0x9e8] sm:$0xf0]  ;;  %v12423_v38 = vor.u32 %v14492_v42, %v12420_v5  ;;  %v14502_v42 = vld [vmem:[#allocation6 + $0x8b4] sm:$0xf] }
 0x3e7   :  { %8736 = vmatpush.bf16.msra.mxu1 %v12207_v21  ;;  %v12319_v21 = vor.u32 %v14466_v47, %v12316_v58  ;;  %v12247_v40 = vor.u32 %v14448_v0, %v12244_v55  ;;  %v12484_v47 = vld [vmem:[#allocation6 + $0x8e8] sm:$0xf0]  ;;  %v12540_v55 = vld [vmem:[#allocation6 + $0x958] sm:$0xf0]  ;;  %v14504_v35 = vld [vmem:[#allocation6 + $0x8c4] sm:$0xf] }
 0x3e8   :  { %8749 = vmatpush.bf16.msra.mxu2 %v12271_v44  ;;  %v8496_v44 = vpop.f32.mrf.mxu2  ;;  %v12548_v58 = vld [vmem:[#allocation6 + $0x968] sm:$0xf0]  ;;  %v12487_v27 = vor.u32 %v14508_v1, %v12484_v47  ;;  %v12460_v1 = vld [vmem:[#allocation6 + $0x8b8] sm:$0xf0] }
 0x3e9   :  { %8762 = vmatpush.bf16.msra.mxu3 %v12335_v39  ;;  %v14494_v39 = vld [vmem:[#allocation6 + $0x874] sm:$0xf]  ;;  %v15410_v18 = vld [vmem:[#allocation13_spill] sm:$0xff]  ;;  %v12524_v47 = vld [vmem:[#allocation6 + $0x938] sm:$0xf0] }
 0x3ea   :  { %8724 = vmatpush.bf16.msra.mxu0 %v12135_v41  ;;  %v14542_v41 = vld [vmem:[#allocation6 + $0x9f4] sm:$0xf]  ;;  %v12431_v36 = vor.u32 %v14494_v39, %v12428_v13 }
 0x3eb   :  { %8737 = vmatpush.bf16.msra.mxu1 %v12199_v17  ;;  %v12620_v17 = vld [vmem:[#allocation6 + $0x9f8] sm:$0xf0]  ;;  %v14522_v44 = vld [vmem:[#allocation6 + $0x954] sm:$0xf] }
 0x3ec   :  { %8750 = vmatpush.bf16.msra.mxu2 %v12263_v25  ;;  %v12311_v25 = vor.u32 %v14464_v15, %v12308_v50  ;;  %v12623_v54 = vor.u32 %v14542_v41, %v12620_v17  ;;  %v8495_v15 = vadd.f32 %v15343_v4, %v8482_v20  ;;  %v12604_v50 = vld [vmem:[#allocation6 + $0x9d8] sm:$0xf0]  ;;  %v12468_v4 = vld [vmem:[#allocation6 + $0x8c8] sm:$0xf0]  ;;  %v14484_v20 = vld [vmem:[#allocation6 + $0x824] sm:$0xf] }
 0x3ed   :  { %8763 = vmatpush.bf16.msra.mxu3 %v12327_v33  ;;  %v12559_v33 = vor.u32 %v14526_v43, %v12556_v16  ;;  %v12607_v43 = vor.u32 %v14538_v34, %v12604_v50  ;;  %v14520_v16 = vld [vmem:[#allocation6 + $0x944] sm:$0xf]  ;;  %v12580_v50 = vld [vmem:[#allocation6 + $0x9a8] sm:$0xf0] }
 0x3ee   :  { %8725 = vmatpush.bf16.msra.mxu0 %v12127_v23  ;;  %v14540_v23 = vld [vmem:[#allocation6 + $0x9e4] sm:$0xf] }
 0x3ef   :  { %8738 = vmatpush.bf16.msra.mxu1 %v12191_v49  ;;  %v12551_v49 = vor.u32 %v14524_v14, %v12548_v58  ;;  %v12615_v0 = vor.u32 %v14540_v23, %v12612_v57  ;;  %v12588_v14 = vld [vmem:[#allocation6 + $0x9b8] sm:$0xf0]  ;;  %v12463_v57 = vor.u32 %v14502_v42, %v12460_v1  ;;  %v14532_v34 = vld [vmem:[#allocation6 + $0x9a4] sm:$0xf]  ;;  %v12500_v1 = vld [vmem:[#allocation6 + $0x908] sm:$0xf0] }
 0x3f0   :  { %8751 = vmatpush.bf16.msra.mxu2 %v12255_v48  ;;  %v14490_v48 = vld [vmem:[#allocation6 + $0x854] sm:$0xf] }
 0x3f1   :  { %8764 = vmatpush.bf16.msra.mxu3 %v12319_v21  ;;  %v12476_v21 = vld [vmem:[#allocation6 + $0x8d8] sm:$0xf0]  ;;  %v12415_v39 = vor.u32 %v14490_v48, %v12412_v11 }
 0x3f2   :  { %8726 = vmatpush.bf16.msra.mxu0 %v12119_v6  ;;  %v12479_v13 = vor.u32 %v14506_v53, %v12476_v21  ;;  %v12404_v6 = vld [vmem:[#allocation6 + $0x848] sm:$0xf0]  ;;  %v8520_v52 = vpop.f32.mrf.mxu0 }
 0x3f3   :  { %8739 = vmatpush.bf16.msra.mxu1 %v12183_v19  ;;  %v14536_v19 = vld [vmem:[#allocation6 + $0x9c4] sm:$0xf]  ;;  %v8533_v41 = vpop.f32.mrf.mxu1  ;;  %v12407_v17 = vor.u32 %v14488_v22, %v12404_v6  ;;  %v12452_v53 = vld [vmem:[#allocation6 + $0x8a8] sm:$0xf0]  ;;  %v14482_v6 = vld [vmem:[#allocation6 + $0x814] sm:$0xf] }
 0x3f4   :  { %8752 = vmatpush.bf16.msra.mxu2 %v12247_v40  ;;  %v12596_v40 = vld [vmem:[#allocation6 + $0x9c8] sm:$0xf0] }
 0x3f5   :  { %8765 = vmatpush.bf16.msra.mxu3 %v12311_v25  ;;  %8727 = vmatmul.bf16.vlgmr.msra.gmra.mxu0 %v15204_v8  ;;  %v12543_v8 = vor.u32 %v14522_v44, %v12540_v55  ;;  %v12599_v5 = vor.u32 %v14536_v19, %v12596_v40  ;;  %v12516_v21 = vld [vmem:[#allocation6 + $0x928] sm:$0xf0]  ;;  %v12572_v19 = vld [vmem:[#allocation6 + $0x998] sm:$0xf0] }
 0x3f6   :  { %8771 = vmatpush.bf16.msrb.mxu0 %v12431_v36  ;;  %8740 = vmatmul.bf16.vlgmr.msra.gmra.mxu1 %v15206_v28  ;;  %v12532_v28 = vld [vmem:[#allocation6 + $0x948] sm:$0xf0]  ;;  %v12471_v36 = vor.u32 %v14504_v35, %v12468_v4  ;;  %v12380_v35 = vld [vmem:[#allocation6 + $0x818] sm:$0xf0]  ;;  %v12583_v4 = vor.u32 %v14532_v34, %v12580_v50  ;;  %v14572_v50 = vld [vmem:[#allocation6 + $0xae4] sm:$0xf] }
 0x3f7   :  { %8784 = vmatpush.bf16.msrb.mxu1 %v12495_v7  ;;  %8753 = vmatmul.bf16.vlgmr.msra.gmra.mxu2 %v15208_v63  ;;  %v8508_v63 = vadd.f32 %v15347_v29, %v8495_v15  ;;  %v12535_v60 = vor.u32 %v14520_v16, %v12532_v28  ;;  %v14486_v7 = vld [vmem:[#allocation6 + $0x834] sm:$0xf]  ;;  %v12444_v16 = vld [vmem:[#allocation6 + $0x898] sm:$0xf0]  ;;  %v12383_v40 = vor.u32 %v14482_v6, %v12380_v35  ;;  %v12676_v34 = vld [vmem:[#allocation6 + $0xa68] sm:$0xf0] }
 0x3f8   :  { %8797 = vmatpush.bf16.msrb.mxu2 %v12559_v33  ;;  %8766 = vmatmul.bf16.vlgmr.msra.gmra.mxu3 %v15410_v18  ;;  %v12396_v33 = vld [vmem:[#allocation6 + $0x838] sm:$0xf0]  ;;  %v14534_v29 = vld [vmem:[#allocation6 + $0x9b4] sm:$0xf]  ;;  %v12868_v6 = vld [vmem:[#allocation6 + $0xbe8] sm:$0xf0] }
 0x3f9   :  { %8810 = vmatpush.bf16.msrb.mxu3 %v12623_v54  ;;  %v8521_v25 = vadd.f32 %v8520_v52, %v8508_v63  ;;  %v14518_v54 = vld [vmem:[#allocation6 + $0x934] sm:$0xf]  ;;  %v12399_v58 = vor.u32 %v14486_v7, %v12396_v33  ;;  %v12591_v48 = vor.u32 %v14534_v29, %v12588_v14  ;;  %v12508_v63 = vld [vmem:[#allocation6 + $0x918] sm:$0xf0]  ;;  %v12436_v7 = vld [vmem:[#allocation6 + $0x888] sm:$0xf0] }
 0x3fa   :  { %8772 = vmatpush.bf16.msrb.mxu0 %v12423_v38  ;;  %v12527_v38 = vor.u32 %v14518_v54, %v12524_v47  ;;  %v8546_v11 = vpop.f32.mrf.mxu2  ;;  %v8522_v15 = vpop.f32.mrf.mxu0  ;;  %v14514_v28 = vld [vmem:[#allocation6 + $0x914] sm:$0xf]  ;;  %v14512_v33 = vld [vmem:[#allocation6 + $0x904] sm:$0xf]  ;;  %v12564_v47 = vld [vmem:[#allocation6 + $0x988] sm:$0xf0] }
 0x3fb   :  { %8785 = vmatpush.bf16.msrb.mxu1 %v12487_v27  ;;  %v8534_v23 = vadd.f32 %v8533_v41, %v8521_v25  ;;  %v12388_v27 = vld [vmem:[#allocation6 + $0x828] sm:$0xf0]  ;;  %v8559_v55 = vpop.f32.mrf.mxu3  ;;  %v8535_v18 = vpop.f32.mrf.mxu1  ;;  %v14530_v52 = vld [vmem:[#allocation6 + $0x994] sm:$0xf]  ;;  %v14480_v41 = vld [vmem:[#allocation6 + $0x804] sm:$0xf] }
 0x3fc   :  { %8798 = vmatpush.bf16.msrb.mxu2 %v12551_v49  ;;  %v14500_v49 = vld [vmem:[#allocation6 + $0x8a4] sm:$0xf]  ;;  %v12575_v42 = vor.u32 %v14530_v52, %v12572_v19  ;;  %v14558_v14 = vld [vmem:[#allocation6 + $0xa74] sm:$0xf]  ;;  %v12732_v19 = vld [vmem:[#allocation6 + $0xad8] sm:$0xf0] }
 0x3fd   :  { %8811 = vmatpush.bf16.msrb.mxu3 %v12615_v0  ;;  %v14516_v0 = vld [vmem:[#allocation6 + $0x924] sm:$0xf]  ;;  %v8547_v44 = vadd.f32 %v8546_v11, %v8534_v23  ;;  %v14574_v23 = vld [vmem:[#allocation6 + $0xaf4] sm:$0xf] }
 0x3fe   :  { %8773 = vmatpush.bf16.msrb.mxu0 %v12415_v39  ;;  %v12391_v39 = vor.u32 %v14484_v20, %v12388_v27  ;;  %v12519_v22 = vor.u32 %v14516_v0, %v12516_v21  ;;  %v14528_v54 = vld [vmem:[#allocation6 + $0x984] sm:$0xf]  ;;  %v14590_v20 = vld [vmem:[#allocation6 + $0xb74] sm:$0xf]  ;;  %v12812_v27 = vld [vmem:[#allocation6 + $0xb78] sm:$0xf0] }
 0x3ff   :  { %8786 = vmatpush.bf16.msrb.mxu1 %v12479_v13  ;;  %v8560_v13 = vadd.f32 %v8559_v55, %v8547_v44  ;;  %v14606_v11 = vld [vmem:[#allocation6 + $0xbf4] sm:$0xf]  ;;  %v12567_v0 = vor.u32 %v14528_v54, %v12564_v47  ;;  %v12815_v55 = vor.u32 %v14590_v20, %v12812_v27  ;;  %v14556_v15 = vld [vmem:[#allocation6 + $0xa64] sm:$0xf] }
 0x400   :  { %8799 = vmatpush.bf16.msrb.mxu2 %v12543_v8  ;;  %v12455_v8 = vor.u32 %v14500_v49, %v12452_v53  ;;  %v12876_v53 = vld [vmem:[#allocation6 + $0xbf8] sm:$0xf0]  ;;  %v12679_v35 = vor.u32 %v14556_v15, %v12676_v34  ;;  %v14568_v54 = vld [vmem:[#allocation6 + $0xac4] sm:$0xf]  ;;  %v14598_v34 = vld [vmem:[#allocation6 + $0xbb4] sm:$0xf] }
 0x401   :  { %8812 = vmatpush.bf16.msrb.mxu3 %v12607_v43  ;;  %v14498_v43 = vld [vmem:[#allocation6 + $0x894] sm:$0xf]  ;;  %9031 = vst [vmem:[%s15400_s5] sm:$0xff] %v8560_v13  ;;  %v12879_v18 = vor.u32 %v14606_v11, %v12876_v53  ;;  %v14588_v13 = vld [vmem:[#allocation6 + $0xb64] sm:$0xf]  ;;  %v12652_v11 = vld [vmem:[#allocation6 + $0xa38] sm:$0xf0] }
 0x402   :  { %8774 = vmatpush.bf16.msrb.mxu0 %v12407_v17  ;;  %v12372_v17 = vld [vmem:[#allocation6 + $0x808] sm:$0xf0]  ;;  %v12447_v25 = vor.u32 %v14498_v43, %v12444_v16  ;;  %v14554_v16 = vld [vmem:[#allocation6 + $0xa54] sm:$0xf]  ;;  %v12780_v15 = vld [vmem:[#allocation6 + $0xb38] sm:$0xf0] }
 0x403   :  { %8787 = vmatpush.bf16.msrb.mxu1 %v12471_v36  ;;  %v12511_v36 = vor.u32 %v14514_v28, %v12508_v63  ;;  %v8561_v29 = vpop.f32.mrf.mxu3  ;;  %v12668_v28 = vld [vmem:[#allocation6 + $0xa58] sm:$0xf0]  ;;  %v14570_v63 = vld [vmem:[#allocation6 + $0xad4] sm:$0xf] }
 0x404   :  { %8800 = vmatpush.bf16.msrb.mxu2 %v12535_v60  ;;  %v14496_v60 = vld [vmem:[#allocation6 + $0x884] sm:$0xf]  ;;  %v14566_v53 = vld [vmem:[#allocation6 + $0xab4] sm:$0xf] }
 0x405   :  { %8813 = vmatpush.bf16.msrb.mxu3 %v12599_v5  ;;  %v8548_v5 = vpop.f32.mrf.mxu2  ;;  %v12439_v49 = vor.u32 %v14496_v60, %v12436_v7  ;;  %v12671_v60 = vor.u32 %v14554_v16, %v12668_v28  ;;  %v14808_v7 = vld [vmem:[#allocation7] sm:$0x3]  ;;  %v14584_v29 = vld [vmem:[#allocation6 + $0xb44] sm:$0xf]  ;;  %v12772_v28 = vld [vmem:[#allocation6 + $0xb28] sm:$0xf0] }
 0x406   :  { %8775 = vmatpush.bf16.msrb.mxu0 %v12399_v58  ;;  %v12684_v58 = vld [vmem:[#allocation6 + $0xa78] sm:$0xf0]  ;;  %v14552_v5 = vld [vmem:[#allocation6 + $0xa44] sm:$0xf] }
 0x407   :  { %8788 = vmatpush.bf16.msrb.mxu1 %v12463_v57  ;;  %v12375_v57 = vor.u32 %v14480_v41, %v12372_v17  ;;  %v12687_v21 = vor.u32 %v14558_v14, %v12684_v58  ;;  %v12796_v41 = vld [vmem:[#allocation6 + $0xb58] sm:$0xf0]  ;;  %v14602_v17 = vld [vmem:[#allocation6 + $0xbd4] sm:$0xf]  ;;  %v14600_v58 = vld [vmem:[#allocation6 + $0xbc4] sm:$0xf] }
 0x408   :  { %8801 = vmatpush.bf16.msrb.mxu2 %v12527_v38  ;;  %v12748_v38 = vld [vmem:[#allocation6 + $0xaf8] sm:$0xf0]  ;;  %v14580_v16 = vld [vmem:[#allocation6 + $0xb24] sm:$0xf] }
 0x409   :  { %8814 = vmatpush.bf16.msrb.mxu3 %v12591_v48  ;;  %v12503_v48 = vor.u32 %v14512_v33, %v12500_v1  ;;  %v12751_v44 = vor.u32 %v14574_v23, %v12748_v38  ;;  %v5212_v33 = vperm.slane %v14808_v7, 1  ;;  %v12660_v1 = vld [vmem:[#allocation6 + $0xa48] sm:$0xf0]  ;;  %v12775_v7 = vor.u32 %v14580_v16, %v12772_v28  ;;  %v14620_v28 = vld [vmem:[#allocation6 + $0xc64] sm:$0xf] }
 0x40a   :  { %8776 = vmatpush.bf16.msrb.mxu0 %v12391_v39  ;;  %v12740_v39 = vld [vmem:[#allocation6 + $0xae8] sm:$0xf0]  ;;  %v12663_v20 = vor.u32 %v14552_v5, %v12660_v1  ;;  %v12700_v1 = vld [vmem:[#allocation6 + $0xa98] sm:$0xf0] }
 0x40b   :  { %8789 = vmatpush.bf16.msrb.mxu1 %v12455_v8  ;;  %v12804_v8 = vld [vmem:[#allocation6 + $0xb68] sm:$0xf0]  ;;  %v12743_v43 = vor.u32 %v14572_v50, %v12740_v39  ;;  %v12844_v50 = vld [vmem:[#allocation6 + $0xbb8] sm:$0xf0] }
 0x40c   :  { %8802 = vmatpush.bf16.msrb.mxu2 %v12519_v22  ;;  %v14604_v22 = vld [vmem:[#allocation6 + $0xbe4] sm:$0xf]  ;;  %v12852_v23 = vld [vmem:[#allocation6 + $0xbc8] sm:$0xf0] }
 0x40d   :  { %8815 = vmatpush.bf16.msrb.mxu3 %v12583_v4  ;;  %v12807_v4 = vor.u32 %v14588_v13, %v12804_v8  ;;  %v12871_v52 = vor.u32 %v14604_v22, %v12868_v6  ;;  %v14548_v8 = vld [vmem:[#allocation6 + $0xa24] sm:$0xf]  ;;  %v12644_v22 = vld [vmem:[#allocation6 + $0xa28] sm:$0xf0] }
 0x40e   :  { %8777 = vmatpush.bf16.msrb.mxu0 %v12383_v40  ;;  %v14586_v40 = vld [vmem:[#allocation6 + $0xb54] sm:$0xf]  ;;  %v14564_v6 = vld [vmem:[#allocation6 + $0xaa4] sm:$0xf] }
 0x40f   :  { %8790 = vmatpush.bf16.msrb.mxu1 %v12447_v25  ;;  %v12860_v25 = vld [vmem:[#allocation6 + $0xbd8] sm:$0xf0] }
 0x410   :  { %8803 = vmatpush.bf16.msrb.mxu2 %v12511_v36  ;;  %v15411_v36 = vld [vmem:[#allocation14_spill] sm:$0xff]  ;;  %v12863_v47 = vor.u32 %v14602_v17, %v12860_v25  ;;  %v12647_v25 = vor.u32 %v14548_v8, %v12644_v22 }
 0x411   :  { %8816 = vmatpush.bf16.msrb.mxu3 %v12575_v42  ;;  %v12735_v42 = vor.u32 %v14570_v63, %v12732_v19  ;;  %v14670_v22 = vld [vmem:[#allocation6 + $0xdf4] sm:$0xf] }
 0x412   :  { %8778 = vmatpush.bf16.msrb.mxu0 %v12375_v57  ;;  %v8572_v14 = vpop.f32.mrf.mxu0 }
 0x413   :  { %8791 = vmatpush.bf16.msrb.mxu1 %v12439_v49  ;;  %v8573_v57 = vadd.f32 %v8572_v14, %v5212_v33  ;;  %v8585_v38 = vpop.f32.mrf.mxu1  ;;  %v14546_v33 = vld [vmem:[#allocation6 + $0xa14] sm:$0xf]  ;;  %v14544_v14 = vld [vmem:[#allocation6 + $0xa04] sm:$0xf] }
 0x414   :  { %8804 = vmatpush.bf16.msrb.mxu2 %v12503_v48  ;;  %v14550_v48 = vld [vmem:[#allocation6 + $0xa34] sm:$0xf] }
 0x415   :  { %8817 = vmatpush.bf16.msrb.mxu3 %v12567_v0  ;;  %8779 = vmatmul.bf16.vlgmr.msrb.gmra.mxu0 %v15226_v3  ;;  %v12799_v3 = vor.u32 %v14586_v40, %v12796_v41  ;;  %v8586_v0 = vadd.f32 %v8585_v38, %v8573_v57  ;;  %v14596_v40 = vld [vmem:[#allocation6 + $0xba4] sm:$0xf]  ;;  %v12836_v41 = vld [vmem:[#allocation6 + $0xba8] sm:$0xf0] }
 0x416   :  { %8823 = vmatpush.bf16.msra.mxu0 %v12687_v21  ;;  %8792 = vmatmul.bf16.vlgmr.msrb.gmra.mxu1 %v15228_v24  ;;  %v12724_v24 = vld [vmem:[#allocation6 + $0xac8] sm:$0xf0]  ;;  %v12855_v21 = vor.u32 %v14600_v58, %v12852_v23  ;;  %v12839_v5 = vor.u32 %v14596_v40, %v12836_v41  ;;  %v14560_v38 = vld [vmem:[#allocation6 + $0xa84] sm:$0xf] }
 0x417   :  { %8836 = vmatpush.bf16.msra.mxu1 %v12751_v44  ;;  %8805 = vmatmul.bf16.vlgmr.msrb.gmra.mxu2 %v15230_v30  ;;  %v12788_v30 = vld [vmem:[#allocation6 + $0xb48] sm:$0xf0]  ;;  %v12727_v27 = vor.u32 %v14568_v54, %v12724_v24  ;;  %v12716_v44 = vld [vmem:[#allocation6 + $0xab8] sm:$0xf0]  ;;  %v14578_v54 = vld [vmem:[#allocation6 + $0xb14] sm:$0xf] }
 0x418   :  { %8849 = vmatpush.bf16.msra.mxu2 %v12815_v55  ;;  %8818 = vmatmul.bf16.vlgmr.msrb.gmra.mxu3 %v15411_v36  ;;  %v12791_v49 = vor.u32 %v14584_v29, %v12788_v30  ;;  %v14582_v55 = vld [vmem:[#allocation6 + $0xb34] sm:$0xf]  ;;  %v12719_v39 = vor.u32 %v14566_v53, %v12716_v44  ;;  %v12828_v29 = vld [vmem:[#allocation6 + $0xb98] sm:$0xf0]  ;;  %v12628_v58 = vld [vmem:[#allocation6 + $0xa08] sm:$0xf0] }
 0x419   :  { %8862 = vmatpush.bf16.msra.mxu3 %v12879_v18  ;;  %v12655_v18 = vor.u32 %v14550_v48, %v12652_v11  ;;  %v12783_v13 = vor.u32 %v14582_v55, %v12780_v15  ;;  %v14594_v24 = vld [vmem:[#allocation6 + $0xb94] sm:$0xf]  ;;  %v12756_v11 = vld [vmem:[#allocation6 + $0xb08] sm:$0xf0]  ;;  %v14592_v53 = vld [vmem:[#allocation6 + $0xb84] sm:$0xf] }
 0x41a   :  { %8824 = vmatpush.bf16.msra.mxu0 %v12679_v35  ;;  %v12847_v35 = vor.u32 %v14598_v34, %v12844_v50  ;;  %v8574_v19 = vpop.f32.mrf.mxu0  ;;  %v14622_v44 = vld [vmem:[#allocation6 + $0xc74] sm:$0xf]  ;;  %v12940_v55 = vld [vmem:[#allocation6 + $0xc78] sm:$0xf0]  ;;  %v12631_v34 = vor.u32 %v14544_v14, %v12628_v58  ;;  %v12996_v40 = vld [vmem:[#allocation6 + $0xce8] sm:$0xf0] }
 0x41b   :  { %8837 = vmatpush.bf16.msra.mxu1 %v12743_v43  ;;  %v8598_v43 = vpop.f32.mrf.mxu2  ;;  %v8587_v17 = vpop.f32.mrf.mxu1  ;;  %v14638_v15 = vld [vmem:[#allocation6 + $0xcf4] sm:$0xf]  ;;  %v13004_v50 = vld [vmem:[#allocation6 + $0xcf8] sm:$0xf0]  ;;  %v14652_v41 = vld [vmem:[#allocation6 + $0xd64] sm:$0xf] }
 0x41c   :  { %8850 = vmatpush.bf16.msra.mxu2 %v12807_v4  ;;  %v12708_v4 = vld [vmem:[#allocation6 + $0xaa8] sm:$0xf0]  ;;  %v8599_v63 = vadd.f32 %v8598_v43, %v8586_v0  ;;  %v12943_v43 = vor.u32 %v14622_v44, %v12940_v55  ;;  %v13116_v14 = vld [vmem:[#allocation6 + $0xdd8] sm:$0xf0] }
 0x41d   :  { %8863 = vmatpush.bf16.msra.mxu3 %v12871_v52  ;;  %v8611_v52 = vpop.f32.mrf.mxu3  ;;  %v12820_v0 = vld [vmem:[#allocation6 + $0xb88] sm:$0xf0] }
 0x41e   :  { %8825 = vmatpush.bf16.msra.mxu0 %v12671_v60  ;;  %v15367_v36 = vadd.f32 %v8611_v52, %v8599_v63  ;;  %v12711_v60 = vor.u32 %v14564_v6, %v12708_v4  ;;  %v13132_v6 = vld [vmem:[#allocation6 + $0xdf8] sm:$0xf0]  ;;  %v13007_v4 = vor.u32 %v14638_v15, %v13004_v50  ;;  %v12932_v63 = vld [vmem:[#allocation6 + $0xc68] sm:$0xf0]  ;;  %v14636_v52 = vld [vmem:[#allocation6 + $0xce4] sm:$0xf] }
 0x41f   :  { %8838 = vmatpush.bf16.msra.mxu1 %v12735_v42  ;;  %v12636_v42 = vld [vmem:[#allocation6 + $0xa18] sm:$0xf0]  ;;  %v13135_v19 = vor.u32 %v14670_v22, %v13132_v6  ;;  %v13060_v17 = vld [vmem:[#allocation6 + $0xd68] sm:$0xf0]  ;;  %v14614_v15 = vld [vmem:[#allocation6 + $0xc34] sm:$0xf] }
 0x420   :  { %8851 = vmatpush.bf16.msra.mxu2 %v12799_v3  ;;  %v14562_v3 = vld [vmem:[#allocation6 + $0xa94] sm:$0xf]  ;;  %v12639_v30 = vor.u32 %v14546_v33, %v12636_v42  ;;  %v12999_v33 = vor.u32 %v14636_v52, %v12996_v40  ;;  %v13063_v42 = vor.u32 %v14652_v41, %v13060_v17  ;;  %v13036_v22 = vld [vmem:[#allocation6 + $0xd38] sm:$0xf0]  ;;  %v12964_v40 = vld [vmem:[#allocation6 + $0xca8] sm:$0xf0] }
 0x421   :  { %8864 = vmatpush.bf16.msra.mxu3 %v12863_v47  ;;  %v12764_v47 = vld [vmem:[#allocation6 + $0xb18] sm:$0xf0]  ;;  %v12703_v23 = vor.u32 %v14562_v3, %v12700_v1  ;;  %v14618_v3 = vld [vmem:[#allocation6 + $0xc54] sm:$0xf]  ;;  %v14644_v41 = vld [vmem:[#allocation6 + $0xd24] sm:$0xf] }
 0x422   :  { %8826 = vmatpush.bf16.msra.mxu0 %v12663_v20  ;;  %v12767_v57 = vor.u32 %v14578_v54, %v12764_v47  ;;  %v12692_v20 = vld [vmem:[#allocation6 + $0xa88] sm:$0xf0]  ;;  %v14634_v1 = vld [vmem:[#allocation6 + $0xcd4] sm:$0xf]  ;;  %v12988_v47 = vld [vmem:[#allocation6 + $0xcd8] sm:$0xf0] }
 0x423   :  { %8839 = vmatpush.bf16.msra.mxu1 %v12727_v27  ;;  %v14576_v27 = vld [vmem:[#allocation6 + $0xb04] sm:$0xf]  ;;  %v8600_v48 = vpop.f32.mrf.mxu2  ;;  %v14630_v50 = vld [vmem:[#allocation6 + $0xcb4] sm:$0xf]  ;;  %v13028_v17 = vld [vmem:[#allocation6 + $0xd28] sm:$0xf0] }
 0x424   :  { %8852 = vmatpush.bf16.msra.mxu2 %v12791_v49  ;;  %v12831_v49 = vor.u32 %v14594_v24, %v12828_v29  ;;  %v12759_v8 = vor.u32 %v14576_v27, %v12756_v11  ;;  %v14650_v24 = vld [vmem:[#allocation6 + $0xd54] sm:$0xf]  ;;  %v13052_v29 = vld [vmem:[#allocation6 + $0xd58] sm:$0xf0]  ;;  %v14648_v48 = vld [vmem:[#allocation6 + $0xd44] sm:$0xf] }
 0x425   :  { %8865 = vmatpush.bf16.msra.mxu3 %v12855_v21  ;;  %v8613_v21 = vpop.f32.mrf.mxu3  ;;  %v14662_v6 = vld [vmem:[#allocation6 + $0xdb4] sm:$0xf] }
 0x426   :  { %8827 = vmatpush.bf16.msra.mxu0 %v12655_v18  ;;  %v14654_v18 = vld [vmem:[#allocation6 + $0xd74] sm:$0xf] }
 0x427   :  { %8840 = vmatpush.bf16.msra.mxu1 %v12719_v39  ;;  %v13068_v39 = vld [vmem:[#allocation6 + $0xd78] sm:$0xf0] }
 0x428   :  { %8853 = vmatpush.bf16.msra.mxu2 %v12783_v13  ;;  %v12695_v13 = vor.u32 %v14560_v38, %v12692_v20  ;;  %v13071_v16 = vor.u32 %v14654_v18, %v13068_v39  ;;  %v14616_v38 = vld [vmem:[#allocation6 + $0xc44] sm:$0xf] }
 0x429   :  { %8866 = vmatpush.bf16.msra.mxu3 %v12847_v35  ;;  %v12823_v35 = vor.u32 %v14592_v53, %v12820_v0  ;;  %v14632_v20 = vld [vmem:[#allocation6 + $0xcc4] sm:$0xf]  ;;  %v13108_v53 = vld [vmem:[#allocation6 + $0xdc8] sm:$0xf0] }
 0x42a   :  { %8828 = vmatpush.bf16.msra.mxu0 %v12647_v25  ;;  %v14668_v25 = vld [vmem:[#allocation6 + $0xde4] sm:$0xf] }
 0x42b   :  { %8841 = vmatpush.bf16.msra.mxu1 %v12711_v60  ;;  %v13124_v60 = vld [vmem:[#allocation6 + $0xde8] sm:$0xf0] }
 0x42c   :  { %8854 = vmatpush.bf16.msra.mxu2 %v12775_v7  ;;  %v12935_v7 = vor.u32 %v14620_v28, %v12932_v63  ;;  %v13127_v54 = vor.u32 %v14668_v25, %v13124_v60  ;;  %v12900_v28 = vld [vmem:[#allocation6 + $0xc28] sm:$0xf0]  ;;  %v14628_v63 = vld [vmem:[#allocation6 + $0xca4] sm:$0xf] }
 0x42d   :  { %8867 = vmatpush.bf16.msra.mxu3 %v12839_v5  ;;  %v12924_v5 = vld [vmem:[#allocation6 + $0xc58] sm:$0xf0] }
 0x42e   :  { %8829 = vmatpush.bf16.msra.mxu0 %v12639_v30  ;;  %v14666_v30 = vld [vmem:[#allocation6 + $0xdd4] sm:$0xf]  ;;  %v12927_v58 = vor.u32 %v14618_v3, %v12924_v5 }
 0x42f   :  { %8842 = vmatpush.bf16.msra.mxu1 %v12703_v23  ;;  %v12991_v23 = vor.u32 %v14634_v1, %v12988_v47  ;;  %v13119_v27 = vor.u32 %v14666_v30, %v13116_v14  ;;  %v13031_v47 = vor.u32 %v14644_v41, %v13028_v17  ;;  %v14626_v30 = vld [vmem:[#allocation6 + $0xc94] sm:$0xf]  ;;  %v13252_v17 = vld [vmem:[#allocation6 + $0xee8] sm:$0xf0] }
 0x430   :  { %8855 = vmatpush.bf16.msra.mxu2 %v12767_v57  ;;  %v13055_v57 = vor.u32 %v14650_v24, %v13052_v29  ;;  %v14610_v24 = vld [vmem:[#allocation6 + $0xc14] sm:$0xf]  ;;  %v12892_v29 = vld [vmem:[#allocation6 + $0xc18] sm:$0xf0] }
 0x431   :  { %8868 = vmatpush.bf16.msra.mxu3 %v12831_v49  ;;  %v12980_v49 = vld [vmem:[#allocation6 + $0xcc8] sm:$0xf0] }
 0x432   :  { %8830 = vmatpush.bf16.msra.mxu0 %v12631_v34  ;;  %v8624_v11 = vpop.f32.mrf.mxu0  ;;  %v12983_v44 = vor.u32 %v14632_v20, %v12980_v49  ;;  %v12908_v34 = vld [vmem:[#allocation6 + $0xc38] sm:$0xf0]  ;;  %v12895_v20 = vor.u32 %v14610_v24, %v12892_v29  ;;  %v12884_v49 = vld [vmem:[#allocation6 + $0xc08] sm:$0xf0]  ;;  %v14698_v24 = vld [vmem:[#allocation6 + $0xed4] sm:$0xf] }
 0x433   :  { %8843 = vmatpush.bf16.msra.mxu1 %v12695_v13  ;;  %v8637_v0 = vpop.f32.mrf.mxu1  ;;  %v12972_v13 = vld [vmem:[#allocation6 + $0xcb8] sm:$0xf0] }
 0x434   :  { %8856 = vmatpush.bf16.msra.mxu2 %v12759_v8  ;;  %v14646_v8 = vld [vmem:[#allocation6 + $0xd34] sm:$0xf] }
 0x435   :  { %8869 = vmatpush.bf16.msra.mxu3 %v12823_v35  ;;  %8831 = vmatmul.bf16.vlgmr.msra.gmra.mxu0 %v15244_v26  ;;  %v12916_v26 = vld [vmem:[#allocation6 + $0xc48] sm:$0xf0]  ;;  %v13100_v35 = vld [vmem:[#allocation6 + $0xdb8] sm:$0xf0] }
 0x436   :  { %8875 = vmatpush.bf16.msrb.mxu0 %v12943_v43  ;;  %8844 = vmatmul.bf16.vlgmr.msra.gmra.mxu1 %v15246_v56  ;;  %v13044_v56 = vld [vmem:[#allocation6 + $0xd48] sm:$0xf0]  ;;  %v12919_v21 = vor.u32 %v14616_v38, %v12916_v26  ;;  %v12911_v43 = vor.u32 %v14614_v15, %v12908_v34  ;;  %v13103_v52 = vor.u32 %v14662_v6, %v13100_v35  ;;  %v14658_v38 = vld [vmem:[#allocation6 + $0xd94] sm:$0xf]  ;;  %v13084_v26 = vld [vmem:[#allocation6 + $0xd98] sm:$0xf0] }
 0x437   :  { %8888 = vmatpush.bf16.msrb.mxu1 %v13007_v4  ;;  %8857 = vmatmul.bf16.vlgmr.msra.gmra.mxu2 %v15248_v37  ;;  %v14664_v37 = vld [vmem:[#allocation6 + $0xdc4] sm:$0xf]  ;;  %v13047_v55 = vor.u32 %v14648_v48, %v13044_v56  ;;  %v13039_v4 = vor.u32 %v14646_v8, %v13036_v22  ;;  %v14686_v34 = vld [vmem:[#allocation6 + $0xe74] sm:$0xf]  ;;  %v13324_v22 = vld [vmem:[#allocation6 + $0xf78] sm:$0xf0] }
 0x438   :  { %8901 = vmatpush.bf16.msrb.mxu2 %v13071_v16  ;;  %8870 = vmatmul.bf16.vlgmr.msra.gmra.mxu3 %v15250_v45  ;;  %v8625_v45 = vadd.f32 %v8624_v11, %v15367_v36  ;;  %v13111_v39 = vor.u32 %v14664_v37, %v13108_v53  ;;  %v12975_v36 = vor.u32 %v14630_v50, %v12972_v13  ;;  %v14612_v16 = vld [vmem:[#allocation6 + $0xc24] sm:$0xf]  ;;  %v12948_v37 = vld [vmem:[#allocation6 + $0xc88] sm:$0xf0]  ;;  %v13196_v50 = vld [vmem:[#allocation6 + $0xe78] sm:$0xf0] }
 0x439   :  { %8914 = vmatpush.bf16.msrb.mxu3 %v13135_v19  ;;  %v12903_v5 = vor.u32 %v14612_v16, %v12900_v28  ;;  %v14624_v11 = vld [vmem:[#allocation6 + $0xc84] sm:$0xf]  ;;  %v13260_v13 = vld [vmem:[#allocation6 + $0xef8] sm:$0xf0]  ;;  %v14718_v8 = vld [vmem:[#allocation6 + $0xf74] sm:$0xf]  ;;  %v13199_v16 = vor.u32 %v14686_v34, %v13196_v50 }
 0x43a   :  { %8876 = vmatpush.bf16.msrb.mxu0 %v12935_v7  ;;  %v8638_v18 = vadd.f32 %v8637_v0, %v8625_v45  ;;  %v8650_v19 = vpop.f32.mrf.mxu2  ;;  %v8626_v7 = vpop.f32.mrf.mxu0  ;;  %v14640_v53 = vld [vmem:[#allocation6 + $0xd04] sm:$0xf]  ;;  %v13087_v45 = vor.u32 %v14658_v38, %v13084_v26  ;;  %v12951_v6 = vor.u32 %v14624_v11, %v12948_v37  ;;  %v14694_v34 = vld [vmem:[#allocation6 + $0xeb4] sm:$0xf] }
 0x43b   :  { %8889 = vmatpush.bf16.msrb.mxu1 %v12999_v33  ;;  %v8663_v60 = vpop.f32.mrf.mxu3  ;;  %v14660_v33 = vld [vmem:[#allocation6 + $0xda4] sm:$0xf]  ;;  %v8639_v3 = vpop.f32.mrf.mxu1 }
 0x43c   :  { %8902 = vmatpush.bf16.msrb.mxu2 %v13063_v42  ;;  %v8651_v25 = vadd.f32 %v8650_v19, %v8638_v18  ;;  %v13092_v42 = vld [vmem:[#allocation6 + $0xda8] sm:$0xf0]  ;;  %v14702_v18 = vld [vmem:[#allocation6 + $0xef4] sm:$0xf]  ;;  %v14732_v7 = vld [vmem:[#allocation6 + $0xfe4] sm:$0xf] }
 0x43d   :  { %8915 = vmatpush.bf16.msrb.mxu3 %v13127_v54  ;;  %v12967_v54 = vor.u32 %v14628_v63, %v12964_v40  ;;  %v13095_v14 = vor.u32 %v14660_v33, %v13092_v42  ;;  %v13263_v28 = vor.u32 %v14702_v18, %v13260_v13  ;;  %v13327_v63 = vor.u32 %v14718_v8, %v13324_v22  ;;  %v13188_v19 = vld [vmem:[#allocation6 + $0xe68] sm:$0xf0]  ;;  %v14700_v40 = vld [vmem:[#allocation6 + $0xee4] sm:$0xf]  ;;  %v14710_v13 = vld [vmem:[#allocation6 + $0xf34] sm:$0xf] }
 0x43e   :  { %8877 = vmatpush.bf16.msrb.mxu0 %v12927_v58  ;;  %v15374_v1 = vadd.f32 %v8663_v60, %v8651_v25  ;;  %v12956_v58 = vld [vmem:[#allocation6 + $0xc98] sm:$0xf0]  ;;  %v14716_v25 = vld [vmem:[#allocation6 + $0xf64] sm:$0xf]  ;;  %v13316_v60 = vld [vmem:[#allocation6 + $0xf68] sm:$0xf0]  ;;  %v13255_v3 = vor.u32 %v14700_v40, %v13252_v17 }
 0x43f   :  { %8890 = vmatpush.bf16.msrb.mxu1 %v12991_v23  ;;  %v14642_v23 = vld [vmem:[#allocation6 + $0xd14] sm:$0xf]  ;;  %v12959_v48 = vor.u32 %v14626_v30, %v12956_v58  ;;  %v13380_v33 = vld [vmem:[#allocation6 + $0xfe8] sm:$0xf0]  ;;  %v13244_v30 = vld [vmem:[#allocation6 + $0xed8] sm:$0xf0] }
 0x440   :  { %8903 = vmatpush.bf16.msrb.mxu2 %v13055_v57  ;;  %v13020_v57 = vld [vmem:[#allocation6 + $0xd18] sm:$0xf0]  ;;  %v13383_v29 = vor.u32 %v14732_v7, %v13380_v33  ;;  %v13247_v26 = vor.u32 %v14698_v24, %v13244_v30  ;;  %v14712_v11 = vld [vmem:[#allocation6 + $0xf44] sm:$0xf]  ;;  %v14726_v22 = vld [vmem:[#allocation6 + $0xfb4] sm:$0xf] }
 0x441   :  { %8916 = vmatpush.bf16.msrb.mxu3 %v13119_v27  ;;  %v14608_v27 = vld [vmem:[#allocation6 + $0xc04] sm:$0xf]  ;;  %v13023_v56 = vor.u32 %v14642_v23, %v13020_v57  ;;  %v13308_v58 = vld [vmem:[#allocation6 + $0xf58] sm:$0xf0]  ;;  %v14730_v23 = vld [vmem:[#allocation6 + $0xfd4] sm:$0xf] }
 0x442   :  { %8878 = vmatpush.bf16.msrb.mxu0 %v12919_v21  ;;  %v8652_v0 = vpop.f32.mrf.mxu2  ;;  %v13012_v21 = vld [vmem:[#allocation6 + $0xd08] sm:$0xf0]  ;;  %v13372_v57 = vld [vmem:[#allocation6 + $0xfd8] sm:$0xf0] }
 0x443   :  { %8891 = vmatpush.bf16.msrb.mxu1 %v12983_v44  ;;  %v14656_v44 = vld [vmem:[#allocation6 + $0xd84] sm:$0xf]  ;;  %v8665_v15 = vpop.f32.mrf.mxu3  ;;  %v13015_v35 = vor.u32 %v14640_v53, %v13012_v21  ;;  %v13364_v53 = vld [vmem:[#allocation6 + $0xfc8] sm:$0xf0]  ;;  %v13292_v8 = vld [vmem:[#allocation6 + $0xf38] sm:$0xf0] }
 0x444   :  { %8904 = vmatpush.bf16.msrb.mxu2 %v13047_v55  ;;  %v13076_v55 = vld [vmem:[#allocation6 + $0xd88] sm:$0xf0]  ;;  %v13164_v15 = vld [vmem:[#allocation6 + $0xe38] sm:$0xf0] }
 0x445   :  { %8917 = vmatpush.bf16.msrb.mxu3 %v13111_v39  ;;  %v12887_v39 = vor.u32 %v14608_v27, %v12884_v49  ;;  %v14680_v27 = vld [vmem:[#allocation6 + $0xe44] sm:$0xf]  ;;  %v13284_v40 = vld [vmem:[#allocation6 + $0xf28] sm:$0xf0]  ;;  %v13148_v24 = vld [vmem:[#allocation6 + $0xe18] sm:$0xf0] }
 0x446   :  { %8879 = vmatpush.bf16.msrb.mxu0 %v12911_v43  ;;  %v14734_v43 = vld [vmem:[#allocation6 + $0xff4] sm:$0xf]  ;;  %v14696_v49 = vld [vmem:[#allocation6 + $0xec4] sm:$0xf]  ;;  %v13348_v7 = vld [vmem:[#allocation6 + $0xfa8] sm:$0xf0] }
 0x447   :  { %8892 = vmatpush.bf16.msrb.mxu1 %v12975_v36  ;;  %v13388_v36 = vld [vmem:[#allocation6 + $0xff8] sm:$0xf0] }
 0x448   :  { %8905 = vmatpush.bf16.msrb.mxu2 %v13039_v4  ;;  %v13079_v4 = vor.u32 %v14656_v44, %v13076_v55  ;;  %v13391_v41 = vor.u32 %v14734_v43, %v13388_v36  ;;  %v14678_v55 = vld [vmem:[#allocation6 + $0xe34] sm:$0xf]  ;;  %v13295_v43 = vor.u32 %v14710_v13, %v13292_v8  ;;  %v14676_v36 = vld [vmem:[#allocation6 + $0xe24] sm:$0xf]  ;;  %v13644_v8 = vld [vmem:[#allocation6 + $0x11f8] sm:$0xf0] }
 0x449   :  { %8918 = vmatpush.bf16.msrb.mxu3 %v13103_v52  ;;  %v14684_v52 = vld [vmem:[#allocation6 + $0xe64] sm:$0xf]  ;;  %v14798_v13 = vld [vmem:[#allocation6 + $0x11f4] sm:$0xf] }
 0x44a   :  { %8880 = vmatpush.bf16.msrb.mxu0 %v12903_v5  ;;  %v13191_v42 = vor.u32 %v14684_v52, %v13188_v19  ;;  %v13319_v5 = vor.u32 %v14716_v25, %v13316_v60  ;;  %v13220_v52 = vld [vmem:[#allocation6 + $0xea8] sm:$0xf0]  ;;  %v14708_v19 = vld [vmem:[#allocation6 + $0xf24] sm:$0xf] }
 0x44b   :  { %8893 = vmatpush.bf16.msrb.mxu1 %v12967_v54  ;;  %v14682_v54 = vld [vmem:[#allocation6 + $0xe54] sm:$0xf]  ;;  %v14724_v60 = vld [vmem:[#allocation6 + $0xfa4] sm:$0xf] }
 0x44c   :  { %8906 = vmatpush.bf16.msrb.mxu2 %v13031_v47  ;;  %v13180_v47 = vld [vmem:[#allocation6 + $0xe58] sm:$0xf0]  ;;  %v13351_v30 = vor.u32 %v14724_v60, %v13348_v7  ;;  %v14746_v60 = vld [vmem:[#allocation6 + $0x1054] sm:$0xf] }
 0x44d   :  { %8919 = vmatpush.bf16.msrb.mxu3 %v13095_v14  ;;  %v14714_v14 = vld [vmem:[#allocation6 + $0xf54] sm:$0xf]  ;;  %v13183_v38 = vor.u32 %v14682_v54, %v13180_v47  ;;  %v13287_v54 = vor.u32 %v14708_v19, %v13284_v40  ;;  %v14796_v19 = vld [vmem:[#allocation6 + $0x11e4] sm:$0xf]  ;;  %v13636_v40 = vld [vmem:[#allocation6 + $0x11e8] sm:$0xf0] }
 0x44e   :  { %8881 = vmatpush.bf16.msrb.mxu0 %v12895_v20  ;;  %v13311_v20 = vor.u32 %v14714_v14, %v13308_v58  ;;  %v14674_v47 = vld [vmem:[#allocation6 + $0xe14] sm:$0xf]  ;;  %v13212_v14 = vld [vmem:[#allocation6 + $0xe98] sm:$0xf0] }
 0x44f   :  { %8894 = vmatpush.bf16.msrb.mxu1 %v12959_v48  ;;  %v13375_v48 = vor.u32 %v14730_v23, %v13372_v57  ;;  %v14706_v58 = vld [vmem:[#allocation6 + $0xf14] sm:$0xf]  ;;  %v13276_v23 = vld [vmem:[#allocation6 + $0xf18] sm:$0xf0] }
 0x450   :  { %8907 = vmatpush.bf16.msrb.mxu2 %v13023_v56  ;;  %v13236_v56 = vld [vmem:[#allocation6 + $0xec8] sm:$0xf0]  ;;  %v14722_v57 = vld [vmem:[#allocation6 + $0xf94] sm:$0xf]  ;;  %v13436_v7 = vld [vmem:[#allocation6 + $0x1058] sm:$0xf0] }
 0x451   :  { %8920 = vmatpush.bf16.msrb.mxu3 %v13087_v45  ;;  %v13239_v21 = vor.u32 %v14696_v49, %v13236_v56  ;;  %v13279_v49 = vor.u32 %v14706_v58, %v13276_v23  ;;  %v13204_v56 = vld [vmem:[#allocation6 + $0xe88] sm:$0xf0]  ;;  %v14744_v23 = vld [vmem:[#allocation6 + $0x1044] sm:$0xf] }
 0x452   :  { %8882 = vmatpush.bf16.msrb.mxu0 %v12887_v39  ;;  %v8676_v37 = vpop.f32.mrf.mxu0  ;;  %v13228_v39 = vld [vmem:[#allocation6 + $0xeb8] sm:$0xf0] }
 0x453   :  { %8895 = vmatpush.bf16.msrb.mxu1 %v12951_v6  ;;  %v8689_v45 = vpop.f32.mrf.mxu1  ;;  %v13356_v6 = vld [vmem:[#allocation6 + $0xfb8] sm:$0xf0] }
 0x454   :  { %8908 = vmatpush.bf16.msrb.mxu2 %v13015_v35  ;;  %v13167_v35 = vor.u32 %v14678_v55, %v13164_v15  ;;  %v13516_v15 = vld [vmem:[#allocation6 + $0x10f8] sm:$0xf0] }
 0x455   :  { %8921 = vmatpush.bf16.msrb.mxu3 %v13079_v4  ;;  %8883 = vmatmul.bf16.vlgmr.msrb.gmra.mxu0 %v15263_v61  ;;  %v13172_v61 = vld [vmem:[#allocation6 + $0xe48] sm:$0xf0] }
 0x456   :  { %8927 = vmatpush.bf16.msra.mxu0 %v13199_v16  ;;  %8896 = vmatmul.bf16.vlgmr.msrb.gmra.mxu1 %v15265_v59  ;;  %v13300_v59 = vld [vmem:[#allocation6 + $0xf48] sm:$0xf0]  ;;  %v13175_v0 = vor.u32 %v14680_v27, %v13172_v61  ;;  %v14692_v16 = vld [vmem:[#allocation6 + $0xea4] sm:$0xf] }
 0x457   :  { %8940 = vmatpush.bf16.msra.mxu1 %v13263_v28  ;;  %8909 = vmatmul.bf16.vlgmr.msrb.gmra.mxu2 %v15267_v51  ;;  %v14728_v51 = vld [vmem:[#allocation6 + $0xfc4] sm:$0xf]  ;;  %v13303_v44 = vor.u32 %v14712_v11, %v13300_v59  ;;  %v13156_v4 = vld [vmem:[#allocation6 + $0xe28] sm:$0xf0]  ;;  %v13359_v28 = vor.u32 %v14726_v22, %v13356_v6 }
 0x458   :  { %8953 = vmatpush.bf16.msra.mxu2 %v13327_v63  ;;  %8922 = vmatmul.bf16.vlgmr.msrb.gmra.mxu3 %v15269_v32  ;;  %v8677_v32 = vadd.f32 %v8676_v37, %v15374_v1  ;;  %v13367_v18 = vor.u32 %v14728_v51, %v13364_v53  ;;  %v13231_v1 = vor.u32 %v14694_v34, %v13228_v39  ;;  %v13140_v27 = vld [vmem:[#allocation6 + $0xe08] sm:$0xf0]  ;;  %v14704_v11 = vld [vmem:[#allocation6 + $0xf04] sm:$0xf]  ;;  %v14782_v34 = vld [vmem:[#allocation6 + $0x1174] sm:$0xf] }
 0x459   :  { %8966 = vmatpush.bf16.msra.mxu3 %v13391_v41  ;;  %v13268_v51 = vld [vmem:[#allocation6 + $0xf08] sm:$0xf0]  ;;  %v14720_v53 = vld [vmem:[#allocation6 + $0xf84] sm:$0xf] }
 0x45a   :  { %8928 = vmatpush.bf16.msra.mxu0 %v13191_v42  ;;  %v8690_v50 = vadd.f32 %v8689_v45, %v8677_v32  ;;  %v8702_v63 = vpop.f32.mrf.mxu2  ;;  %v8678_v25 = vpop.f32.mrf.mxu0  ;;  %v13159_v42 = vor.u32 %v14676_v36, %v13156_v4  ;;  %v13332_v32 = vld [vmem:[#allocation6 + $0xf88] sm:$0xf0]  ;;  %v13271_v39 = vor.u32 %v14704_v11, %v13268_v51  ;;  %v14764_v4 = vld [vmem:[#allocation6 + $0x10e4] sm:$0xf]  ;;  %v14758_v51 = vld [vmem:[#allocation6 + $0x10b4] sm:$0xf] }
 0x45b   :  { %8941 = vmatpush.bf16.msra.mxu1 %v13255_v3  ;;  %v8715_v17 = vpop.f32.mrf.mxu3  ;;  %v8691_v33 = vpop.f32.mrf.mxu1  ;;  %v13335_v22 = vor.u32 %v14720_v53, %v13332_v32  ;;  %v13444_v36 = vld [vmem:[#allocation6 + $0x1068] sm:$0xf0] }
 0x45c   :  { %8954 = vmatpush.bf16.msra.mxu2 %v13319_v5  ;;  %v8703_v41 = vadd.f32 %v8702_v63, %v8690_v50  ;;  %v13223_v5 = vor.u32 %v14692_v16, %v13220_v52  ;;  %v13580_v50 = vld [vmem:[#allocation6 + $0x1178] sm:$0xf0]  ;;  %v13647_v16 = vor.u32 %v14798_v13, %v13644_v8  ;;  %v14780_v63 = vld [vmem:[#allocation6 + $0x1164] sm:$0xf]  ;;  %v13572_v52 = vld [vmem:[#allocation6 + $0x1168] sm:$0xf0] }
 0x45d   :  { %8967 = vmatpush.bf16.msra.mxu3 %v13383_v29  ;;  %v14690_v29 = vld [vmem:[#allocation6 + $0xe94] sm:$0xf]  ;;  %v13575_v25 = vor.u32 %v14780_v63, %v13572_v52 }
 0x45e   :  { %8929 = vmatpush.bf16.msra.mxu0 %v13183_v38  ;;  %v15381_v3 = vadd.f32 %v8715_v17, %v8703_v41  ;;  %v13340_v38 = vld [vmem:[#allocation6 + $0xf98] sm:$0xf0]  ;;  %v13215_v61 = vor.u32 %v14690_v29, %v13212_v14  ;;  %v14762_v33 = vld [vmem:[#allocation6 + $0x10d4] sm:$0xf] }
 0x45f   :  { %8942 = vmatpush.bf16.msra.mxu1 %v13247_v26  ;;  %v13151_v26 = vor.u32 %v14674_v47, %v13148_v24  ;;  %v13343_v59 = vor.u32 %v14722_v57, %v13340_v38  ;;  %v13564_v47 = vld [vmem:[#allocation6 + $0x1158] sm:$0xf0]  ;;  %v14794_v24 = vld [vmem:[#allocation6 + $0x11d4] sm:$0xf]  ;;  %v14760_v57 = vld [vmem:[#allocation6 + $0x10c4] sm:$0xf] }
 0x460   :  { %8955 = vmatpush.bf16.msra.mxu2 %v13311_v20  ;;  %v14672_v20 = vld [vmem:[#allocation6 + $0xe04] sm:$0xf]  ;;  %v13628_v29 = vld [vmem:[#allocation6 + $0x11d8] sm:$0xf0] }
 0x461   :  { %8968 = vmatpush.bf16.msra.mxu3 %v13375_v48  ;;  %v14688_v48 = vld [vmem:[#allocation6 + $0xe84] sm:$0xf]  ;;  %v13143_v55 = vor.u32 %v14672_v20, %v13140_v27  ;;  %v13631_v38 = vor.u32 %v14794_v24, %v13628_v29 }
 0x462   :  { %8930 = vmatpush.bf16.msra.mxu0 %v13175_v0  ;;  %v8704_v37 = vpop.f32.mrf.mxu2  ;;  %v14750_v0 = vld [vmem:[#allocation6 + $0x1074] sm:$0xf]  ;;  %v14776_v20 = vld [vmem:[#allocation6 + $0x1144] sm:$0xf] }
 0x463   :  { %8943 = vmatpush.bf16.msra.mxu1 %v13239_v21  ;;  %v8717_v45 = vpop.f32.mrf.mxu3  ;;  %v13452_v21 = vld [vmem:[#allocation6 + $0x1078] sm:$0xf0] }
 0x464   :  { %8956 = vmatpush.bf16.msra.mxu2 %v13303_v44  ;;  %v14766_v44 = vld [vmem:[#allocation6 + $0x10f4] sm:$0xf]  ;;  %v13455_v6 = vor.u32 %v14750_v0, %v13452_v21  ;;  %v13420_v37 = vld [vmem:[#allocation6 + $0x1038] sm:$0xf0] }
 0x465   :  { %8969 = vmatpush.bf16.msra.mxu3 %v13367_v18  ;;  %v13207_v18 = vor.u32 %v14688_v48, %v13204_v56  ;;  %v13484_v45 = vld [vmem:[#allocation6 + $0x10b8] sm:$0xf0]  ;;  %v14774_v0 = vld [vmem:[#allocation6 + $0x1134] sm:$0xf] }
 0x466   :  { %8931 = vmatpush.bf16.msra.mxu0 %v13167_v35  ;;  %v13519_v35 = vor.u32 %v14766_v44, %v13516_v15  ;;  %v13548_v21 = vld [vmem:[#allocation6 + $0x1138] sm:$0xf0]  ;;  %v14790_v44 = vld [vmem:[#allocation6 + $0x11b4] sm:$0xf] }
 0x467   :  { %8944 = vmatpush.bf16.msra.mxu1 %v13231_v1  ;;  %v13583_v1 = vor.u32 %v14782_v34, %v13580_v50  ;;  %v13551_v34 = vor.u32 %v14774_v0, %v13548_v21  ;;  %v14740_v50 = vld [vmem:[#allocation6 + $0x1024] sm:$0xf] }
 0x468   :  { %8957 = vmatpush.bf16.msra.mxu2 %v13295_v43  ;;  %v14748_v43 = vld [vmem:[#allocation6 + $0x1064] sm:$0xf] }
 0x469   :  { %8970 = vmatpush.bf16.msra.mxu3 %v13359_v28  ;;  %v13508_v28 = vld [vmem:[#allocation6 + $0x10e8] sm:$0xf0]  ;;  %v13447_v41 = vor.u32 %v14748_v43, %v13444_v36 }
 0x46a   :  { %8932 = vmatpush.bf16.msra.mxu0 %v13159_v42  ;;  %v13511_v17 = vor.u32 %v14764_v4, %v13508_v28  ;;  %v13639_v42 = vor.u32 %v14796_v19, %v13636_v40  ;;  %v14788_v4 = vld [vmem:[#allocation6 + $0x11a4] sm:$0xf] }
 0x46b   :  { %8945 = vmatpush.bf16.msra.mxu1 %v13223_v5  ;;  %v13500_v5 = vld [vmem:[#allocation6 + $0x10d8] sm:$0xf0] }
 0x46c   :  { %8958 = vmatpush.bf16.msra.mxu2 %v13287_v54  ;;  %v14778_v54 = vld [vmem:[#allocation6 + $0x1154] sm:$0xf]  ;;  %v13503_v14 = vor.u32 %v14762_v33, %v13500_v5 }
 0x46d   :  { %8971 = vmatpush.bf16.msra.mxu3 %v13351_v30  ;;  %v13439_v30 = vor.u32 %v14746_v60, %v13436_v7  ;;  %v13567_v58 = vor.u32 %v14778_v54, %v13564_v47  ;;  %v13468_v7 = vld [vmem:[#allocation6 + $0x1098] sm:$0xf0]  ;;  %v14770_v33 = vld [vmem:[#allocation6 + $0x1114] sm:$0xf] }
 0x46e   :  { %8933 = vmatpush.bf16.msra.mxu0 %v13151_v26  ;;  %v13492_v26 = vld [vmem:[#allocation6 + $0x10c8] sm:$0xf0]  ;;  %v14786_v5 = vld [vmem:[#allocation6 + $0x1194] sm:$0xf]  ;;  %v13596_v54 = vld [vmem:[#allocation6 + $0x1198] sm:$0xf0] }
 0x46f   :  { %8946 = vmatpush.bf16.msra.mxu1 %v13215_v61  ;;  %v13620_v61 = vld [vmem:[#allocation6 + $0x11c8] sm:$0xf0]  ;;  %v13495_v56 = vor.u32 %v14760_v57, %v13492_v26 }
 0x470   :  { %8959 = vmatpush.bf16.msra.mxu2 %v13279_v49  ;;  %v13460_v57 = vld [vmem:[#allocation6 + $0x1088] sm:$0xf0] }
 0x471   :  { %8972 = vmatpush.bf16.msra.mxu3 %v13343_v59  ;;  %v14742_v59 = vld [vmem:[#allocation6 + $0x1034] sm:$0xf]  ;;  %v13524_v26 = vld [vmem:[#allocation6 + $0x1108] sm:$0xf0] }
 0x472   :  { %8934 = vmatpush.bf16.msra.mxu0 %v13143_v55  ;;  %v8728_v27 = vpop.f32.mrf.mxu0  ;;  %v13612_v55 = vld [vmem:[#allocation6 + $0x11b8] sm:$0xf0]  ;;  %v13423_v15 = vor.u32 %v14742_v59, %v13420_v37 }
 0x473   :  { %8947 = vmatpush.bf16.msra.mxu1 %v13207_v18  ;;  %v8741_v49 = vpop.f32.mrf.mxu1  ;;  %v13412_v18 = vld [vmem:[#allocation6 + $0x1028] sm:$0xf0]  ;;  %v13615_v13 = vor.u32 %v14790_v44, %v13612_v55 }
 0x474   :  { %8960 = vmatpush.bf16.msra.mxu2 %v13271_v39  ;;  %v14756_v39 = vld [vmem:[#allocation6 + $0x10a4] sm:$0xf]  ;;  %v13415_v63 = vor.u32 %v14740_v50, %v13412_v18 }
 0x475   :  { %8973 = vmatpush.bf16.msra.mxu3 %v13335_v22  ;;  %8935 = vmatmul.bf16.vlgmr.msra.gmra.mxu0 %v15282_v2  ;;  %v13428_v2 = vld [vmem:[#allocation6 + $0x1048] sm:$0xf0] }
 0x476   :  { %8979 = vmatpush.bf16.msrb.mxu0 %v13455_v6  ;;  %8948 = vmatmul.bf16.vlgmr.msra.gmra.mxu1 %v15284_v31  ;;  %v13556_v31 = vld [vmem:[#allocation6 + $0x1148] sm:$0xf0]  ;;  %v13431_v48 = vor.u32 %v14744_v23, %v13428_v2  ;;  %v14772_v6 = vld [vmem:[#allocation6 + $0x1124] sm:$0xf]  ;;  %v13599_v23 = vor.u32 %v14786_v5, %v13596_v54 }
 0x477   :  { %8992 = vmatpush.bf16.msrb.mxu1 %v13519_v35  ;;  %8961 = vmatmul.bf16.vlgmr.msra.gmra.mxu2 %v15286_v46  ;;  %v14792_v46 = vld [vmem:[#allocation6 + $0x11c4] sm:$0xf]  ;;  %v13559_v11 = vor.u32 %v14776_v20, %v13556_v31  ;;  %v13476_v22 = vld [vmem:[#allocation6 + $0x10a8] sm:$0xf0] }
 0x478   :  { %9005 = vmatpush.bf16.msrb.mxu2 %v13583_v1  ;;  %8974 = vmatmul.bf16.vlgmr.msra.gmra.mxu3 %v15288_v62  ;;  %v8729_v62 = vadd.f32 %v8728_v27, %v15381_v3  ;;  %v13623_v32 = vor.u32 %v14792_v46, %v13620_v61  ;;  %v13487_v3 = vor.u32 %v14758_v51, %v13484_v45  ;;  %v13540_v35 = vld [vmem:[#allocation6 + $0x1128] sm:$0xf0]  ;;  %v14784_v31 = vld [vmem:[#allocation6 + $0x1184] sm:$0xf] }
 0x479   :  { %9018 = vmatpush.bf16.msrb.mxu3 %v13647_v16  ;;  %v13604_v16 = vld [vmem:[#allocation6 + $0x11a8] sm:$0xf0]  ;;  %v13479_v19 = vor.u32 %v14756_v39, %v13476_v22  ;;  %v13543_v40 = vor.u32 %v14772_v6, %v13540_v35 }
 0x47a   :  { %8980 = vmatpush.bf16.msrb.mxu0 %v13447_v41  ;;  %v8742_v53 = vadd.f32 %v8741_v49, %v8729_v62  ;;  %v8754_v8 = vpop.f32.mrf.mxu2  ;;  %v8730_v36 = vpop.f32.mrf.mxu0  ;;  %v14738_v41 = vld [vmem:[#allocation6 + $0x1014] sm:$0xf]  ;;  %v13607_v60 = vor.u32 %v14788_v4, %v13604_v16  ;;  %v13588_v27 = vld [vmem:[#allocation6 + $0x1188] sm:$0xf0] }
 0x47b   :  { %8993 = vmatpush.bf16.msrb.mxu1 %v13511_v17  ;;  %v8767_v43 = vpop.f32.mrf.mxu3  ;;  %v8743_v28 = vpop.f32.mrf.mxu1  ;;  %v13404_v17 = vld [vmem:[#allocation6 + $0x1018] sm:$0xf0]  ;;  %v13591_v49 = vor.u32 %v14784_v31, %v13588_v27 }
 0x47c   :  { %9006 = vmatpush.bf16.msrb.mxu2 %v13575_v25  ;;  %v8755_v1 = vadd.f32 %v8754_v8, %v8742_v53  ;;  %v14754_v25 = vld [vmem:[#allocation6 + $0x1094] sm:$0xf]  ;;  %v13407_v47 = vor.u32 %v14738_v41, %v13404_v17 }
 0x47d   :  { %9019 = vmatpush.bf16.msrb.mxu3 %v13639_v42  ;;  %v13532_v42 = vld [vmem:[#allocation6 + $0x1118] sm:$0xf0]  ;;  %v13471_v24 = vor.u32 %v14754_v25, %v13468_v7 }
 0x47e   :  { %8981 = vmatpush.bf16.msrb.mxu0 %v13439_v30  ;;  %v8768_v52 = vadd.f32 %v8767_v43, %v8755_v1  ;;  %v13535_v29 = vor.u32 %v14770_v33, %v13532_v42  ;;  %v14736_v30 = vld [vmem:[#allocation6 + $0x1004] sm:$0xf] }
 0x47f   :  { %8994 = vmatpush.bf16.msrb.mxu1 %v13503_v14  ;;  %v13396_v14 = vld [vmem:[#allocation6 + $0x1008] sm:$0xf0] }
 0x480   :  { %9007 = vmatpush.bf16.msrb.mxu2 %v13567_v58  ;;  %v14752_v58 = vld [vmem:[#allocation6 + $0x1084] sm:$0xf]  ;;  %v13399_v46 = vor.u32 %v14736_v30, %v13396_v14 }
 0x481   :  { %9020 = vmatpush.bf16.msrb.mxu3 %v13631_v38  ;;  %v14768_v38 = vld [vmem:[#allocation6 + $0x1104] sm:$0xf]  ;;  %v13463_v61 = vor.u32 %v14752_v58, %v13460_v57 }
 0x482   :  { %8982 = vmatpush.bf16.msrb.mxu0 %v13431_v48  ;;  %v8756_v2 = vpop.f32.mrf.mxu2  ;;  %v13527_v62 = vor.u32 %v14768_v38, %v13524_v26  ;;  %v15412_v48 = vld [vmem:[#allocation15_spill] sm:$0xff] }
 0x483   :  { %8995 = vmatpush.bf16.msrb.mxu1 %v13495_v56  ;;  %v8769_v20 = vpop.f32.mrf.mxu3 }
 0x484   :  { %9008 = vmatpush.bf16.msrb.mxu2 %v13559_v11 }
 0x485   :  { %9021 = vmatpush.bf16.msrb.mxu3 %v13623_v32 }
 0x486   :  { %8983 = vmatpush.bf16.msrb.mxu0 %v13423_v15 }
 0x487   :  { %8996 = vmatpush.bf16.msrb.mxu1 %v13487_v3 }
 0x488   :  { %9009 = vmatpush.bf16.msrb.mxu2 %v13551_v34 }
 0x489   :  { %9022 = vmatpush.bf16.msrb.mxu3 %v13615_v13 }
 0x48a   :  { %8984 = vmatpush.bf16.msrb.mxu0 %v13415_v63 }
 0x48b   :  { %8997 = vmatpush.bf16.msrb.mxu1 %v13479_v19 }
 0x48c   :  { %9010 = vmatpush.bf16.msrb.mxu2 %v13543_v40 }
 0x48d   :  { %9023 = vmatpush.bf16.msrb.mxu3 %v13607_v60 }
 0x48e   :  { %8985 = vmatpush.bf16.msrb.mxu0 %v13407_v47 }
 0x48f   :  { %8998 = vmatpush.bf16.msrb.mxu1 %v13471_v24 }
 0x490   :  { %9011 = vmatpush.bf16.msrb.mxu2 %v13535_v29 }
 0x491   :  { %9024 = vmatpush.bf16.msrb.mxu3 %v13599_v23 }
 0x492   :  { %8986 = vmatpush.bf16.msrb.mxu0 %v13399_v46  ;;  %v8780_v56 = vpop.f32.mrf.mxu0 }
 0x493   :  { %8999 = vmatpush.bf16.msrb.mxu1 %v13463_v61  ;;  %v8781_v11 = vadd.f32 %v8780_v56, %v8768_v52  ;;  %v8793_v59 = vpop.f32.mrf.mxu1 }
 0x494   :  { %9012 = vmatpush.bf16.msrb.mxu2 %v13527_v62 }
 0x495   :  { %9025 = vmatpush.bf16.msrb.mxu3 %v13591_v49  ;;  %8987 = vmatmul.bf16.vlgmr.msrb.gmra.mxu0 %v15301_v12  ;;  %v8794_v37 = vadd.f32 %v8793_v59, %v8781_v11 }
 0x496   :  { %9000 = vmatmul.bf16.vlgmr.msrb.gmra.mxu1 %v15303_v9 }
 0x497   :  { %9013 = vmatmul.bf16.vlgmr.msrb.gmra.mxu2 %v15305_v10 }
 0x498   :  { %9026 = vmatmul.bf16.vlgmr.msrb.gmra.mxu3 %v15412_v48 }
 0x49a   :  { %v8806_v51 = vpop.f32.mrf.mxu2  ;;  %v8782_v45 = vpop.f32.mrf.mxu0 }
 0x49b   :  { %v8807_v53 = vadd.f32 %v8806_v51, %v8794_v37  ;;  %v8819_v32 = vpop.f32.mrf.mxu3  ;;  %v8795_v0 = vpop.f32.mrf.mxu1 }
 0x49d   :  { %v8820_v21 = vadd.f32 %v8819_v32, %v8807_v53 }
 0x4a2   :  { %v8808_v44 = vpop.f32.mrf.mxu2 }
 0x4a3   :  { %v8821_v55 = vpop.f32.mrf.mxu3 }
 0x4b2   :  { %v8832_v15 = vpop.f32.mrf.mxu0 }
 0x4b3   :  { %v8833_v12 = vadd.f32 %v8832_v15, %v8820_v21  ;;  %v8845_v3 = vpop.f32.mrf.mxu1 }
 0x4b5   :  { %v8846_v9 = vadd.f32 %v8845_v3, %v8833_v12 }
 0x4ba   :  { %v8858_v34 = vpop.f32.mrf.mxu2  ;;  %v8834_v18 = vpop.f32.mrf.mxu0 }
 0x4bb   :  { %v8859_v10 = vadd.f32 %v8858_v34, %v8846_v9  ;;  %v8871_v50 = vpop.f32.mrf.mxu3  ;;  %v8847_v39 = vpop.f32.mrf.mxu1 }
 0x4bd   :  { %v8872_v13 = vadd.f32 %v8871_v50, %v8859_v10 }
 0x4c2   :  { %v8860_v8 = vpop.f32.mrf.mxu2 }
 0x4c3   :  { %v8873_v22 = vpop.f32.mrf.mxu3 }
 0x4d2   :  { %v8884_v6 = vpop.f32.mrf.mxu0 }
 0x4d3   :  { %v8897_v35 = vpop.f32.mrf.mxu1  ;;  %v8885_v19 = vadd.f32 %v8884_v6, %v8872_v13 }
 0x4d5   :  { %v8898_v60 = vadd.f32 %v8897_v35, %v8885_v19 }
 0x4da   :  { %v8910_v1 = vpop.f32.mrf.mxu2  ;;  %v8886_v36 = vpop.f32.mrf.mxu0 }
 0x4db   :  { %v8923_v43 = vpop.f32.mrf.mxu3  ;;  %v8899_v4 = vpop.f32.mrf.mxu1  ;;  %v8911_v7 = vadd.f32 %v8910_v1, %v8898_v60 }
 0x4dd   :  { %v8924_v5 = vadd.f32 %v8923_v43, %v8911_v7 }
 0x4e2   :  { %v8912_v16 = vpop.f32.mrf.mxu2 }
 0x4e3   :  { %v8925_v28 = vpop.f32.mrf.mxu3 }
 0x4f2   :  { %v8936_v63 = vpop.f32.mrf.mxu0 }
 0x4f3   :  { %v8949_v52 = vpop.f32.mrf.mxu1  ;;  %v8937_v54 = vadd.f32 %v8936_v63, %v8924_v5 }
 0x4f5   :  { %v8950_v47 = vadd.f32 %v8949_v52, %v8937_v54 }
 0x4fa   :  { %v8962_v40 = vpop.f32.mrf.mxu2  ;;  %v8938_v17 = vpop.f32.mrf.mxu0 }
 0x4fb   :  { %v8975_v41 = vpop.f32.mrf.mxu3  ;;  %v8951_v25 = vpop.f32.mrf.mxu1  ;;  %v8963_v24 = vadd.f32 %v8962_v40, %v8950_v47 }
 0x4fd   :  { %v8976_v29 = vadd.f32 %v8975_v41, %v8963_v24 }
 0x502   :  { %v8964_v33 = vpop.f32.mrf.mxu2 }
 0x503   :  { %v8977_v42 = vpop.f32.mrf.mxu3 }
 0x512   :  { %v8988_v30 = vpop.f32.mrf.mxu0 }
 0x513   :  { %v9001_v14 = vpop.f32.mrf.mxu1  ;;  %v8989_v58 = vadd.f32 %v8988_v30, %v8976_v29 }
 0x515   :  { %v9002_v23 = vadd.f32 %v9001_v14, %v8989_v58 }
 0x51a   :  { %v9014_v2 = vpop.f32.mrf.mxu2  ;;  %v8990_v26 = vpop.f32.mrf.mxu0 }
 0x51b   :  { %v9015_v57 = vadd.f32 %v9014_v2, %v9002_v23  ;;  %v9027_v38 = vpop.f32.mrf.mxu3  ;;  %v9003_v20 = vpop.f32.mrf.mxu1 }
 0x51d   :  { %v9028_v31 = vadd.f32 %v9027_v38, %v9015_v57 }
 0x51f   :  { %9032 = vst [vmem:[%s15400_s5 + $0x8] sm:$0xff] %v9028_v31 }
 0x522   :  { %v9016_v27 = vpop.f32.mrf.mxu2 }
 0x523   :  { %v9029_v46 = vpop.f32.mrf.mxu3 }
 0x524   :  { %9037 = vsyncpa [#allocation3], 1 }
 0x525   :  { %9038 = vsyncpa [#allocation5], 1 }
 0x526   :  { %9039 = vsyncpa [#allocation8], 1 }

</bundles_post_ra>
